<compile_context>
chip_gen: v7x
topology: tpu7x:2x2x1
jax: 0.10.0
libtpu: 0.0.40
codegen_flags: <defaults>
</compile_context>

<pallas_src>
import functools
import math

import jax
import jax.numpy as jnp
from jax import lax
from jax.experimental import pallas as pl
from jax.experimental.pallas import tpu as pltpu

LN_EPS = 1e-5
NEG_INF = -1e30

# Per-layer parameters (each stacked to (num_layers, ...)), in kernel-arg order.
PARAM_ORDER = (
    "sa_in_w", "sa_in_b", "sa_out_w", "sa_out_b", "ln1_g", "ln1_b",
    "ca_q_w", "ca_q_b", "ca_kv_w", "ca_kv_b", "ca_out_w", "ca_out_b",
    "ln2_g", "ln2_b", "ff1_w", "ff1_b", "ff2_w", "ff2_b", "ln3_g", "ln3_b",
)


# ----------------------------------------------------------------------------
# In-kernel helpers (operate on loaded arrays, all inside the fused kernel)
# ----------------------------------------------------------------------------
def _layer_norm(h, g, b):
    mean = jnp.mean(h, axis=-1, keepdims=True)
    c = h - mean
    var = jnp.mean(c * c, axis=-1, keepdims=True)
    return c * lax.rsqrt(var + LN_EPS) * g + b


def _mha_outproj(q, k, v, w_out, *, nhead, dh, scale, causal):
    """Multi-head attention with the head-merge fused into the out-projection.

    concat_h(softmax(q_h k_hᵀ·scale [+mask]) v_h) @ W_out
      == Σ_h  (softmax(q_h k_hᵀ·scale [+mask]) v_h) @ W_out[h*dh:(h+1)*dh, :]
    """
    Sq, Sk = q.shape[0], k.shape[0]
    if causal:
        row = lax.broadcasted_iota(jnp.int32, (Sq, Sk), 0)
        col = lax.broadcasted_iota(jnp.int32, (Sq, Sk), 1)
        mask_add = jnp.where(col > row, NEG_INF, 0.0).astype(jnp.float32)
    acc = jnp.zeros((Sq, w_out.shape[1]), jnp.float32)
    for h in range(nhead):                          # static unroll, nhead small
        lo = h * dh
        qh = q[:, lo:lo + dh].astype(jnp.bfloat16)
        kh = k[:, lo:lo + dh].astype(jnp.bfloat16)
        vh = v[:, lo:lo + dh].astype(jnp.bfloat16)
        s = lax.dot_general(qh, kh, (((1,), (1,)), ((), ())),
                            preferred_element_type=jnp.float32) * scale
        if causal:
            s = s + mask_add
        m = jnp.max(s, axis=-1, keepdims=True)
        p = jnp.exp(s - m)
        denom = jnp.sum(p, axis=-1, keepdims=True)
        attn = (p * pl.reciprocal(denom, approx=True)).astype(jnp.bfloat16)
        oh = jnp.dot(attn, vh, preferred_element_type=jnp.float32)   # (Sq, dh)
        acc = acc + jnp.dot(oh.astype(jnp.bfloat16), w_out[lo:lo + dh, :],
                            preferred_element_type=jnp.float32)
    return acc


# ----------------------------------------------------------------------------
# Fused whole-model kernel: one grid step = one batch element
# ----------------------------------------------------------------------------
def _gpt_kernel(x_ref, pe_ref, *refs, num_layers, nhead, dh, d_model):
    n = len(PARAM_ORDER)
    lp = {name: refs[i] for i, name in enumerate(PARAM_ORDER)}
    fc_w_ref, fc_b_ref, o_ref = refs[n], refs[n + 1], refs[n + 2]

    D = d_model
    scale = 1.0 / math.sqrt(dh)

    # Positional-encoding add (folded into the fused kernel).
    x = x_ref[0].astype(jnp.float32) + pe_ref[...]            # (S, D) f32
    mem_bf = x.astype(jnp.bfloat16)                           # decoder memory

    for l in range(num_layers):                               # static unroll
        # ---- masked self-attention + residual + LayerNorm (post-norm) ------
        qkv = jnp.dot(x.astype(jnp.bfloat16), lp["sa_in_w"][l],
                      preferred_element_type=jnp.float32) + lp["sa_in_b"][l]
        sa = _mha_outproj(qkv[:, :D], qkv[:, D:2 * D], qkv[:, 2 * D:],
                          lp["sa_out_w"][l], nhead=nhead, dh=dh, scale=scale,
                          causal=True) + lp["sa_out_b"][l]
        x = _layer_norm(x + sa, lp["ln1_g"][l], lp["ln1_b"][l])

        # ---- cross-attention over memory + residual + LayerNorm ------------
        q = jnp.dot(x.astype(jnp.bfloat16), lp["ca_q_w"][l],
                    preferred_element_type=jnp.float32) + lp["ca_q_b"][l]
        kv = jnp.dot(mem_bf, lp["ca_kv_w"][l],
                     preferred_element_type=jnp.float32) + lp["ca_kv_b"][l]
        ca = _mha_outproj(q, kv[:, :D], kv[:, D:],
                          lp["ca_out_w"][l], nhead=nhead, dh=dh, scale=scale,
                          causal=False) + lp["ca_out_b"][l]
        x = _layer_norm(x + ca, lp["ln2_g"][l], lp["ln2_b"][l])

        # ---- feed-forward (relu) + residual + LayerNorm ---------------------
        h = jnp.maximum(
            jnp.dot(x.astype(jnp.bfloat16), lp["ff1_w"][l],
                    preferred_element_type=jnp.float32) + lp["ff1_b"][l], 0.0)
        ff = jnp.dot(h.astype(jnp.bfloat16), lp["ff2_w"][l],
                     preferred_element_type=jnp.float32) + lp["ff2_b"][l]
        x = _layer_norm(x + ff, lp["ln3_g"][l], lp["ln3_b"][l])

    # ---- vocab head (lane-dense, padded to a multiple of 128) ---------------
    logits = jnp.dot(x.astype(jnp.bfloat16), fc_w_ref[...],
                     preferred_element_type=jnp.float32) + fc_b_ref[...]
    o_ref[0] = logits.astype(o_ref.dtype)


def gpt_forward(x, params, *, nhead, vocab_size):
    B, S, D = x.shape
    L = params["sa_in_w"].shape[0]
    dh = D // nhead
    vocab_pad = params["fc_w"].shape[-1]
    pe = params["pos_emb"][:S]                                # positions 0..S-1

    inputs = [x, pe] + [params[name] for name in PARAM_ORDER] \
        + [params["fc_w"], params["fc_b"]]

    def _resident(arr):
        # Whole array VMEM-resident; same block at every grid step => no re-DMA.
        nd = arr.ndim
        return pl.BlockSpec(arr.shape, lambda b, _nd=nd: (0,) * _nd)

    in_specs = [pl.BlockSpec((1, S, D), lambda b: (b, 0, 0)), _resident(pe)] \
        + [_resident(params[name]) for name in PARAM_ORDER] \
        + [_resident(params["fc_w"]), _resident(params["fc_b"])]

    logits = pl.pallas_call(
        functools.partial(_gpt_kernel, num_layers=L, nhead=nhead, dh=dh,
                          d_model=D),
        out_shape=jax.ShapeDtypeStruct((B, S, vocab_pad), jnp.float32),
        grid=(B,),
        in_specs=in_specs,
        out_specs=pl.BlockSpec((1, S, vocab_pad), lambda b: (b, 0, 0)),
        compiler_params=pltpu.CompilerParams(
            dimension_semantics=("parallel",)),
    )(*inputs)
    return logits[:, :, :vocab_size]


# ----------------------------------------------------------------------------
# Deterministic synthetic parameters (weights bf16 for the MXU, rest f32),
# per-layer params stacked along a leading num_layers axis.
# ----------------------------------------------------------------------------
def init_params(key, vocab_size, d_model, nhead, num_layers, max_len, dff):
    vocab_pad = max(128, ((vocab_size + 127) // 128) * 128)
    keys = iter(jax.random.split(key, 7 * num_layers + 2))

    def nrm(k, shape, std=0.02, dtype=jnp.bfloat16):
        return (std * jax.random.normal(k, shape)).astype(dtype)

    def wstack(shape):
        return jnp.stack([nrm(next(keys), shape) for _ in range(num_layers)])

    def zeros(shape):
        return jnp.zeros((num_layers,) + shape, jnp.float32)

    def ones(shape):
        return jnp.ones((num_layers,) + shape, jnp.float32)

    fc_w = jnp.zeros((d_model, vocab_pad), jnp.bfloat16)
    fc_w = fc_w.at[:, :vocab_size].set(nrm(next(keys), (d_model, vocab_size)))

    return {
        "pos_emb": nrm(next(keys), (max_len, d_model), dtype=jnp.float32),
        "fc_w": fc_w,
        "fc_b": jnp.zeros((1, vocab_pad), jnp.float32),
        "sa_in_w": wstack((d_model, 3 * d_model)),
        "sa_in_b": zeros((1, 3 * d_model)),
        "sa_out_w": wstack((d_model, d_model)),
        "sa_out_b": zeros((1, d_model)),
        "ln1_g": ones((1, d_model)),
        "ln1_b": zeros((1, d_model)),
        "ca_q_w": wstack((d_model, d_model)),
        "ca_q_b": zeros((1, d_model)),
        "ca_kv_w": wstack((d_model, 2 * d_model)),
        "ca_kv_b": zeros((1, 2 * d_model)),
        "ca_out_w": wstack((d_model, d_model)),
        "ca_out_b": zeros((1, d_model)),
        "ln2_g": ones((1, d_model)),
        "ln2_b": zeros((1, d_model)),
        "ff1_w": wstack((d_model, dff)),
        "ff1_b": zeros((1, dff)),
        "ff2_w": wstack((dff, d_model)),
        "ff2_b": zeros((1, d_model)),
        "ln3_g": ones((1, d_model)),
        "ln3_b": zeros((1, d_model)),
    }


# ----------------------------------------------------------------------------
if __name__ == "__main__":
    vocab_size = 32
    d_model = 128      # module default
    nhead = 4          # module default -> head_dim = 32
    num_layers = 4     # module default
    max_len = 100      # module default
    dff = 512          # hardcoded in module

    B, S = 2, 8        # small demo batch / sequence length

    key = jax.random.PRNGKey(0)
    pkey, xkey = jax.random.split(key)
    params = init_params(pkey, vocab_size, d_model, nhead, num_layers,
                         max_len, dff)

    # Input is already an embedded sequence (B, S, d_model), as in the reference.
    x = jax.random.normal(xkey, (B, S, d_model), dtype=jnp.float32)

    fwd = jax.jit(functools.partial(gpt_forward, nhead=nhead,
                                    vocab_size=vocab_size))
    logits = fwd(x, params)
    jax.block_until_ready(logits)

    assert logits.shape == (B, S, vocab_size), logits.shape
    assert bool(jnp.all(jnp.isfinite(logits)))
    print("KERNEL_OK")
</pallas_src>

<mosaic_0001>
module attributes {stable_mosaic.version = 11 : i64} {
  func.func @_gpt_kernel(%arg0: i32, %arg1: memref<1x8x128xf32, #tpu.memory_space<vmem>>, %arg2: memref<8x128xf32, #tpu.memory_space<vmem>>, %arg3: memref<4x128x384xbf16, #tpu.memory_space<vmem>>, %arg4: memref<4x1x384xf32, #tpu.memory_space<vmem>>, %arg5: memref<4x128x128xbf16, #tpu.memory_space<vmem>>, %arg6: memref<4x1x128xf32, #tpu.memory_space<vmem>>, %arg7: memref<4x1x128xf32, #tpu.memory_space<vmem>>, %arg8: memref<4x1x128xf32, #tpu.memory_space<vmem>>, %arg9: memref<4x128x128xbf16, #tpu.memory_space<vmem>>, %arg10: memref<4x1x128xf32, #tpu.memory_space<vmem>>, %arg11: memref<4x128x256xbf16, #tpu.memory_space<vmem>>, %arg12: memref<4x1x256xf32, #tpu.memory_space<vmem>>, %arg13: memref<4x128x128xbf16, #tpu.memory_space<vmem>>, %arg14: memref<4x1x128xf32, #tpu.memory_space<vmem>>, %arg15: memref<4x1x128xf32, #tpu.memory_space<vmem>>, %arg16: memref<4x1x128xf32, #tpu.memory_space<vmem>>, %arg17: memref<4x128x512xbf16, #tpu.memory_space<vmem>>, %arg18: memref<4x1x512xf32, #tpu.memory_space<vmem>>, %arg19: memref<4x512x128xbf16, #tpu.memory_space<vmem>>, %arg20: memref<4x1x128xf32, #tpu.memory_space<vmem>>, %arg21: memref<4x1x128xf32, #tpu.memory_space<vmem>>, %arg22: memref<4x1x128xf32, #tpu.memory_space<vmem>>, %arg23: memref<128x128xbf16, #tpu.memory_space<vmem>>, %arg24: memref<1x128xf32, #tpu.memory_space<vmem>>, %arg25: memref<1x8x128xf32, #tpu.memory_space<vmem>>) attributes {dimension_semantics = [#tpu.dimension_semantics<parallel>], iteration_bounds = array<i64: 2>, scalar_prefetch = 0 : i64, scratch_operands = 0 : i64, tpu.core_type = #tpu.core_type<tc>, window_params = [{transform_indices = @transform_0, window_bounds = array<i64: 1, 8, 128>}, {pipeline_mode = #tpu.pipeline_mode<synchronous>, transform_indices = @transform_1, window_bounds = array<i64: 8, 128>}, {pipeline_mode = #tpu.pipeline_mode<synchronous>, transform_indices = @transform_2, window_bounds = array<i64: 4, 128, 384>}, {pipeline_mode = #tpu.pipeline_mode<synchronous>, transform_indices = @transform_3, window_bounds = array<i64: 4, 1, 384>}, {pipeline_mode = #tpu.pipeline_mode<synchronous>, transform_indices = @transform_4, window_bounds = array<i64: 4, 128, 128>}, {pipeline_mode = #tpu.pipeline_mode<synchronous>, transform_indices = @transform_5, window_bounds = array<i64: 4, 1, 128>}, {pipeline_mode = #tpu.pipeline_mode<synchronous>, transform_indices = @transform_6, window_bounds = array<i64: 4, 1, 128>}, {pipeline_mode = #tpu.pipeline_mode<synchronous>, transform_indices = @transform_7, window_bounds = array<i64: 4, 1, 128>}, {pipeline_mode = #tpu.pipeline_mode<synchronous>, transform_indices = @transform_8, window_bounds = array<i64: 4, 128, 128>}, {pipeline_mode = #tpu.pipeline_mode<synchronous>, transform_indices = @transform_9, window_bounds = array<i64: 4, 1, 128>}, {pipeline_mode = #tpu.pipeline_mode<synchronous>, transform_indices = @transform_10, window_bounds = array<i64: 4, 128, 256>}, {pipeline_mode = #tpu.pipeline_mode<synchronous>, transform_indices = @transform_11, window_bounds = array<i64: 4, 1, 256>}, {pipeline_mode = #tpu.pipeline_mode<synchronous>, transform_indices = @transform_12, window_bounds = array<i64: 4, 128, 128>}, {pipeline_mode = #tpu.pipeline_mode<synchronous>, transform_indices = @transform_13, window_bounds = array<i64: 4, 1, 128>}, {pipeline_mode = #tpu.pipeline_mode<synchronous>, transform_indices = @transform_14, window_bounds = array<i64: 4, 1, 128>}, {pipeline_mode = #tpu.pipeline_mode<synchronous>, transform_indices = @transform_15, window_bounds = array<i64: 4, 1, 128>}, {pipeline_mode = #tpu.pipeline_mode<synchronous>, transform_indices = @transform_16, window_bounds = array<i64: 4, 128, 512>}, {pipeline_mode = #tpu.pipeline_mode<synchronous>, transform_indices = @transform_17, window_bounds = array<i64: 4, 1, 512>}, {pipeline_mode = #tpu.pipeline_mode<synchronous>, transform_indices = @transform_18, window_bounds = array<i64: 4, 512, 128>}, {pipeline_mode = #tpu.pipeline_mode<synchronous>, transform_indices = @transform_19, window_bounds = array<i64: 4, 1, 128>}, {pipeline_mode = #tpu.pipeline_mode<synchronous>, transform_indices = @transform_20, window_bounds = array<i64: 4, 1, 128>}, {pipeline_mode = #tpu.pipeline_mode<synchronous>, transform_indices = @transform_21, window_bounds = array<i64: 4, 1, 128>}, {pipeline_mode = #tpu.pipeline_mode<synchronous>, transform_indices = @transform_22, window_bounds = array<i64: 128, 128>}, {pipeline_mode = #tpu.pipeline_mode<synchronous>, transform_indices = @transform_23, window_bounds = array<i64: 1, 128>}, {transform_indices = @transform_24, window_bounds = array<i64: 1, 8, 128>}]} {
    %c0 = arith.constant 0 : index
    %c0_0 = arith.constant 0 : index
    %c0_1 = arith.constant 0 : index
    %0 = vector.load %arg1[%c0, %c0_0, %c0_1] : memref<1x8x128xf32, #tpu.memory_space<vmem>>, vector<1x8x128xf32>
    %1 = vector.shape_cast %0 : vector<1x8x128xf32> to vector<8x128xf32>
    %c0_2 = arith.constant 0 : index
    %c0_3 = arith.constant 0 : index
    %2 = vector.load %arg2[%c0_2, %c0_3] : memref<8x128xf32, #tpu.memory_space<vmem>>, vector<8x128xf32>
    %3 = arith.addf %1, %2 : vector<8x128xf32>
    %4 = arith.truncf %3 : vector<8x128xf32> to vector<8x128xbf16>
    %5 = arith.truncf %3 : vector<8x128xf32> to vector<8x128xbf16>
    %c0_4 = arith.constant 0 : index
    %c0_5 = arith.constant 0 : index
    %c0_6 = arith.constant 0 : index
    %6 = vector.load %arg3[%c0_4, %c0_5, %c0_6] : memref<4x128x384xbf16, #tpu.memory_space<vmem>>, vector<1x128x384xbf16>
    %7 = vector.shape_cast %6 : vector<1x128x384xbf16> to vector<128x384xbf16>
    %cst = arith.constant dense<0.000000e+00> : vector<8x384xf32>
    %8 = tpu.matmul %5, %7, %cst {dimension_numbers = #tpu.dot_dimension_numbers<[1], [0], [0], [1], [0, 0, 1, 1], [], []>} : vector<8x128xbf16>, vector<128x384xbf16>, vector<8x384xf32> -> vector<8x384xf32>
    %c0_7 = arith.constant 0 : index
    %c0_8 = arith.constant 0 : index
    %c0_9 = arith.constant 0 : index
    %9 = vector.load %arg4[%c0_7, %c0_8, %c0_9] : memref<4x1x384xf32, #tpu.memory_space<vmem>>, vector<1x1x384xf32>
    %10 = vector.shape_cast %9 : vector<1x1x384xf32> to vector<1x384xf32>
    %11 = vector.broadcast %10 : vector<1x384xf32> to vector<8x384xf32>
    %12 = arith.addf %8, %11 : vector<8x384xf32>
    %13 = vector.extract_strided_slice %12 {offsets = [0, 0], sizes = [8, 128], strides = [1, 1]} : vector<8x384xf32> to vector<8x128xf32>
    %14 = vector.extract_strided_slice %12 {offsets = [0, 128], sizes = [8, 128], strides = [1, 1]} : vector<8x384xf32> to vector<8x128xf32>
    %15 = vector.extract_strided_slice %12 {offsets = [0, 256], sizes = [8, 128], strides = [1, 1]} : vector<8x384xf32> to vector<8x128xf32>
    %c0_10 = arith.constant 0 : index
    %c0_11 = arith.constant 0 : index
    %c0_12 = arith.constant 0 : index
    %16 = vector.load %arg5[%c0_10, %c0_11, %c0_12] : memref<4x128x128xbf16, #tpu.memory_space<vmem>>, vector<1x128x128xbf16>
    %17 = vector.shape_cast %16 : vector<1x128x128xbf16> to vector<128x128xbf16>
    %18 = tpu.iota {dimensions = array<i32: 0>} : vector<8x8xi32>
    %19 = tpu.iota {dimensions = array<i32: 1>} : vector<8x8xi32>
    %20 = arith.cmpi sgt, %19, %18 : vector<8x8xi32>
    %cst_13 = arith.constant -1.000000e+30 : f32
    %cst_14 = arith.constant 0.000000e+00 : f32
    %21 = vector.broadcast %cst_13 : f32 to vector<8x8xf32>
    %22 = vector.broadcast %cst_14 : f32 to vector<8x8xf32>
    %23 = arith.select %20, %21, %22 : vector<8x8xi1>, vector<8x8xf32>
    %cst_15 = arith.constant 0.000000e+00 : f32
    %24 = vector.broadcast %cst_15 : f32 to vector<8x128xf32>
    %25 = vector.extract_strided_slice %13 {offsets = [0, 0], sizes = [8, 32], strides = [1, 1]} : vector<8x128xf32> to vector<8x32xf32>
    %26 = arith.truncf %25 : vector<8x32xf32> to vector<8x32xbf16>
    %27 = vector.extract_strided_slice %14 {offsets = [0, 0], sizes = [8, 32], strides = [1, 1]} : vector<8x128xf32> to vector<8x32xf32>
    %28 = arith.truncf %27 : vector<8x32xf32> to vector<8x32xbf16>
    %29 = vector.extract_strided_slice %15 {offsets = [0, 0], sizes = [8, 32], strides = [1, 1]} : vector<8x128xf32> to vector<8x32xf32>
    %30 = arith.truncf %29 : vector<8x32xf32> to vector<8x32xbf16>
    %cst_16 = arith.constant dense<0.000000e+00> : vector<8x8xf32>
    %31 = tpu.matmul %26, %28, %cst_16 {dimension_numbers = #tpu.dot_dimension_numbers<[1], [1], [0], [0], [0, 0, 1, 0], [], []>} : vector<8x32xbf16>, vector<8x32xbf16>, vector<8x8xf32> -> vector<8x8xf32>
    %cst_17 = arith.constant 0.176776692 : f32
    %32 = vector.broadcast %cst_17 : f32 to vector<8x8xf32>
    %33 = arith.mulf %31, %32 : vector<8x8xf32>
    %34 = arith.addf %33, %23 : vector<8x8xf32>
    %cst_18 = arith.constant dense<0xFF800000> : vector<8xf32>
    %35 = vector.multi_reduction <maximumf>, %34, %cst_18 [1] : vector<8x8xf32> to vector<8xf32>
    %36 = vector.shape_cast %35 : vector<8xf32> to vector<8x1xf32>
    %37 = vector.broadcast %36 : vector<8x1xf32> to vector<8x8xf32>
    %38 = arith.subf %34, %37 : vector<8x8xf32>
    %39 = math.exp %38 : vector<8x8xf32>
    %cst_19 = arith.constant dense<0.000000e+00> : vector<8xf32>
    %40 = vector.multi_reduction <add>, %39, %cst_19 [1] : vector<8x8xf32> to vector<8xf32>
    %41 = vector.shape_cast %40 : vector<8xf32> to vector<8x1xf32>
    %42 = tpu.reciprocal %41 {approx = true} : vector<8x1xf32> -> vector<8x1xf32>
    %43 = vector.broadcast %42 : vector<8x1xf32> to vector<8x8xf32>
    %44 = arith.mulf %39, %43 : vector<8x8xf32>
    %45 = arith.truncf %44 : vector<8x8xf32> to vector<8x8xbf16>
    %cst_20 = arith.constant dense<0.000000e+00> : vector<8x32xf32>
    %46 = tpu.matmul %45, %30, %cst_20 {dimension_numbers = #tpu.dot_dimension_numbers<[1], [0], [0], [1], [0, 0, 1, 1], [], []>} : vector<8x8xbf16>, vector<8x32xbf16>, vector<8x32xf32> -> vector<8x32xf32>
    %47 = arith.truncf %46 : vector<8x32xf32> to vector<8x32xbf16>
    %48 = vector.extract_strided_slice %17 {offsets = [0, 0], sizes = [32, 128], strides = [1, 1]} : vector<128x128xbf16> to vector<32x128xbf16>
    %cst_21 = arith.constant dense<0.000000e+00> : vector<8x128xf32>
    %49 = tpu.matmul %47, %48, %cst_21 {dimension_numbers = #tpu.dot_dimension_numbers<[1], [0], [0], [1], [0, 0, 1, 1], [], []>} : vector<8x32xbf16>, vector<32x128xbf16>, vector<8x128xf32> -> vector<8x128xf32>
    %50 = arith.addf %24, %49 : vector<8x128xf32>
    %51 = vector.extract_strided_slice %13 {offsets = [0, 32], sizes = [8, 32], strides = [1, 1]} : vector<8x128xf32> to vector<8x32xf32>
    %52 = arith.truncf %51 : vector<8x32xf32> to vector<8x32xbf16>
    %53 = vector.extract_strided_slice %14 {offsets = [0, 32], sizes = [8, 32], strides = [1, 1]} : vector<8x128xf32> to vector<8x32xf32>
    %54 = arith.truncf %53 : vector<8x32xf32> to vector<8x32xbf16>
    %55 = vector.extract_strided_slice %15 {offsets = [0, 32], sizes = [8, 32], strides = [1, 1]} : vector<8x128xf32> to vector<8x32xf32>
    %56 = arith.truncf %55 : vector<8x32xf32> to vector<8x32xbf16>
    %cst_22 = arith.constant dense<0.000000e+00> : vector<8x8xf32>
    %57 = tpu.matmul %52, %54, %cst_22 {dimension_numbers = #tpu.dot_dimension_numbers<[1], [1], [0], [0], [0, 0, 1, 0], [], []>} : vector<8x32xbf16>, vector<8x32xbf16>, vector<8x8xf32> -> vector<8x8xf32>
    %cst_23 = arith.constant 0.176776692 : f32
    %58 = vector.broadcast %cst_23 : f32 to vector<8x8xf32>
    %59 = arith.mulf %57, %58 : vector<8x8xf32>
    %60 = arith.addf %59, %23 : vector<8x8xf32>
    %cst_24 = arith.constant dense<0xFF800000> : vector<8xf32>
    %61 = vector.multi_reduction <maximumf>, %60, %cst_24 [1] : vector<8x8xf32> to vector<8xf32>
    %62 = vector.shape_cast %61 : vector<8xf32> to vector<8x1xf32>
    %63 = vector.broadcast %62 : vector<8x1xf32> to vector<8x8xf32>
    %64 = arith.subf %60, %63 : vector<8x8xf32>
    %65 = math.exp %64 : vector<8x8xf32>
    %cst_25 = arith.constant dense<0.000000e+00> : vector<8xf32>
    %66 = vector.multi_reduction <add>, %65, %cst_25 [1] : vector<8x8xf32> to vector<8xf32>
    %67 = vector.shape_cast %66 : vector<8xf32> to vector<8x1xf32>
    %68 = tpu.reciprocal %67 {approx = true} : vector<8x1xf32> -> vector<8x1xf32>
    %69 = vector.broadcast %68 : vector<8x1xf32> to vector<8x8xf32>
    %70 = arith.mulf %65, %69 : vector<8x8xf32>
    %71 = arith.truncf %70 : vector<8x8xf32> to vector<8x8xbf16>
    %cst_26 = arith.constant dense<0.000000e+00> : vector<8x32xf32>
    %72 = tpu.matmul %71, %56, %cst_26 {dimension_numbers = #tpu.dot_dimension_numbers<[1], [0], [0], [1], [0, 0, 1, 1], [], []>} : vector<8x8xbf16>, vector<8x32xbf16>, vector<8x32xf32> -> vector<8x32xf32>
    %73 = arith.truncf %72 : vector<8x32xf32> to vector<8x32xbf16>
    %74 = vector.extract_strided_slice %17 {offsets = [32, 0], sizes = [32, 128], strides = [1, 1]} : vector<128x128xbf16> to vector<32x128xbf16>
    %cst_27 = arith.constant dense<0.000000e+00> : vector<8x128xf32>
    %75 = tpu.matmul %73, %74, %cst_27 {dimension_numbers = #tpu.dot_dimension_numbers<[1], [0], [0], [1], [0, 0, 1, 1], [], []>} : vector<8x32xbf16>, vector<32x128xbf16>, vector<8x128xf32> -> vector<8x128xf32>
    %76 = arith.addf %50, %75 : vector<8x128xf32>
    %77 = vector.extract_strided_slice %13 {offsets = [0, 64], sizes = [8, 32], strides = [1, 1]} : vector<8x128xf32> to vector<8x32xf32>
    %78 = arith.truncf %77 : vector<8x32xf32> to vector<8x32xbf16>
    %79 = vector.extract_strided_slice %14 {offsets = [0, 64], sizes = [8, 32], strides = [1, 1]} : vector<8x128xf32> to vector<8x32xf32>
    %80 = arith.truncf %79 : vector<8x32xf32> to vector<8x32xbf16>
    %81 = vector.extract_strided_slice %15 {offsets = [0, 64], sizes = [8, 32], strides = [1, 1]} : vector<8x128xf32> to vector<8x32xf32>
    %82 = arith.truncf %81 : vector<8x32xf32> to vector<8x32xbf16>
    %cst_28 = arith.constant dense<0.000000e+00> : vector<8x8xf32>
    %83 = tpu.matmul %78, %80, %cst_28 {dimension_numbers = #tpu.dot_dimension_numbers<[1], [1], [0], [0], [0, 0, 1, 0], [], []>} : vector<8x32xbf16>, vector<8x32xbf16>, vector<8x8xf32> -> vector<8x8xf32>
    %cst_29 = arith.constant 0.176776692 : f32
    %84 = vector.broadcast %cst_29 : f32 to vector<8x8xf32>
    %85 = arith.mulf %83, %84 : vector<8x8xf32>
    %86 = arith.addf %85, %23 : vector<8x8xf32>
    %cst_30 = arith.constant dense<0xFF800000> : vector<8xf32>
    %87 = vector.multi_reduction <maximumf>, %86, %cst_30 [1] : vector<8x8xf32> to vector<8xf32>
    %88 = vector.shape_cast %87 : vector<8xf32> to vector<8x1xf32>
    %89 = vector.broadcast %88 : vector<8x1xf32> to vector<8x8xf32>
    %90 = arith.subf %86, %89 : vector<8x8xf32>
    %91 = math.exp %90 : vector<8x8xf32>
    %cst_31 = arith.constant dense<0.000000e+00> : vector<8xf32>
    %92 = vector.multi_reduction <add>, %91, %cst_31 [1] : vector<8x8xf32> to vector<8xf32>
    %93 = vector.shape_cast %92 : vector<8xf32> to vector<8x1xf32>
    %94 = tpu.reciprocal %93 {approx = true} : vector<8x1xf32> -> vector<8x1xf32>
    %95 = vector.broadcast %94 : vector<8x1xf32> to vector<8x8xf32>
    %96 = arith.mulf %91, %95 : vector<8x8xf32>
    %97 = arith.truncf %96 : vector<8x8xf32> to vector<8x8xbf16>
    %cst_32 = arith.constant dense<0.000000e+00> : vector<8x32xf32>
    %98 = tpu.matmul %97, %82, %cst_32 {dimension_numbers = #tpu.dot_dimension_numbers<[1], [0], [0], [1], [0, 0, 1, 1], [], []>} : vector<8x8xbf16>, vector<8x32xbf16>, vector<8x32xf32> -> vector<8x32xf32>
    %99 = arith.truncf %98 : vector<8x32xf32> to vector<8x32xbf16>
    %100 = vector.extract_strided_slice %17 {offsets = [64, 0], sizes = [32, 128], strides = [1, 1]} : vector<128x128xbf16> to vector<32x128xbf16>
    %cst_33 = arith.constant dense<0.000000e+00> : vector<8x128xf32>
    %101 = tpu.matmul %99, %100, %cst_33 {dimension_numbers = #tpu.dot_dimension_numbers<[1], [0], [0], [1], [0, 0, 1, 1], [], []>} : vector<8x32xbf16>, vector<32x128xbf16>, vector<8x128xf32> -> vector<8x128xf32>
    %102 = arith.addf %76, %101 : vector<8x128xf32>
    %103 = vector.extract_strided_slice %13 {offsets = [0, 96], sizes = [8, 32], strides = [1, 1]} : vector<8x128xf32> to vector<8x32xf32>
    %104 = arith.truncf %103 : vector<8x32xf32> to vector<8x32xbf16>
    %105 = vector.extract_strided_slice %14 {offsets = [0, 96], sizes = [8, 32], strides = [1, 1]} : vector<8x128xf32> to vector<8x32xf32>
    %106 = arith.truncf %105 : vector<8x32xf32> to vector<8x32xbf16>
    %107 = vector.extract_strided_slice %15 {offsets = [0, 96], sizes = [8, 32], strides = [1, 1]} : vector<8x128xf32> to vector<8x32xf32>
    %108 = arith.truncf %107 : vector<8x32xf32> to vector<8x32xbf16>
    %cst_34 = arith.constant dense<0.000000e+00> : vector<8x8xf32>
    %109 = tpu.matmul %104, %106, %cst_34 {dimension_numbers = #tpu.dot_dimension_numbers<[1], [1], [0], [0], [0, 0, 1, 0], [], []>} : vector<8x32xbf16>, vector<8x32xbf16>, vector<8x8xf32> -> vector<8x8xf32>
    %cst_35 = arith.constant 0.176776692 : f32
    %110 = vector.broadcast %cst_35 : f32 to vector<8x8xf32>
    %111 = arith.mulf %109, %110 : vector<8x8xf32>
    %112 = arith.addf %111, %23 : vector<8x8xf32>
    %cst_36 = arith.constant dense<0xFF800000> : vector<8xf32>
    %113 = vector.multi_reduction <maximumf>, %112, %cst_36 [1] : vector<8x8xf32> to vector<8xf32>
    %114 = vector.shape_cast %113 : vector<8xf32> to vector<8x1xf32>
    %115 = vector.broadcast %114 : vector<8x1xf32> to vector<8x8xf32>
    %116 = arith.subf %112, %115 : vector<8x8xf32>
    %117 = math.exp %116 : vector<8x8xf32>
    %cst_37 = arith.constant dense<0.000000e+00> : vector<8xf32>
    %118 = vector.multi_reduction <add>, %117, %cst_37 [1] : vector<8x8xf32> to vector<8xf32>
    %119 = vector.shape_cast %118 : vector<8xf32> to vector<8x1xf32>
    %120 = tpu.reciprocal %119 {approx = true} : vector<8x1xf32> -> vector<8x1xf32>
    %121 = vector.broadcast %120 : vector<8x1xf32> to vector<8x8xf32>
    %122 = arith.mulf %117, %121 : vector<8x8xf32>
    %123 = arith.truncf %122 : vector<8x8xf32> to vector<8x8xbf16>
    %cst_38 = arith.constant dense<0.000000e+00> : vector<8x32xf32>
    %124 = tpu.matmul %123, %108, %cst_38 {dimension_numbers = #tpu.dot_dimension_numbers<[1], [0], [0], [1], [0, 0, 1, 1], [], []>} : vector<8x8xbf16>, vector<8x32xbf16>, vector<8x32xf32> -> vector<8x32xf32>
    %125 = arith.truncf %124 : vector<8x32xf32> to vector<8x32xbf16>
    %126 = vector.extract_strided_slice %17 {offsets = [96, 0], sizes = [32, 128], strides = [1, 1]} : vector<128x128xbf16> to vector<32x128xbf16>
    %cst_39 = arith.constant dense<0.000000e+00> : vector<8x128xf32>
    %127 = tpu.matmul %125, %126, %cst_39 {dimension_numbers = #tpu.dot_dimension_numbers<[1], [0], [0], [1], [0, 0, 1, 1], [], []>} : vector<8x32xbf16>, vector<32x128xbf16>, vector<8x128xf32> -> vector<8x128xf32>
    %128 = arith.addf %102, %127 : vector<8x128xf32>
    %c0_40 = arith.constant 0 : index
    %c0_41 = arith.constant 0 : index
    %c0_42 = arith.constant 0 : index
    %129 = vector.load %arg6[%c0_40, %c0_41, %c0_42] : memref<4x1x128xf32, #tpu.memory_space<vmem>>, vector<1x1x128xf32>
    %130 = vector.shape_cast %129 : vector<1x1x128xf32> to vector<1x128xf32>
    %131 = vector.broadcast %130 : vector<1x128xf32> to vector<8x128xf32>
    %132 = arith.addf %128, %131 : vector<8x128xf32>
    %133 = arith.addf %3, %132 : vector<8x128xf32>
    %c0_43 = arith.constant 0 : index
    %c0_44 = arith.constant 0 : index
    %c0_45 = arith.constant 0 : index
    %134 = vector.load %arg7[%c0_43, %c0_44, %c0_45] : memref<4x1x128xf32, #tpu.memory_space<vmem>>, vector<1x1x128xf32>
    %135 = vector.shape_cast %134 : vector<1x1x128xf32> to vector<1x128xf32>
    %c0_46 = arith.constant 0 : index
    %c0_47 = arith.constant 0 : index
    %c0_48 = arith.constant 0 : index
    %136 = vector.load %arg8[%c0_46, %c0_47, %c0_48] : memref<4x1x128xf32, #tpu.memory_space<vmem>>, vector<1x1x128xf32>
    %137 = vector.shape_cast %136 : vector<1x1x128xf32> to vector<1x128xf32>
    %cst_49 = arith.constant dense<0.000000e+00> : vector<8xf32>
    %138 = vector.multi_reduction <add>, %133, %cst_49 [1] : vector<8x128xf32> to vector<8xf32>
    %139 = vector.shape_cast %138 : vector<8xf32> to vector<8x1xf32>
    %cst_50 = arith.constant 1.280000e+02 : f32
    %140 = vector.broadcast %cst_50 : f32 to vector<8x1xf32>
    %141 = arith.divf %139, %140 : vector<8x1xf32>
    %142 = vector.broadcast %141 : vector<8x1xf32> to vector<8x128xf32>
    %143 = arith.subf %133, %142 : vector<8x128xf32>
    %144 = arith.mulf %143, %143 : vector<8x128xf32>
    %cst_51 = arith.constant dense<0.000000e+00> : vector<8xf32>
    %145 = vector.multi_reduction <add>, %144, %cst_51 [1] : vector<8x128xf32> to vector<8xf32>
    %146 = vector.shape_cast %145 : vector<8xf32> to vector<8x1xf32>
    %cst_52 = arith.constant 1.280000e+02 : f32
    %147 = vector.broadcast %cst_52 : f32 to vector<8x1xf32>
    %148 = arith.divf %146, %147 : vector<8x1xf32>
    %cst_53 = arith.constant 9.99999974E-6 : f32
    %149 = vector.broadcast %cst_53 : f32 to vector<8x1xf32>
    %150 = arith.addf %148, %149 : vector<8x1xf32>
    %151 = math.rsqrt %150 : vector<8x1xf32>
    %152 = vector.broadcast %151 : vector<8x1xf32> to vector<8x128xf32>
    %153 = arith.mulf %143, %152 : vector<8x128xf32>
    %154 = vector.broadcast %135 : vector<1x128xf32> to vector<8x128xf32>
    %155 = arith.mulf %153, %154 : vector<8x128xf32>
    %156 = vector.broadcast %137 : vector<1x128xf32> to vector<8x128xf32>
    %157 = arith.addf %155, %156 : vector<8x128xf32>
    %158 = arith.truncf %157 : vector<8x128xf32> to vector<8x128xbf16>
    %c0_54 = arith.constant 0 : index
    %c0_55 = arith.constant 0 : index
    %c0_56 = arith.constant 0 : index
    %159 = vector.load %arg9[%c0_54, %c0_55, %c0_56] : memref<4x128x128xbf16, #tpu.memory_space<vmem>>, vector<1x128x128xbf16>
    %160 = vector.shape_cast %159 : vector<1x128x128xbf16> to vector<128x128xbf16>
    %cst_57 = arith.constant dense<0.000000e+00> : vector<8x128xf32>
    %161 = tpu.matmul %158, %160, %cst_57 {dimension_numbers = #tpu.dot_dimension_numbers<[1], [0], [0], [1], [0, 0, 1, 1], [], []>} : vector<8x128xbf16>, vector<128x128xbf16>, vector<8x128xf32> -> vector<8x128xf32>
    %c0_58 = arith.constant 0 : index
    %c0_59 = arith.constant 0 : index
    %c0_60 = arith.constant 0 : index
    %162 = vector.load %arg10[%c0_58, %c0_59, %c0_60] : memref<4x1x128xf32, #tpu.memory_space<vmem>>, vector<1x1x128xf32>
    %163 = vector.shape_cast %162 : vector<1x1x128xf32> to vector<1x128xf32>
    %164 = vector.broadcast %163 : vector<1x128xf32> to vector<8x128xf32>
    %165 = arith.addf %161, %164 : vector<8x128xf32>
    %c0_61 = arith.constant 0 : index
    %c0_62 = arith.constant 0 : index
    %c0_63 = arith.constant 0 : index
    %166 = vector.load %arg11[%c0_61, %c0_62, %c0_63] : memref<4x128x256xbf16, #tpu.memory_space<vmem>>, vector<1x128x256xbf16>
    %167 = vector.shape_cast %166 : vector<1x128x256xbf16> to vector<128x256xbf16>
    %cst_64 = arith.constant dense<0.000000e+00> : vector<8x256xf32>
    %168 = tpu.matmul %4, %167, %cst_64 {dimension_numbers = #tpu.dot_dimension_numbers<[1], [0], [0], [1], [0, 0, 1, 1], [], []>} : vector<8x128xbf16>, vector<128x256xbf16>, vector<8x256xf32> -> vector<8x256xf32>
    %c0_65 = arith.constant 0 : index
    %c0_66 = arith.constant 0 : index
    %c0_67 = arith.constant 0 : index
    %169 = vector.load %arg12[%c0_65, %c0_66, %c0_67] : memref<4x1x256xf32, #tpu.memory_space<vmem>>, vector<1x1x256xf32>
    %170 = vector.shape_cast %169 : vector<1x1x256xf32> to vector<1x256xf32>
    %171 = vector.broadcast %170 : vector<1x256xf32> to vector<8x256xf32>
    %172 = arith.addf %168, %171 : vector<8x256xf32>
    %173 = vector.extract_strided_slice %172 {offsets = [0, 0], sizes = [8, 128], strides = [1, 1]} : vector<8x256xf32> to vector<8x128xf32>
    %174 = vector.extract_strided_slice %172 {offsets = [0, 128], sizes = [8, 128], strides = [1, 1]} : vector<8x256xf32> to vector<8x128xf32>
    %c0_68 = arith.constant 0 : index
    %c0_69 = arith.constant 0 : index
    %c0_70 = arith.constant 0 : index
    %175 = vector.load %arg13[%c0_68, %c0_69, %c0_70] : memref<4x128x128xbf16, #tpu.memory_space<vmem>>, vector<1x128x128xbf16>
    %176 = vector.shape_cast %175 : vector<1x128x128xbf16> to vector<128x128xbf16>
    %cst_71 = arith.constant 0.000000e+00 : f32
    %177 = vector.broadcast %cst_71 : f32 to vector<8x128xf32>
    %178 = vector.extract_strided_slice %165 {offsets = [0, 0], sizes = [8, 32], strides = [1, 1]} : vector<8x128xf32> to vector<8x32xf32>
    %179 = arith.truncf %178 : vector<8x32xf32> to vector<8x32xbf16>
    %180 = vector.extract_strided_slice %173 {offsets = [0, 0], sizes = [8, 32], strides = [1, 1]} : vector<8x128xf32> to vector<8x32xf32>
    %181 = arith.truncf %180 : vector<8x32xf32> to vector<8x32xbf16>
    %182 = vector.extract_strided_slice %174 {offsets = [0, 0], sizes = [8, 32], strides = [1, 1]} : vector<8x128xf32> to vector<8x32xf32>
    %183 = arith.truncf %182 : vector<8x32xf32> to vector<8x32xbf16>
    %cst_72 = arith.constant dense<0.000000e+00> : vector<8x8xf32>
    %184 = tpu.matmul %179, %181, %cst_72 {dimension_numbers = #tpu.dot_dimension_numbers<[1], [1], [0], [0], [0, 0, 1, 0], [], []>} : vector<8x32xbf16>, vector<8x32xbf16>, vector<8x8xf32> -> vector<8x8xf32>
    %cst_73 = arith.constant 0.176776692 : f32
    %185 = vector.broadcast %cst_73 : f32 to vector<8x8xf32>
    %186 = arith.mulf %184, %185 : vector<8x8xf32>
    %cst_74 = arith.constant dense<0xFF800000> : vector<8xf32>
    %187 = vector.multi_reduction <maximumf>, %186, %cst_74 [1] : vector<8x8xf32> to vector<8xf32>
    %188 = vector.shape_cast %187 : vector<8xf32> to vector<8x1xf32>
    %189 = vector.broadcast %188 : vector<8x1xf32> to vector<8x8xf32>
    %190 = arith.subf %186, %189 : vector<8x8xf32>
    %191 = math.exp %190 : vector<8x8xf32>
    %cst_75 = arith.constant dense<0.000000e+00> : vector<8xf32>
    %192 = vector.multi_reduction <add>, %191, %cst_75 [1] : vector<8x8xf32> to vector<8xf32>
    %193 = vector.shape_cast %192 : vector<8xf32> to vector<8x1xf32>
    %194 = tpu.reciprocal %193 {approx = true} : vector<8x1xf32> -> vector<8x1xf32>
    %195 = vector.broadcast %194 : vector<8x1xf32> to vector<8x8xf32>
    %196 = arith.mulf %191, %195 : vector<8x8xf32>
    %197 = arith.truncf %196 : vector<8x8xf32> to vector<8x8xbf16>
    %cst_76 = arith.constant dense<0.000000e+00> : vector<8x32xf32>
    %198 = tpu.matmul %197, %183, %cst_76 {dimension_numbers = #tpu.dot_dimension_numbers<[1], [0], [0], [1], [0, 0, 1, 1], [], []>} : vector<8x8xbf16>, vector<8x32xbf16>, vector<8x32xf32> -> vector<8x32xf32>
    %199 = arith.truncf %198 : vector<8x32xf32> to vector<8x32xbf16>
    %200 = vector.extract_strided_slice %176 {offsets = [0, 0], sizes = [32, 128], strides = [1, 1]} : vector<128x128xbf16> to vector<32x128xbf16>
    %cst_77 = arith.constant dense<0.000000e+00> : vector<8x128xf32>
    %201 = tpu.matmul %199, %200, %cst_77 {dimension_numbers = #tpu.dot_dimension_numbers<[1], [0], [0], [1], [0, 0, 1, 1], [], []>} : vector<8x32xbf16>, vector<32x128xbf16>, vector<8x128xf32> -> vector<8x128xf32>
    %202 = arith.addf %177, %201 : vector<8x128xf32>
    %203 = vector.extract_strided_slice %165 {offsets = [0, 32], sizes = [8, 32], strides = [1, 1]} : vector<8x128xf32> to vector<8x32xf32>
    %204 = arith.truncf %203 : vector<8x32xf32> to vector<8x32xbf16>
    %205 = vector.extract_strided_slice %173 {offsets = [0, 32], sizes = [8, 32], strides = [1, 1]} : vector<8x128xf32> to vector<8x32xf32>
    %206 = arith.truncf %205 : vector<8x32xf32> to vector<8x32xbf16>
    %207 = vector.extract_strided_slice %174 {offsets = [0, 32], sizes = [8, 32], strides = [1, 1]} : vector<8x128xf32> to vector<8x32xf32>
    %208 = arith.truncf %207 : vector<8x32xf32> to vector<8x32xbf16>
    %cst_78 = arith.constant dense<0.000000e+00> : vector<8x8xf32>
    %209 = tpu.matmul %204, %206, %cst_78 {dimension_numbers = #tpu.dot_dimension_numbers<[1], [1], [0], [0], [0, 0, 1, 0], [], []>} : vector<8x32xbf16>, vector<8x32xbf16>, vector<8x8xf32> -> vector<8x8xf32>
    %cst_79 = arith.constant 0.176776692 : f32
    %210 = vector.broadcast %cst_79 : f32 to vector<8x8xf32>
    %211 = arith.mulf %209, %210 : vector<8x8xf32>
    %cst_80 = arith.constant dense<0xFF800000> : vector<8xf32>
    %212 = vector.multi_reduction <maximumf>, %211, %cst_80 [1] : vector<8x8xf32> to vector<8xf32>
    %213 = vector.shape_cast %212 : vector<8xf32> to vector<8x1xf32>
    %214 = vector.broadcast %213 : vector<8x1xf32> to vector<8x8xf32>
    %215 = arith.subf %211, %214 : vector<8x8xf32>
    %216 = math.exp %215 : vector<8x8xf32>
    %cst_81 = arith.constant dense<0.000000e+00> : vector<8xf32>
    %217 = vector.multi_reduction <add>, %216, %cst_81 [1] : vector<8x8xf32> to vector<8xf32>
    %218 = vector.shape_cast %217 : vector<8xf32> to vector<8x1xf32>
    %219 = tpu.reciprocal %218 {approx = true} : vector<8x1xf32> -> vector<8x1xf32>
    %220 = vector.broadcast %219 : vector<8x1xf32> to vector<8x8xf32>
    %221 = arith.mulf %216, %220 : vector<8x8xf32>
    %222 = arith.truncf %221 : vector<8x8xf32> to vector<8x8xbf16>
    %cst_82 = arith.constant dense<0.000000e+00> : vector<8x32xf32>
    %223 = tpu.matmul %222, %208, %cst_82 {dimension_numbers = #tpu.dot_dimension_numbers<[1], [0], [0], [1], [0, 0, 1, 1], [], []>} : vector<8x8xbf16>, vector<8x32xbf16>, vector<8x32xf32> -> vector<8x32xf32>
    %224 = arith.truncf %223 : vector<8x32xf32> to vector<8x32xbf16>
    %225 = vector.extract_strided_slice %176 {offsets = [32, 0], sizes = [32, 128], strides = [1, 1]} : vector<128x128xbf16> to vector<32x128xbf16>
    %cst_83 = arith.constant dense<0.000000e+00> : vector<8x128xf32>
    %226 = tpu.matmul %224, %225, %cst_83 {dimension_numbers = #tpu.dot_dimension_numbers<[1], [0], [0], [1], [0, 0, 1, 1], [], []>} : vector<8x32xbf16>, vector<32x128xbf16>, vector<8x128xf32> -> vector<8x128xf32>
    %227 = arith.addf %202, %226 : vector<8x128xf32>
    %228 = vector.extract_strided_slice %165 {offsets = [0, 64], sizes = [8, 32], strides = [1, 1]} : vector<8x128xf32> to vector<8x32xf32>
    %229 = arith.truncf %228 : vector<8x32xf32> to vector<8x32xbf16>
    %230 = vector.extract_strided_slice %173 {offsets = [0, 64], sizes = [8, 32], strides = [1, 1]} : vector<8x128xf32> to vector<8x32xf32>
    %231 = arith.truncf %230 : vector<8x32xf32> to vector<8x32xbf16>
    %232 = vector.extract_strided_slice %174 {offsets = [0, 64], sizes = [8, 32], strides = [1, 1]} : vector<8x128xf32> to vector<8x32xf32>
    %233 = arith.truncf %232 : vector<8x32xf32> to vector<8x32xbf16>
    %cst_84 = arith.constant dense<0.000000e+00> : vector<8x8xf32>
    %234 = tpu.matmul %229, %231, %cst_84 {dimension_numbers = #tpu.dot_dimension_numbers<[1], [1], [0], [0], [0, 0, 1, 0], [], []>} : vector<8x32xbf16>, vector<8x32xbf16>, vector<8x8xf32> -> vector<8x8xf32>
    %cst_85 = arith.constant 0.176776692 : f32
    %235 = vector.broadcast %cst_85 : f32 to vector<8x8xf32>
    %236 = arith.mulf %234, %235 : vector<8x8xf32>
    %cst_86 = arith.constant dense<0xFF800000> : vector<8xf32>
    %237 = vector.multi_reduction <maximumf>, %236, %cst_86 [1] : vector<8x8xf32> to vector<8xf32>
    %238 = vector.shape_cast %237 : vector<8xf32> to vector<8x1xf32>
    %239 = vector.broadcast %238 : vector<8x1xf32> to vector<8x8xf32>
    %240 = arith.subf %236, %239 : vector<8x8xf32>
    %241 = math.exp %240 : vector<8x8xf32>
    %cst_87 = arith.constant dense<0.000000e+00> : vector<8xf32>
    %242 = vector.multi_reduction <add>, %241, %cst_87 [1] : vector<8x8xf32> to vector<8xf32>
    %243 = vector.shape_cast %242 : vector<8xf32> to vector<8x1xf32>
    %244 = tpu.reciprocal %243 {approx = true} : vector<8x1xf32> -> vector<8x1xf32>
    %245 = vector.broadcast %244 : vector<8x1xf32> to vector<8x8xf32>
    %246 = arith.mulf %241, %245 : vector<8x8xf32>
    %247 = arith.truncf %246 : vector<8x8xf32> to vector<8x8xbf16>
    %cst_88 = arith.constant dense<0.000000e+00> : vector<8x32xf32>
    %248 = tpu.matmul %247, %233, %cst_88 {dimension_numbers = #tpu.dot_dimension_numbers<[1], [0], [0], [1], [0, 0, 1, 1], [], []>} : vector<8x8xbf16>, vector<8x32xbf16>, vector<8x32xf32> -> vector<8x32xf32>
    %249 = arith.truncf %248 : vector<8x32xf32> to vector<8x32xbf16>
    %250 = vector.extract_strided_slice %176 {offsets = [64, 0], sizes = [32, 128], strides = [1, 1]} : vector<128x128xbf16> to vector<32x128xbf16>
    %cst_89 = arith.constant dense<0.000000e+00> : vector<8x128xf32>
    %251 = tpu.matmul %249, %250, %cst_89 {dimension_numbers = #tpu.dot_dimension_numbers<[1], [0], [0], [1], [0, 0, 1, 1], [], []>} : vector<8x32xbf16>, vector<32x128xbf16>, vector<8x128xf32> -> vector<8x128xf32>
    %252 = arith.addf %227, %251 : vector<8x128xf32>
    %253 = vector.extract_strided_slice %165 {offsets = [0, 96], sizes = [8, 32], strides = [1, 1]} : vector<8x128xf32> to vector<8x32xf32>
    %254 = arith.truncf %253 : vector<8x32xf32> to vector<8x32xbf16>
    %255 = vector.extract_strided_slice %173 {offsets = [0, 96], sizes = [8, 32], strides = [1, 1]} : vector<8x128xf32> to vector<8x32xf32>
    %256 = arith.truncf %255 : vector<8x32xf32> to vector<8x32xbf16>
    %257 = vector.extract_strided_slice %174 {offsets = [0, 96], sizes = [8, 32], strides = [1, 1]} : vector<8x128xf32> to vector<8x32xf32>
    %258 = arith.truncf %257 : vector<8x32xf32> to vector<8x32xbf16>
    %cst_90 = arith.constant dense<0.000000e+00> : vector<8x8xf32>
    %259 = tpu.matmul %254, %256, %cst_90 {dimension_numbers = #tpu.dot_dimension_numbers<[1], [1], [0], [0], [0, 0, 1, 0], [], []>} : vector<8x32xbf16>, vector<8x32xbf16>, vector<8x8xf32> -> vector<8x8xf32>
    %cst_91 = arith.constant 0.176776692 : f32
    %260 = vector.broadcast %cst_91 : f32 to vector<8x8xf32>
    %261 = arith.mulf %259, %260 : vector<8x8xf32>
    %cst_92 = arith.constant dense<0xFF800000> : vector<8xf32>
    %262 = vector.multi_reduction <maximumf>, %261, %cst_92 [1] : vector<8x8xf32> to vector<8xf32>
    %263 = vector.shape_cast %262 : vector<8xf32> to vector<8x1xf32>
    %264 = vector.broadcast %263 : vector<8x1xf32> to vector<8x8xf32>
    %265 = arith.subf %261, %264 : vector<8x8xf32>
    %266 = math.exp %265 : vector<8x8xf32>
    %cst_93 = arith.constant dense<0.000000e+00> : vector<8xf32>
    %267 = vector.multi_reduction <add>, %266, %cst_93 [1] : vector<8x8xf32> to vector<8xf32>
    %268 = vector.shape_cast %267 : vector<8xf32> to vector<8x1xf32>
    %269 = tpu.reciprocal %268 {approx = true} : vector<8x1xf32> -> vector<8x1xf32>
    %270 = vector.broadcast %269 : vector<8x1xf32> to vector<8x8xf32>
    %271 = arith.mulf %266, %270 : vector<8x8xf32>
    %272 = arith.truncf %271 : vector<8x8xf32> to vector<8x8xbf16>
    %cst_94 = arith.constant dense<0.000000e+00> : vector<8x32xf32>
    %273 = tpu.matmul %272, %258, %cst_94 {dimension_numbers = #tpu.dot_dimension_numbers<[1], [0], [0], [1], [0, 0, 1, 1], [], []>} : vector<8x8xbf16>, vector<8x32xbf16>, vector<8x32xf32> -> vector<8x32xf32>
    %274 = arith.truncf %273 : vector<8x32xf32> to vector<8x32xbf16>
    %275 = vector.extract_strided_slice %176 {offsets = [96, 0], sizes = [32, 128], strides = [1, 1]} : vector<128x128xbf16> to vector<32x128xbf16>
    %cst_95 = arith.constant dense<0.000000e+00> : vector<8x128xf32>
    %276 = tpu.matmul %274, %275, %cst_95 {dimension_numbers = #tpu.dot_dimension_numbers<[1], [0], [0], [1], [0, 0, 1, 1], [], []>} : vector<8x32xbf16>, vector<32x128xbf16>, vector<8x128xf32> -> vector<8x128xf32>
    %277 = arith.addf %252, %276 : vector<8x128xf32>
    %c0_96 = arith.constant 0 : index
    %c0_97 = arith.constant 0 : index
    %c0_98 = arith.constant 0 : index
    %278 = vector.load %arg14[%c0_96, %c0_97, %c0_98] : memref<4x1x128xf32, #tpu.memory_space<vmem>>, vector<1x1x128xf32>
    %279 = vector.shape_cast %278 : vector<1x1x128xf32> to vector<1x128xf32>
    %280 = vector.broadcast %279 : vector<1x128xf32> to vector<8x128xf32>
    %281 = arith.addf %277, %280 : vector<8x128xf32>
    %282 = arith.addf %157, %281 : vector<8x128xf32>
    %c0_99 = arith.constant 0 : index
    %c0_100 = arith.constant 0 : index
    %c0_101 = arith.constant 0 : index
    %283 = vector.load %arg15[%c0_99, %c0_100, %c0_101] : memref<4x1x128xf32, #tpu.memory_space<vmem>>, vector<1x1x128xf32>
    %284 = vector.shape_cast %283 : vector<1x1x128xf32> to vector<1x128xf32>
    %c0_102 = arith.constant 0 : index
    %c0_103 = arith.constant 0 : index
    %c0_104 = arith.constant 0 : index
    %285 = vector.load %arg16[%c0_102, %c0_103, %c0_104] : memref<4x1x128xf32, #tpu.memory_space<vmem>>, vector<1x1x128xf32>
    %286 = vector.shape_cast %285 : vector<1x1x128xf32> to vector<1x128xf32>
    %cst_105 = arith.constant dense<0.000000e+00> : vector<8xf32>
    %287 = vector.multi_reduction <add>, %282, %cst_105 [1] : vector<8x128xf32> to vector<8xf32>
    %288 = vector.shape_cast %287 : vector<8xf32> to vector<8x1xf32>
    %cst_106 = arith.constant 1.280000e+02 : f32
    %289 = vector.broadcast %cst_106 : f32 to vector<8x1xf32>
    %290 = arith.divf %288, %289 : vector<8x1xf32>
    %291 = vector.broadcast %290 : vector<8x1xf32> to vector<8x128xf32>
    %292 = arith.subf %282, %291 : vector<8x128xf32>
    %293 = arith.mulf %292, %292 : vector<8x128xf32>
    %cst_107 = arith.constant dense<0.000000e+00> : vector<8xf32>
    %294 = vector.multi_reduction <add>, %293, %cst_107 [1] : vector<8x128xf32> to vector<8xf32>
    %295 = vector.shape_cast %294 : vector<8xf32> to vector<8x1xf32>
    %cst_108 = arith.constant 1.280000e+02 : f32
    %296 = vector.broadcast %cst_108 : f32 to vector<8x1xf32>
    %297 = arith.divf %295, %296 : vector<8x1xf32>
    %cst_109 = arith.constant 9.99999974E-6 : f32
    %298 = vector.broadcast %cst_109 : f32 to vector<8x1xf32>
    %299 = arith.addf %297, %298 : vector<8x1xf32>
    %300 = math.rsqrt %299 : vector<8x1xf32>
    %301 = vector.broadcast %300 : vector<8x1xf32> to vector<8x128xf32>
    %302 = arith.mulf %292, %301 : vector<8x128xf32>
    %303 = vector.broadcast %284 : vector<1x128xf32> to vector<8x128xf32>
    %304 = arith.mulf %302, %303 : vector<8x128xf32>
    %305 = vector.broadcast %286 : vector<1x128xf32> to vector<8x128xf32>
    %306 = arith.addf %304, %305 : vector<8x128xf32>
    %307 = arith.truncf %306 : vector<8x128xf32> to vector<8x128xbf16>
    %c0_110 = arith.constant 0 : index
    %c0_111 = arith.constant 0 : index
    %c0_112 = arith.constant 0 : index
    %308 = vector.load %arg17[%c0_110, %c0_111, %c0_112] : memref<4x128x512xbf16, #tpu.memory_space<vmem>>, vector<1x128x512xbf16>
    %309 = vector.shape_cast %308 : vector<1x128x512xbf16> to vector<128x512xbf16>
    %cst_113 = arith.constant dense<0.000000e+00> : vector<8x512xf32>
    %310 = tpu.matmul %307, %309, %cst_113 {dimension_numbers = #tpu.dot_dimension_numbers<[1], [0], [0], [1], [0, 0, 1, 1], [], []>} : vector<8x128xbf16>, vector<128x512xbf16>, vector<8x512xf32> -> vector<8x512xf32>
    %c0_114 = arith.constant 0 : index
    %c0_115 = arith.constant 0 : index
    %c0_116 = arith.constant 0 : index
    %311 = vector.load %arg18[%c0_114, %c0_115, %c0_116] : memref<4x1x512xf32, #tpu.memory_space<vmem>>, vector<1x1x512xf32>
    %312 = vector.shape_cast %311 : vector<1x1x512xf32> to vector<1x512xf32>
    %313 = vector.broadcast %312 : vector<1x512xf32> to vector<8x512xf32>
    %314 = arith.addf %310, %313 : vector<8x512xf32>
    %cst_117 = arith.constant 0.000000e+00 : f32
    %315 = vector.broadcast %cst_117 : f32 to vector<8x512xf32>
    %316 = arith.maximumf %314, %315 : vector<8x512xf32>
    %317 = arith.truncf %316 : vector<8x512xf32> to vector<8x512xbf16>
    %c0_118 = arith.constant 0 : index
    %c0_119 = arith.constant 0 : index
    %c0_120 = arith.constant 0 : index
    %318 = vector.load %arg19[%c0_118, %c0_119, %c0_120] : memref<4x512x128xbf16, #tpu.memory_space<vmem>>, vector<1x512x128xbf16>
    %319 = vector.shape_cast %318 : vector<1x512x128xbf16> to vector<512x128xbf16>
    %cst_121 = arith.constant dense<0.000000e+00> : vector<8x128xf32>
    %320 = tpu.matmul %317, %319, %cst_121 {dimension_numbers = #tpu.dot_dimension_numbers<[1], [0], [0], [1], [0, 0, 1, 1], [], []>} : vector<8x512xbf16>, vector<512x128xbf16>, vector<8x128xf32> -> vector<8x128xf32>
    %c0_122 = arith.constant 0 : index
    %c0_123 = arith.constant 0 : index
    %c0_124 = arith.constant 0 : index
    %321 = vector.load %arg20[%c0_122, %c0_123, %c0_124] : memref<4x1x128xf32, #tpu.memory_space<vmem>>, vector<1x1x128xf32>
    %322 = vector.shape_cast %321 : vector<1x1x128xf32> to vector<1x128xf32>
    %323 = vector.broadcast %322 : vector<1x128xf32> to vector<8x128xf32>
    %324 = arith.addf %320, %323 : vector<8x128xf32>
    %325 = arith.addf %306, %324 : vector<8x128xf32>
    %c0_125 = arith.constant 0 : index
    %c0_126 = arith.constant 0 : index
    %c0_127 = arith.constant 0 : index
    %326 = vector.load %arg21[%c0_125, %c0_126, %c0_127] : memref<4x1x128xf32, #tpu.memory_space<vmem>>, vector<1x1x128xf32>
    %327 = vector.shape_cast %326 : vector<1x1x128xf32> to vector<1x128xf32>
    %c0_128 = arith.constant 0 : index
    %c0_129 = arith.constant 0 : index
    %c0_130 = arith.constant 0 : index
    %328 = vector.load %arg22[%c0_128, %c0_129, %c0_130] : memref<4x1x128xf32, #tpu.memory_space<vmem>>, vector<1x1x128xf32>
    %329 = vector.shape_cast %328 : vector<1x1x128xf32> to vector<1x128xf32>
    %cst_131 = arith.constant dense<0.000000e+00> : vector<8xf32>
    %330 = vector.multi_reduction <add>, %325, %cst_131 [1] : vector<8x128xf32> to vector<8xf32>
    %331 = vector.shape_cast %330 : vector<8xf32> to vector<8x1xf32>
    %cst_132 = arith.constant 1.280000e+02 : f32
    %332 = vector.broadcast %cst_132 : f32 to vector<8x1xf32>
    %333 = arith.divf %331, %332 : vector<8x1xf32>
    %334 = vector.broadcast %333 : vector<8x1xf32> to vector<8x128xf32>
    %335 = arith.subf %325, %334 : vector<8x128xf32>
    %336 = arith.mulf %335, %335 : vector<8x128xf32>
    %cst_133 = arith.constant dense<0.000000e+00> : vector<8xf32>
    %337 = vector.multi_reduction <add>, %336, %cst_133 [1] : vector<8x128xf32> to vector<8xf32>
    %338 = vector.shape_cast %337 : vector<8xf32> to vector<8x1xf32>
    %cst_134 = arith.constant 1.280000e+02 : f32
    %339 = vector.broadcast %cst_134 : f32 to vector<8x1xf32>
    %340 = arith.divf %338, %339 : vector<8x1xf32>
    %cst_135 = arith.constant 9.99999974E-6 : f32
    %341 = vector.broadcast %cst_135 : f32 to vector<8x1xf32>
    %342 = arith.addf %340, %341 : vector<8x1xf32>
    %343 = math.rsqrt %342 : vector<8x1xf32>
    %344 = vector.broadcast %343 : vector<8x1xf32> to vector<8x128xf32>
    %345 = arith.mulf %335, %344 : vector<8x128xf32>
    %346 = vector.broadcast %327 : vector<1x128xf32> to vector<8x128xf32>
    %347 = arith.mulf %345, %346 : vector<8x128xf32>
    %348 = vector.broadcast %329 : vector<1x128xf32> to vector<8x128xf32>
    %349 = arith.addf %347, %348 : vector<8x128xf32>
    %350 = arith.truncf %349 : vector<8x128xf32> to vector<8x128xbf16>
    %c1 = arith.constant 1 : index
    %c0_136 = arith.constant 0 : index
    %c0_137 = arith.constant 0 : index
    %351 = vector.load %arg3[%c1, %c0_136, %c0_137] : memref<4x128x384xbf16, #tpu.memory_space<vmem>>, vector<1x128x384xbf16>
    %352 = vector.shape_cast %351 : vector<1x128x384xbf16> to vector<128x384xbf16>
    %cst_138 = arith.constant dense<0.000000e+00> : vector<8x384xf32>
    %353 = tpu.matmul %350, %352, %cst_138 {dimension_numbers = #tpu.dot_dimension_numbers<[1], [0], [0], [1], [0, 0, 1, 1], [], []>} : vector<8x128xbf16>, vector<128x384xbf16>, vector<8x384xf32> -> vector<8x384xf32>
    %c1_139 = arith.constant 1 : index
    %c0_140 = arith.constant 0 : index
    %c0_141 = arith.constant 0 : index
    %354 = vector.load %arg4[%c1_139, %c0_140, %c0_141] : memref<4x1x384xf32, #tpu.memory_space<vmem>>, vector<1x1x384xf32>
    %355 = vector.shape_cast %354 : vector<1x1x384xf32> to vector<1x384xf32>
    %356 = vector.broadcast %355 : vector<1x384xf32> to vector<8x384xf32>
    %357 = arith.addf %353, %356 : vector<8x384xf32>
    %358 = vector.extract_strided_slice %357 {offsets = [0, 0], sizes = [8, 128], strides = [1, 1]} : vector<8x384xf32> to vector<8x128xf32>
    %359 = vector.extract_strided_slice %357 {offsets = [0, 128], sizes = [8, 128], strides = [1, 1]} : vector<8x384xf32> to vector<8x128xf32>
    %360 = vector.extract_strided_slice %357 {offsets = [0, 256], sizes = [8, 128], strides = [1, 1]} : vector<8x384xf32> to vector<8x128xf32>
    %c1_142 = arith.constant 1 : index
    %c0_143 = arith.constant 0 : index
    %c0_144 = arith.constant 0 : index
    %361 = vector.load %arg5[%c1_142, %c0_143, %c0_144] : memref<4x128x128xbf16, #tpu.memory_space<vmem>>, vector<1x128x128xbf16>
    %362 = vector.shape_cast %361 : vector<1x128x128xbf16> to vector<128x128xbf16>
    %363 = tpu.iota {dimensions = array<i32: 0>} : vector<8x8xi32>
    %364 = tpu.iota {dimensions = array<i32: 1>} : vector<8x8xi32>
    %365 = arith.cmpi sgt, %364, %363 : vector<8x8xi32>
    %cst_145 = arith.constant -1.000000e+30 : f32
    %cst_146 = arith.constant 0.000000e+00 : f32
    %366 = vector.broadcast %cst_145 : f32 to vector<8x8xf32>
    %367 = vector.broadcast %cst_146 : f32 to vector<8x8xf32>
    %368 = arith.select %365, %366, %367 : vector<8x8xi1>, vector<8x8xf32>
    %cst_147 = arith.constant 0.000000e+00 : f32
    %369 = vector.broadcast %cst_147 : f32 to vector<8x128xf32>
    %370 = vector.extract_strided_slice %358 {offsets = [0, 0], sizes = [8, 32], strides = [1, 1]} : vector<8x128xf32> to vector<8x32xf32>
    %371 = arith.truncf %370 : vector<8x32xf32> to vector<8x32xbf16>
    %372 = vector.extract_strided_slice %359 {offsets = [0, 0], sizes = [8, 32], strides = [1, 1]} : vector<8x128xf32> to vector<8x32xf32>
    %373 = arith.truncf %372 : vector<8x32xf32> to vector<8x32xbf16>
    %374 = vector.extract_strided_slice %360 {offsets = [0, 0], sizes = [8, 32], strides = [1, 1]} : vector<8x128xf32> to vector<8x32xf32>
    %375 = arith.truncf %374 : vector<8x32xf32> to vector<8x32xbf16>
    %cst_148 = arith.constant dense<0.000000e+00> : vector<8x8xf32>
    %376 = tpu.matmul %371, %373, %cst_148 {dimension_numbers = #tpu.dot_dimension_numbers<[1], [1], [0], [0], [0, 0, 1, 0], [], []>} : vector<8x32xbf16>, vector<8x32xbf16>, vector<8x8xf32> -> vector<8x8xf32>
    %cst_149 = arith.constant 0.176776692 : f32
    %377 = vector.broadcast %cst_149 : f32 to vector<8x8xf32>
    %378 = arith.mulf %376, %377 : vector<8x8xf32>
    %379 = arith.addf %378, %368 : vector<8x8xf32>
    %cst_150 = arith.constant dense<0xFF800000> : vector<8xf32>
    %380 = vector.multi_reduction <maximumf>, %379, %cst_150 [1] : vector<8x8xf32> to vector<8xf32>
    %381 = vector.shape_cast %380 : vector<8xf32> to vector<8x1xf32>
    %382 = vector.broadcast %381 : vector<8x1xf32> to vector<8x8xf32>
    %383 = arith.subf %379, %382 : vector<8x8xf32>
    %384 = math.exp %383 : vector<8x8xf32>
    %cst_151 = arith.constant dense<0.000000e+00> : vector<8xf32>
    %385 = vector.multi_reduction <add>, %384, %cst_151 [1] : vector<8x8xf32> to vector<8xf32>
    %386 = vector.shape_cast %385 : vector<8xf32> to vector<8x1xf32>
    %387 = tpu.reciprocal %386 {approx = true} : vector<8x1xf32> -> vector<8x1xf32>
    %388 = vector.broadcast %387 : vector<8x1xf32> to vector<8x8xf32>
    %389 = arith.mulf %384, %388 : vector<8x8xf32>
    %390 = arith.truncf %389 : vector<8x8xf32> to vector<8x8xbf16>
    %cst_152 = arith.constant dense<0.000000e+00> : vector<8x32xf32>
    %391 = tpu.matmul %390, %375, %cst_152 {dimension_numbers = #tpu.dot_dimension_numbers<[1], [0], [0], [1], [0, 0, 1, 1], [], []>} : vector<8x8xbf16>, vector<8x32xbf16>, vector<8x32xf32> -> vector<8x32xf32>
    %392 = arith.truncf %391 : vector<8x32xf32> to vector<8x32xbf16>
    %393 = vector.extract_strided_slice %362 {offsets = [0, 0], sizes = [32, 128], strides = [1, 1]} : vector<128x128xbf16> to vector<32x128xbf16>
    %cst_153 = arith.constant dense<0.000000e+00> : vector<8x128xf32>
    %394 = tpu.matmul %392, %393, %cst_153 {dimension_numbers = #tpu.dot_dimension_numbers<[1], [0], [0], [1], [0, 0, 1, 1], [], []>} : vector<8x32xbf16>, vector<32x128xbf16>, vector<8x128xf32> -> vector<8x128xf32>
    %395 = arith.addf %369, %394 : vector<8x128xf32>
    %396 = vector.extract_strided_slice %358 {offsets = [0, 32], sizes = [8, 32], strides = [1, 1]} : vector<8x128xf32> to vector<8x32xf32>
    %397 = arith.truncf %396 : vector<8x32xf32> to vector<8x32xbf16>
    %398 = vector.extract_strided_slice %359 {offsets = [0, 32], sizes = [8, 32], strides = [1, 1]} : vector<8x128xf32> to vector<8x32xf32>
    %399 = arith.truncf %398 : vector<8x32xf32> to vector<8x32xbf16>
    %400 = vector.extract_strided_slice %360 {offsets = [0, 32], sizes = [8, 32], strides = [1, 1]} : vector<8x128xf32> to vector<8x32xf32>
    %401 = arith.truncf %400 : vector<8x32xf32> to vector<8x32xbf16>
    %cst_154 = arith.constant dense<0.000000e+00> : vector<8x8xf32>
    %402 = tpu.matmul %397, %399, %cst_154 {dimension_numbers = #tpu.dot_dimension_numbers<[1], [1], [0], [0], [0, 0, 1, 0], [], []>} : vector<8x32xbf16>, vector<8x32xbf16>, vector<8x8xf32> -> vector<8x8xf32>
    %cst_155 = arith.constant 0.176776692 : f32
    %403 = vector.broadcast %cst_155 : f32 to vector<8x8xf32>
    %404 = arith.mulf %402, %403 : vector<8x8xf32>
    %405 = arith.addf %404, %368 : vector<8x8xf32>
    %cst_156 = arith.constant dense<0xFF800000> : vector<8xf32>
    %406 = vector.multi_reduction <maximumf>, %405, %cst_156 [1] : vector<8x8xf32> to vector<8xf32>
    %407 = vector.shape_cast %406 : vector<8xf32> to vector<8x1xf32>
    %408 = vector.broadcast %407 : vector<8x1xf32> to vector<8x8xf32>
    %409 = arith.subf %405, %408 : vector<8x8xf32>
    %410 = math.exp %409 : vector<8x8xf32>
    %cst_157 = arith.constant dense<0.000000e+00> : vector<8xf32>
    %411 = vector.multi_reduction <add>, %410, %cst_157 [1] : vector<8x8xf32> to vector<8xf32>
    %412 = vector.shape_cast %411 : vector<8xf32> to vector<8x1xf32>
    %413 = tpu.reciprocal %412 {approx = true} : vector<8x1xf32> -> vector<8x1xf32>
    %414 = vector.broadcast %413 : vector<8x1xf32> to vector<8x8xf32>
    %415 = arith.mulf %410, %414 : vector<8x8xf32>
    %416 = arith.truncf %415 : vector<8x8xf32> to vector<8x8xbf16>
    %cst_158 = arith.constant dense<0.000000e+00> : vector<8x32xf32>
    %417 = tpu.matmul %416, %401, %cst_158 {dimension_numbers = #tpu.dot_dimension_numbers<[1], [0], [0], [1], [0, 0, 1, 1], [], []>} : vector<8x8xbf16>, vector<8x32xbf16>, vector<8x32xf32> -> vector<8x32xf32>
    %418 = arith.truncf %417 : vector<8x32xf32> to vector<8x32xbf16>
    %419 = vector.extract_strided_slice %362 {offsets = [32, 0], sizes = [32, 128], strides = [1, 1]} : vector<128x128xbf16> to vector<32x128xbf16>
    %cst_159 = arith.constant dense<0.000000e+00> : vector<8x128xf32>
    %420 = tpu.matmul %418, %419, %cst_159 {dimension_numbers = #tpu.dot_dimension_numbers<[1], [0], [0], [1], [0, 0, 1, 1], [], []>} : vector<8x32xbf16>, vector<32x128xbf16>, vector<8x128xf32> -> vector<8x128xf32>
    %421 = arith.addf %395, %420 : vector<8x128xf32>
    %422 = vector.extract_strided_slice %358 {offsets = [0, 64], sizes = [8, 32], strides = [1, 1]} : vector<8x128xf32> to vector<8x32xf32>
    %423 = arith.truncf %422 : vector<8x32xf32> to vector<8x32xbf16>
    %424 = vector.extract_strided_slice %359 {offsets = [0, 64], sizes = [8, 32], strides = [1, 1]} : vector<8x128xf32> to vector<8x32xf32>
    %425 = arith.truncf %424 : vector<8x32xf32> to vector<8x32xbf16>
    %426 = vector.extract_strided_slice %360 {offsets = [0, 64], sizes = [8, 32], strides = [1, 1]} : vector<8x128xf32> to vector<8x32xf32>
    %427 = arith.truncf %426 : vector<8x32xf32> to vector<8x32xbf16>
    %cst_160 = arith.constant dense<0.000000e+00> : vector<8x8xf32>
    %428 = tpu.matmul %423, %425, %cst_160 {dimension_numbers = #tpu.dot_dimension_numbers<[1], [1], [0], [0], [0, 0, 1, 0], [], []>} : vector<8x32xbf16>, vector<8x32xbf16>, vector<8x8xf32> -> vector<8x8xf32>
    %cst_161 = arith.constant 0.176776692 : f32
    %429 = vector.broadcast %cst_161 : f32 to vector<8x8xf32>
    %430 = arith.mulf %428, %429 : vector<8x8xf32>
    %431 = arith.addf %430, %368 : vector<8x8xf32>
    %cst_162 = arith.constant dense<0xFF800000> : vector<8xf32>
    %432 = vector.multi_reduction <maximumf>, %431, %cst_162 [1] : vector<8x8xf32> to vector<8xf32>
    %433 = vector.shape_cast %432 : vector<8xf32> to vector<8x1xf32>
    %434 = vector.broadcast %433 : vector<8x1xf32> to vector<8x8xf32>
    %435 = arith.subf %431, %434 : vector<8x8xf32>
    %436 = math.exp %435 : vector<8x8xf32>
    %cst_163 = arith.constant dense<0.000000e+00> : vector<8xf32>
    %437 = vector.multi_reduction <add>, %436, %cst_163 [1] : vector<8x8xf32> to vector<8xf32>
    %438 = vector.shape_cast %437 : vector<8xf32> to vector<8x1xf32>
    %439 = tpu.reciprocal %438 {approx = true} : vector<8x1xf32> -> vector<8x1xf32>
    %440 = vector.broadcast %439 : vector<8x1xf32> to vector<8x8xf32>
    %441 = arith.mulf %436, %440 : vector<8x8xf32>
    %442 = arith.truncf %441 : vector<8x8xf32> to vector<8x8xbf16>
    %cst_164 = arith.constant dense<0.000000e+00> : vector<8x32xf32>
    %443 = tpu.matmul %442, %427, %cst_164 {dimension_numbers = #tpu.dot_dimension_numbers<[1], [0], [0], [1], [0, 0, 1, 1], [], []>} : vector<8x8xbf16>, vector<8x32xbf16>, vector<8x32xf32> -> vector<8x32xf32>
    %444 = arith.truncf %443 : vector<8x32xf32> to vector<8x32xbf16>
    %445 = vector.extract_strided_slice %362 {offsets = [64, 0], sizes = [32, 128], strides = [1, 1]} : vector<128x128xbf16> to vector<32x128xbf16>
    %cst_165 = arith.constant dense<0.000000e+00> : vector<8x128xf32>
    %446 = tpu.matmul %444, %445, %cst_165 {dimension_numbers = #tpu.dot_dimension_numbers<[1], [0], [0], [1], [0, 0, 1, 1], [], []>} : vector<8x32xbf16>, vector<32x128xbf16>, vector<8x128xf32> -> vector<8x128xf32>
    %447 = arith.addf %421, %446 : vector<8x128xf32>
    %448 = vector.extract_strided_slice %358 {offsets = [0, 96], sizes = [8, 32], strides = [1, 1]} : vector<8x128xf32> to vector<8x32xf32>
    %449 = arith.truncf %448 : vector<8x32xf32> to vector<8x32xbf16>
    %450 = vector.extract_strided_slice %359 {offsets = [0, 96], sizes = [8, 32], strides = [1, 1]} : vector<8x128xf32> to vector<8x32xf32>
    %451 = arith.truncf %450 : vector<8x32xf32> to vector<8x32xbf16>
    %452 = vector.extract_strided_slice %360 {offsets = [0, 96], sizes = [8, 32], strides = [1, 1]} : vector<8x128xf32> to vector<8x32xf32>
    %453 = arith.truncf %452 : vector<8x32xf32> to vector<8x32xbf16>
    %cst_166 = arith.constant dense<0.000000e+00> : vector<8x8xf32>
    %454 = tpu.matmul %449, %451, %cst_166 {dimension_numbers = #tpu.dot_dimension_numbers<[1], [1], [0], [0], [0, 0, 1, 0], [], []>} : vector<8x32xbf16>, vector<8x32xbf16>, vector<8x8xf32> -> vector<8x8xf32>
    %cst_167 = arith.constant 0.176776692 : f32
    %455 = vector.broadcast %cst_167 : f32 to vector<8x8xf32>
    %456 = arith.mulf %454, %455 : vector<8x8xf32>
    %457 = arith.addf %456, %368 : vector<8x8xf32>
    %cst_168 = arith.constant dense<0xFF800000> : vector<8xf32>
    %458 = vector.multi_reduction <maximumf>, %457, %cst_168 [1] : vector<8x8xf32> to vector<8xf32>
    %459 = vector.shape_cast %458 : vector<8xf32> to vector<8x1xf32>
    %460 = vector.broadcast %459 : vector<8x1xf32> to vector<8x8xf32>
    %461 = arith.subf %457, %460 : vector<8x8xf32>
    %462 = math.exp %461 : vector<8x8xf32>
    %cst_169 = arith.constant dense<0.000000e+00> : vector<8xf32>
    %463 = vector.multi_reduction <add>, %462, %cst_169 [1] : vector<8x8xf32> to vector<8xf32>
    %464 = vector.shape_cast %463 : vector<8xf32> to vector<8x1xf32>
    %465 = tpu.reciprocal %464 {approx = true} : vector<8x1xf32> -> vector<8x1xf32>
    %466 = vector.broadcast %465 : vector<8x1xf32> to vector<8x8xf32>
    %467 = arith.mulf %462, %466 : vector<8x8xf32>
    %468 = arith.truncf %467 : vector<8x8xf32> to vector<8x8xbf16>
    %cst_170 = arith.constant dense<0.000000e+00> : vector<8x32xf32>
    %469 = tpu.matmul %468, %453, %cst_170 {dimension_numbers = #tpu.dot_dimension_numbers<[1], [0], [0], [1], [0, 0, 1, 1], [], []>} : vector<8x8xbf16>, vector<8x32xbf16>, vector<8x32xf32> -> vector<8x32xf32>
    %470 = arith.truncf %469 : vector<8x32xf32> to vector<8x32xbf16>
    %471 = vector.extract_strided_slice %362 {offsets = [96, 0], sizes = [32, 128], strides = [1, 1]} : vector<128x128xbf16> to vector<32x128xbf16>
    %cst_171 = arith.constant dense<0.000000e+00> : vector<8x128xf32>
    %472 = tpu.matmul %470, %471, %cst_171 {dimension_numbers = #tpu.dot_dimension_numbers<[1], [0], [0], [1], [0, 0, 1, 1], [], []>} : vector<8x32xbf16>, vector<32x128xbf16>, vector<8x128xf32> -> vector<8x128xf32>
    %473 = arith.addf %447, %472 : vector<8x128xf32>
    %c1_172 = arith.constant 1 : index
    %c0_173 = arith.constant 0 : index
    %c0_174 = arith.constant 0 : index
    %474 = vector.load %arg6[%c1_172, %c0_173, %c0_174] : memref<4x1x128xf32, #tpu.memory_space<vmem>>, vector<1x1x128xf32>
    %475 = vector.shape_cast %474 : vector<1x1x128xf32> to vector<1x128xf32>
    %476 = vector.broadcast %475 : vector<1x128xf32> to vector<8x128xf32>
    %477 = arith.addf %473, %476 : vector<8x128xf32>
    %478 = arith.addf %349, %477 : vector<8x128xf32>
    %c1_175 = arith.constant 1 : index
    %c0_176 = arith.constant 0 : index
    %c0_177 = arith.constant 0 : index
    %479 = vector.load %arg7[%c1_175, %c0_176, %c0_177] : memref<4x1x128xf32, #tpu.memory_space<vmem>>, vector<1x1x128xf32>
    %480 = vector.shape_cast %479 : vector<1x1x128xf32> to vector<1x128xf32>
    %c1_178 = arith.constant 1 : index
    %c0_179 = arith.constant 0 : index
    %c0_180 = arith.constant 0 : index
    %481 = vector.load %arg8[%c1_178, %c0_179, %c0_180] : memref<4x1x128xf32, #tpu.memory_space<vmem>>, vector<1x1x128xf32>
    %482 = vector.shape_cast %481 : vector<1x1x128xf32> to vector<1x128xf32>
    %cst_181 = arith.constant dense<0.000000e+00> : vector<8xf32>
    %483 = vector.multi_reduction <add>, %478, %cst_181 [1] : vector<8x128xf32> to vector<8xf32>
    %484 = vector.shape_cast %483 : vector<8xf32> to vector<8x1xf32>
    %cst_182 = arith.constant 1.280000e+02 : f32
    %485 = vector.broadcast %cst_182 : f32 to vector<8x1xf32>
    %486 = arith.divf %484, %485 : vector<8x1xf32>
    %487 = vector.broadcast %486 : vector<8x1xf32> to vector<8x128xf32>
    %488 = arith.subf %478, %487 : vector<8x128xf32>
    %489 = arith.mulf %488, %488 : vector<8x128xf32>
    %cst_183 = arith.constant dense<0.000000e+00> : vector<8xf32>
    %490 = vector.multi_reduction <add>, %489, %cst_183 [1] : vector<8x128xf32> to vector<8xf32>
    %491 = vector.shape_cast %490 : vector<8xf32> to vector<8x1xf32>
    %cst_184 = arith.constant 1.280000e+02 : f32
    %492 = vector.broadcast %cst_184 : f32 to vector<8x1xf32>
    %493 = arith.divf %491, %492 : vector<8x1xf32>
    %cst_185 = arith.constant 9.99999974E-6 : f32
    %494 = vector.broadcast %cst_185 : f32 to vector<8x1xf32>
    %495 = arith.addf %493, %494 : vector<8x1xf32>
    %496 = math.rsqrt %495 : vector<8x1xf32>
    %497 = vector.broadcast %496 : vector<8x1xf32> to vector<8x128xf32>
    %498 = arith.mulf %488, %497 : vector<8x128xf32>
    %499 = vector.broadcast %480 : vector<1x128xf32> to vector<8x128xf32>
    %500 = arith.mulf %498, %499 : vector<8x128xf32>
    %501 = vector.broadcast %482 : vector<1x128xf32> to vector<8x128xf32>
    %502 = arith.addf %500, %501 : vector<8x128xf32>
    %503 = arith.truncf %502 : vector<8x128xf32> to vector<8x128xbf16>
    %c1_186 = arith.constant 1 : index
    %c0_187 = arith.constant 0 : index
    %c0_188 = arith.constant 0 : index
    %504 = vector.load %arg9[%c1_186, %c0_187, %c0_188] : memref<4x128x128xbf16, #tpu.memory_space<vmem>>, vector<1x128x128xbf16>
    %505 = vector.shape_cast %504 : vector<1x128x128xbf16> to vector<128x128xbf16>
    %cst_189 = arith.constant dense<0.000000e+00> : vector<8x128xf32>
    %506 = tpu.matmul %503, %505, %cst_189 {dimension_numbers = #tpu.dot_dimension_numbers<[1], [0], [0], [1], [0, 0, 1, 1], [], []>} : vector<8x128xbf16>, vector<128x128xbf16>, vector<8x128xf32> -> vector<8x128xf32>
    %c1_190 = arith.constant 1 : index
    %c0_191 = arith.constant 0 : index
    %c0_192 = arith.constant 0 : index
    %507 = vector.load %arg10[%c1_190, %c0_191, %c0_192] : memref<4x1x128xf32, #tpu.memory_space<vmem>>, vector<1x1x128xf32>
    %508 = vector.shape_cast %507 : vector<1x1x128xf32> to vector<1x128xf32>
    %509 = vector.broadcast %508 : vector<1x128xf32> to vector<8x128xf32>
    %510 = arith.addf %506, %509 : vector<8x128xf32>
    %c1_193 = arith.constant 1 : index
    %c0_194 = arith.constant 0 : index
    %c0_195 = arith.constant 0 : index
    %511 = vector.load %arg11[%c1_193, %c0_194, %c0_195] : memref<4x128x256xbf16, #tpu.memory_space<vmem>>, vector<1x128x256xbf16>
    %512 = vector.shape_cast %511 : vector<1x128x256xbf16> to vector<128x256xbf16>
    %cst_196 = arith.constant dense<0.000000e+00> : vector<8x256xf32>
    %513 = tpu.matmul %4, %512, %cst_196 {dimension_numbers = #tpu.dot_dimension_numbers<[1], [0], [0], [1], [0, 0, 1, 1], [], []>} : vector<8x128xbf16>, vector<128x256xbf16>, vector<8x256xf32> -> vector<8x256xf32>
    %c1_197 = arith.constant 1 : index
    %c0_198 = arith.constant 0 : index
    %c0_199 = arith.constant 0 : index
    %514 = vector.load %arg12[%c1_197, %c0_198, %c0_199] : memref<4x1x256xf32, #tpu.memory_space<vmem>>, vector<1x1x256xf32>
    %515 = vector.shape_cast %514 : vector<1x1x256xf32> to vector<1x256xf32>
    %516 = vector.broadcast %515 : vector<1x256xf32> to vector<8x256xf32>
    %517 = arith.addf %513, %516 : vector<8x256xf32>
    %518 = vector.extract_strided_slice %517 {offsets = [0, 0], sizes = [8, 128], strides = [1, 1]} : vector<8x256xf32> to vector<8x128xf32>
    %519 = vector.extract_strided_slice %517 {offsets = [0, 128], sizes = [8, 128], strides = [1, 1]} : vector<8x256xf32> to vector<8x128xf32>
    %c1_200 = arith.constant 1 : index
    %c0_201 = arith.constant 0 : index
    %c0_202 = arith.constant 0 : index
    %520 = vector.load %arg13[%c1_200, %c0_201, %c0_202] : memref<4x128x128xbf16, #tpu.memory_space<vmem>>, vector<1x128x128xbf16>
    %521 = vector.shape_cast %520 : vector<1x128x128xbf16> to vector<128x128xbf16>
    %cst_203 = arith.constant 0.000000e+00 : f32
    %522 = vector.broadcast %cst_203 : f32 to vector<8x128xf32>
    %523 = vector.extract_strided_slice %510 {offsets = [0, 0], sizes = [8, 32], strides = [1, 1]} : vector<8x128xf32> to vector<8x32xf32>
    %524 = arith.truncf %523 : vector<8x32xf32> to vector<8x32xbf16>
    %525 = vector.extract_strided_slice %518 {offsets = [0, 0], sizes = [8, 32], strides = [1, 1]} : vector<8x128xf32> to vector<8x32xf32>
    %526 = arith.truncf %525 : vector<8x32xf32> to vector<8x32xbf16>
    %527 = vector.extract_strided_slice %519 {offsets = [0, 0], sizes = [8, 32], strides = [1, 1]} : vector<8x128xf32> to vector<8x32xf32>
    %528 = arith.truncf %527 : vector<8x32xf32> to vector<8x32xbf16>
    %cst_204 = arith.constant dense<0.000000e+00> : vector<8x8xf32>
    %529 = tpu.matmul %524, %526, %cst_204 {dimension_numbers = #tpu.dot_dimension_numbers<[1], [1], [0], [0], [0, 0, 1, 0], [], []>} : vector<8x32xbf16>, vector<8x32xbf16>, vector<8x8xf32> -> vector<8x8xf32>
    %cst_205 = arith.constant 0.176776692 : f32
    %530 = vector.broadcast %cst_205 : f32 to vector<8x8xf32>
    %531 = arith.mulf %529, %530 : vector<8x8xf32>
    %cst_206 = arith.constant dense<0xFF800000> : vector<8xf32>
    %532 = vector.multi_reduction <maximumf>, %531, %cst_206 [1] : vector<8x8xf32> to vector<8xf32>
    %533 = vector.shape_cast %532 : vector<8xf32> to vector<8x1xf32>
    %534 = vector.broadcast %533 : vector<8x1xf32> to vector<8x8xf32>
    %535 = arith.subf %531, %534 : vector<8x8xf32>
    %536 = math.exp %535 : vector<8x8xf32>
    %cst_207 = arith.constant dense<0.000000e+00> : vector<8xf32>
    %537 = vector.multi_reduction <add>, %536, %cst_207 [1] : vector<8x8xf32> to vector<8xf32>
    %538 = vector.shape_cast %537 : vector<8xf32> to vector<8x1xf32>
    %539 = tpu.reciprocal %538 {approx = true} : vector<8x1xf32> -> vector<8x1xf32>
    %540 = vector.broadcast %539 : vector<8x1xf32> to vector<8x8xf32>
    %541 = arith.mulf %536, %540 : vector<8x8xf32>
    %542 = arith.truncf %541 : vector<8x8xf32> to vector<8x8xbf16>
    %cst_208 = arith.constant dense<0.000000e+00> : vector<8x32xf32>
    %543 = tpu.matmul %542, %528, %cst_208 {dimension_numbers = #tpu.dot_dimension_numbers<[1], [0], [0], [1], [0, 0, 1, 1], [], []>} : vector<8x8xbf16>, vector<8x32xbf16>, vector<8x32xf32> -> vector<8x32xf32>
    %544 = arith.truncf %543 : vector<8x32xf32> to vector<8x32xbf16>
    %545 = vector.extract_strided_slice %521 {offsets = [0, 0], sizes = [32, 128], strides = [1, 1]} : vector<128x128xbf16> to vector<32x128xbf16>
    %cst_209 = arith.constant dense<0.000000e+00> : vector<8x128xf32>
    %546 = tpu.matmul %544, %545, %cst_209 {dimension_numbers = #tpu.dot_dimension_numbers<[1], [0], [0], [1], [0, 0, 1, 1], [], []>} : vector<8x32xbf16>, vector<32x128xbf16>, vector<8x128xf32> -> vector<8x128xf32>
    %547 = arith.addf %522, %546 : vector<8x128xf32>
    %548 = vector.extract_strided_slice %510 {offsets = [0, 32], sizes = [8, 32], strides = [1, 1]} : vector<8x128xf32> to vector<8x32xf32>
    %549 = arith.truncf %548 : vector<8x32xf32> to vector<8x32xbf16>
    %550 = vector.extract_strided_slice %518 {offsets = [0, 32], sizes = [8, 32], strides = [1, 1]} : vector<8x128xf32> to vector<8x32xf32>
    %551 = arith.truncf %550 : vector<8x32xf32> to vector<8x32xbf16>
    %552 = vector.extract_strided_slice %519 {offsets = [0, 32], sizes = [8, 32], strides = [1, 1]} : vector<8x128xf32> to vector<8x32xf32>
    %553 = arith.truncf %552 : vector<8x32xf32> to vector<8x32xbf16>
    %cst_210 = arith.constant dense<0.000000e+00> : vector<8x8xf32>
    %554 = tpu.matmul %549, %551, %cst_210 {dimension_numbers = #tpu.dot_dimension_numbers<[1], [1], [0], [0], [0, 0, 1, 0], [], []>} : vector<8x32xbf16>, vector<8x32xbf16>, vector<8x8xf32> -> vector<8x8xf32>
    %cst_211 = arith.constant 0.176776692 : f32
    %555 = vector.broadcast %cst_211 : f32 to vector<8x8xf32>
    %556 = arith.mulf %554, %555 : vector<8x8xf32>
    %cst_212 = arith.constant dense<0xFF800000> : vector<8xf32>
    %557 = vector.multi_reduction <maximumf>, %556, %cst_212 [1] : vector<8x8xf32> to vector<8xf32>
    %558 = vector.shape_cast %557 : vector<8xf32> to vector<8x1xf32>
    %559 = vector.broadcast %558 : vector<8x1xf32> to vector<8x8xf32>
    %560 = arith.subf %556, %559 : vector<8x8xf32>
    %561 = math.exp %560 : vector<8x8xf32>
    %cst_213 = arith.constant dense<0.000000e+00> : vector<8xf32>
    %562 = vector.multi_reduction <add>, %561, %cst_213 [1] : vector<8x8xf32> to vector<8xf32>
    %563 = vector.shape_cast %562 : vector<8xf32> to vector<8x1xf32>
    %564 = tpu.reciprocal %563 {approx = true} : vector<8x1xf32> -> vector<8x1xf32>
    %565 = vector.broadcast %564 : vector<8x1xf32> to vector<8x8xf32>
    %566 = arith.mulf %561, %565 : vector<8x8xf32>
    %567 = arith.truncf %566 : vector<8x8xf32> to vector<8x8xbf16>
    %cst_214 = arith.constant dense<0.000000e+00> : vector<8x32xf32>
    %568 = tpu.matmul %567, %553, %cst_214 {dimension_numbers = #tpu.dot_dimension_numbers<[1], [0], [0], [1], [0, 0, 1, 1], [], []>} : vector<8x8xbf16>, vector<8x32xbf16>, vector<8x32xf32> -> vector<8x32xf32>
    %569 = arith.truncf %568 : vector<8x32xf32> to vector<8x32xbf16>
    %570 = vector.extract_strided_slice %521 {offsets = [32, 0], sizes = [32, 128], strides = [1, 1]} : vector<128x128xbf16> to vector<32x128xbf16>
    %cst_215 = arith.constant dense<0.000000e+00> : vector<8x128xf32>
    %571 = tpu.matmul %569, %570, %cst_215 {dimension_numbers = #tpu.dot_dimension_numbers<[1], [0], [0], [1], [0, 0, 1, 1], [], []>} : vector<8x32xbf16>, vector<32x128xbf16>, vector<8x128xf32> -> vector<8x128xf32>
    %572 = arith.addf %547, %571 : vector<8x128xf32>
    %573 = vector.extract_strided_slice %510 {offsets = [0, 64], sizes = [8, 32], strides = [1, 1]} : vector<8x128xf32> to vector<8x32xf32>
    %574 = arith.truncf %573 : vector<8x32xf32> to vector<8x32xbf16>
    %575 = vector.extract_strided_slice %518 {offsets = [0, 64], sizes = [8, 32], strides = [1, 1]} : vector<8x128xf32> to vector<8x32xf32>
    %576 = arith.truncf %575 : vector<8x32xf32> to vector<8x32xbf16>
    %577 = vector.extract_strided_slice %519 {offsets = [0, 64], sizes = [8, 32], strides = [1, 1]} : vector<8x128xf32> to vector<8x32xf32>
    %578 = arith.truncf %577 : vector<8x32xf32> to vector<8x32xbf16>
    %cst_216 = arith.constant dense<0.000000e+00> : vector<8x8xf32>
    %579 = tpu.matmul %574, %576, %cst_216 {dimension_numbers = #tpu.dot_dimension_numbers<[1], [1], [0], [0], [0, 0, 1, 0], [], []>} : vector<8x32xbf16>, vector<8x32xbf16>, vector<8x8xf32> -> vector<8x8xf32>
    %cst_217 = arith.constant 0.176776692 : f32
    %580 = vector.broadcast %cst_217 : f32 to vector<8x8xf32>
    %581 = arith.mulf %579, %580 : vector<8x8xf32>
    %cst_218 = arith.constant dense<0xFF800000> : vector<8xf32>
    %582 = vector.multi_reduction <maximumf>, %581, %cst_218 [1] : vector<8x8xf32> to vector<8xf32>
    %583 = vector.shape_cast %582 : vector<8xf32> to vector<8x1xf32>
    %584 = vector.broadcast %583 : vector<8x1xf32> to vector<8x8xf32>
    %585 = arith.subf %581, %584 : vector<8x8xf32>
    %586 = math.exp %585 : vector<8x8xf32>
    %cst_219 = arith.constant dense<0.000000e+00> : vector<8xf32>
    %587 = vector.multi_reduction <add>, %586, %cst_219 [1] : vector<8x8xf32> to vector<8xf32>
    %588 = vector.shape_cast %587 : vector<8xf32> to vector<8x1xf32>
    %589 = tpu.reciprocal %588 {approx = true} : vector<8x1xf32> -> vector<8x1xf32>
    %590 = vector.broadcast %589 : vector<8x1xf32> to vector<8x8xf32>
    %591 = arith.mulf %586, %590 : vector<8x8xf32>
    %592 = arith.truncf %591 : vector<8x8xf32> to vector<8x8xbf16>
    %cst_220 = arith.constant dense<0.000000e+00> : vector<8x32xf32>
    %593 = tpu.matmul %592, %578, %cst_220 {dimension_numbers = #tpu.dot_dimension_numbers<[1], [0], [0], [1], [0, 0, 1, 1], [], []>} : vector<8x8xbf16>, vector<8x32xbf16>, vector<8x32xf32> -> vector<8x32xf32>
    %594 = arith.truncf %593 : vector<8x32xf32> to vector<8x32xbf16>
    %595 = vector.extract_strided_slice %521 {offsets = [64, 0], sizes = [32, 128], strides = [1, 1]} : vector<128x128xbf16> to vector<32x128xbf16>
    %cst_221 = arith.constant dense<0.000000e+00> : vector<8x128xf32>
    %596 = tpu.matmul %594, %595, %cst_221 {dimension_numbers = #tpu.dot_dimension_numbers<[1], [0], [0], [1], [0, 0, 1, 1], [], []>} : vector<8x32xbf16>, vector<32x128xbf16>, vector<8x128xf32> -> vector<8x128xf32>
    %597 = arith.addf %572, %596 : vector<8x128xf32>
    %598 = vector.extract_strided_slice %510 {offsets = [0, 96], sizes = [8, 32], strides = [1, 1]} : vector<8x128xf32> to vector<8x32xf32>
    %599 = arith.truncf %598 : vector<8x32xf32> to vector<8x32xbf16>
    %600 = vector.extract_strided_slice %518 {offsets = [0, 96], sizes = [8, 32], strides = [1, 1]} : vector<8x128xf32> to vector<8x32xf32>
    %601 = arith.truncf %600 : vector<8x32xf32> to vector<8x32xbf16>
    %602 = vector.extract_strided_slice %519 {offsets = [0, 96], sizes = [8, 32], strides = [1, 1]} : vector<8x128xf32> to vector<8x32xf32>
    %603 = arith.truncf %602 : vector<8x32xf32> to vector<8x32xbf16>
    %cst_222 = arith.constant dense<0.000000e+00> : vector<8x8xf32>
    %604 = tpu.matmul %599, %601, %cst_222 {dimension_numbers = #tpu.dot_dimension_numbers<[1], [1], [0], [0], [0, 0, 1, 0], [], []>} : vector<8x32xbf16>, vector<8x32xbf16>, vector<8x8xf32> -> vector<8x8xf32>
    %cst_223 = arith.constant 0.176776692 : f32
    %605 = vector.broadcast %cst_223 : f32 to vector<8x8xf32>
    %606 = arith.mulf %604, %605 : vector<8x8xf32>
    %cst_224 = arith.constant dense<0xFF800000> : vector<8xf32>
    %607 = vector.multi_reduction <maximumf>, %606, %cst_224 [1] : vector<8x8xf32> to vector<8xf32>
    %608 = vector.shape_cast %607 : vector<8xf32> to vector<8x1xf32>
    %609 = vector.broadcast %608 : vector<8x1xf32> to vector<8x8xf32>
    %610 = arith.subf %606, %609 : vector<8x8xf32>
    %611 = math.exp %610 : vector<8x8xf32>
    %cst_225 = arith.constant dense<0.000000e+00> : vector<8xf32>
    %612 = vector.multi_reduction <add>, %611, %cst_225 [1] : vector<8x8xf32> to vector<8xf32>
    %613 = vector.shape_cast %612 : vector<8xf32> to vector<8x1xf32>
    %614 = tpu.reciprocal %613 {approx = true} : vector<8x1xf32> -> vector<8x1xf32>
    %615 = vector.broadcast %614 : vector<8x1xf32> to vector<8x8xf32>
    %616 = arith.mulf %611, %615 : vector<8x8xf32>
    %617 = arith.truncf %616 : vector<8x8xf32> to vector<8x8xbf16>
    %cst_226 = arith.constant dense<0.000000e+00> : vector<8x32xf32>
    %618 = tpu.matmul %617, %603, %cst_226 {dimension_numbers = #tpu.dot_dimension_numbers<[1], [0], [0], [1], [0, 0, 1, 1], [], []>} : vector<8x8xbf16>, vector<8x32xbf16>, vector<8x32xf32> -> vector<8x32xf32>
    %619 = arith.truncf %618 : vector<8x32xf32> to vector<8x32xbf16>
    %620 = vector.extract_strided_slice %521 {offsets = [96, 0], sizes = [32, 128], strides = [1, 1]} : vector<128x128xbf16> to vector<32x128xbf16>
    %cst_227 = arith.constant dense<0.000000e+00> : vector<8x128xf32>
    %621 = tpu.matmul %619, %620, %cst_227 {dimension_numbers = #tpu.dot_dimension_numbers<[1], [0], [0], [1], [0, 0, 1, 1], [], []>} : vector<8x32xbf16>, vector<32x128xbf16>, vector<8x128xf32> -> vector<8x128xf32>
    %622 = arith.addf %597, %621 : vector<8x128xf32>
    %c1_228 = arith.constant 1 : index
    %c0_229 = arith.constant 0 : index
    %c0_230 = arith.constant 0 : index
    %623 = vector.load %arg14[%c1_228, %c0_229, %c0_230] : memref<4x1x128xf32, #tpu.memory_space<vmem>>, vector<1x1x128xf32>
    %624 = vector.shape_cast %623 : vector<1x1x128xf32> to vector<1x128xf32>
    %625 = vector.broadcast %624 : vector<1x128xf32> to vector<8x128xf32>
    %626 = arith.addf %622, %625 : vector<8x128xf32>
    %627 = arith.addf %502, %626 : vector<8x128xf32>
    %c1_231 = arith.constant 1 : index
    %c0_232 = arith.constant 0 : index
    %c0_233 = arith.constant 0 : index
    %628 = vector.load %arg15[%c1_231, %c0_232, %c0_233] : memref<4x1x128xf32, #tpu.memory_space<vmem>>, vector<1x1x128xf32>
    %629 = vector.shape_cast %628 : vector<1x1x128xf32> to vector<1x128xf32>
    %c1_234 = arith.constant 1 : index
    %c0_235 = arith.constant 0 : index
    %c0_236 = arith.constant 0 : index
    %630 = vector.load %arg16[%c1_234, %c0_235, %c0_236] : memref<4x1x128xf32, #tpu.memory_space<vmem>>, vector<1x1x128xf32>
    %631 = vector.shape_cast %630 : vector<1x1x128xf32> to vector<1x128xf32>
    %cst_237 = arith.constant dense<0.000000e+00> : vector<8xf32>
    %632 = vector.multi_reduction <add>, %627, %cst_237 [1] : vector<8x128xf32> to vector<8xf32>
    %633 = vector.shape_cast %632 : vector<8xf32> to vector<8x1xf32>
    %cst_238 = arith.constant 1.280000e+02 : f32
    %634 = vector.broadcast %cst_238 : f32 to vector<8x1xf32>
    %635 = arith.divf %633, %634 : vector<8x1xf32>
    %636 = vector.broadcast %635 : vector<8x1xf32> to vector<8x128xf32>
    %637 = arith.subf %627, %636 : vector<8x128xf32>
    %638 = arith.mulf %637, %637 : vector<8x128xf32>
    %cst_239 = arith.constant dense<0.000000e+00> : vector<8xf32>
    %639 = vector.multi_reduction <add>, %638, %cst_239 [1] : vector<8x128xf32> to vector<8xf32>
    %640 = vector.shape_cast %639 : vector<8xf32> to vector<8x1xf32>
    %cst_240 = arith.constant 1.280000e+02 : f32
    %641 = vector.broadcast %cst_240 : f32 to vector<8x1xf32>
    %642 = arith.divf %640, %641 : vector<8x1xf32>
    %cst_241 = arith.constant 9.99999974E-6 : f32
    %643 = vector.broadcast %cst_241 : f32 to vector<8x1xf32>
    %644 = arith.addf %642, %643 : vector<8x1xf32>
    %645 = math.rsqrt %644 : vector<8x1xf32>
    %646 = vector.broadcast %645 : vector<8x1xf32> to vector<8x128xf32>
    %647 = arith.mulf %637, %646 : vector<8x128xf32>
    %648 = vector.broadcast %629 : vector<1x128xf32> to vector<8x128xf32>
    %649 = arith.mulf %647, %648 : vector<8x128xf32>
    %650 = vector.broadcast %631 : vector<1x128xf32> to vector<8x128xf32>
    %651 = arith.addf %649, %650 : vector<8x128xf32>
    %652 = arith.truncf %651 : vector<8x128xf32> to vector<8x128xbf16>
    %c1_242 = arith.constant 1 : index
    %c0_243 = arith.constant 0 : index
    %c0_244 = arith.constant 0 : index
    %653 = vector.load %arg17[%c1_242, %c0_243, %c0_244] : memref<4x128x512xbf16, #tpu.memory_space<vmem>>, vector<1x128x512xbf16>
    %654 = vector.shape_cast %653 : vector<1x128x512xbf16> to vector<128x512xbf16>
    %cst_245 = arith.constant dense<0.000000e+00> : vector<8x512xf32>
    %655 = tpu.matmul %652, %654, %cst_245 {dimension_numbers = #tpu.dot_dimension_numbers<[1], [0], [0], [1], [0, 0, 1, 1], [], []>} : vector<8x128xbf16>, vector<128x512xbf16>, vector<8x512xf32> -> vector<8x512xf32>
    %c1_246 = arith.constant 1 : index
    %c0_247 = arith.constant 0 : index
    %c0_248 = arith.constant 0 : index
    %656 = vector.load %arg18[%c1_246, %c0_247, %c0_248] : memref<4x1x512xf32, #tpu.memory_space<vmem>>, vector<1x1x512xf32>
    %657 = vector.shape_cast %656 : vector<1x1x512xf32> to vector<1x512xf32>
    %658 = vector.broadcast %657 : vector<1x512xf32> to vector<8x512xf32>
    %659 = arith.addf %655, %658 : vector<8x512xf32>
    %cst_249 = arith.constant 0.000000e+00 : f32
    %660 = vector.broadcast %cst_249 : f32 to vector<8x512xf32>
    %661 = arith.maximumf %659, %660 : vector<8x512xf32>
    %662 = arith.truncf %661 : vector<8x512xf32> to vector<8x512xbf16>
    %c1_250 = arith.constant 1 : index
    %c0_251 = arith.constant 0 : index
    %c0_252 = arith.constant 0 : index
    %663 = vector.load %arg19[%c1_250, %c0_251, %c0_252] : memref<4x512x128xbf16, #tpu.memory_space<vmem>>, vector<1x512x128xbf16>
    %664 = vector.shape_cast %663 : vector<1x512x128xbf16> to vector<512x128xbf16>
    %cst_253 = arith.constant dense<0.000000e+00> : vector<8x128xf32>
    %665 = tpu.matmul %662, %664, %cst_253 {dimension_numbers = #tpu.dot_dimension_numbers<[1], [0], [0], [1], [0, 0, 1, 1], [], []>} : vector<8x512xbf16>, vector<512x128xbf16>, vector<8x128xf32> -> vector<8x128xf32>
    %c1_254 = arith.constant 1 : index
    %c0_255 = arith.constant 0 : index
    %c0_256 = arith.constant 0 : index
    %666 = vector.load %arg20[%c1_254, %c0_255, %c0_256] : memref<4x1x128xf32, #tpu.memory_space<vmem>>, vector<1x1x128xf32>
    %667 = vector.shape_cast %666 : vector<1x1x128xf32> to vector<1x128xf32>
    %668 = vector.broadcast %667 : vector<1x128xf32> to vector<8x128xf32>
    %669 = arith.addf %665, %668 : vector<8x128xf32>
    %670 = arith.addf %651, %669 : vector<8x128xf32>
    %c1_257 = arith.constant 1 : index
    %c0_258 = arith.constant 0 : index
    %c0_259 = arith.constant 0 : index
    %671 = vector.load %arg21[%c1_257, %c0_258, %c0_259] : memref<4x1x128xf32, #tpu.memory_space<vmem>>, vector<1x1x128xf32>
    %672 = vector.shape_cast %671 : vector<1x1x128xf32> to vector<1x128xf32>
    %c1_260 = arith.constant 1 : index
    %c0_261 = arith.constant 0 : index
    %c0_262 = arith.constant 0 : index
    %673 = vector.load %arg22[%c1_260, %c0_261, %c0_262] : memref<4x1x128xf32, #tpu.memory_space<vmem>>, vector<1x1x128xf32>
    %674 = vector.shape_cast %673 : vector<1x1x128xf32> to vector<1x128xf32>
    %cst_263 = arith.constant dense<0.000000e+00> : vector<8xf32>
    %675 = vector.multi_reduction <add>, %670, %cst_263 [1] : vector<8x128xf32> to vector<8xf32>
    %676 = vector.shape_cast %675 : vector<8xf32> to vector<8x1xf32>
    %cst_264 = arith.constant 1.280000e+02 : f32
    %677 = vector.broadcast %cst_264 : f32 to vector<8x1xf32>
    %678 = arith.divf %676, %677 : vector<8x1xf32>
    %679 = vector.broadcast %678 : vector<8x1xf32> to vector<8x128xf32>
    %680 = arith.subf %670, %679 : vector<8x128xf32>
    %681 = arith.mulf %680, %680 : vector<8x128xf32>
    %cst_265 = arith.constant dense<0.000000e+00> : vector<8xf32>
    %682 = vector.multi_reduction <add>, %681, %cst_265 [1] : vector<8x128xf32> to vector<8xf32>
    %683 = vector.shape_cast %682 : vector<8xf32> to vector<8x1xf32>
    %cst_266 = arith.constant 1.280000e+02 : f32
    %684 = vector.broadcast %cst_266 : f32 to vector<8x1xf32>
    %685 = arith.divf %683, %684 : vector<8x1xf32>
    %cst_267 = arith.constant 9.99999974E-6 : f32
    %686 = vector.broadcast %cst_267 : f32 to vector<8x1xf32>
    %687 = arith.addf %685, %686 : vector<8x1xf32>
    %688 = math.rsqrt %687 : vector<8x1xf32>
    %689 = vector.broadcast %688 : vector<8x1xf32> to vector<8x128xf32>
    %690 = arith.mulf %680, %689 : vector<8x128xf32>
    %691 = vector.broadcast %672 : vector<1x128xf32> to vector<8x128xf32>
    %692 = arith.mulf %690, %691 : vector<8x128xf32>
    %693 = vector.broadcast %674 : vector<1x128xf32> to vector<8x128xf32>
    %694 = arith.addf %692, %693 : vector<8x128xf32>
    %695 = arith.truncf %694 : vector<8x128xf32> to vector<8x128xbf16>
    %c2 = arith.constant 2 : index
    %c0_268 = arith.constant 0 : index
    %c0_269 = arith.constant 0 : index
    %696 = vector.load %arg3[%c2, %c0_268, %c0_269] : memref<4x128x384xbf16, #tpu.memory_space<vmem>>, vector<1x128x384xbf16>
    %697 = vector.shape_cast %696 : vector<1x128x384xbf16> to vector<128x384xbf16>
    %cst_270 = arith.constant dense<0.000000e+00> : vector<8x384xf32>
    %698 = tpu.matmul %695, %697, %cst_270 {dimension_numbers = #tpu.dot_dimension_numbers<[1], [0], [0], [1], [0, 0, 1, 1], [], []>} : vector<8x128xbf16>, vector<128x384xbf16>, vector<8x384xf32> -> vector<8x384xf32>
    %c2_271 = arith.constant 2 : index
    %c0_272 = arith.constant 0 : index
    %c0_273 = arith.constant 0 : index
    %699 = vector.load %arg4[%c2_271, %c0_272, %c0_273] : memref<4x1x384xf32, #tpu.memory_space<vmem>>, vector<1x1x384xf32>
    %700 = vector.shape_cast %699 : vector<1x1x384xf32> to vector<1x384xf32>
    %701 = vector.broadcast %700 : vector<1x384xf32> to vector<8x384xf32>
    %702 = arith.addf %698, %701 : vector<8x384xf32>
    %703 = vector.extract_strided_slice %702 {offsets = [0, 0], sizes = [8, 128], strides = [1, 1]} : vector<8x384xf32> to vector<8x128xf32>
    %704 = vector.extract_strided_slice %702 {offsets = [0, 128], sizes = [8, 128], strides = [1, 1]} : vector<8x384xf32> to vector<8x128xf32>
    %705 = vector.extract_strided_slice %702 {offsets = [0, 256], sizes = [8, 128], strides = [1, 1]} : vector<8x384xf32> to vector<8x128xf32>
    %c2_274 = arith.constant 2 : index
    %c0_275 = arith.constant 0 : index
    %c0_276 = arith.constant 0 : index
    %706 = vector.load %arg5[%c2_274, %c0_275, %c0_276] : memref<4x128x128xbf16, #tpu.memory_space<vmem>>, vector<1x128x128xbf16>
    %707 = vector.shape_cast %706 : vector<1x128x128xbf16> to vector<128x128xbf16>
    %708 = tpu.iota {dimensions = array<i32: 0>} : vector<8x8xi32>
    %709 = tpu.iota {dimensions = array<i32: 1>} : vector<8x8xi32>
    %710 = arith.cmpi sgt, %709, %708 : vector<8x8xi32>
    %cst_277 = arith.constant -1.000000e+30 : f32
    %cst_278 = arith.constant 0.000000e+00 : f32
    %711 = vector.broadcast %cst_277 : f32 to vector<8x8xf32>
    %712 = vector.broadcast %cst_278 : f32 to vector<8x8xf32>
    %713 = arith.select %710, %711, %712 : vector<8x8xi1>, vector<8x8xf32>
    %cst_279 = arith.constant 0.000000e+00 : f32
    %714 = vector.broadcast %cst_279 : f32 to vector<8x128xf32>
    %715 = vector.extract_strided_slice %703 {offsets = [0, 0], sizes = [8, 32], strides = [1, 1]} : vector<8x128xf32> to vector<8x32xf32>
    %716 = arith.truncf %715 : vector<8x32xf32> to vector<8x32xbf16>
    %717 = vector.extract_strided_slice %704 {offsets = [0, 0], sizes = [8, 32], strides = [1, 1]} : vector<8x128xf32> to vector<8x32xf32>
    %718 = arith.truncf %717 : vector<8x32xf32> to vector<8x32xbf16>
    %719 = vector.extract_strided_slice %705 {offsets = [0, 0], sizes = [8, 32], strides = [1, 1]} : vector<8x128xf32> to vector<8x32xf32>
    %720 = arith.truncf %719 : vector<8x32xf32> to vector<8x32xbf16>
    %cst_280 = arith.constant dense<0.000000e+00> : vector<8x8xf32>
    %721 = tpu.matmul %716, %718, %cst_280 {dimension_numbers = #tpu.dot_dimension_numbers<[1], [1], [0], [0], [0, 0, 1, 0], [], []>} : vector<8x32xbf16>, vector<8x32xbf16>, vector<8x8xf32> -> vector<8x8xf32>
    %cst_281 = arith.constant 0.176776692 : f32
    %722 = vector.broadcast %cst_281 : f32 to vector<8x8xf32>
    %723 = arith.mulf %721, %722 : vector<8x8xf32>
    %724 = arith.addf %723, %713 : vector<8x8xf32>
    %cst_282 = arith.constant dense<0xFF800000> : vector<8xf32>
    %725 = vector.multi_reduction <maximumf>, %724, %cst_282 [1] : vector<8x8xf32> to vector<8xf32>
    %726 = vector.shape_cast %725 : vector<8xf32> to vector<8x1xf32>
    %727 = vector.broadcast %726 : vector<8x1xf32> to vector<8x8xf32>
    %728 = arith.subf %724, %727 : vector<8x8xf32>
    %729 = math.exp %728 : vector<8x8xf32>
    %cst_283 = arith.constant dense<0.000000e+00> : vector<8xf32>
    %730 = vector.multi_reduction <add>, %729, %cst_283 [1] : vector<8x8xf32> to vector<8xf32>
    %731 = vector.shape_cast %730 : vector<8xf32> to vector<8x1xf32>
    %732 = tpu.reciprocal %731 {approx = true} : vector<8x1xf32> -> vector<8x1xf32>
    %733 = vector.broadcast %732 : vector<8x1xf32> to vector<8x8xf32>
    %734 = arith.mulf %729, %733 : vector<8x8xf32>
    %735 = arith.truncf %734 : vector<8x8xf32> to vector<8x8xbf16>
    %cst_284 = arith.constant dense<0.000000e+00> : vector<8x32xf32>
    %736 = tpu.matmul %735, %720, %cst_284 {dimension_numbers = #tpu.dot_dimension_numbers<[1], [0], [0], [1], [0, 0, 1, 1], [], []>} : vector<8x8xbf16>, vector<8x32xbf16>, vector<8x32xf32> -> vector<8x32xf32>
    %737 = arith.truncf %736 : vector<8x32xf32> to vector<8x32xbf16>
    %738 = vector.extract_strided_slice %707 {offsets = [0, 0], sizes = [32, 128], strides = [1, 1]} : vector<128x128xbf16> to vector<32x128xbf16>
    %cst_285 = arith.constant dense<0.000000e+00> : vector<8x128xf32>
    %739 = tpu.matmul %737, %738, %cst_285 {dimension_numbers = #tpu.dot_dimension_numbers<[1], [0], [0], [1], [0, 0, 1, 1], [], []>} : vector<8x32xbf16>, vector<32x128xbf16>, vector<8x128xf32> -> vector<8x128xf32>
    %740 = arith.addf %714, %739 : vector<8x128xf32>
    %741 = vector.extract_strided_slice %703 {offsets = [0, 32], sizes = [8, 32], strides = [1, 1]} : vector<8x128xf32> to vector<8x32xf32>
    %742 = arith.truncf %741 : vector<8x32xf32> to vector<8x32xbf16>
    %743 = vector.extract_strided_slice %704 {offsets = [0, 32], sizes = [8, 32], strides = [1, 1]} : vector<8x128xf32> to vector<8x32xf32>
    %744 = arith.truncf %743 : vector<8x32xf32> to vector<8x32xbf16>
    %745 = vector.extract_strided_slice %705 {offsets = [0, 32], sizes = [8, 32], strides = [1, 1]} : vector<8x128xf32> to vector<8x32xf32>
    %746 = arith.truncf %745 : vector<8x32xf32> to vector<8x32xbf16>
    %cst_286 = arith.constant dense<0.000000e+00> : vector<8x8xf32>
    %747 = tpu.matmul %742, %744, %cst_286 {dimension_numbers = #tpu.dot_dimension_numbers<[1], [1], [0], [0], [0, 0, 1, 0], [], []>} : vector<8x32xbf16>, vector<8x32xbf16>, vector<8x8xf32> -> vector<8x8xf32>
    %cst_287 = arith.constant 0.176776692 : f32
    %748 = vector.broadcast %cst_287 : f32 to vector<8x8xf32>
    %749 = arith.mulf %747, %748 : vector<8x8xf32>
    %750 = arith.addf %749, %713 : vector<8x8xf32>
    %cst_288 = arith.constant dense<0xFF800000> : vector<8xf32>
    %751 = vector.multi_reduction <maximumf>, %750, %cst_288 [1] : vector<8x8xf32> to vector<8xf32>
    %752 = vector.shape_cast %751 : vector<8xf32> to vector<8x1xf32>
    %753 = vector.broadcast %752 : vector<8x1xf32> to vector<8x8xf32>
    %754 = arith.subf %750, %753 : vector<8x8xf32>
    %755 = math.exp %754 : vector<8x8xf32>
    %cst_289 = arith.constant dense<0.000000e+00> : vector<8xf32>
    %756 = vector.multi_reduction <add>, %755, %cst_289 [1] : vector<8x8xf32> to vector<8xf32>
    %757 = vector.shape_cast %756 : vector<8xf32> to vector<8x1xf32>
    %758 = tpu.reciprocal %757 {approx = true} : vector<8x1xf32> -> vector<8x1xf32>
    %759 = vector.broadcast %758 : vector<8x1xf32> to vector<8x8xf32>
    %760 = arith.mulf %755, %759 : vector<8x8xf32>
    %761 = arith.truncf %760 : vector<8x8xf32> to vector<8x8xbf16>
    %cst_290 = arith.constant dense<0.000000e+00> : vector<8x32xf32>
    %762 = tpu.matmul %761, %746, %cst_290 {dimension_numbers = #tpu.dot_dimension_numbers<[1], [0], [0], [1], [0, 0, 1, 1], [], []>} : vector<8x8xbf16>, vector<8x32xbf16>, vector<8x32xf32> -> vector<8x32xf32>
    %763 = arith.truncf %762 : vector<8x32xf32> to vector<8x32xbf16>
    %764 = vector.extract_strided_slice %707 {offsets = [32, 0], sizes = [32, 128], strides = [1, 1]} : vector<128x128xbf16> to vector<32x128xbf16>
    %cst_291 = arith.constant dense<0.000000e+00> : vector<8x128xf32>
    %765 = tpu.matmul %763, %764, %cst_291 {dimension_numbers = #tpu.dot_dimension_numbers<[1], [0], [0], [1], [0, 0, 1, 1], [], []>} : vector<8x32xbf16>, vector<32x128xbf16>, vector<8x128xf32> -> vector<8x128xf32>
    %766 = arith.addf %740, %765 : vector<8x128xf32>
    %767 = vector.extract_strided_slice %703 {offsets = [0, 64], sizes = [8, 32], strides = [1, 1]} : vector<8x128xf32> to vector<8x32xf32>
    %768 = arith.truncf %767 : vector<8x32xf32> to vector<8x32xbf16>
    %769 = vector.extract_strided_slice %704 {offsets = [0, 64], sizes = [8, 32], strides = [1, 1]} : vector<8x128xf32> to vector<8x32xf32>
    %770 = arith.truncf %769 : vector<8x32xf32> to vector<8x32xbf16>
    %771 = vector.extract_strided_slice %705 {offsets = [0, 64], sizes = [8, 32], strides = [1, 1]} : vector<8x128xf32> to vector<8x32xf32>
    %772 = arith.truncf %771 : vector<8x32xf32> to vector<8x32xbf16>
    %cst_292 = arith.constant dense<0.000000e+00> : vector<8x8xf32>
    %773 = tpu.matmul %768, %770, %cst_292 {dimension_numbers = #tpu.dot_dimension_numbers<[1], [1], [0], [0], [0, 0, 1, 0], [], []>} : vector<8x32xbf16>, vector<8x32xbf16>, vector<8x8xf32> -> vector<8x8xf32>
    %cst_293 = arith.constant 0.176776692 : f32
    %774 = vector.broadcast %cst_293 : f32 to vector<8x8xf32>
    %775 = arith.mulf %773, %774 : vector<8x8xf32>
    %776 = arith.addf %775, %713 : vector<8x8xf32>
    %cst_294 = arith.constant dense<0xFF800000> : vector<8xf32>
    %777 = vector.multi_reduction <maximumf>, %776, %cst_294 [1] : vector<8x8xf32> to vector<8xf32>
    %778 = vector.shape_cast %777 : vector<8xf32> to vector<8x1xf32>
    %779 = vector.broadcast %778 : vector<8x1xf32> to vector<8x8xf32>
    %780 = arith.subf %776, %779 : vector<8x8xf32>
    %781 = math.exp %780 : vector<8x8xf32>
    %cst_295 = arith.constant dense<0.000000e+00> : vector<8xf32>
    %782 = vector.multi_reduction <add>, %781, %cst_295 [1] : vector<8x8xf32> to vector<8xf32>
    %783 = vector.shape_cast %782 : vector<8xf32> to vector<8x1xf32>
    %784 = tpu.reciprocal %783 {approx = true} : vector<8x1xf32> -> vector<8x1xf32>
    %785 = vector.broadcast %784 : vector<8x1xf32> to vector<8x8xf32>
    %786 = arith.mulf %781, %785 : vector<8x8xf32>
    %787 = arith.truncf %786 : vector<8x8xf32> to vector<8x8xbf16>
    %cst_296 = arith.constant dense<0.000000e+00> : vector<8x32xf32>
    %788 = tpu.matmul %787, %772, %cst_296 {dimension_numbers = #tpu.dot_dimension_numbers<[1], [0], [0], [1], [0, 0, 1, 1], [], []>} : vector<8x8xbf16>, vector<8x32xbf16>, vector<8x32xf32> -> vector<8x32xf32>
    %789 = arith.truncf %788 : vector<8x32xf32> to vector<8x32xbf16>
    %790 = vector.extract_strided_slice %707 {offsets = [64, 0], sizes = [32, 128], strides = [1, 1]} : vector<128x128xbf16> to vector<32x128xbf16>
    %cst_297 = arith.constant dense<0.000000e+00> : vector<8x128xf32>
    %791 = tpu.matmul %789, %790, %cst_297 {dimension_numbers = #tpu.dot_dimension_numbers<[1], [0], [0], [1], [0, 0, 1, 1], [], []>} : vector<8x32xbf16>, vector<32x128xbf16>, vector<8x128xf32> -> vector<8x128xf32>
    %792 = arith.addf %766, %791 : vector<8x128xf32>
    %793 = vector.extract_strided_slice %703 {offsets = [0, 96], sizes = [8, 32], strides = [1, 1]} : vector<8x128xf32> to vector<8x32xf32>
    %794 = arith.truncf %793 : vector<8x32xf32> to vector<8x32xbf16>
    %795 = vector.extract_strided_slice %704 {offsets = [0, 96], sizes = [8, 32], strides = [1, 1]} : vector<8x128xf32> to vector<8x32xf32>
    %796 = arith.truncf %795 : vector<8x32xf32> to vector<8x32xbf16>
    %797 = vector.extract_strided_slice %705 {offsets = [0, 96], sizes = [8, 32], strides = [1, 1]} : vector<8x128xf32> to vector<8x32xf32>
    %798 = arith.truncf %797 : vector<8x32xf32> to vector<8x32xbf16>
    %cst_298 = arith.constant dense<0.000000e+00> : vector<8x8xf32>
    %799 = tpu.matmul %794, %796, %cst_298 {dimension_numbers = #tpu.dot_dimension_numbers<[1], [1], [0], [0], [0, 0, 1, 0], [], []>} : vector<8x32xbf16>, vector<8x32xbf16>, vector<8x8xf32> -> vector<8x8xf32>
    %cst_299 = arith.constant 0.176776692 : f32
    %800 = vector.broadcast %cst_299 : f32 to vector<8x8xf32>
    %801 = arith.mulf %799, %800 : vector<8x8xf32>
    %802 = arith.addf %801, %713 : vector<8x8xf32>
    %cst_300 = arith.constant dense<0xFF800000> : vector<8xf32>
    %803 = vector.multi_reduction <maximumf>, %802, %cst_300 [1] : vector<8x8xf32> to vector<8xf32>
    %804 = vector.shape_cast %803 : vector<8xf32> to vector<8x1xf32>
    %805 = vector.broadcast %804 : vector<8x1xf32> to vector<8x8xf32>
    %806 = arith.subf %802, %805 : vector<8x8xf32>
    %807 = math.exp %806 : vector<8x8xf32>
    %cst_301 = arith.constant dense<0.000000e+00> : vector<8xf32>
    %808 = vector.multi_reduction <add>, %807, %cst_301 [1] : vector<8x8xf32> to vector<8xf32>
    %809 = vector.shape_cast %808 : vector<8xf32> to vector<8x1xf32>
    %810 = tpu.reciprocal %809 {approx = true} : vector<8x1xf32> -> vector<8x1xf32>
    %811 = vector.broadcast %810 : vector<8x1xf32> to vector<8x8xf32>
    %812 = arith.mulf %807, %811 : vector<8x8xf32>
    %813 = arith.truncf %812 : vector<8x8xf32> to vector<8x8xbf16>
    %cst_302 = arith.constant dense<0.000000e+00> : vector<8x32xf32>
    %814 = tpu.matmul %813, %798, %cst_302 {dimension_numbers = #tpu.dot_dimension_numbers<[1], [0], [0], [1], [0, 0, 1, 1], [], []>} : vector<8x8xbf16>, vector<8x32xbf16>, vector<8x32xf32> -> vector<8x32xf32>
    %815 = arith.truncf %814 : vector<8x32xf32> to vector<8x32xbf16>
    %816 = vector.extract_strided_slice %707 {offsets = [96, 0], sizes = [32, 128], strides = [1, 1]} : vector<128x128xbf16> to vector<32x128xbf16>
    %cst_303 = arith.constant dense<0.000000e+00> : vector<8x128xf32>
    %817 = tpu.matmul %815, %816, %cst_303 {dimension_numbers = #tpu.dot_dimension_numbers<[1], [0], [0], [1], [0, 0, 1, 1], [], []>} : vector<8x32xbf16>, vector<32x128xbf16>, vector<8x128xf32> -> vector<8x128xf32>
    %818 = arith.addf %792, %817 : vector<8x128xf32>
    %c2_304 = arith.constant 2 : index
    %c0_305 = arith.constant 0 : index
    %c0_306 = arith.constant 0 : index
    %819 = vector.load %arg6[%c2_304, %c0_305, %c0_306] : memref<4x1x128xf32, #tpu.memory_space<vmem>>, vector<1x1x128xf32>
    %820 = vector.shape_cast %819 : vector<1x1x128xf32> to vector<1x128xf32>
    %821 = vector.broadcast %820 : vector<1x128xf32> to vector<8x128xf32>
    %822 = arith.addf %818, %821 : vector<8x128xf32>
    %823 = arith.addf %694, %822 : vector<8x128xf32>
    %c2_307 = arith.constant 2 : index
    %c0_308 = arith.constant 0 : index
    %c0_309 = arith.constant 0 : index
    %824 = vector.load %arg7[%c2_307, %c0_308, %c0_309] : memref<4x1x128xf32, #tpu.memory_space<vmem>>, vector<1x1x128xf32>
    %825 = vector.shape_cast %824 : vector<1x1x128xf32> to vector<1x128xf32>
    %c2_310 = arith.constant 2 : index
    %c0_311 = arith.constant 0 : index
    %c0_312 = arith.constant 0 : index
    %826 = vector.load %arg8[%c2_310, %c0_311, %c0_312] : memref<4x1x128xf32, #tpu.memory_space<vmem>>, vector<1x1x128xf32>
    %827 = vector.shape_cast %826 : vector<1x1x128xf32> to vector<1x128xf32>
    %cst_313 = arith.constant dense<0.000000e+00> : vector<8xf32>
    %828 = vector.multi_reduction <add>, %823, %cst_313 [1] : vector<8x128xf32> to vector<8xf32>
    %829 = vector.shape_cast %828 : vector<8xf32> to vector<8x1xf32>
    %cst_314 = arith.constant 1.280000e+02 : f32
    %830 = vector.broadcast %cst_314 : f32 to vector<8x1xf32>
    %831 = arith.divf %829, %830 : vector<8x1xf32>
    %832 = vector.broadcast %831 : vector<8x1xf32> to vector<8x128xf32>
    %833 = arith.subf %823, %832 : vector<8x128xf32>
    %834 = arith.mulf %833, %833 : vector<8x128xf32>
    %cst_315 = arith.constant dense<0.000000e+00> : vector<8xf32>
    %835 = vector.multi_reduction <add>, %834, %cst_315 [1] : vector<8x128xf32> to vector<8xf32>
    %836 = vector.shape_cast %835 : vector<8xf32> to vector<8x1xf32>
    %cst_316 = arith.constant 1.280000e+02 : f32
    %837 = vector.broadcast %cst_316 : f32 to vector<8x1xf32>
    %838 = arith.divf %836, %837 : vector<8x1xf32>
    %cst_317 = arith.constant 9.99999974E-6 : f32
    %839 = vector.broadcast %cst_317 : f32 to vector<8x1xf32>
    %840 = arith.addf %838, %839 : vector<8x1xf32>
    %841 = math.rsqrt %840 : vector<8x1xf32>
    %842 = vector.broadcast %841 : vector<8x1xf32> to vector<8x128xf32>
    %843 = arith.mulf %833, %842 : vector<8x128xf32>
    %844 = vector.broadcast %825 : vector<1x128xf32> to vector<8x128xf32>
    %845 = arith.mulf %843, %844 : vector<8x128xf32>
    %846 = vector.broadcast %827 : vector<1x128xf32> to vector<8x128xf32>
    %847 = arith.addf %845, %846 : vector<8x128xf32>
    %848 = arith.truncf %847 : vector<8x128xf32> to vector<8x128xbf16>
    %c2_318 = arith.constant 2 : index
    %c0_319 = arith.constant 0 : index
    %c0_320 = arith.constant 0 : index
    %849 = vector.load %arg9[%c2_318, %c0_319, %c0_320] : memref<4x128x128xbf16, #tpu.memory_space<vmem>>, vector<1x128x128xbf16>
    %850 = vector.shape_cast %849 : vector<1x128x128xbf16> to vector<128x128xbf16>
    %cst_321 = arith.constant dense<0.000000e+00> : vector<8x128xf32>
    %851 = tpu.matmul %848, %850, %cst_321 {dimension_numbers = #tpu.dot_dimension_numbers<[1], [0], [0], [1], [0, 0, 1, 1], [], []>} : vector<8x128xbf16>, vector<128x128xbf16>, vector<8x128xf32> -> vector<8x128xf32>
    %c2_322 = arith.constant 2 : index
    %c0_323 = arith.constant 0 : index
    %c0_324 = arith.constant 0 : index
    %852 = vector.load %arg10[%c2_322, %c0_323, %c0_324] : memref<4x1x128xf32, #tpu.memory_space<vmem>>, vector<1x1x128xf32>
    %853 = vector.shape_cast %852 : vector<1x1x128xf32> to vector<1x128xf32>
    %854 = vector.broadcast %853 : vector<1x128xf32> to vector<8x128xf32>
    %855 = arith.addf %851, %854 : vector<8x128xf32>
    %c2_325 = arith.constant 2 : index
    %c0_326 = arith.constant 0 : index
    %c0_327 = arith.constant 0 : index
    %856 = vector.load %arg11[%c2_325, %c0_326, %c0_327] : memref<4x128x256xbf16, #tpu.memory_space<vmem>>, vector<1x128x256xbf16>
    %857 = vector.shape_cast %856 : vector<1x128x256xbf16> to vector<128x256xbf16>
    %cst_328 = arith.constant dense<0.000000e+00> : vector<8x256xf32>
    %858 = tpu.matmul %4, %857, %cst_328 {dimension_numbers = #tpu.dot_dimension_numbers<[1], [0], [0], [1], [0, 0, 1, 1], [], []>} : vector<8x128xbf16>, vector<128x256xbf16>, vector<8x256xf32> -> vector<8x256xf32>
    %c2_329 = arith.constant 2 : index
    %c0_330 = arith.constant 0 : index
    %c0_331 = arith.constant 0 : index
    %859 = vector.load %arg12[%c2_329, %c0_330, %c0_331] : memref<4x1x256xf32, #tpu.memory_space<vmem>>, vector<1x1x256xf32>
    %860 = vector.shape_cast %859 : vector<1x1x256xf32> to vector<1x256xf32>
    %861 = vector.broadcast %860 : vector<1x256xf32> to vector<8x256xf32>
    %862 = arith.addf %858, %861 : vector<8x256xf32>
    %863 = vector.extract_strided_slice %862 {offsets = [0, 0], sizes = [8, 128], strides = [1, 1]} : vector<8x256xf32> to vector<8x128xf32>
    %864 = vector.extract_strided_slice %862 {offsets = [0, 128], sizes = [8, 128], strides = [1, 1]} : vector<8x256xf32> to vector<8x128xf32>
    %c2_332 = arith.constant 2 : index
    %c0_333 = arith.constant 0 : index
    %c0_334 = arith.constant 0 : index
    %865 = vector.load %arg13[%c2_332, %c0_333, %c0_334] : memref<4x128x128xbf16, #tpu.memory_space<vmem>>, vector<1x128x128xbf16>
    %866 = vector.shape_cast %865 : vector<1x128x128xbf16> to vector<128x128xbf16>
    %cst_335 = arith.constant 0.000000e+00 : f32
    %867 = vector.broadcast %cst_335 : f32 to vector<8x128xf32>
    %868 = vector.extract_strided_slice %855 {offsets = [0, 0], sizes = [8, 32], strides = [1, 1]} : vector<8x128xf32> to vector<8x32xf32>
    %869 = arith.truncf %868 : vector<8x32xf32> to vector<8x32xbf16>
    %870 = vector.extract_strided_slice %863 {offsets = [0, 0], sizes = [8, 32], strides = [1, 1]} : vector<8x128xf32> to vector<8x32xf32>
    %871 = arith.truncf %870 : vector<8x32xf32> to vector<8x32xbf16>
    %872 = vector.extract_strided_slice %864 {offsets = [0, 0], sizes = [8, 32], strides = [1, 1]} : vector<8x128xf32> to vector<8x32xf32>
    %873 = arith.truncf %872 : vector<8x32xf32> to vector<8x32xbf16>
    %cst_336 = arith.constant dense<0.000000e+00> : vector<8x8xf32>
    %874 = tpu.matmul %869, %871, %cst_336 {dimension_numbers = #tpu.dot_dimension_numbers<[1], [1], [0], [0], [0, 0, 1, 0], [], []>} : vector<8x32xbf16>, vector<8x32xbf16>, vector<8x8xf32> -> vector<8x8xf32>
    %cst_337 = arith.constant 0.176776692 : f32
    %875 = vector.broadcast %cst_337 : f32 to vector<8x8xf32>
    %876 = arith.mulf %874, %875 : vector<8x8xf32>
    %cst_338 = arith.constant dense<0xFF800000> : vector<8xf32>
    %877 = vector.multi_reduction <maximumf>, %876, %cst_338 [1] : vector<8x8xf32> to vector<8xf32>
    %878 = vector.shape_cast %877 : vector<8xf32> to vector<8x1xf32>
    %879 = vector.broadcast %878 : vector<8x1xf32> to vector<8x8xf32>
    %880 = arith.subf %876, %879 : vector<8x8xf32>
    %881 = math.exp %880 : vector<8x8xf32>
    %cst_339 = arith.constant dense<0.000000e+00> : vector<8xf32>
    %882 = vector.multi_reduction <add>, %881, %cst_339 [1] : vector<8x8xf32> to vector<8xf32>
    %883 = vector.shape_cast %882 : vector<8xf32> to vector<8x1xf32>
    %884 = tpu.reciprocal %883 {approx = true} : vector<8x1xf32> -> vector<8x1xf32>
    %885 = vector.broadcast %884 : vector<8x1xf32> to vector<8x8xf32>
    %886 = arith.mulf %881, %885 : vector<8x8xf32>
    %887 = arith.truncf %886 : vector<8x8xf32> to vector<8x8xbf16>
    %cst_340 = arith.constant dense<0.000000e+00> : vector<8x32xf32>
    %888 = tpu.matmul %887, %873, %cst_340 {dimension_numbers = #tpu.dot_dimension_numbers<[1], [0], [0], [1], [0, 0, 1, 1], [], []>} : vector<8x8xbf16>, vector<8x32xbf16>, vector<8x32xf32> -> vector<8x32xf32>
    %889 = arith.truncf %888 : vector<8x32xf32> to vector<8x32xbf16>
    %890 = vector.extract_strided_slice %866 {offsets = [0, 0], sizes = [32, 128], strides = [1, 1]} : vector<128x128xbf16> to vector<32x128xbf16>
    %cst_341 = arith.constant dense<0.000000e+00> : vector<8x128xf32>
    %891 = tpu.matmul %889, %890, %cst_341 {dimension_numbers = #tpu.dot_dimension_numbers<[1], [0], [0], [1], [0, 0, 1, 1], [], []>} : vector<8x32xbf16>, vector<32x128xbf16>, vector<8x128xf32> -> vector<8x128xf32>
    %892 = arith.addf %867, %891 : vector<8x128xf32>
    %893 = vector.extract_strided_slice %855 {offsets = [0, 32], sizes = [8, 32], strides = [1, 1]} : vector<8x128xf32> to vector<8x32xf32>
    %894 = arith.truncf %893 : vector<8x32xf32> to vector<8x32xbf16>
    %895 = vector.extract_strided_slice %863 {offsets = [0, 32], sizes = [8, 32], strides = [1, 1]} : vector<8x128xf32> to vector<8x32xf32>
    %896 = arith.truncf %895 : vector<8x32xf32> to vector<8x32xbf16>
    %897 = vector.extract_strided_slice %864 {offsets = [0, 32], sizes = [8, 32], strides = [1, 1]} : vector<8x128xf32> to vector<8x32xf32>
    %898 = arith.truncf %897 : vector<8x32xf32> to vector<8x32xbf16>
    %cst_342 = arith.constant dense<0.000000e+00> : vector<8x8xf32>
    %899 = tpu.matmul %894, %896, %cst_342 {dimension_numbers = #tpu.dot_dimension_numbers<[1], [1], [0], [0], [0, 0, 1, 0], [], []>} : vector<8x32xbf16>, vector<8x32xbf16>, vector<8x8xf32> -> vector<8x8xf32>
    %cst_343 = arith.constant 0.176776692 : f32
    %900 = vector.broadcast %cst_343 : f32 to vector<8x8xf32>
    %901 = arith.mulf %899, %900 : vector<8x8xf32>
    %cst_344 = arith.constant dense<0xFF800000> : vector<8xf32>
    %902 = vector.multi_reduction <maximumf>, %901, %cst_344 [1] : vector<8x8xf32> to vector<8xf32>
    %903 = vector.shape_cast %902 : vector<8xf32> to vector<8x1xf32>
    %904 = vector.broadcast %903 : vector<8x1xf32> to vector<8x8xf32>
    %905 = arith.subf %901, %904 : vector<8x8xf32>
    %906 = math.exp %905 : vector<8x8xf32>
    %cst_345 = arith.constant dense<0.000000e+00> : vector<8xf32>
    %907 = vector.multi_reduction <add>, %906, %cst_345 [1] : vector<8x8xf32> to vector<8xf32>
    %908 = vector.shape_cast %907 : vector<8xf32> to vector<8x1xf32>
    %909 = tpu.reciprocal %908 {approx = true} : vector<8x1xf32> -> vector<8x1xf32>
    %910 = vector.broadcast %909 : vector<8x1xf32> to vector<8x8xf32>
    %911 = arith.mulf %906, %910 : vector<8x8xf32>
    %912 = arith.truncf %911 : vector<8x8xf32> to vector<8x8xbf16>
    %cst_346 = arith.constant dense<0.000000e+00> : vector<8x32xf32>
    %913 = tpu.matmul %912, %898, %cst_346 {dimension_numbers = #tpu.dot_dimension_numbers<[1], [0], [0], [1], [0, 0, 1, 1], [], []>} : vector<8x8xbf16>, vector<8x32xbf16>, vector<8x32xf32> -> vector<8x32xf32>
    %914 = arith.truncf %913 : vector<8x32xf32> to vector<8x32xbf16>
    %915 = vector.extract_strided_slice %866 {offsets = [32, 0], sizes = [32, 128], strides = [1, 1]} : vector<128x128xbf16> to vector<32x128xbf16>
    %cst_347 = arith.constant dense<0.000000e+00> : vector<8x128xf32>
    %916 = tpu.matmul %914, %915, %cst_347 {dimension_numbers = #tpu.dot_dimension_numbers<[1], [0], [0], [1], [0, 0, 1, 1], [], []>} : vector<8x32xbf16>, vector<32x128xbf16>, vector<8x128xf32> -> vector<8x128xf32>
    %917 = arith.addf %892, %916 : vector<8x128xf32>
    %918 = vector.extract_strided_slice %855 {offsets = [0, 64], sizes = [8, 32], strides = [1, 1]} : vector<8x128xf32> to vector<8x32xf32>
    %919 = arith.truncf %918 : vector<8x32xf32> to vector<8x32xbf16>
    %920 = vector.extract_strided_slice %863 {offsets = [0, 64], sizes = [8, 32], strides = [1, 1]} : vector<8x128xf32> to vector<8x32xf32>
    %921 = arith.truncf %920 : vector<8x32xf32> to vector<8x32xbf16>
    %922 = vector.extract_strided_slice %864 {offsets = [0, 64], sizes = [8, 32], strides = [1, 1]} : vector<8x128xf32> to vector<8x32xf32>
    %923 = arith.truncf %922 : vector<8x32xf32> to vector<8x32xbf16>
    %cst_348 = arith.constant dense<0.000000e+00> : vector<8x8xf32>
    %924 = tpu.matmul %919, %921, %cst_348 {dimension_numbers = #tpu.dot_dimension_numbers<[1], [1], [0], [0], [0, 0, 1, 0], [], []>} : vector<8x32xbf16>, vector<8x32xbf16>, vector<8x8xf32> -> vector<8x8xf32>
    %cst_349 = arith.constant 0.176776692 : f32
    %925 = vector.broadcast %cst_349 : f32 to vector<8x8xf32>
    %926 = arith.mulf %924, %925 : vector<8x8xf32>
    %cst_350 = arith.constant dense<0xFF800000> : vector<8xf32>
    %927 = vector.multi_reduction <maximumf>, %926, %cst_350 [1] : vector<8x8xf32> to vector<8xf32>
    %928 = vector.shape_cast %927 : vector<8xf32> to vector<8x1xf32>
    %929 = vector.broadcast %928 : vector<8x1xf32> to vector<8x8xf32>
    %930 = arith.subf %926, %929 : vector<8x8xf32>
    %931 = math.exp %930 : vector<8x8xf32>
    %cst_351 = arith.constant dense<0.000000e+00> : vector<8xf32>
    %932 = vector.multi_reduction <add>, %931, %cst_351 [1] : vector<8x8xf32> to vector<8xf32>
    %933 = vector.shape_cast %932 : vector<8xf32> to vector<8x1xf32>
    %934 = tpu.reciprocal %933 {approx = true} : vector<8x1xf32> -> vector<8x1xf32>
    %935 = vector.broadcast %934 : vector<8x1xf32> to vector<8x8xf32>
    %936 = arith.mulf %931, %935 : vector<8x8xf32>
    %937 = arith.truncf %936 : vector<8x8xf32> to vector<8x8xbf16>
    %cst_352 = arith.constant dense<0.000000e+00> : vector<8x32xf32>
    %938 = tpu.matmul %937, %923, %cst_352 {dimension_numbers = #tpu.dot_dimension_numbers<[1], [0], [0], [1], [0, 0, 1, 1], [], []>} : vector<8x8xbf16>, vector<8x32xbf16>, vector<8x32xf32> -> vector<8x32xf32>
    %939 = arith.truncf %938 : vector<8x32xf32> to vector<8x32xbf16>
    %940 = vector.extract_strided_slice %866 {offsets = [64, 0], sizes = [32, 128], strides = [1, 1]} : vector<128x128xbf16> to vector<32x128xbf16>
    %cst_353 = arith.constant dense<0.000000e+00> : vector<8x128xf32>
    %941 = tpu.matmul %939, %940, %cst_353 {dimension_numbers = #tpu.dot_dimension_numbers<[1], [0], [0], [1], [0, 0, 1, 1], [], []>} : vector<8x32xbf16>, vector<32x128xbf16>, vector<8x128xf32> -> vector<8x128xf32>
    %942 = arith.addf %917, %941 : vector<8x128xf32>
    %943 = vector.extract_strided_slice %855 {offsets = [0, 96], sizes = [8, 32], strides = [1, 1]} : vector<8x128xf32> to vector<8x32xf32>
    %944 = arith.truncf %943 : vector<8x32xf32> to vector<8x32xbf16>
    %945 = vector.extract_strided_slice %863 {offsets = [0, 96], sizes = [8, 32], strides = [1, 1]} : vector<8x128xf32> to vector<8x32xf32>
    %946 = arith.truncf %945 : vector<8x32xf32> to vector<8x32xbf16>
    %947 = vector.extract_strided_slice %864 {offsets = [0, 96], sizes = [8, 32], strides = [1, 1]} : vector<8x128xf32> to vector<8x32xf32>
    %948 = arith.truncf %947 : vector<8x32xf32> to vector<8x32xbf16>
    %cst_354 = arith.constant dense<0.000000e+00> : vector<8x8xf32>
    %949 = tpu.matmul %944, %946, %cst_354 {dimension_numbers = #tpu.dot_dimension_numbers<[1], [1], [0], [0], [0, 0, 1, 0], [], []>} : vector<8x32xbf16>, vector<8x32xbf16>, vector<8x8xf32> -> vector<8x8xf32>
    %cst_355 = arith.constant 0.176776692 : f32
    %950 = vector.broadcast %cst_355 : f32 to vector<8x8xf32>
    %951 = arith.mulf %949, %950 : vector<8x8xf32>
    %cst_356 = arith.constant dense<0xFF800000> : vector<8xf32>
    %952 = vector.multi_reduction <maximumf>, %951, %cst_356 [1] : vector<8x8xf32> to vector<8xf32>
    %953 = vector.shape_cast %952 : vector<8xf32> to vector<8x1xf32>
    %954 = vector.broadcast %953 : vector<8x1xf32> to vector<8x8xf32>
    %955 = arith.subf %951, %954 : vector<8x8xf32>
    %956 = math.exp %955 : vector<8x8xf32>
    %cst_357 = arith.constant dense<0.000000e+00> : vector<8xf32>
    %957 = vector.multi_reduction <add>, %956, %cst_357 [1] : vector<8x8xf32> to vector<8xf32>
    %958 = vector.shape_cast %957 : vector<8xf32> to vector<8x1xf32>
    %959 = tpu.reciprocal %958 {approx = true} : vector<8x1xf32> -> vector<8x1xf32>
    %960 = vector.broadcast %959 : vector<8x1xf32> to vector<8x8xf32>
    %961 = arith.mulf %956, %960 : vector<8x8xf32>
    %962 = arith.truncf %961 : vector<8x8xf32> to vector<8x8xbf16>
    %cst_358 = arith.constant dense<0.000000e+00> : vector<8x32xf32>
    %963 = tpu.matmul %962, %948, %cst_358 {dimension_numbers = #tpu.dot_dimension_numbers<[1], [0], [0], [1], [0, 0, 1, 1], [], []>} : vector<8x8xbf16>, vector<8x32xbf16>, vector<8x32xf32> -> vector<8x32xf32>
    %964 = arith.truncf %963 : vector<8x32xf32> to vector<8x32xbf16>
    %965 = vector.extract_strided_slice %866 {offsets = [96, 0], sizes = [32, 128], strides = [1, 1]} : vector<128x128xbf16> to vector<32x128xbf16>
    %cst_359 = arith.constant dense<0.000000e+00> : vector<8x128xf32>
    %966 = tpu.matmul %964, %965, %cst_359 {dimension_numbers = #tpu.dot_dimension_numbers<[1], [0], [0], [1], [0, 0, 1, 1], [], []>} : vector<8x32xbf16>, vector<32x128xbf16>, vector<8x128xf32> -> vector<8x128xf32>
    %967 = arith.addf %942, %966 : vector<8x128xf32>
    %c2_360 = arith.constant 2 : index
    %c0_361 = arith.constant 0 : index
    %c0_362 = arith.constant 0 : index
    %968 = vector.load %arg14[%c2_360, %c0_361, %c0_362] : memref<4x1x128xf32, #tpu.memory_space<vmem>>, vector<1x1x128xf32>
    %969 = vector.shape_cast %968 : vector<1x1x128xf32> to vector<1x128xf32>
    %970 = vector.broadcast %969 : vector<1x128xf32> to vector<8x128xf32>
    %971 = arith.addf %967, %970 : vector<8x128xf32>
    %972 = arith.addf %847, %971 : vector<8x128xf32>
    %c2_363 = arith.constant 2 : index
    %c0_364 = arith.constant 0 : index
    %c0_365 = arith.constant 0 : index
    %973 = vector.load %arg15[%c2_363, %c0_364, %c0_365] : memref<4x1x128xf32, #tpu.memory_space<vmem>>, vector<1x1x128xf32>
    %974 = vector.shape_cast %973 : vector<1x1x128xf32> to vector<1x128xf32>
    %c2_366 = arith.constant 2 : index
    %c0_367 = arith.constant 0 : index
    %c0_368 = arith.constant 0 : index
    %975 = vector.load %arg16[%c2_366, %c0_367, %c0_368] : memref<4x1x128xf32, #tpu.memory_space<vmem>>, vector<1x1x128xf32>
    %976 = vector.shape_cast %975 : vector<1x1x128xf32> to vector<1x128xf32>
    %cst_369 = arith.constant dense<0.000000e+00> : vector<8xf32>
    %977 = vector.multi_reduction <add>, %972, %cst_369 [1] : vector<8x128xf32> to vector<8xf32>
    %978 = vector.shape_cast %977 : vector<8xf32> to vector<8x1xf32>
    %cst_370 = arith.constant 1.280000e+02 : f32
    %979 = vector.broadcast %cst_370 : f32 to vector<8x1xf32>
    %980 = arith.divf %978, %979 : vector<8x1xf32>
    %981 = vector.broadcast %980 : vector<8x1xf32> to vector<8x128xf32>
    %982 = arith.subf %972, %981 : vector<8x128xf32>
    %983 = arith.mulf %982, %982 : vector<8x128xf32>
    %cst_371 = arith.constant dense<0.000000e+00> : vector<8xf32>
    %984 = vector.multi_reduction <add>, %983, %cst_371 [1] : vector<8x128xf32> to vector<8xf32>
    %985 = vector.shape_cast %984 : vector<8xf32> to vector<8x1xf32>
    %cst_372 = arith.constant 1.280000e+02 : f32
    %986 = vector.broadcast %cst_372 : f32 to vector<8x1xf32>
    %987 = arith.divf %985, %986 : vector<8x1xf32>
    %cst_373 = arith.constant 9.99999974E-6 : f32
    %988 = vector.broadcast %cst_373 : f32 to vector<8x1xf32>
    %989 = arith.addf %987, %988 : vector<8x1xf32>
    %990 = math.rsqrt %989 : vector<8x1xf32>
    %991 = vector.broadcast %990 : vector<8x1xf32> to vector<8x128xf32>
    %992 = arith.mulf %982, %991 : vector<8x128xf32>
    %993 = vector.broadcast %974 : vector<1x128xf32> to vector<8x128xf32>
    %994 = arith.mulf %992, %993 : vector<8x128xf32>
    %995 = vector.broadcast %976 : vector<1x128xf32> to vector<8x128xf32>
    %996 = arith.addf %994, %995 : vector<8x128xf32>
    %997 = arith.truncf %996 : vector<8x128xf32> to vector<8x128xbf16>
    %c2_374 = arith.constant 2 : index
    %c0_375 = arith.constant 0 : index
    %c0_376 = arith.constant 0 : index
    %998 = vector.load %arg17[%c2_374, %c0_375, %c0_376] : memref<4x128x512xbf16, #tpu.memory_space<vmem>>, vector<1x128x512xbf16>
    %999 = vector.shape_cast %998 : vector<1x128x512xbf16> to vector<128x512xbf16>
    %cst_377 = arith.constant dense<0.000000e+00> : vector<8x512xf32>
    %1000 = tpu.matmul %997, %999, %cst_377 {dimension_numbers = #tpu.dot_dimension_numbers<[1], [0], [0], [1], [0, 0, 1, 1], [], []>} : vector<8x128xbf16>, vector<128x512xbf16>, vector<8x512xf32> -> vector<8x512xf32>
    %c2_378 = arith.constant 2 : index
    %c0_379 = arith.constant 0 : index
    %c0_380 = arith.constant 0 : index
    %1001 = vector.load %arg18[%c2_378, %c0_379, %c0_380] : memref<4x1x512xf32, #tpu.memory_space<vmem>>, vector<1x1x512xf32>
    %1002 = vector.shape_cast %1001 : vector<1x1x512xf32> to vector<1x512xf32>
    %1003 = vector.broadcast %1002 : vector<1x512xf32> to vector<8x512xf32>
    %1004 = arith.addf %1000, %1003 : vector<8x512xf32>
    %cst_381 = arith.constant 0.000000e+00 : f32
    %1005 = vector.broadcast %cst_381 : f32 to vector<8x512xf32>
    %1006 = arith.maximumf %1004, %1005 : vector<8x512xf32>
    %1007 = arith.truncf %1006 : vector<8x512xf32> to vector<8x512xbf16>
    %c2_382 = arith.constant 2 : index
    %c0_383 = arith.constant 0 : index
    %c0_384 = arith.constant 0 : index
    %1008 = vector.load %arg19[%c2_382, %c0_383, %c0_384] : memref<4x512x128xbf16, #tpu.memory_space<vmem>>, vector<1x512x128xbf16>
    %1009 = vector.shape_cast %1008 : vector<1x512x128xbf16> to vector<512x128xbf16>
    %cst_385 = arith.constant dense<0.000000e+00> : vector<8x128xf32>
    %1010 = tpu.matmul %1007, %1009, %cst_385 {dimension_numbers = #tpu.dot_dimension_numbers<[1], [0], [0], [1], [0, 0, 1, 1], [], []>} : vector<8x512xbf16>, vector<512x128xbf16>, vector<8x128xf32> -> vector<8x128xf32>
    %c2_386 = arith.constant 2 : index
    %c0_387 = arith.constant 0 : index
    %c0_388 = arith.constant 0 : index
    %1011 = vector.load %arg20[%c2_386, %c0_387, %c0_388] : memref<4x1x128xf32, #tpu.memory_space<vmem>>, vector<1x1x128xf32>
    %1012 = vector.shape_cast %1011 : vector<1x1x128xf32> to vector<1x128xf32>
    %1013 = vector.broadcast %1012 : vector<1x128xf32> to vector<8x128xf32>
    %1014 = arith.addf %1010, %1013 : vector<8x128xf32>
    %1015 = arith.addf %996, %1014 : vector<8x128xf32>
    %c2_389 = arith.constant 2 : index
    %c0_390 = arith.constant 0 : index
    %c0_391 = arith.constant 0 : index
    %1016 = vector.load %arg21[%c2_389, %c0_390, %c0_391] : memref<4x1x128xf32, #tpu.memory_space<vmem>>, vector<1x1x128xf32>
    %1017 = vector.shape_cast %1016 : vector<1x1x128xf32> to vector<1x128xf32>
    %c2_392 = arith.constant 2 : index
    %c0_393 = arith.constant 0 : index
    %c0_394 = arith.constant 0 : index
    %1018 = vector.load %arg22[%c2_392, %c0_393, %c0_394] : memref<4x1x128xf32, #tpu.memory_space<vmem>>, vector<1x1x128xf32>
    %1019 = vector.shape_cast %1018 : vector<1x1x128xf32> to vector<1x128xf32>
    %cst_395 = arith.constant dense<0.000000e+00> : vector<8xf32>
    %1020 = vector.multi_reduction <add>, %1015, %cst_395 [1] : vector<8x128xf32> to vector<8xf32>
    %1021 = vector.shape_cast %1020 : vector<8xf32> to vector<8x1xf32>
    %cst_396 = arith.constant 1.280000e+02 : f32
    %1022 = vector.broadcast %cst_396 : f32 to vector<8x1xf32>
    %1023 = arith.divf %1021, %1022 : vector<8x1xf32>
    %1024 = vector.broadcast %1023 : vector<8x1xf32> to vector<8x128xf32>
    %1025 = arith.subf %1015, %1024 : vector<8x128xf32>
    %1026 = arith.mulf %1025, %1025 : vector<8x128xf32>
    %cst_397 = arith.constant dense<0.000000e+00> : vector<8xf32>
    %1027 = vector.multi_reduction <add>, %1026, %cst_397 [1] : vector<8x128xf32> to vector<8xf32>
    %1028 = vector.shape_cast %1027 : vector<8xf32> to vector<8x1xf32>
    %cst_398 = arith.constant 1.280000e+02 : f32
    %1029 = vector.broadcast %cst_398 : f32 to vector<8x1xf32>
    %1030 = arith.divf %1028, %1029 : vector<8x1xf32>
    %cst_399 = arith.constant 9.99999974E-6 : f32
    %1031 = vector.broadcast %cst_399 : f32 to vector<8x1xf32>
    %1032 = arith.addf %1030, %1031 : vector<8x1xf32>
    %1033 = math.rsqrt %1032 : vector<8x1xf32>
    %1034 = vector.broadcast %1033 : vector<8x1xf32> to vector<8x128xf32>
    %1035 = arith.mulf %1025, %1034 : vector<8x128xf32>
    %1036 = vector.broadcast %1017 : vector<1x128xf32> to vector<8x128xf32>
    %1037 = arith.mulf %1035, %1036 : vector<8x128xf32>
    %1038 = vector.broadcast %1019 : vector<1x128xf32> to vector<8x128xf32>
    %1039 = arith.addf %1037, %1038 : vector<8x128xf32>
    %1040 = arith.truncf %1039 : vector<8x128xf32> to vector<8x128xbf16>
    %c3 = arith.constant 3 : index
    %c0_400 = arith.constant 0 : index
    %c0_401 = arith.constant 0 : index
    %1041 = vector.load %arg3[%c3, %c0_400, %c0_401] : memref<4x128x384xbf16, #tpu.memory_space<vmem>>, vector<1x128x384xbf16>
    %1042 = vector.shape_cast %1041 : vector<1x128x384xbf16> to vector<128x384xbf16>
    %cst_402 = arith.constant dense<0.000000e+00> : vector<8x384xf32>
    %1043 = tpu.matmul %1040, %1042, %cst_402 {dimension_numbers = #tpu.dot_dimension_numbers<[1], [0], [0], [1], [0, 0, 1, 1], [], []>} : vector<8x128xbf16>, vector<128x384xbf16>, vector<8x384xf32> -> vector<8x384xf32>
    %c3_403 = arith.constant 3 : index
    %c0_404 = arith.constant 0 : index
    %c0_405 = arith.constant 0 : index
    %1044 = vector.load %arg4[%c3_403, %c0_404, %c0_405] : memref<4x1x384xf32, #tpu.memory_space<vmem>>, vector<1x1x384xf32>
    %1045 = vector.shape_cast %1044 : vector<1x1x384xf32> to vector<1x384xf32>
    %1046 = vector.broadcast %1045 : vector<1x384xf32> to vector<8x384xf32>
    %1047 = arith.addf %1043, %1046 : vector<8x384xf32>
    %1048 = vector.extract_strided_slice %1047 {offsets = [0, 0], sizes = [8, 128], strides = [1, 1]} : vector<8x384xf32> to vector<8x128xf32>
    %1049 = vector.extract_strided_slice %1047 {offsets = [0, 128], sizes = [8, 128], strides = [1, 1]} : vector<8x384xf32> to vector<8x128xf32>
    %1050 = vector.extract_strided_slice %1047 {offsets = [0, 256], sizes = [8, 128], strides = [1, 1]} : vector<8x384xf32> to vector<8x128xf32>
    %c3_406 = arith.constant 3 : index
    %c0_407 = arith.constant 0 : index
    %c0_408 = arith.constant 0 : index
    %1051 = vector.load %arg5[%c3_406, %c0_407, %c0_408] : memref<4x128x128xbf16, #tpu.memory_space<vmem>>, vector<1x128x128xbf16>
    %1052 = vector.shape_cast %1051 : vector<1x128x128xbf16> to vector<128x128xbf16>
    %1053 = tpu.iota {dimensions = array<i32: 0>} : vector<8x8xi32>
    %1054 = tpu.iota {dimensions = array<i32: 1>} : vector<8x8xi32>
    %1055 = arith.cmpi sgt, %1054, %1053 : vector<8x8xi32>
    %cst_409 = arith.constant -1.000000e+30 : f32
    %cst_410 = arith.constant 0.000000e+00 : f32
    %1056 = vector.broadcast %cst_409 : f32 to vector<8x8xf32>
    %1057 = vector.broadcast %cst_410 : f32 to vector<8x8xf32>
    %1058 = arith.select %1055, %1056, %1057 : vector<8x8xi1>, vector<8x8xf32>
    %cst_411 = arith.constant 0.000000e+00 : f32
    %1059 = vector.broadcast %cst_411 : f32 to vector<8x128xf32>
    %1060 = vector.extract_strided_slice %1048 {offsets = [0, 0], sizes = [8, 32], strides = [1, 1]} : vector<8x128xf32> to vector<8x32xf32>
    %1061 = arith.truncf %1060 : vector<8x32xf32> to vector<8x32xbf16>
    %1062 = vector.extract_strided_slice %1049 {offsets = [0, 0], sizes = [8, 32], strides = [1, 1]} : vector<8x128xf32> to vector<8x32xf32>
    %1063 = arith.truncf %1062 : vector<8x32xf32> to vector<8x32xbf16>
    %1064 = vector.extract_strided_slice %1050 {offsets = [0, 0], sizes = [8, 32], strides = [1, 1]} : vector<8x128xf32> to vector<8x32xf32>
    %1065 = arith.truncf %1064 : vector<8x32xf32> to vector<8x32xbf16>
    %cst_412 = arith.constant dense<0.000000e+00> : vector<8x8xf32>
    %1066 = tpu.matmul %1061, %1063, %cst_412 {dimension_numbers = #tpu.dot_dimension_numbers<[1], [1], [0], [0], [0, 0, 1, 0], [], []>} : vector<8x32xbf16>, vector<8x32xbf16>, vector<8x8xf32> -> vector<8x8xf32>
    %cst_413 = arith.constant 0.176776692 : f32
    %1067 = vector.broadcast %cst_413 : f32 to vector<8x8xf32>
    %1068 = arith.mulf %1066, %1067 : vector<8x8xf32>
    %1069 = arith.addf %1068, %1058 : vector<8x8xf32>
    %cst_414 = arith.constant dense<0xFF800000> : vector<8xf32>
    %1070 = vector.multi_reduction <maximumf>, %1069, %cst_414 [1] : vector<8x8xf32> to vector<8xf32>
    %1071 = vector.shape_cast %1070 : vector<8xf32> to vector<8x1xf32>
    %1072 = vector.broadcast %1071 : vector<8x1xf32> to vector<8x8xf32>
    %1073 = arith.subf %1069, %1072 : vector<8x8xf32>
    %1074 = math.exp %1073 : vector<8x8xf32>
    %cst_415 = arith.constant dense<0.000000e+00> : vector<8xf32>
    %1075 = vector.multi_reduction <add>, %1074, %cst_415 [1] : vector<8x8xf32> to vector<8xf32>
    %1076 = vector.shape_cast %1075 : vector<8xf32> to vector<8x1xf32>
    %1077 = tpu.reciprocal %1076 {approx = true} : vector<8x1xf32> -> vector<8x1xf32>
    %1078 = vector.broadcast %1077 : vector<8x1xf32> to vector<8x8xf32>
    %1079 = arith.mulf %1074, %1078 : vector<8x8xf32>
    %1080 = arith.truncf %1079 : vector<8x8xf32> to vector<8x8xbf16>
    %cst_416 = arith.constant dense<0.000000e+00> : vector<8x32xf32>
    %1081 = tpu.matmul %1080, %1065, %cst_416 {dimension_numbers = #tpu.dot_dimension_numbers<[1], [0], [0], [1], [0, 0, 1, 1], [], []>} : vector<8x8xbf16>, vector<8x32xbf16>, vector<8x32xf32> -> vector<8x32xf32>
    %1082 = arith.truncf %1081 : vector<8x32xf32> to vector<8x32xbf16>
    %1083 = vector.extract_strided_slice %1052 {offsets = [0, 0], sizes = [32, 128], strides = [1, 1]} : vector<128x128xbf16> to vector<32x128xbf16>
    %cst_417 = arith.constant dense<0.000000e+00> : vector<8x128xf32>
    %1084 = tpu.matmul %1082, %1083, %cst_417 {dimension_numbers = #tpu.dot_dimension_numbers<[1], [0], [0], [1], [0, 0, 1, 1], [], []>} : vector<8x32xbf16>, vector<32x128xbf16>, vector<8x128xf32> -> vector<8x128xf32>
    %1085 = arith.addf %1059, %1084 : vector<8x128xf32>
    %1086 = vector.extract_strided_slice %1048 {offsets = [0, 32], sizes = [8, 32], strides = [1, 1]} : vector<8x128xf32> to vector<8x32xf32>
    %1087 = arith.truncf %1086 : vector<8x32xf32> to vector<8x32xbf16>
    %1088 = vector.extract_strided_slice %1049 {offsets = [0, 32], sizes = [8, 32], strides = [1, 1]} : vector<8x128xf32> to vector<8x32xf32>
    %1089 = arith.truncf %1088 : vector<8x32xf32> to vector<8x32xbf16>
    %1090 = vector.extract_strided_slice %1050 {offsets = [0, 32], sizes = [8, 32], strides = [1, 1]} : vector<8x128xf32> to vector<8x32xf32>
    %1091 = arith.truncf %1090 : vector<8x32xf32> to vector<8x32xbf16>
    %cst_418 = arith.constant dense<0.000000e+00> : vector<8x8xf32>
    %1092 = tpu.matmul %1087, %1089, %cst_418 {dimension_numbers = #tpu.dot_dimension_numbers<[1], [1], [0], [0], [0, 0, 1, 0], [], []>} : vector<8x32xbf16>, vector<8x32xbf16>, vector<8x8xf32> -> vector<8x8xf32>
    %cst_419 = arith.constant 0.176776692 : f32
    %1093 = vector.broadcast %cst_419 : f32 to vector<8x8xf32>
    %1094 = arith.mulf %1092, %1093 : vector<8x8xf32>
    %1095 = arith.addf %1094, %1058 : vector<8x8xf32>
    %cst_420 = arith.constant dense<0xFF800000> : vector<8xf32>
    %1096 = vector.multi_reduction <maximumf>, %1095, %cst_420 [1] : vector<8x8xf32> to vector<8xf32>
    %1097 = vector.shape_cast %1096 : vector<8xf32> to vector<8x1xf32>
    %1098 = vector.broadcast %1097 : vector<8x1xf32> to vector<8x8xf32>
    %1099 = arith.subf %1095, %1098 : vector<8x8xf32>
    %1100 = math.exp %1099 : vector<8x8xf32>
    %cst_421 = arith.constant dense<0.000000e+00> : vector<8xf32>
    %1101 = vector.multi_reduction <add>, %1100, %cst_421 [1] : vector<8x8xf32> to vector<8xf32>
    %1102 = vector.shape_cast %1101 : vector<8xf32> to vector<8x1xf32>
    %1103 = tpu.reciprocal %1102 {approx = true} : vector<8x1xf32> -> vector<8x1xf32>
    %1104 = vector.broadcast %1103 : vector<8x1xf32> to vector<8x8xf32>
    %1105 = arith.mulf %1100, %1104 : vector<8x8xf32>
    %1106 = arith.truncf %1105 : vector<8x8xf32> to vector<8x8xbf16>
    %cst_422 = arith.constant dense<0.000000e+00> : vector<8x32xf32>
    %1107 = tpu.matmul %1106, %1091, %cst_422 {dimension_numbers = #tpu.dot_dimension_numbers<[1], [0], [0], [1], [0, 0, 1, 1], [], []>} : vector<8x8xbf16>, vector<8x32xbf16>, vector<8x32xf32> -> vector<8x32xf32>
    %1108 = arith.truncf %1107 : vector<8x32xf32> to vector<8x32xbf16>
    %1109 = vector.extract_strided_slice %1052 {offsets = [32, 0], sizes = [32, 128], strides = [1, 1]} : vector<128x128xbf16> to vector<32x128xbf16>
    %cst_423 = arith.constant dense<0.000000e+00> : vector<8x128xf32>
    %1110 = tpu.matmul %1108, %1109, %cst_423 {dimension_numbers = #tpu.dot_dimension_numbers<[1], [0], [0], [1], [0, 0, 1, 1], [], []>} : vector<8x32xbf16>, vector<32x128xbf16>, vector<8x128xf32> -> vector<8x128xf32>
    %1111 = arith.addf %1085, %1110 : vector<8x128xf32>
    %1112 = vector.extract_strided_slice %1048 {offsets = [0, 64], sizes = [8, 32], strides = [1, 1]} : vector<8x128xf32> to vector<8x32xf32>
    %1113 = arith.truncf %1112 : vector<8x32xf32> to vector<8x32xbf16>
    %1114 = vector.extract_strided_slice %1049 {offsets = [0, 64], sizes = [8, 32], strides = [1, 1]} : vector<8x128xf32> to vector<8x32xf32>
    %1115 = arith.truncf %1114 : vector<8x32xf32> to vector<8x32xbf16>
    %1116 = vector.extract_strided_slice %1050 {offsets = [0, 64], sizes = [8, 32], strides = [1, 1]} : vector<8x128xf32> to vector<8x32xf32>
    %1117 = arith.truncf %1116 : vector<8x32xf32> to vector<8x32xbf16>
    %cst_424 = arith.constant dense<0.000000e+00> : vector<8x8xf32>
    %1118 = tpu.matmul %1113, %1115, %cst_424 {dimension_numbers = #tpu.dot_dimension_numbers<[1], [1], [0], [0], [0, 0, 1, 0], [], []>} : vector<8x32xbf16>, vector<8x32xbf16>, vector<8x8xf32> -> vector<8x8xf32>
    %cst_425 = arith.constant 0.176776692 : f32
    %1119 = vector.broadcast %cst_425 : f32 to vector<8x8xf32>
    %1120 = arith.mulf %1118, %1119 : vector<8x8xf32>
    %1121 = arith.addf %1120, %1058 : vector<8x8xf32>
    %cst_426 = arith.constant dense<0xFF800000> : vector<8xf32>
    %1122 = vector.multi_reduction <maximumf>, %1121, %cst_426 [1] : vector<8x8xf32> to vector<8xf32>
    %1123 = vector.shape_cast %1122 : vector<8xf32> to vector<8x1xf32>
    %1124 = vector.broadcast %1123 : vector<8x1xf32> to vector<8x8xf32>
    %1125 = arith.subf %1121, %1124 : vector<8x8xf32>
    %1126 = math.exp %1125 : vector<8x8xf32>
    %cst_427 = arith.constant dense<0.000000e+00> : vector<8xf32>
    %1127 = vector.multi_reduction <add>, %1126, %cst_427 [1] : vector<8x8xf32> to vector<8xf32>
    %1128 = vector.shape_cast %1127 : vector<8xf32> to vector<8x1xf32>
    %1129 = tpu.reciprocal %1128 {approx = true} : vector<8x1xf32> -> vector<8x1xf32>
    %1130 = vector.broadcast %1129 : vector<8x1xf32> to vector<8x8xf32>
    %1131 = arith.mulf %1126, %1130 : vector<8x8xf32>
    %1132 = arith.truncf %1131 : vector<8x8xf32> to vector<8x8xbf16>
    %cst_428 = arith.constant dense<0.000000e+00> : vector<8x32xf32>
    %1133 = tpu.matmul %1132, %1117, %cst_428 {dimension_numbers = #tpu.dot_dimension_numbers<[1], [0], [0], [1], [0, 0, 1, 1], [], []>} : vector<8x8xbf16>, vector<8x32xbf16>, vector<8x32xf32> -> vector<8x32xf32>
    %1134 = arith.truncf %1133 : vector<8x32xf32> to vector<8x32xbf16>
    %1135 = vector.extract_strided_slice %1052 {offsets = [64, 0], sizes = [32, 128], strides = [1, 1]} : vector<128x128xbf16> to vector<32x128xbf16>
    %cst_429 = arith.constant dense<0.000000e+00> : vector<8x128xf32>
    %1136 = tpu.matmul %1134, %1135, %cst_429 {dimension_numbers = #tpu.dot_dimension_numbers<[1], [0], [0], [1], [0, 0, 1, 1], [], []>} : vector<8x32xbf16>, vector<32x128xbf16>, vector<8x128xf32> -> vector<8x128xf32>
    %1137 = arith.addf %1111, %1136 : vector<8x128xf32>
    %1138 = vector.extract_strided_slice %1048 {offsets = [0, 96], sizes = [8, 32], strides = [1, 1]} : vector<8x128xf32> to vector<8x32xf32>
    %1139 = arith.truncf %1138 : vector<8x32xf32> to vector<8x32xbf16>
    %1140 = vector.extract_strided_slice %1049 {offsets = [0, 96], sizes = [8, 32], strides = [1, 1]} : vector<8x128xf32> to vector<8x32xf32>
    %1141 = arith.truncf %1140 : vector<8x32xf32> to vector<8x32xbf16>
    %1142 = vector.extract_strided_slice %1050 {offsets = [0, 96], sizes = [8, 32], strides = [1, 1]} : vector<8x128xf32> to vector<8x32xf32>
    %1143 = arith.truncf %1142 : vector<8x32xf32> to vector<8x32xbf16>
    %cst_430 = arith.constant dense<0.000000e+00> : vector<8x8xf32>
    %1144 = tpu.matmul %1139, %1141, %cst_430 {dimension_numbers = #tpu.dot_dimension_numbers<[1], [1], [0], [0], [0, 0, 1, 0], [], []>} : vector<8x32xbf16>, vector<8x32xbf16>, vector<8x8xf32> -> vector<8x8xf32>
    %cst_431 = arith.constant 0.176776692 : f32
    %1145 = vector.broadcast %cst_431 : f32 to vector<8x8xf32>
    %1146 = arith.mulf %1144, %1145 : vector<8x8xf32>
    %1147 = arith.addf %1146, %1058 : vector<8x8xf32>
    %cst_432 = arith.constant dense<0xFF800000> : vector<8xf32>
    %1148 = vector.multi_reduction <maximumf>, %1147, %cst_432 [1] : vector<8x8xf32> to vector<8xf32>
    %1149 = vector.shape_cast %1148 : vector<8xf32> to vector<8x1xf32>
    %1150 = vector.broadcast %1149 : vector<8x1xf32> to vector<8x8xf32>
    %1151 = arith.subf %1147, %1150 : vector<8x8xf32>
    %1152 = math.exp %1151 : vector<8x8xf32>
    %cst_433 = arith.constant dense<0.000000e+00> : vector<8xf32>
    %1153 = vector.multi_reduction <add>, %1152, %cst_433 [1] : vector<8x8xf32> to vector<8xf32>
    %1154 = vector.shape_cast %1153 : vector<8xf32> to vector<8x1xf32>
    %1155 = tpu.reciprocal %1154 {approx = true} : vector<8x1xf32> -> vector<8x1xf32>
    %1156 = vector.broadcast %1155 : vector<8x1xf32> to vector<8x8xf32>
    %1157 = arith.mulf %1152, %1156 : vector<8x8xf32>
    %1158 = arith.truncf %1157 : vector<8x8xf32> to vector<8x8xbf16>
    %cst_434 = arith.constant dense<0.000000e+00> : vector<8x32xf32>
    %1159 = tpu.matmul %1158, %1143, %cst_434 {dimension_numbers = #tpu.dot_dimension_numbers<[1], [0], [0], [1], [0, 0, 1, 1], [], []>} : vector<8x8xbf16>, vector<8x32xbf16>, vector<8x32xf32> -> vector<8x32xf32>
    %1160 = arith.truncf %1159 : vector<8x32xf32> to vector<8x32xbf16>
    %1161 = vector.extract_strided_slice %1052 {offsets = [96, 0], sizes = [32, 128], strides = [1, 1]} : vector<128x128xbf16> to vector<32x128xbf16>
    %cst_435 = arith.constant dense<0.000000e+00> : vector<8x128xf32>
    %1162 = tpu.matmul %1160, %1161, %cst_435 {dimension_numbers = #tpu.dot_dimension_numbers<[1], [0], [0], [1], [0, 0, 1, 1], [], []>} : vector<8x32xbf16>, vector<32x128xbf16>, vector<8x128xf32> -> vector<8x128xf32>
    %1163 = arith.addf %1137, %1162 : vector<8x128xf32>
    %c3_436 = arith.constant 3 : index
    %c0_437 = arith.constant 0 : index
    %c0_438 = arith.constant 0 : index
    %1164 = vector.load %arg6[%c3_436, %c0_437, %c0_438] : memref<4x1x128xf32, #tpu.memory_space<vmem>>, vector<1x1x128xf32>
    %1165 = vector.shape_cast %1164 : vector<1x1x128xf32> to vector<1x128xf32>
    %1166 = vector.broadcast %1165 : vector<1x128xf32> to vector<8x128xf32>
    %1167 = arith.addf %1163, %1166 : vector<8x128xf32>
    %1168 = arith.addf %1039, %1167 : vector<8x128xf32>
    %c3_439 = arith.constant 3 : index
    %c0_440 = arith.constant 0 : index
    %c0_441 = arith.constant 0 : index
    %1169 = vector.load %arg7[%c3_439, %c0_440, %c0_441] : memref<4x1x128xf32, #tpu.memory_space<vmem>>, vector<1x1x128xf32>
    %1170 = vector.shape_cast %1169 : vector<1x1x128xf32> to vector<1x128xf32>
    %c3_442 = arith.constant 3 : index
    %c0_443 = arith.constant 0 : index
    %c0_444 = arith.constant 0 : index
    %1171 = vector.load %arg8[%c3_442, %c0_443, %c0_444] : memref<4x1x128xf32, #tpu.memory_space<vmem>>, vector<1x1x128xf32>
    %1172 = vector.shape_cast %1171 : vector<1x1x128xf32> to vector<1x128xf32>
    %cst_445 = arith.constant dense<0.000000e+00> : vector<8xf32>
    %1173 = vector.multi_reduction <add>, %1168, %cst_445 [1] : vector<8x128xf32> to vector<8xf32>
    %1174 = vector.shape_cast %1173 : vector<8xf32> to vector<8x1xf32>
    %cst_446 = arith.constant 1.280000e+02 : f32
    %1175 = vector.broadcast %cst_446 : f32 to vector<8x1xf32>
    %1176 = arith.divf %1174, %1175 : vector<8x1xf32>
    %1177 = vector.broadcast %1176 : vector<8x1xf32> to vector<8x128xf32>
    %1178 = arith.subf %1168, %1177 : vector<8x128xf32>
    %1179 = arith.mulf %1178, %1178 : vector<8x128xf32>
    %cst_447 = arith.constant dense<0.000000e+00> : vector<8xf32>
    %1180 = vector.multi_reduction <add>, %1179, %cst_447 [1] : vector<8x128xf32> to vector<8xf32>
    %1181 = vector.shape_cast %1180 : vector<8xf32> to vector<8x1xf32>
    %cst_448 = arith.constant 1.280000e+02 : f32
    %1182 = vector.broadcast %cst_448 : f32 to vector<8x1xf32>
    %1183 = arith.divf %1181, %1182 : vector<8x1xf32>
    %cst_449 = arith.constant 9.99999974E-6 : f32
    %1184 = vector.broadcast %cst_449 : f32 to vector<8x1xf32>
    %1185 = arith.addf %1183, %1184 : vector<8x1xf32>
    %1186 = math.rsqrt %1185 : vector<8x1xf32>
    %1187 = vector.broadcast %1186 : vector<8x1xf32> to vector<8x128xf32>
    %1188 = arith.mulf %1178, %1187 : vector<8x128xf32>
    %1189 = vector.broadcast %1170 : vector<1x128xf32> to vector<8x128xf32>
    %1190 = arith.mulf %1188, %1189 : vector<8x128xf32>
    %1191 = vector.broadcast %1172 : vector<1x128xf32> to vector<8x128xf32>
    %1192 = arith.addf %1190, %1191 : vector<8x128xf32>
    %1193 = arith.truncf %1192 : vector<8x128xf32> to vector<8x128xbf16>
    %c3_450 = arith.constant 3 : index
    %c0_451 = arith.constant 0 : index
    %c0_452 = arith.constant 0 : index
    %1194 = vector.load %arg9[%c3_450, %c0_451, %c0_452] : memref<4x128x128xbf16, #tpu.memory_space<vmem>>, vector<1x128x128xbf16>
    %1195 = vector.shape_cast %1194 : vector<1x128x128xbf16> to vector<128x128xbf16>
    %cst_453 = arith.constant dense<0.000000e+00> : vector<8x128xf32>
    %1196 = tpu.matmul %1193, %1195, %cst_453 {dimension_numbers = #tpu.dot_dimension_numbers<[1], [0], [0], [1], [0, 0, 1, 1], [], []>} : vector<8x128xbf16>, vector<128x128xbf16>, vector<8x128xf32> -> vector<8x128xf32>
    %c3_454 = arith.constant 3 : index
    %c0_455 = arith.constant 0 : index
    %c0_456 = arith.constant 0 : index
    %1197 = vector.load %arg10[%c3_454, %c0_455, %c0_456] : memref<4x1x128xf32, #tpu.memory_space<vmem>>, vector<1x1x128xf32>
    %1198 = vector.shape_cast %1197 : vector<1x1x128xf32> to vector<1x128xf32>
    %1199 = vector.broadcast %1198 : vector<1x128xf32> to vector<8x128xf32>
    %1200 = arith.addf %1196, %1199 : vector<8x128xf32>
    %c3_457 = arith.constant 3 : index
    %c0_458 = arith.constant 0 : index
    %c0_459 = arith.constant 0 : index
    %1201 = vector.load %arg11[%c3_457, %c0_458, %c0_459] : memref<4x128x256xbf16, #tpu.memory_space<vmem>>, vector<1x128x256xbf16>
    %1202 = vector.shape_cast %1201 : vector<1x128x256xbf16> to vector<128x256xbf16>
    %cst_460 = arith.constant dense<0.000000e+00> : vector<8x256xf32>
    %1203 = tpu.matmul %4, %1202, %cst_460 {dimension_numbers = #tpu.dot_dimension_numbers<[1], [0], [0], [1], [0, 0, 1, 1], [], []>} : vector<8x128xbf16>, vector<128x256xbf16>, vector<8x256xf32> -> vector<8x256xf32>
    %c3_461 = arith.constant 3 : index
    %c0_462 = arith.constant 0 : index
    %c0_463 = arith.constant 0 : index
    %1204 = vector.load %arg12[%c3_461, %c0_462, %c0_463] : memref<4x1x256xf32, #tpu.memory_space<vmem>>, vector<1x1x256xf32>
    %1205 = vector.shape_cast %1204 : vector<1x1x256xf32> to vector<1x256xf32>
    %1206 = vector.broadcast %1205 : vector<1x256xf32> to vector<8x256xf32>
    %1207 = arith.addf %1203, %1206 : vector<8x256xf32>
    %1208 = vector.extract_strided_slice %1207 {offsets = [0, 0], sizes = [8, 128], strides = [1, 1]} : vector<8x256xf32> to vector<8x128xf32>
    %1209 = vector.extract_strided_slice %1207 {offsets = [0, 128], sizes = [8, 128], strides = [1, 1]} : vector<8x256xf32> to vector<8x128xf32>
    %c3_464 = arith.constant 3 : index
    %c0_465 = arith.constant 0 : index
    %c0_466 = arith.constant 0 : index
    %1210 = vector.load %arg13[%c3_464, %c0_465, %c0_466] : memref<4x128x128xbf16, #tpu.memory_space<vmem>>, vector<1x128x128xbf16>
    %1211 = vector.shape_cast %1210 : vector<1x128x128xbf16> to vector<128x128xbf16>
    %cst_467 = arith.constant 0.000000e+00 : f32
    %1212 = vector.broadcast %cst_467 : f32 to vector<8x128xf32>
    %1213 = vector.extract_strided_slice %1200 {offsets = [0, 0], sizes = [8, 32], strides = [1, 1]} : vector<8x128xf32> to vector<8x32xf32>
    %1214 = arith.truncf %1213 : vector<8x32xf32> to vector<8x32xbf16>
    %1215 = vector.extract_strided_slice %1208 {offsets = [0, 0], sizes = [8, 32], strides = [1, 1]} : vector<8x128xf32> to vector<8x32xf32>
    %1216 = arith.truncf %1215 : vector<8x32xf32> to vector<8x32xbf16>
    %1217 = vector.extract_strided_slice %1209 {offsets = [0, 0], sizes = [8, 32], strides = [1, 1]} : vector<8x128xf32> to vector<8x32xf32>
    %1218 = arith.truncf %1217 : vector<8x32xf32> to vector<8x32xbf16>
    %cst_468 = arith.constant dense<0.000000e+00> : vector<8x8xf32>
    %1219 = tpu.matmul %1214, %1216, %cst_468 {dimension_numbers = #tpu.dot_dimension_numbers<[1], [1], [0], [0], [0, 0, 1, 0], [], []>} : vector<8x32xbf16>, vector<8x32xbf16>, vector<8x8xf32> -> vector<8x8xf32>
    %cst_469 = arith.constant 0.176776692 : f32
    %1220 = vector.broadcast %cst_469 : f32 to vector<8x8xf32>
    %1221 = arith.mulf %1219, %1220 : vector<8x8xf32>
    %cst_470 = arith.constant dense<0xFF800000> : vector<8xf32>
    %1222 = vector.multi_reduction <maximumf>, %1221, %cst_470 [1] : vector<8x8xf32> to vector<8xf32>
    %1223 = vector.shape_cast %1222 : vector<8xf32> to vector<8x1xf32>
    %1224 = vector.broadcast %1223 : vector<8x1xf32> to vector<8x8xf32>
    %1225 = arith.subf %1221, %1224 : vector<8x8xf32>
    %1226 = math.exp %1225 : vector<8x8xf32>
    %cst_471 = arith.constant dense<0.000000e+00> : vector<8xf32>
    %1227 = vector.multi_reduction <add>, %1226, %cst_471 [1] : vector<8x8xf32> to vector<8xf32>
    %1228 = vector.shape_cast %1227 : vector<8xf32> to vector<8x1xf32>
    %1229 = tpu.reciprocal %1228 {approx = true} : vector<8x1xf32> -> vector<8x1xf32>
    %1230 = vector.broadcast %1229 : vector<8x1xf32> to vector<8x8xf32>
    %1231 = arith.mulf %1226, %1230 : vector<8x8xf32>
    %1232 = arith.truncf %1231 : vector<8x8xf32> to vector<8x8xbf16>
    %cst_472 = arith.constant dense<0.000000e+00> : vector<8x32xf32>
    %1233 = tpu.matmul %1232, %1218, %cst_472 {dimension_numbers = #tpu.dot_dimension_numbers<[1], [0], [0], [1], [0, 0, 1, 1], [], []>} : vector<8x8xbf16>, vector<8x32xbf16>, vector<8x32xf32> -> vector<8x32xf32>
    %1234 = arith.truncf %1233 : vector<8x32xf32> to vector<8x32xbf16>
    %1235 = vector.extract_strided_slice %1211 {offsets = [0, 0], sizes = [32, 128], strides = [1, 1]} : vector<128x128xbf16> to vector<32x128xbf16>
    %cst_473 = arith.constant dense<0.000000e+00> : vector<8x128xf32>
    %1236 = tpu.matmul %1234, %1235, %cst_473 {dimension_numbers = #tpu.dot_dimension_numbers<[1], [0], [0], [1], [0, 0, 1, 1], [], []>} : vector<8x32xbf16>, vector<32x128xbf16>, vector<8x128xf32> -> vector<8x128xf32>
    %1237 = arith.addf %1212, %1236 : vector<8x128xf32>
    %1238 = vector.extract_strided_slice %1200 {offsets = [0, 32], sizes = [8, 32], strides = [1, 1]} : vector<8x128xf32> to vector<8x32xf32>
    %1239 = arith.truncf %1238 : vector<8x32xf32> to vector<8x32xbf16>
    %1240 = vector.extract_strided_slice %1208 {offsets = [0, 32], sizes = [8, 32], strides = [1, 1]} : vector<8x128xf32> to vector<8x32xf32>
    %1241 = arith.truncf %1240 : vector<8x32xf32> to vector<8x32xbf16>
    %1242 = vector.extract_strided_slice %1209 {offsets = [0, 32], sizes = [8, 32], strides = [1, 1]} : vector<8x128xf32> to vector<8x32xf32>
    %1243 = arith.truncf %1242 : vector<8x32xf32> to vector<8x32xbf16>
    %cst_474 = arith.constant dense<0.000000e+00> : vector<8x8xf32>
    %1244 = tpu.matmul %1239, %1241, %cst_474 {dimension_numbers = #tpu.dot_dimension_numbers<[1], [1], [0], [0], [0, 0, 1, 0], [], []>} : vector<8x32xbf16>, vector<8x32xbf16>, vector<8x8xf32> -> vector<8x8xf32>
    %cst_475 = arith.constant 0.176776692 : f32
    %1245 = vector.broadcast %cst_475 : f32 to vector<8x8xf32>
    %1246 = arith.mulf %1244, %1245 : vector<8x8xf32>
    %cst_476 = arith.constant dense<0xFF800000> : vector<8xf32>
    %1247 = vector.multi_reduction <maximumf>, %1246, %cst_476 [1] : vector<8x8xf32> to vector<8xf32>
    %1248 = vector.shape_cast %1247 : vector<8xf32> to vector<8x1xf32>
    %1249 = vector.broadcast %1248 : vector<8x1xf32> to vector<8x8xf32>
    %1250 = arith.subf %1246, %1249 : vector<8x8xf32>
    %1251 = math.exp %1250 : vector<8x8xf32>
    %cst_477 = arith.constant dense<0.000000e+00> : vector<8xf32>
    %1252 = vector.multi_reduction <add>, %1251, %cst_477 [1] : vector<8x8xf32> to vector<8xf32>
    %1253 = vector.shape_cast %1252 : vector<8xf32> to vector<8x1xf32>
    %1254 = tpu.reciprocal %1253 {approx = true} : vector<8x1xf32> -> vector<8x1xf32>
    %1255 = vector.broadcast %1254 : vector<8x1xf32> to vector<8x8xf32>
    %1256 = arith.mulf %1251, %1255 : vector<8x8xf32>
    %1257 = arith.truncf %1256 : vector<8x8xf32> to vector<8x8xbf16>
    %cst_478 = arith.constant dense<0.000000e+00> : vector<8x32xf32>
    %1258 = tpu.matmul %1257, %1243, %cst_478 {dimension_numbers = #tpu.dot_dimension_numbers<[1], [0], [0], [1], [0, 0, 1, 1], [], []>} : vector<8x8xbf16>, vector<8x32xbf16>, vector<8x32xf32> -> vector<8x32xf32>
    %1259 = arith.truncf %1258 : vector<8x32xf32> to vector<8x32xbf16>
    %1260 = vector.extract_strided_slice %1211 {offsets = [32, 0], sizes = [32, 128], strides = [1, 1]} : vector<128x128xbf16> to vector<32x128xbf16>
    %cst_479 = arith.constant dense<0.000000e+00> : vector<8x128xf32>
    %1261 = tpu.matmul %1259, %1260, %cst_479 {dimension_numbers = #tpu.dot_dimension_numbers<[1], [0], [0], [1], [0, 0, 1, 1], [], []>} : vector<8x32xbf16>, vector<32x128xbf16>, vector<8x128xf32> -> vector<8x128xf32>
    %1262 = arith.addf %1237, %1261 : vector<8x128xf32>
    %1263 = vector.extract_strided_slice %1200 {offsets = [0, 64], sizes = [8, 32], strides = [1, 1]} : vector<8x128xf32> to vector<8x32xf32>
    %1264 = arith.truncf %1263 : vector<8x32xf32> to vector<8x32xbf16>
    %1265 = vector.extract_strided_slice %1208 {offsets = [0, 64], sizes = [8, 32], strides = [1, 1]} : vector<8x128xf32> to vector<8x32xf32>
    %1266 = arith.truncf %1265 : vector<8x32xf32> to vector<8x32xbf16>
    %1267 = vector.extract_strided_slice %1209 {offsets = [0, 64], sizes = [8, 32], strides = [1, 1]} : vector<8x128xf32> to vector<8x32xf32>
    %1268 = arith.truncf %1267 : vector<8x32xf32> to vector<8x32xbf16>
    %cst_480 = arith.constant dense<0.000000e+00> : vector<8x8xf32>
    %1269 = tpu.matmul %1264, %1266, %cst_480 {dimension_numbers = #tpu.dot_dimension_numbers<[1], [1], [0], [0], [0, 0, 1, 0], [], []>} : vector<8x32xbf16>, vector<8x32xbf16>, vector<8x8xf32> -> vector<8x8xf32>
    %cst_481 = arith.constant 0.176776692 : f32
    %1270 = vector.broadcast %cst_481 : f32 to vector<8x8xf32>
    %1271 = arith.mulf %1269, %1270 : vector<8x8xf32>
    %cst_482 = arith.constant dense<0xFF800000> : vector<8xf32>
    %1272 = vector.multi_reduction <maximumf>, %1271, %cst_482 [1] : vector<8x8xf32> to vector<8xf32>
    %1273 = vector.shape_cast %1272 : vector<8xf32> to vector<8x1xf32>
    %1274 = vector.broadcast %1273 : vector<8x1xf32> to vector<8x8xf32>
    %1275 = arith.subf %1271, %1274 : vector<8x8xf32>
    %1276 = math.exp %1275 : vector<8x8xf32>
    %cst_483 = arith.constant dense<0.000000e+00> : vector<8xf32>
    %1277 = vector.multi_reduction <add>, %1276, %cst_483 [1] : vector<8x8xf32> to vector<8xf32>
    %1278 = vector.shape_cast %1277 : vector<8xf32> to vector<8x1xf32>
    %1279 = tpu.reciprocal %1278 {approx = true} : vector<8x1xf32> -> vector<8x1xf32>
    %1280 = vector.broadcast %1279 : vector<8x1xf32> to vector<8x8xf32>
    %1281 = arith.mulf %1276, %1280 : vector<8x8xf32>
    %1282 = arith.truncf %1281 : vector<8x8xf32> to vector<8x8xbf16>
    %cst_484 = arith.constant dense<0.000000e+00> : vector<8x32xf32>
    %1283 = tpu.matmul %1282, %1268, %cst_484 {dimension_numbers = #tpu.dot_dimension_numbers<[1], [0], [0], [1], [0, 0, 1, 1], [], []>} : vector<8x8xbf16>, vector<8x32xbf16>, vector<8x32xf32> -> vector<8x32xf32>
    %1284 = arith.truncf %1283 : vector<8x32xf32> to vector<8x32xbf16>
    %1285 = vector.extract_strided_slice %1211 {offsets = [64, 0], sizes = [32, 128], strides = [1, 1]} : vector<128x128xbf16> to vector<32x128xbf16>
    %cst_485 = arith.constant dense<0.000000e+00> : vector<8x128xf32>
    %1286 = tpu.matmul %1284, %1285, %cst_485 {dimension_numbers = #tpu.dot_dimension_numbers<[1], [0], [0], [1], [0, 0, 1, 1], [], []>} : vector<8x32xbf16>, vector<32x128xbf16>, vector<8x128xf32> -> vector<8x128xf32>
    %1287 = arith.addf %1262, %1286 : vector<8x128xf32>
    %1288 = vector.extract_strided_slice %1200 {offsets = [0, 96], sizes = [8, 32], strides = [1, 1]} : vector<8x128xf32> to vector<8x32xf32>
    %1289 = arith.truncf %1288 : vector<8x32xf32> to vector<8x32xbf16>
    %1290 = vector.extract_strided_slice %1208 {offsets = [0, 96], sizes = [8, 32], strides = [1, 1]} : vector<8x128xf32> to vector<8x32xf32>
    %1291 = arith.truncf %1290 : vector<8x32xf32> to vector<8x32xbf16>
    %1292 = vector.extract_strided_slice %1209 {offsets = [0, 96], sizes = [8, 32], strides = [1, 1]} : vector<8x128xf32> to vector<8x32xf32>
    %1293 = arith.truncf %1292 : vector<8x32xf32> to vector<8x32xbf16>
    %cst_486 = arith.constant dense<0.000000e+00> : vector<8x8xf32>
    %1294 = tpu.matmul %1289, %1291, %cst_486 {dimension_numbers = #tpu.dot_dimension_numbers<[1], [1], [0], [0], [0, 0, 1, 0], [], []>} : vector<8x32xbf16>, vector<8x32xbf16>, vector<8x8xf32> -> vector<8x8xf32>
    %cst_487 = arith.constant 0.176776692 : f32
    %1295 = vector.broadcast %cst_487 : f32 to vector<8x8xf32>
    %1296 = arith.mulf %1294, %1295 : vector<8x8xf32>
    %cst_488 = arith.constant dense<0xFF800000> : vector<8xf32>
    %1297 = vector.multi_reduction <maximumf>, %1296, %cst_488 [1] : vector<8x8xf32> to vector<8xf32>
    %1298 = vector.shape_cast %1297 : vector<8xf32> to vector<8x1xf32>
    %1299 = vector.broadcast %1298 : vector<8x1xf32> to vector<8x8xf32>
    %1300 = arith.subf %1296, %1299 : vector<8x8xf32>
    %1301 = math.exp %1300 : vector<8x8xf32>
    %cst_489 = arith.constant dense<0.000000e+00> : vector<8xf32>
    %1302 = vector.multi_reduction <add>, %1301, %cst_489 [1] : vector<8x8xf32> to vector<8xf32>
    %1303 = vector.shape_cast %1302 : vector<8xf32> to vector<8x1xf32>
    %1304 = tpu.reciprocal %1303 {approx = true} : vector<8x1xf32> -> vector<8x1xf32>
    %1305 = vector.broadcast %1304 : vector<8x1xf32> to vector<8x8xf32>
    %1306 = arith.mulf %1301, %1305 : vector<8x8xf32>
    %1307 = arith.truncf %1306 : vector<8x8xf32> to vector<8x8xbf16>
    %cst_490 = arith.constant dense<0.000000e+00> : vector<8x32xf32>
    %1308 = tpu.matmul %1307, %1293, %cst_490 {dimension_numbers = #tpu.dot_dimension_numbers<[1], [0], [0], [1], [0, 0, 1, 1], [], []>} : vector<8x8xbf16>, vector<8x32xbf16>, vector<8x32xf32> -> vector<8x32xf32>
    %1309 = arith.truncf %1308 : vector<8x32xf32> to vector<8x32xbf16>
    %1310 = vector.extract_strided_slice %1211 {offsets = [96, 0], sizes = [32, 128], strides = [1, 1]} : vector<128x128xbf16> to vector<32x128xbf16>
    %cst_491 = arith.constant dense<0.000000e+00> : vector<8x128xf32>
    %1311 = tpu.matmul %1309, %1310, %cst_491 {dimension_numbers = #tpu.dot_dimension_numbers<[1], [0], [0], [1], [0, 0, 1, 1], [], []>} : vector<8x32xbf16>, vector<32x128xbf16>, vector<8x128xf32> -> vector<8x128xf32>
    %1312 = arith.addf %1287, %1311 : vector<8x128xf32>
    %c3_492 = arith.constant 3 : index
    %c0_493 = arith.constant 0 : index
    %c0_494 = arith.constant 0 : index
    %1313 = vector.load %arg14[%c3_492, %c0_493, %c0_494] : memref<4x1x128xf32, #tpu.memory_space<vmem>>, vector<1x1x128xf32>
    %1314 = vector.shape_cast %1313 : vector<1x1x128xf32> to vector<1x128xf32>
    %1315 = vector.broadcast %1314 : vector<1x128xf32> to vector<8x128xf32>
    %1316 = arith.addf %1312, %1315 : vector<8x128xf32>
    %1317 = arith.addf %1192, %1316 : vector<8x128xf32>
    %c3_495 = arith.constant 3 : index
    %c0_496 = arith.constant 0 : index
    %c0_497 = arith.constant 0 : index
    %1318 = vector.load %arg15[%c3_495, %c0_496, %c0_497] : memref<4x1x128xf32, #tpu.memory_space<vmem>>, vector<1x1x128xf32>
    %1319 = vector.shape_cast %1318 : vector<1x1x128xf32> to vector<1x128xf32>
    %c3_498 = arith.constant 3 : index
    %c0_499 = arith.constant 0 : index
    %c0_500 = arith.constant 0 : index
    %1320 = vector.load %arg16[%c3_498, %c0_499, %c0_500] : memref<4x1x128xf32, #tpu.memory_space<vmem>>, vector<1x1x128xf32>
    %1321 = vector.shape_cast %1320 : vector<1x1x128xf32> to vector<1x128xf32>
    %cst_501 = arith.constant dense<0.000000e+00> : vector<8xf32>
    %1322 = vector.multi_reduction <add>, %1317, %cst_501 [1] : vector<8x128xf32> to vector<8xf32>
    %1323 = vector.shape_cast %1322 : vector<8xf32> to vector<8x1xf32>
    %cst_502 = arith.constant 1.280000e+02 : f32
    %1324 = vector.broadcast %cst_502 : f32 to vector<8x1xf32>
    %1325 = arith.divf %1323, %1324 : vector<8x1xf32>
    %1326 = vector.broadcast %1325 : vector<8x1xf32> to vector<8x128xf32>
    %1327 = arith.subf %1317, %1326 : vector<8x128xf32>
    %1328 = arith.mulf %1327, %1327 : vector<8x128xf32>
    %cst_503 = arith.constant dense<0.000000e+00> : vector<8xf32>
    %1329 = vector.multi_reduction <add>, %1328, %cst_503 [1] : vector<8x128xf32> to vector<8xf32>
    %1330 = vector.shape_cast %1329 : vector<8xf32> to vector<8x1xf32>
    %cst_504 = arith.constant 1.280000e+02 : f32
    %1331 = vector.broadcast %cst_504 : f32 to vector<8x1xf32>
    %1332 = arith.divf %1330, %1331 : vector<8x1xf32>
    %cst_505 = arith.constant 9.99999974E-6 : f32
    %1333 = vector.broadcast %cst_505 : f32 to vector<8x1xf32>
    %1334 = arith.addf %1332, %1333 : vector<8x1xf32>
    %1335 = math.rsqrt %1334 : vector<8x1xf32>
    %1336 = vector.broadcast %1335 : vector<8x1xf32> to vector<8x128xf32>
    %1337 = arith.mulf %1327, %1336 : vector<8x128xf32>
    %1338 = vector.broadcast %1319 : vector<1x128xf32> to vector<8x128xf32>
    %1339 = arith.mulf %1337, %1338 : vector<8x128xf32>
    %1340 = vector.broadcast %1321 : vector<1x128xf32> to vector<8x128xf32>
    %1341 = arith.addf %1339, %1340 : vector<8x128xf32>
    %1342 = arith.truncf %1341 : vector<8x128xf32> to vector<8x128xbf16>
    %c3_506 = arith.constant 3 : index
    %c0_507 = arith.constant 0 : index
    %c0_508 = arith.constant 0 : index
    %1343 = vector.load %arg17[%c3_506, %c0_507, %c0_508] : memref<4x128x512xbf16, #tpu.memory_space<vmem>>, vector<1x128x512xbf16>
    %1344 = vector.shape_cast %1343 : vector<1x128x512xbf16> to vector<128x512xbf16>
    %cst_509 = arith.constant dense<0.000000e+00> : vector<8x512xf32>
    %1345 = tpu.matmul %1342, %1344, %cst_509 {dimension_numbers = #tpu.dot_dimension_numbers<[1], [0], [0], [1], [0, 0, 1, 1], [], []>} : vector<8x128xbf16>, vector<128x512xbf16>, vector<8x512xf32> -> vector<8x512xf32>
    %c3_510 = arith.constant 3 : index
    %c0_511 = arith.constant 0 : index
    %c0_512 = arith.constant 0 : index
    %1346 = vector.load %arg18[%c3_510, %c0_511, %c0_512] : memref<4x1x512xf32, #tpu.memory_space<vmem>>, vector<1x1x512xf32>
    %1347 = vector.shape_cast %1346 : vector<1x1x512xf32> to vector<1x512xf32>
    %1348 = vector.broadcast %1347 : vector<1x512xf32> to vector<8x512xf32>
    %1349 = arith.addf %1345, %1348 : vector<8x512xf32>
    %cst_513 = arith.constant 0.000000e+00 : f32
    %1350 = vector.broadcast %cst_513 : f32 to vector<8x512xf32>
    %1351 = arith.maximumf %1349, %1350 : vector<8x512xf32>
    %1352 = arith.truncf %1351 : vector<8x512xf32> to vector<8x512xbf16>
    %c3_514 = arith.constant 3 : index
    %c0_515 = arith.constant 0 : index
    %c0_516 = arith.constant 0 : index
    %1353 = vector.load %arg19[%c3_514, %c0_515, %c0_516] : memref<4x512x128xbf16, #tpu.memory_space<vmem>>, vector<1x512x128xbf16>
    %1354 = vector.shape_cast %1353 : vector<1x512x128xbf16> to vector<512x128xbf16>
    %cst_517 = arith.constant dense<0.000000e+00> : vector<8x128xf32>
    %1355 = tpu.matmul %1352, %1354, %cst_517 {dimension_numbers = #tpu.dot_dimension_numbers<[1], [0], [0], [1], [0, 0, 1, 1], [], []>} : vector<8x512xbf16>, vector<512x128xbf16>, vector<8x128xf32> -> vector<8x128xf32>
    %c3_518 = arith.constant 3 : index
    %c0_519 = arith.constant 0 : index
    %c0_520 = arith.constant 0 : index
    %1356 = vector.load %arg20[%c3_518, %c0_519, %c0_520] : memref<4x1x128xf32, #tpu.memory_space<vmem>>, vector<1x1x128xf32>
    %1357 = vector.shape_cast %1356 : vector<1x1x128xf32> to vector<1x128xf32>
    %1358 = vector.broadcast %1357 : vector<1x128xf32> to vector<8x128xf32>
    %1359 = arith.addf %1355, %1358 : vector<8x128xf32>
    %1360 = arith.addf %1341, %1359 : vector<8x128xf32>
    %c3_521 = arith.constant 3 : index
    %c0_522 = arith.constant 0 : index
    %c0_523 = arith.constant 0 : index
    %1361 = vector.load %arg21[%c3_521, %c0_522, %c0_523] : memref<4x1x128xf32, #tpu.memory_space<vmem>>, vector<1x1x128xf32>
    %1362 = vector.shape_cast %1361 : vector<1x1x128xf32> to vector<1x128xf32>
    %c3_524 = arith.constant 3 : index
    %c0_525 = arith.constant 0 : index
    %c0_526 = arith.constant 0 : index
    %1363 = vector.load %arg22[%c3_524, %c0_525, %c0_526] : memref<4x1x128xf32, #tpu.memory_space<vmem>>, vector<1x1x128xf32>
    %1364 = vector.shape_cast %1363 : vector<1x1x128xf32> to vector<1x128xf32>
    %cst_527 = arith.constant dense<0.000000e+00> : vector<8xf32>
    %1365 = vector.multi_reduction <add>, %1360, %cst_527 [1] : vector<8x128xf32> to vector<8xf32>
    %1366 = vector.shape_cast %1365 : vector<8xf32> to vector<8x1xf32>
    %cst_528 = arith.constant 1.280000e+02 : f32
    %1367 = vector.broadcast %cst_528 : f32 to vector<8x1xf32>
    %1368 = arith.divf %1366, %1367 : vector<8x1xf32>
    %1369 = vector.broadcast %1368 : vector<8x1xf32> to vector<8x128xf32>
    %1370 = arith.subf %1360, %1369 : vector<8x128xf32>
    %1371 = arith.mulf %1370, %1370 : vector<8x128xf32>
    %cst_529 = arith.constant dense<0.000000e+00> : vector<8xf32>
    %1372 = vector.multi_reduction <add>, %1371, %cst_529 [1] : vector<8x128xf32> to vector<8xf32>
    %1373 = vector.shape_cast %1372 : vector<8xf32> to vector<8x1xf32>
    %cst_530 = arith.constant 1.280000e+02 : f32
    %1374 = vector.broadcast %cst_530 : f32 to vector<8x1xf32>
    %1375 = arith.divf %1373, %1374 : vector<8x1xf32>
    %cst_531 = arith.constant 9.99999974E-6 : f32
    %1376 = vector.broadcast %cst_531 : f32 to vector<8x1xf32>
    %1377 = arith.addf %1375, %1376 : vector<8x1xf32>
    %1378 = math.rsqrt %1377 : vector<8x1xf32>
    %1379 = vector.broadcast %1378 : vector<8x1xf32> to vector<8x128xf32>
    %1380 = arith.mulf %1370, %1379 : vector<8x128xf32>
    %1381 = vector.broadcast %1362 : vector<1x128xf32> to vector<8x128xf32>
    %1382 = arith.mulf %1380, %1381 : vector<8x128xf32>
    %1383 = vector.broadcast %1364 : vector<1x128xf32> to vector<8x128xf32>
    %1384 = arith.addf %1382, %1383 : vector<8x128xf32>
    %1385 = arith.truncf %1384 : vector<8x128xf32> to vector<8x128xbf16>
    %c0_532 = arith.constant 0 : index
    %c0_533 = arith.constant 0 : index
    %1386 = vector.load %arg23[%c0_532, %c0_533] : memref<128x128xbf16, #tpu.memory_space<vmem>>, vector<128x128xbf16>
    %cst_534 = arith.constant dense<0.000000e+00> : vector<8x128xf32>
    %1387 = tpu.matmul %1385, %1386, %cst_534 {dimension_numbers = #tpu.dot_dimension_numbers<[1], [0], [0], [1], [0, 0, 1, 1], [], []>} : vector<8x128xbf16>, vector<128x128xbf16>, vector<8x128xf32> -> vector<8x128xf32>
    %c0_535 = arith.constant 0 : index
    %c0_536 = arith.constant 0 : index
    %1388 = vector.load %arg24[%c0_535, %c0_536] : memref<1x128xf32, #tpu.memory_space<vmem>>, vector<1x128xf32>
    %1389 = vector.broadcast %1388 : vector<1x128xf32> to vector<8x128xf32>
    %1390 = arith.addf %1387, %1389 : vector<8x128xf32>
    %c0_537 = arith.constant 0 : index
    %c0_538 = arith.constant 0 : index
    %c0_539 = arith.constant 0 : index
    %1391 = vector.load %arg25[%c0_537, %c0_538, %c0_539] : memref<1x8x128xf32, #tpu.memory_space<vmem>>, vector<1x8x128xf32>
    %1392 = vector.shape_cast %1391 : vector<1x8x128xf32> to vector<8x128xf32>
    %1393 = vector.shape_cast %1390 : vector<8x128xf32> to vector<1x8x128xf32>
    tpu.vector_store %arg25[%c0_537, %c0_538, %c0_539], %1393 {strides = array<i32>} : memref<1x8x128xf32, #tpu.memory_space<vmem>>, vector<1x8x128xf32>,
    return
  }
  func.func @transform_0(%arg0: i32) -> (i32, i32, i32) {
    %c0_i32 = arith.constant 0 : i32
    %c0_i32_0 = arith.constant 0 : i32
    %c0_i32_1 = arith.constant 0 : i32
    return %arg0, %c0_i32, %c0_i32_0 : i32, i32, i32
  }
  func.func @transform_1(%arg0: i32) -> (i32, i32) {
    %c0_i32 = arith.constant 0 : i32
    %c0_i32_0 = arith.constant 0 : i32
    %c0_i32_1 = arith.constant 0 : i32
    return %c0_i32, %c0_i32_0 : i32, i32
  }
  func.func @transform_2(%arg0: i32) -> (i32, i32, i32) {
    %c0_i32 = arith.constant 0 : i32
    %c0_i32_0 = arith.constant 0 : i32
    %c0_i32_1 = arith.constant 0 : i32
    %c0_i32_2 = arith.constant 0 : i32
    return %c0_i32, %c0_i32_0, %c0_i32_1 : i32, i32, i32
  }
  func.func @transform_3(%arg0: i32) -> (i32, i32, i32) {
    %c0_i32 = arith.constant 0 : i32
    %c0_i32_0 = arith.constant 0 : i32
    %c0_i32_1 = arith.constant 0 : i32
    %c0_i32_2 = arith.constant 0 : i32
    return %c0_i32, %c0_i32_0, %c0_i32_1 : i32, i32, i32
  }
  func.func @transform_4(%arg0: i32) -> (i32, i32, i32) {
    %c0_i32 = arith.constant 0 : i32
    %c0_i32_0 = arith.constant 0 : i32
    %c0_i32_1 = arith.constant 0 : i32
    %c0_i32_2 = arith.constant 0 : i32
    return %c0_i32, %c0_i32_0, %c0_i32_1 : i32, i32, i32
  }
  func.func @transform_5(%arg0: i32) -> (i32, i32, i32) {
    %c0_i32 = arith.constant 0 : i32
    %c0_i32_0 = arith.constant 0 : i32
    %c0_i32_1 = arith.constant 0 : i32
    %c0_i32_2 = arith.constant 0 : i32
    return %c0_i32, %c0_i32_0, %c0_i32_1 : i32, i32, i32
  }
  func.func @transform_6(%arg0: i32) -> (i32, i32, i32) {
    %c0_i32 = arith.constant 0 : i32
    %c0_i32_0 = arith.constant 0 : i32
    %c0_i32_1 = arith.constant 0 : i32
    %c0_i32_2 = arith.constant 0 : i32
    return %c0_i32, %c0_i32_0, %c0_i32_1 : i32, i32, i32
  }
  func.func @transform_7(%arg0: i32) -> (i32, i32, i32) {
    %c0_i32 = arith.constant 0 : i32
    %c0_i32_0 = arith.constant 0 : i32
    %c0_i32_1 = arith.constant 0 : i32
    %c0_i32_2 = arith.constant 0 : i32
    return %c0_i32, %c0_i32_0, %c0_i32_1 : i32, i32, i32
  }
  func.func @transform_8(%arg0: i32) -> (i32, i32, i32) {
    %c0_i32 = arith.constant 0 : i32
    %c0_i32_0 = arith.constant 0 : i32
    %c0_i32_1 = arith.constant 0 : i32
    %c0_i32_2 = arith.constant 0 : i32
    return %c0_i32, %c0_i32_0, %c0_i32_1 : i32, i32, i32
  }
  func.func @transform_9(%arg0: i32) -> (i32, i32, i32) {
    %c0_i32 = arith.constant 0 : i32
    %c0_i32_0 = arith.constant 0 : i32
    %c0_i32_1 = arith.constant 0 : i32
    %c0_i32_2 = arith.constant 0 : i32
    return %c0_i32, %c0_i32_0, %c0_i32_1 : i32, i32, i32
  }
  func.func @transform_10(%arg0: i32) -> (i32, i32, i32) {
    %c0_i32 = arith.constant 0 : i32
    %c0_i32_0 = arith.constant 0 : i32
    %c0_i32_1 = arith.constant 0 : i32
    %c0_i32_2 = arith.constant 0 : i32
    return %c0_i32, %c0_i32_0, %c0_i32_1 : i32, i32, i32
  }
  func.func @transform_11(%arg0: i32) -> (i32, i32, i32) {
    %c0_i32 = arith.constant 0 : i32
    %c0_i32_0 = arith.constant 0 : i32
    %c0_i32_1 = arith.constant 0 : i32
    %c0_i32_2 = arith.constant 0 : i32
    return %c0_i32, %c0_i32_0, %c0_i32_1 : i32, i32, i32
  }
  func.func @transform_12(%arg0: i32) -> (i32, i32, i32) {
    %c0_i32 = arith.constant 0 : i32
    %c0_i32_0 = arith.constant 0 : i32
    %c0_i32_1 = arith.constant 0 : i32
    %c0_i32_2 = arith.constant 0 : i32
    return %c0_i32, %c0_i32_0, %c0_i32_1 : i32, i32, i32
  }
  func.func @transform_13(%arg0: i32) -> (i32, i32, i32) {
    %c0_i32 = arith.constant 0 : i32
    %c0_i32_0 = arith.constant 0 : i32
    %c0_i32_1 = arith.constant 0 : i32
    %c0_i32_2 = arith.constant 0 : i32
    return %c0_i32, %c0_i32_0, %c0_i32_1 : i32, i32, i32
  }
  func.func @transform_14(%arg0: i32) -> (i32, i32, i32) {
    %c0_i32 = arith.constant 0 : i32
    %c0_i32_0 = arith.constant 0 : i32
    %c0_i32_1 = arith.constant 0 : i32
    %c0_i32_2 = arith.constant 0 : i32
    return %c0_i32, %c0_i32_0, %c0_i32_1 : i32, i32, i32
  }
  func.func @transform_15(%arg0: i32) -> (i32, i32, i32) {
    %c0_i32 = arith.constant 0 : i32
    %c0_i32_0 = arith.constant 0 : i32
    %c0_i32_1 = arith.constant 0 : i32
    %c0_i32_2 = arith.constant 0 : i32
    return %c0_i32, %c0_i32_0, %c0_i32_1 : i32, i32, i32
  }
  func.func @transform_16(%arg0: i32) -> (i32, i32, i32) {
    %c0_i32 = arith.constant 0 : i32
    %c0_i32_0 = arith.constant 0 : i32
    %c0_i32_1 = arith.constant 0 : i32
    %c0_i32_2 = arith.constant 0 : i32
    return %c0_i32, %c0_i32_0, %c0_i32_1 : i32, i32, i32
  }
  func.func @transform_17(%arg0: i32) -> (i32, i32, i32) {
    %c0_i32 = arith.constant 0 : i32
    %c0_i32_0 = arith.constant 0 : i32
    %c0_i32_1 = arith.constant 0 : i32
    %c0_i32_2 = arith.constant 0 : i32
    return %c0_i32, %c0_i32_0, %c0_i32_1 : i32, i32, i32
  }
  func.func @transform_18(%arg0: i32) -> (i32, i32, i32) {
    %c0_i32 = arith.constant 0 : i32
    %c0_i32_0 = arith.constant 0 : i32
    %c0_i32_1 = arith.constant 0 : i32
    %c0_i32_2 = arith.constant 0 : i32
    return %c0_i32, %c0_i32_0, %c0_i32_1 : i32, i32, i32
  }
  func.func @transform_19(%arg0: i32) -> (i32, i32, i32) {
    %c0_i32 = arith.constant 0 : i32
    %c0_i32_0 = arith.constant 0 : i32
    %c0_i32_1 = arith.constant 0 : i32
    %c0_i32_2 = arith.constant 0 : i32
    return %c0_i32, %c0_i32_0, %c0_i32_1 : i32, i32, i32
  }
  func.func @transform_20(%arg0: i32) -> (i32, i32, i32) {
    %c0_i32 = arith.constant 0 : i32
    %c0_i32_0 = arith.constant 0 : i32
    %c0_i32_1 = arith.constant 0 : i32
    %c0_i32_2 = arith.constant 0 : i32
    return %c0_i32, %c0_i32_0, %c0_i32_1 : i32, i32, i32
  }
  func.func @transform_21(%arg0: i32) -> (i32, i32, i32) {
    %c0_i32 = arith.constant 0 : i32
    %c0_i32_0 = arith.constant 0 : i32
    %c0_i32_1 = arith.constant 0 : i32
    %c0_i32_2 = arith.constant 0 : i32
    return %c0_i32, %c0_i32_0, %c0_i32_1 : i32, i32, i32
  }
  func.func @transform_22(%arg0: i32) -> (i32, i32) {
    %c0_i32 = arith.constant 0 : i32
    %c0_i32_0 = arith.constant 0 : i32
    %c0_i32_1 = arith.constant 0 : i32
    return %c0_i32, %c0_i32_0 : i32, i32
  }
  func.func @transform_23(%arg0: i32) -> (i32, i32) {
    %c0_i32 = arith.constant 0 : i32
    %c0_i32_0 = arith.constant 0 : i32
    %c0_i32_1 = arith.constant 0 : i32
    return %c0_i32, %c0_i32_0 : i32, i32
  }
  func.func @transform_24(%arg0: i32) -> (i32, i32, i32) {
    %c0_i32 = arith.constant 0 : i32
    %c0_i32_0 = arith.constant 0 : i32
    %c0_i32_1 = arith.constant 0 : i32
    return %arg0, %c0_i32, %c0_i32_0 : i32, i32, i32
  }
}

</mosaic_0001>

<bundles_post_ra>
// kernel: gpt_forward.1
= control target key start
LH: loop header
LB: loop body
LE: loop exit
PB: predicated region body
PF: predicated region fallthrough
CT: control target
= control target key end

     0   :  { %s17132_s0 = inlined_call_operand.hbm [shape: f32[2,8,128], index: 0, kind: input, shape index: {}]   ;;  %s17133_s1 = inlined_call_operand.vmem [shape: f32[8,128], index: 1, kind: input, shape index: {}]   ;;  %s17134_s2 = inlined_call_operand.hbm [shape: bf16[4,128,384], index: 2, kind: input, shape index: {}]   ;;  %s17135_s3 = inlined_call_operand.vmem [shape: f32[4,1,384], index: 3, kind: input, shape index: {}]   ;;  %s17136_s4 = inlined_call_operand.hbm [shape: bf16[4,128,128], index: 4, kind: input, shape index: {}]   ;;  %s17137_s5 = inlined_call_operand.vmem [shape: f32[4,1,128], index: 5, kind: input, shape index: {}]   ;;  %s17138_s6 = inlined_call_operand.vmem [shape: f32[4,1,128], index: 6, kind: input, shape index: {}]   ;;  %s17139_s7 = inlined_call_operand.vmem [shape: f32[4,1,128], index: 7, kind: input, shape index: {}]   ;;  %s17140_s8 = inlined_call_operand.hbm [shape: bf16[4,128,128], index: 8, kind: input, shape index: {}]   ;;  %s17141_s9 = inlined_call_operand.hbm [shape: f32[4,1,128], index: 9, kind: input, shape index: {}]   ;;  %s17142_s10 = inlined_call_operand.hbm [shape: bf16[4,128,256], index: 10, kind: input, shape index: {}]   ;;  %s17143_s11 = inlined_call_operand.hbm [shape: f32[4,1,256], index: 11, kind: input, shape index: {}]   ;;  %s17144_s12 = inlined_call_operand.hbm [shape: bf16[4,128,128], index: 12, kind: input, shape index: {}]   ;;  %s17145_s13 = inlined_call_operand.hbm [shape: f32[4,1,128], index: 13, kind: input, shape index: {}]   ;;  %s17146_s14 = inlined_call_operand.vmem [shape: f32[4,1,128], index: 14, kind: input, shape index: {}]   ;;  %s17147_s15 = inlined_call_operand.vmem [shape: f32[4,1,128], index: 15, kind: input, shape index: {}]   ;;  %s17148_s16 = inlined_call_operand.hbm [shape: bf16[4,128,512], index: 16, kind: input, shape index: {}]   ;;  %s17149_s17 = inlined_call_operand.vmem [shape: f32[4,1,512], index: 17, kind: input, shape index: {}]   ;;  %s17150_s18 = inlined_call_operand.hbm [shape: bf16[4,512,128], index: 18, kind: input, shape index: {}]   ;;  %s17151_s19 = inlined_call_operand.hbm [shape: f32[4,1,128], index: 19, kind: input, shape index: {}]   ;;  %s17152_s20 = inlined_call_operand.vmem [shape: f32[4,1,128], index: 20, kind: input, shape index: {}]   ;;  %s17153_s21 = inlined_call_operand.vmem [shape: f32[4,1,128], index: 21, kind: input, shape index: {}]   ;;  %s17154_s22 = inlined_call_operand.hbm [shape: bf16[128,128], index: 22, kind: input, shape index: {}]   ;;  %s17155_s23 = inlined_call_operand.vmem [shape: f32[1,128], index: 23, kind: input, shape index: {}]   ;;  %s17156_s24 = inlined_call_operand.hbm [shape: f32[2,8,128], index: 24, kind: output, shape index: {}]  }
   0x1   :  { %17199 = sst [smem:[#allocation34_spill]] %s17132_s0 }
   0x2   :  { %17200 = sst [smem:[#allocation35_spill]] %s17133_s1 }
   0x3   :  { %17201 = sst [smem:[#allocation36_spill]] %s17134_s2 }
   0x4   :  { %17202 = sst [smem:[#allocation37_spill]] %s17135_s3 }
   0x5   :  { %17203 = sst [smem:[#allocation38_spill]] %s17136_s4 }
   0x6   :  { %17204 = sst [smem:[#allocation39_spill]] %s17137_s5 }
   0x7   :  { %17205 = sst [smem:[#allocation40_spill]] %s17138_s6 }
   0x8   :  { %17206 = sst [smem:[#allocation41_spill]] %s17139_s7 }
   0x9   :  { %17207 = sst [smem:[#allocation42_spill]] %s17140_s8 }
   0xa   :  { %17208 = sst [smem:[#allocation43_spill]] %s17141_s9 }
   0xb   :  { %17209 = sst [smem:[#allocation44_spill]] %s17142_s10 }
   0xc   :  { %17210 = sst [smem:[#allocation45_spill]] %s17143_s11 }
   0xd   :  { %17211 = sst [smem:[#allocation46_spill]] %s17144_s12 }
   0xe   :  { %17212 = sst [smem:[#allocation47_spill]] %s17145_s13 }
   0xf   :  { %17213 = sst [smem:[#allocation48_spill]] %s17146_s14 }
  0x10   :  { %17214 = sst [smem:[#allocation49_spill]] %s17147_s15 }
  0x11   :  { %17215 = sst [smem:[#allocation50_spill]] %s17149_s17 }
  0x12   :  { %17216 = sst [smem:[#allocation51_spill]] %s17152_s20 }
  0x13   :  { %17217 = sst [smem:[#allocation52_spill]] %s17153_s21 }
  0x14   :  { %17218 = sst [smem:[#allocation53_spill]] %s17155_s23 }
  0x15   :  { %17219 = sst [smem:[#allocation54_spill]] %s17156_s24 }
  0x16   :  { %29 = vsyncpa [#allocation3], 0 }
  0x17   :  { %31 = vsyncpa [#allocation3 + $0x1], 0 }
  0x18   :  { %32 = vsyncpa [#allocation6], 0 }
  0x19   :  { %33 = vsyncpa [#allocation9], 0 }
  0x1a   :  { %34 = vsyncpa [#allocation12], 0 }
  0x1b   :  { %35 = vsyncpa [#allocation15], 0 }
  0x1c   :  { %36 = vsyncpa [#allocation18], 0 }
  0x1d   :  { %37 = vsyncpa [#allocation21], 0 }
  0x1e   :  { %38 = vsyncpa [#allocation4], 0 }
  0x1f   :  { %40 = vsyncpa [#allocation4 + $0x1], 0  ;;  %s15507_s5 = smov 0   ;;  %s15509_s26 = smov 0  }
  0x20   :  { %s15511_s27 = smov 0   ;;  %s15513_s28 = smov 0  }
  0x21 LB: > { %s15351_s6 = smov [#allocation5]   ;;  %s15528_s29 = sadd.s32 4294967295, %s15349_s28   ;;  %s15349_s28 = sphi %s15513_s28, %s17281_s28   ;;  %s15345_s27 = sphi %s15511_s27, %s17280_s27   ;;  %s15341_s26 = sphi %s15509_s26, %s17279_s26   ;;  %s15337_s5 = sphi %s15507_s5, %s17278_s5  }
  0x22   : > { %s601_s2 = sshll.u32 %s15351_s6, 4  ;;  %17220 = sst [smem:[#allocation32_spill]] %s15528_s29  ;;  %s15533_s2 = int_to_ptr.vmem [resolvable:$true] %s601_s2 }
  0x23   : > { %p11889_p0 = scmp.ge.s32.totalorder %s15349_s28, 1  ;;  %p17175_p1 = scmp.eq.s32.totalorder %s15528_s29, 0 }
  0x24   : > { %p586_p2 = scmp.lt.s32.totalorder %s15349_s28, 3  ;;  %s15352_s30 = smov [#allocation8]  }
  0x25   : > { %s639_s3 = sshll.u32 %s15352_s30, 4  ;;  %s15353_s25 = smov [#allocation11]   ;;  %s15548_s3 = int_to_ptr.vmem [resolvable:$true] %s639_s3 }
  0x26   : > { %p15535_p3 = pnand %p11889_p0, %p586_p2  ;;  %s15550_s8 = sshll.u32 %s15353_s25, 4  ;;  %s666_s8 = int_to_ptr.vmem [resolvable:$true] %s15550_s8 }
  0x27   : > { %s17224_s6 = sld [smem:[#allocation36_spill]] }
  0x28   : > { %s17221_s0 = scalar_select %p15535_p3, 1, 0 }
  0x29   : > { %p13961_p5 = pneg %p15535_p3 }
  0x2a   : > { %17222 = sst [smem:[#allocation33_spill]] %s17221_s0 }
  0x2b   : > { %p15544_p6 = pnand %p13961_p5, %p17175_p1 }
  0x2d   : > { %s14893_s24 = scalar_lea.hbm %s17224_s6, 12288  ;;  %p15560_p8 = pneg %p15544_p6 }
  0x2e   : > { %p14894_p7 = scmp.ne.s32.totalorder %s17224_s6, %s14893_s24  ;;  %p14900_p11 = scmp.lt.u32.totalorder %s14893_s24, %s17224_s6 }
  0x30   : > { %p14896_p9 = pnand %p15560_p8, %p14894_p7 }
  0x32   : > { %p14897_p10 = pneg %p14896_p9 }
  0x34   : > { %p14902_p12 = pnand %p14900_p11, %p14897_p10 }
  0x36   : > { %14905 = shalt.err (!%p14902_p12)
}
  0x37   : > { %s14906_s21 = scalar_lea.vmem %s15533_s2, 12288  ;;  %p14914_p5 = scmp.lt.s32.totalorder %s15533_s2, %s15533_s2 }
  0x38   : > { %p14907_p13 = scmp.ne.s32.totalorder %s15533_s2, %s14906_s21  ;;  %p14915_p4 = scmp.lt.s32.totalorder %s14906_s21, %s14906_s21 }
  0x3a   : > { %p14909_p0 = pnand %p14907_p13, %p15560_p8  ;;  %p14916_p7 = por %p14915_p4, %p14914_p5 }
  0x3c   : > { %p14910_p2 = pneg %p14909_p0 }
  0x3e   : > { %p14917_p9 = pnand %p14916_p7, %p14910_p2 }
  0x40   : > { %14920 = shalt.err (!%p14917_p9)
}
  0x41   : > { %s15354_s23 = smov 192   ;;  %s15355_s24 = smov 12  }
  0x42   : > { %13964 = dma.hbm_to_vmem [thread:$0]  (!%p15544_p6), %s17224_s6, 12288, %s15533_s2, [#allocation6], %s15354_s23, %s15354_s23, %s15355_s24  }
  0x43   : > { %s17226_s17 = sld [smem:[#allocation42_spill]] }
  0x49   : > { %s14921_s15 = scalar_lea.hbm %s17226_s17, 4096 }
  0x4a   : > { %p14922_p4 = scmp.ne.s32.totalorder %s17226_s17, %s14921_s15  ;;  %p14928_p12 = scmp.lt.u32.totalorder %s14921_s15, %s17226_s17 }
  0x4c   : > { %p14924_p10 = pnand %p14922_p4, %p15560_p8 }
  0x4e   : > { %p14925_p11 = pneg %p14924_p10 }
  0x50   : > { %p14930_p13 = pnand %p14928_p12, %p14925_p11 }
  0x52   : > { %14933 = shalt.err (!%p14930_p13)
}
  0x53   : > { %s14934_s2 = scalar_lea.vmem %s15548_s3, 4096  ;;  %p14942_p7 = scmp.lt.s32.totalorder %s15548_s3, %s15548_s3 }
  0x54   : > { %p14935_p0 = scmp.ne.s32.totalorder %s15548_s3, %s14934_s2  ;;  %p14943_p9 = scmp.lt.s32.totalorder %s14934_s2, %s14934_s2 }
  0x56   : > { %p14937_p2 = pnand %p14935_p0, %p15560_p8  ;;  %p14944_p4 = por %p14943_p9, %p14942_p7 }
  0x58   : > { %p14938_p5 = pneg %p14937_p2 }
  0x5a   : > { %p14945_p10 = pnand %p14944_p4, %p14938_p5 }
  0x5c   : > { %14948 = shalt.err (!%p14945_p10)
}
  0x5d   : > { %s17177_s14 = smov 64   ;;  %s17179_s15 = smov 4  }
  0x5e   : > { %13970 = dma.hbm_to_vmem [thread:$0]  (!%p15544_p6), %s17226_s17, 4096, %s15548_s3, [#allocation9], %s17177_s14, %s17177_s14, %s17179_s15  }
  0x5f   : > { %s17227_s10 = sld [smem:[#allocation44_spill]] }
  0x65   : > { %s14949_s4 = scalar_lea.hbm %s17227_s10, 8192 }
  0x66   : > { %p14950_p11 = scmp.ne.s32.totalorder %s17227_s10, %s14949_s4  ;;  %p14956_p0 = scmp.lt.u32.totalorder %s14949_s4, %s17227_s10 }
  0x68   : > { %p14952_p12 = pnand %p14950_p11, %p15560_p8 }
  0x6a   : > { %p14953_p13 = pneg %p14952_p12 }
  0x6c   : > { %p14958_p2 = pnand %p14956_p0, %p14953_p13 }
  0x6e   : > { %14961 = shalt.err (!%p14958_p2)
}
  0x6f   : > { %s14962_s2 = scalar_lea.vmem %s666_s8, 8192  ;;  %p14970_p4 = scmp.lt.s32.totalorder %s666_s8, %s666_s8 }
  0x70   : > { %p14963_p5 = scmp.ne.s32.totalorder %s666_s8, %s14962_s2  ;;  %p14971_p10 = scmp.lt.s32.totalorder %s14962_s2, %s14962_s2 }
  0x72   : > { %p14965_p7 = pnand %p14963_p5, %p15560_p8  ;;  %p14972_p1 = por %p14971_p10, %p14970_p4 }
  0x74   : > { %p14966_p9 = pneg %p14965_p7 }
  0x76   : > { %p14973_p3 = pnand %p14972_p1, %p14966_p9 }
  0x78   : > { %14976 = shalt.err (!%p14973_p3)
}
  0x79   : > { %s15358_s3 = smov 128   ;;  %s15359_s29 = smov 8  }
  0x7a   : > { %13976 = dma.hbm_to_vmem [thread:$0]  (!%p15544_p6), %s17227_s10, 8192, %s666_s8, [#allocation12], %s15358_s3, %s15358_s3, %s15359_s29  }
  0x7b   : > { %s15360_s24 = smov [#allocation14]   ;;  %s17228_s12 = sld [smem:[#allocation46_spill]] }
  0x7c   : > { %s691_s4 = sshll.u32 %s15360_s24, 4  ;;  %s692_s4 = int_to_ptr.vmem [resolvable:$true] %s691_s4 }
  0x81   : > { %s14977_s25 = scalar_lea.hbm %s17228_s12, 4096 }
  0x82   : > { %p14978_p1 = scmp.ne.s32.totalorder %s17228_s12, %s14977_s25  ;;  %p14984_p12 = scmp.lt.u32.totalorder %s14977_s25, %s17228_s12 }
  0x84   : > { %p14980_p3 = pnand %p14978_p1, %p15560_p8 }
  0x86   : > { %p14981_p11 = pneg %p14980_p3 }
  0x88   : > { %p14986_p13 = pnand %p14984_p12, %p14981_p11 }
  0x8a   : > { %14989 = shalt.err (!%p14986_p13)
}
  0x8b   : > { %s14990_s8 = scalar_lea.vmem %s692_s4, 4096  ;;  %p14998_p7 = scmp.lt.s32.totalorder %s692_s4, %s692_s4 }
  0x8c   : > { %p14991_p0 = scmp.ne.s32.totalorder %s692_s4, %s14990_s8  ;;  %p14999_p9 = scmp.lt.s32.totalorder %s14990_s8, %s14990_s8 }
  0x8e   : > { %p14993_p2 = pnand %p14991_p0, %p15560_p8  ;;  %p15000_p4 = por %p14999_p9, %p14998_p7 }
  0x90   : > { %p14994_p5 = pneg %p14993_p2 }
  0x92   : > { %p15001_p10 = pnand %p15000_p4, %p14994_p5 }
  0x94   : > { %15004 = shalt.err (!%p15001_p10)
}
  0x95   : > { %s17229_s3 = smov 4   ;;  %s17230_s29 = smov 64  }
  0x96   : > { %13982 = dma.hbm_to_vmem [thread:$0]  (!%p15544_p6), %s17228_s12, 4096, %s692_s4, [#allocation15], %s17230_s29, %s17230_s29, %s17229_s3  }
  0x97   : > { %s15361_s0 = smov [#allocation17]   ;;  %s15005_s30 = scalar_lea.hbm %s17148_s16, 16384 }
  0x98   : > { %s723_s23 = sshll.u32 %s15361_s0, 4  ;;  %p15006_p1 = scmp.ne.s32.totalorder %s17148_s16, %s15005_s30  ;;  %s724_s23 = int_to_ptr.vmem [resolvable:$true] %s723_s23 }
  0x99   : > { %p15012_p12 = scmp.lt.u32.totalorder %s15005_s30, %s17148_s16 }
  0x9a   : > { %p15008_p3 = pnand %p15006_p1, %p15560_p8 }
  0x9c   : > { %p15009_p11 = pneg %p15008_p3 }
  0x9e   : > { %p15014_p13 = pnand %p15012_p12, %p15009_p11 }
  0xa0   : > { %15017 = shalt.err (!%p15014_p13)
}
  0xa1   : > { %s15018_s4 = scalar_lea.vmem %s724_s23, 16384  ;;  %p15026_p7 = scmp.lt.s32.totalorder %s724_s23, %s724_s23 }
  0xa2   : > { %p15019_p0 = scmp.ne.s32.totalorder %s724_s23, %s15018_s4  ;;  %p15027_p9 = scmp.lt.s32.totalorder %s15018_s4, %s15018_s4 }
  0xa4   : > { %p15021_p2 = pnand %p15019_p0, %p15560_p8  ;;  %p15028_p4 = por %p15027_p9, %p15026_p7 }
  0xa6   : > { %p15022_p5 = pneg %p15021_p2 }
  0xa8   : > { %p15029_p10 = pnand %p15028_p4, %p15022_p5 }
  0xaa   : > { %15032 = shalt.err (!%p15029_p10)
}
  0xab   : > { %s15362_s14 = smov 256   ;;  %s17182_s15 = smov 16  }
  0xac   : > { %13988 = dma.hbm_to_vmem [thread:$0]  (!%p15544_p6), %s17148_s16, 16384, %s724_s23, [#allocation18], %s15362_s14, %s15362_s14, %s17182_s15  }
  0xad   : > { %s15364_s1 = smov [#allocation20]   ;;  %s15365_s25 = smov [#allocation7]  }
  0xae   : > { %s752_s30 = sshll.u32 %s15364_s1, 4  ;;  %s617_s21 = sshll.u32 %s15365_s25, 4  ;;  %s753_s30 = int_to_ptr.vmem [resolvable:$true] %s752_s30  ;;  %s15666_s21 = int_to_ptr.vmem [resolvable:$true] %s617_s21 }
  0xaf   : > { %s15033_s4 = scalar_lea.hbm %s17151_s19, 64 }
  0xb0   : > { %p15034_p1 = scmp.ne.s32.totalorder %s17151_s19, %s15033_s4  ;;  %p15040_p12 = scmp.lt.u32.totalorder %s15033_s4, %s17151_s19 }
  0xb2   : > { %p15036_p3 = pnand %p15034_p1, %p15560_p8 }
  0xb4   : > { %p15037_p11 = pneg %p15036_p3 }
  0xb6   : > { %p15042_p13 = pnand %p15040_p12, %p15037_p11 }
  0xb8   : > { %15045 = shalt.err (!%p15042_p13)
}
  0xb9   : > { %s15046_s14 = scalar_lea.vmem %s753_s30, 64  ;;  %p15054_p7 = scmp.lt.s32.totalorder %s753_s30, %s753_s30 }
  0xba   : > { %p15047_p0 = scmp.ne.s32.totalorder %s753_s30, %s15046_s14  ;;  %p15055_p9 = scmp.lt.s32.totalorder %s15046_s14, %s15046_s14 }
  0xbc   : > { %p15049_p2 = pnand %p15047_p0, %p15560_p8  ;;  %p15056_p4 = por %p15055_p9, %p15054_p7 }
  0xbe   : > { %p15050_p5 = pneg %p15049_p2 }
  0xc0   : > { %p15057_p10 = pnand %p15056_p4, %p15050_p5 }
  0xc2   : > { %15060 = shalt.err (!%p15057_p10)
}
  0xc3   : > { %s17184_s10 = smov 1   ;;  %s17231_s2 = sld [smem:[#allocation38_spill]] }
  0xc4   : > { %13994 = dma.hbm_to_vmem [thread:$0]  (!%p15544_p6), %s17151_s19, 64, %s753_s30, [#allocation21], %s17182_s15, %s17182_s15, %s17184_s10  }
  0xc9   : > { %s15061_s8 = scalar_lea.hbm %s17231_s2, 4096 }
  0xca   : > { %p15062_p1 = scmp.ne.s32.totalorder %s17231_s2, %s15061_s8  ;;  %p15068_p12 = scmp.lt.u32.totalorder %s15061_s8, %s17231_s2 }
  0xcc   : > { %p15064_p3 = pnand %p15062_p1, %p15560_p8 }
  0xce   : > { %p15065_p11 = pneg %p15064_p3 }
  0xd0   : > { %p15070_p13 = pnand %p15068_p12, %p15065_p11 }
  0xd2   : > { %15073 = shalt.err (!%p15070_p13)
}
  0xd3   : > { %s15074_s30 = scalar_lea.vmem %s15666_s21, 4096  ;;  %p15082_p7 = scmp.lt.s32.totalorder %s15666_s21, %s15666_s21 }
  0xd4   : > { %p15075_p0 = scmp.ne.s32.totalorder %s15666_s21, %s15074_s30  ;;  %p15083_p9 = scmp.lt.s32.totalorder %s15074_s30, %s15074_s30 }
  0xd6   : > { %p15077_p2 = pnand %p15075_p0, %p15560_p8  ;;  %p15084_p4 = por %p15083_p9, %p15082_p7 }
  0xd8   : > { %p15078_p5 = pneg %p15077_p2 }
  0xda   : > { %p15085_p10 = pnand %p15084_p4, %p15078_p5 }
  0xdc   : > { %15088 = shalt.err (!%p15085_p10)
}
  0xdd   : > { %13967 = dma.hbm_to_vmem [thread:$0]  (!%p15544_p6), %s17231_s2, 4096, %s15666_s21, [#allocation6], %s17230_s29, %s17230_s29, %s17229_s3  }
  0xde   : > { %s15367_s1 = smov [#allocation10]   ;;  %s15368_s8 = smov [#allocation13]  }
  0xdf   : > { %s652_s25 = sshll.u32 %s15367_s1, 4  ;;  %s678_s4 = sshll.u32 %s15368_s8, 4  ;;  %s653_s25 = int_to_ptr.vmem [resolvable:$true] %s652_s25  ;;  %s15715_s4 = int_to_ptr.vmem [resolvable:$true] %s678_s4 }
  0xe0   : > { %s17232_s9 = sld [smem:[#allocation43_spill]] }
  0xe6   : > { %s15089_s14 = scalar_lea.hbm %s17232_s9, 64 }
  0xe7   : > { %p15090_p1 = scmp.ne.s32.totalorder %s17232_s9, %s15089_s14  ;;  %p15096_p12 = scmp.lt.u32.totalorder %s15089_s14, %s17232_s9 }
  0xe9   : > { %p15092_p3 = pnand %p15090_p1, %p15560_p8 }
  0xeb   : > { %p15093_p11 = pneg %p15092_p3 }
  0xed   : > { %p15098_p13 = pnand %p15096_p12, %p15093_p11 }
  0xef   : > { %15101 = shalt.err (!%p15098_p13)
}
  0xf0   : > { %s15102_s24 = scalar_lea.vmem %s653_s25, 64  ;;  %p15110_p7 = scmp.lt.s32.totalorder %s653_s25, %s653_s25 }
  0xf1   : > { %p15103_p0 = scmp.ne.s32.totalorder %s653_s25, %s15102_s24  ;;  %p15111_p9 = scmp.lt.s32.totalorder %s15102_s24, %s15102_s24 }
  0xf3   : > { %p15105_p2 = pnand %p15103_p0, %p15560_p8  ;;  %p15112_p4 = por %p15111_p9, %p15110_p7 }
  0xf5   : > { %p15106_p5 = pneg %p15105_p2 }
  0xf7   : > { %p15113_p10 = pnand %p15112_p4, %p15106_p5 }
  0xf9   : > { %15116 = shalt.err (!%p15113_p10)
}
  0xfa   : > { %s17233_s15 = smov 16   ;;  %s17234_s11 = sld [smem:[#allocation45_spill]] }
  0xfb   : > { %13973 = dma.hbm_to_vmem [thread:$0]  (!%p15544_p6), %s17232_s9, 64, %s653_s25, [#allocation9], %s17233_s15, %s17233_s15, %s17184_s10  }
 0x100   : > { %s15117_s14 = scalar_lea.hbm %s17234_s11, 128 }
 0x101   : > { %p15118_p1 = scmp.ne.s32.totalorder %s17234_s11, %s15117_s14  ;;  %p15124_p12 = scmp.lt.u32.totalorder %s15117_s14, %s17234_s11 }
 0x103   : > { %p15120_p3 = pnand %p15118_p1, %p15560_p8 }
 0x105   : > { %p15121_p11 = pneg %p15120_p3 }
 0x107   : > { %p15126_p13 = pnand %p15124_p12, %p15121_p11 }
 0x109   : > { %15129 = shalt.err (!%p15126_p13)
}
 0x10a   : > { %s15130_s25 = scalar_lea.vmem %s15715_s4, 128  ;;  %p15138_p7 = scmp.lt.s32.totalorder %s15715_s4, %s15715_s4 }
 0x10b   : > { %p15131_p0 = scmp.ne.s32.totalorder %s15715_s4, %s15130_s25  ;;  %p15139_p9 = scmp.lt.s32.totalorder %s15130_s25, %s15130_s25 }
 0x10d   : > { %p15133_p2 = pnand %p15131_p0, %p15560_p8  ;;  %p15140_p4 = por %p15139_p9, %p15138_p7 }
 0x10f   : > { %p15134_p5 = pneg %p15133_p2 }
 0x111   : > { %p15141_p10 = pnand %p15140_p4, %p15134_p5 }
 0x113   : > { %15144 = shalt.err (!%p15141_p10)
}
 0x114   : > { %s15369_s1 = smov 32   ;;  %s15370_s8 = smov 2  }
 0x115   : > { %13979 = dma.hbm_to_vmem [thread:$0]  (!%p15544_p6), %s17234_s11, 128, %s15715_s4, [#allocation12], %s15369_s1, %s15369_s1, %s15370_s8  }
 0x116   : > { %s15371_s14 = smov [#allocation16]   ;;  %s15372_s6 = smov [#allocation19]  }
 0x117   : > { %s704_s30 = sshll.u32 %s15371_s14, 4  ;;  %s739_s21 = sshll.u32 %s15372_s6, 4  ;;  %s705_s30 = int_to_ptr.vmem [resolvable:$true] %s704_s30  ;;  %s15761_s21 = int_to_ptr.vmem [resolvable:$true] %s739_s21 }
 0x118   : > { %s17235_s13 = sld [smem:[#allocation47_spill]] }
 0x11e   : > { %s15145_s10 = scalar_lea.hbm %s17235_s13, 64 }
 0x11f   : > { %p15146_p1 = scmp.ne.s32.totalorder %s17235_s13, %s15145_s10  ;;  %p15152_p12 = scmp.lt.u32.totalorder %s15145_s10, %s17235_s13 }
 0x121   : > { %p15148_p3 = pnand %p15146_p1, %p15560_p8 }
 0x123   : > { %p15149_p11 = pneg %p15148_p3 }
 0x125   : > { %p15154_p13 = pnand %p15152_p12, %p15149_p11 }
 0x127   : > { %15157 = shalt.err (!%p15154_p13)
}
 0x128   : > { %s15158_s1 = scalar_lea.vmem %s705_s30, 64  ;;  %p15166_p7 = scmp.lt.s32.totalorder %s705_s30, %s705_s30 }
 0x129   : > { %p15159_p0 = scmp.ne.s32.totalorder %s705_s30, %s15158_s1  ;;  %p15167_p9 = scmp.lt.s32.totalorder %s15158_s1, %s15158_s1 }
 0x12b   : > { %p15161_p2 = pnand %p15159_p0, %p15560_p8  ;;  %p15168_p4 = por %p15167_p9, %p15166_p7 }
 0x12d   : > { %p15162_p5 = pneg %p15161_p2 }
 0x12f   : > { %p15169_p10 = pnand %p15168_p4, %p15162_p5 }
 0x131   : > { %15172 = shalt.err (!%p15169_p10)
}
 0x132   : > { %s17236_s9 = smov 1   ;;  %s15173_s14 = scalar_lea.hbm %s17150_s18, 16384 }
 0x133   : > { %13985 = dma.hbm_to_vmem [thread:$0]  (!%p15544_p6), %s17235_s13, 64, %s705_s30, [#allocation15], %s17233_s15, %s17233_s15, %s17236_s9  }
 0x134   : > { %p15174_p1 = scmp.ne.s32.totalorder %s17150_s18, %s15173_s14  ;;  %p15180_p12 = scmp.lt.u32.totalorder %s15173_s14, %s17150_s18 }
 0x136   : > { %p15176_p3 = pnand %p15174_p1, %p15560_p8 }
 0x138   : > { %p15177_p11 = pneg %p15176_p3 }
 0x13a   : > { %p15182_p13 = pnand %p15180_p12, %p15177_p11 }
 0x13c   : > { %15185 = shalt.err (!%p15182_p13)
}
 0x13d   : > { %s15186_s15 = scalar_lea.vmem %s15761_s21, 16384  ;;  %p15194_p7 = scmp.lt.s32.totalorder %s15761_s21, %s15761_s21 }
 0x13e   : > { %p15187_p0 = scmp.ne.s32.totalorder %s15761_s21, %s15186_s15  ;;  %p15195_p9 = scmp.lt.s32.totalorder %s15186_s15, %s15186_s15 }
 0x140   : > { %p15189_p2 = pnand %p15187_p0, %p15560_p8  ;;  %p15196_p4 = por %p15195_p9, %p15194_p7 }
 0x142   : > { %p15190_p5 = pneg %p15189_p2 }
 0x144   : > { %p15197_p10 = pnand %p15196_p4, %p15190_p5 }
 0x146   : > { %15200 = shalt.err (!%p15197_p10)
}
 0x147   : > { %13991 = dma.hbm_to_vmem [thread:$0]  (!%p15544_p6), %s17150_s18, 16384, %s15761_s21, [#allocation18], %s17230_s29, %s17230_s29, %s17229_s3  }
 0x148   : > { %s15373_s1 = smov [#allocation22]   ;;  %s15201_s8 = scalar_lea.hbm %s17154_s22, 1024 }
 0x149   : > { %s771_s9 = sshll.u32 %s15373_s1, 4  ;;  %p15202_p1 = scmp.ne.s32.totalorder %s17154_s22, %s15201_s8  ;;  %s772_s9 = int_to_ptr.vmem [resolvable:$true] %s771_s9 }
 0x14a   : > { %p15208_p12 = scmp.lt.u32.totalorder %s15201_s8, %s17154_s22 }
 0x14b   : > { %p15204_p3 = pnand %p15202_p1, %p15560_p8 }
 0x14d   : > { %p15205_p11 = pneg %p15204_p3 }
 0x14f   : > { %p15210_p13 = pnand %p15208_p12, %p15205_p11 }
 0x151   : > { %15213 = shalt.err (!%p15210_p13)
}
 0x152   : > { %s15214_s21 = scalar_lea.vmem %s772_s9, 1024  ;;  %p15222_p7 = scmp.lt.s32.totalorder %s772_s9, %s772_s9 }
 0x153   : > { %p15215_p0 = scmp.ne.s32.totalorder %s772_s9, %s15214_s21  ;;  %p15223_p9 = scmp.lt.s32.totalorder %s15214_s21, %s15214_s21 }
 0x155   : > { %p15217_p2 = pnand %p15215_p0, %p15560_p8  ;;  %p15224_p4 = por %p15223_p9, %p15222_p7 }
 0x157   : > { %p15218_p5 = pneg %p15217_p2 }
 0x159   : > { %p15225_p10 = pnand %p15224_p4, %p15218_p5 }
 0x15b   : > { %15228 = shalt.err (!%p15225_p10)
}
 0x15c   : > { %s17237_s20 = sld [smem:[#allocation32_spill]]  ;;  %s11888_s7 = sadd.s32 4294967294, %s15349_s28  }
 0x15d   : > { %13997 = dma.hbm_to_vmem [thread:$0]  (!%p15544_p6), %s17154_s22, 1024, %s772_s9, [#allocation21], %s17230_s29, %s17230_s29, %s17229_s3  }
 0x15e   : > { %s15833_s15 = sadd.s32 1, %s15349_s28   ;;  %s53_s30 = sadd.s32 1, %s15345_s27 }
 0x15f   : > { %s50_s4 = ssub.s32 %s15349_s28, %s15833_s15  ;;  %p60_p8 = scmp.ne.s32.totalorder %s15345_s27, %s15341_s26 }
 0x160   : > { %p51_p1 = scmp.eq.s32.totalorder %s50_s4, 0  ;;  %p61_p3 = scmp.eq.s32.totalorder %s15349_s28, 0 }
 0x161   : > { %p66_p11 = scmp.ne.s32.totalorder %s15341_s26, %s15337_s5  ;;  %p579_p5 = scmp.eq.s32.totalorder %s11888_s7, 1 }
 0x162   : > { %p573_p12 = scmp.eq.s32.totalorder %s17237_s20, 1  ;;  %p62_p13 = por %p61_p3, %p60_p8 }
 0x163   : > { %s15845_s1 = scalar_select %p51_p1, %s15345_s27, %s53_s30  }
 0x164   : > { %p17238_p0 = scmp.eq.s32.totalorder %s17237_s20, 0  ;;  %p15853_p6 = por %p573_p12, %p60_p8 }
 0x165   : > { %p14018_p7 = scmp.lt.s32.totalorder %s15349_s28, 2  ;;  %s788_s29 = sand.u32 1, %s15345_s27  }
 0x166   : > { %p15849_p2 = por %p17238_p0, %p66_p11  ;;  %p15859_p9 = por %p579_p5, %p66_p11 }
 0x167   : > { %s17240_s3 = scalar_select %p15853_p6, 1, 0 }
 0x168   : > { %s17241_s9 = scalar_select %p15859_p9, 1, 0 }
 0x169   : > { %s11903_s10 = sshll.u32 %s788_s29, 3  ;;  %s11904_s8 = sshll.u32 %s15349_s28, 7 }
 0x16a   : > { %s17242_s6 = sld [smem:[#allocation34_spill]]  ;;  %s792_s21 = scalar_lea.vmem [#allocation2], %s11903_s10 }
 0x16b   : > { %s799_s25 = sshll.u32 %s792_s21, 4  ;;  %p15869_p4 = pnand %p14018_p7, %p62_p13  ;;  %s15873_s25 = int_to_ptr.vmem [resolvable:$true] %s799_s25 }
 0x16c   : > { %s789_s20 = scalar_lea.sflag [#allocation3], %s788_s29 }
 0x16d   : > { %p15231_p8 = pneg %p15869_p4 }
 0x170   : > { %s15867_s24 = scalar_lea.hbm %s17242_s6, %s11904_s8  ;;  %s15234_s10 = scalar_lea.hbm %s17242_s6, 256 }
 0x171   : > { %s15229_s7 = scalar_lea.hbm %s15867_s24, 128  ;;  %p15235_p11 = scmp.lt.u32.totalorder %s15867_s24, %s17242_s6 }
 0x172   : > { %p15230_p10 = scmp.ne.s32.totalorder %s15867_s24, %s15229_s7  ;;  %p15236_p12 = scmp.lt.u32.totalorder %s15234_s10, %s15229_s7 }
 0x173   : > { %p15238_p0 = scmp.lt.u32.totalorder %s15229_s7, %s15867_s24 }
 0x174   : > { %p15232_p1 = pnand %p15231_p8, %p15230_p10  ;;  %p15237_p13 = por %p15236_p12, %p15235_p11 }
 0x176   : > { %p15233_p3 = pneg %p15232_p1  ;;  %p15239_p5 = por %p15238_p0, %p15237_p13 }
 0x178   : > { %p15240_p7 = pnand %p15239_p5, %p15233_p3 }
 0x17a   : > { %15243 = shalt.err (!%p15240_p7)
}
 0x17b   : > { %s15244_s29 = scalar_lea.vmem %s15873_s25, 128  ;;  %s15374_s14 = smov [#allocation2]  }
 0x17c   : > { %p15245_p10 = scmp.ne.s32.totalorder %s15873_s25, %s15244_s29  ;;  %s15249_s21 = sshll.u32 %s15374_s14, 4  ;;  %s15250_s21 = int_to_ptr.vmem [resolvable:$false] %s15249_s21 }
 0x17d   : > { %s15251_s30 = scalar_lea.vmem %s15250_s21, 256  ;;  %p15252_p6 = scmp.lt.s32.totalorder %s15873_s25, %s15250_s21 }
 0x17e   : > { %p15247_p1 = pnand %p15245_p10, %p15231_p8  ;;  %p15253_p11 = scmp.lt.s32.totalorder %s15251_s30, %s15244_s29 }
 0x180   : > { %p15248_p9 = pneg %p15247_p1  ;;  %p15254_p12 = por %p15253_p11, %p15252_p6 }
 0x182   : > { %p15255_p13 = pnand %p15254_p12, %p15248_p9 }
 0x184   : > { %15258 = shalt.err (!%p15255_p13)
}
 0x185   : > { %14001 = dma.hbm_to_vmem [thread:$0]  (!%p15869_p4), %s15867_s24, 128, %s15873_s25, %s789_s20  }
 0x186   : > { %s17244_s7 = sld [smem:[#allocation33_spill]] }
 0x18c   : > { %p17245_p3 = scmp.ne.s32.totalorder %s17244_s7, 0 }
 0x18d   : > { %s15903_s4 = sand.u32 (!%p17245_p3), 1, %s15341_s26  }
 0x18e   : > { %808 = sbr.rel (%p17245_p3) target bundleno = 27361 (0x6ae1), region = 116  ;;  %s17187_s10 = sshll.u32 (!%p17245_p3), %s15903_s4, 3 }
 0x18f   : > { %s811_s8 = scalar_lea.sflag (!%p17245_p3), [#allocation3], %s15903_s4  ;;  %s15909_s23 = scalar_lea.vmem (!%p17245_p3), [#allocation2], %s17187_s10 }
 0x195   : > { %15304 = dma.done.wait (%p15849_p2), %s811_s8, 128  }
 0x196   : > { %15306 = vsyncadd (%p15849_p2), %s811_s8, 4294967168  ;;  %s17246_s24 = sld [smem:[#allocation32_spill]] }
 0x19c   : > { %p17247_p6 = scmp.eq.s32.totalorder %s17246_s24, 0 }
 0x19e   : > { %15308 = dma.done.wait (%p17247_p6), [#allocation6], 16384   ;;  %p17248_p9 = pmov %p17247_p6 }
 0x19f   : > { %p17249_p4 = pmov %p17247_p6 }
 0x1a0   : > { %15310 = vsyncadd (%p17248_p9), [#allocation6], 4294950912 }
 0x1a1   : > { %15312 = dma.done.wait (%p17249_p4), [#allocation9], 4160   ;;  %p17250_p8 = pmov %p17249_p4 }
 0x1a2   : > { %p17251_p0 = pmov %p17249_p4 }
 0x1a3   : > { %15314 = vsyncadd (%p17250_p8), [#allocation9], 4294963136 }
 0x1a4   : > { %15316 = dma.done.wait (%p17251_p0), [#allocation12], 8320   ;;  %p17252_p5 = pmov %p17251_p0 }
 0x1a5   : > { %p17253_p2 = pmov %p17251_p0 }
 0x1a6   : > { %15318 = vsyncadd (%p17252_p5), [#allocation12], 4294958976 }
 0x1a7   : > { %15320 = dma.done.wait (%p17253_p2), [#allocation15], 4160   ;;  %p17254_p7 = pmov %p17251_p0 }
 0x1a8   : > { %p17255_p10 = pmov %p17251_p0 }
 0x1a9   : > { %15322 = vsyncadd (%p17254_p7), [#allocation15], 4294963136 }
 0x1aa   : > { %15324 = dma.done.wait (%p17255_p10), [#allocation18], 32768   ;;  %p17256_p1 = pmov %p17251_p0 }
 0x1ab   : > { %p17257_p11 = pmov %p17251_p0 }
 0x1ac   : > { %15326 = vsyncadd (%p17256_p1), [#allocation18], 4294934528 }
 0x1ad   : > { %15328 = dma.done.wait (%p17257_p11), [#allocation21], 1088   ;;  %p17258_p12 = pmov %p17251_p0 }
 0x1ae   : > { %v15375_v0 = vmov 0   ;;  %v15376_v1 = vmov 0.0   ;;  %v14093_v2 = vld [vmem:[#allocation5 + $0x4] ss:$12 sps:$4 sm:$0xff]   ;;  %v14095_v3 = vld [vmem:[#allocation5] ss:$12 sps:$4 sm:$0xff]   ;;  %v966_v30 = vlaneseq }
 0x1af   : > { %15330 = vsyncadd (%p17258_p12), [#allocation21], 4294966208  ;;  %1141 = vmatprep.mubr.bf16.mxu0 %v15375_v0  ;;  %13089 = vmatprep.subr.bf16.mxu1 %v15376_v1  ;;  %v14096_v4 = vld [vmem:[#allocation5 + $0x1c] ss:$12 sps:$4 sm:$0xff]   ;;  %v14098_v5 = vld [vmem:[#allocation5 + $0x18] ss:$12 sps:$4 sm:$0xff]  }
 0x1b0   : > { %1109 = vmatprep.subr.bf16.mxu0 %v14093_v2  ;;  %v14099_v6 = vld [vmem:[#allocation5 + $0x34] ss:$12 sps:$4 sm:$0xff]   ;;  %v14101_v7 = vld [vmem:[#allocation5 + $0x30] ss:$12 sps:$4 sm:$0xff]   ;;  %v14102_v8 = vld [vmem:[#allocation5 + $0x4c] ss:$12 sps:$4 sm:$0xff]  }
 0x1b1   : > { %1110 = vmatpush1.bf16.msra.mxu0 %v14095_v3  ;;  %v14104_v9 = vld [vmem:[#allocation5 + $0x48] ss:$12 sps:$4 sm:$0xff]   ;;  %v14105_v10 = vld [vmem:[#allocation5 + $0x64] ss:$12 sps:$4 sm:$0xff]   ;;  %v14118_v12 = vld [vmem:[#allocation5 + $0x20] ss:$12 sps:$4 sm:$0xff]  }
 0x1b2   : > { %1111 = vmatprep.subr.bf16.mxu0 %v14096_v4  ;;  %v14117_v11 = vld [vmem:[#allocation5 + $0x8] ss:$12 sps:$4 sm:$0xff]   ;;  %v14107_v13 = vld [vmem:[#allocation5 + $0x60] ss:$12 sps:$4 sm:$0xff]   ;;  %v14119_v15 = vld [vmem:[#allocation5 + $0x38] ss:$12 sps:$4 sm:$0xff]  }
 0x1b3   : > { %13090 = vmatpush3.bf16.msra.mxu1 %v14117_v11  ;;  %v14108_v14 = vld [vmem:[#allocation5 + $0x7c] ss:$12 sps:$4 sm:$0xff]   ;;  %v14110_v16 = vld [vmem:[#allocation5 + $0x78] ss:$12 sps:$4 sm:$0xff]   ;;  %v14111_v17 = vld [vmem:[#allocation5 + $0x94] ss:$12 sps:$4 sm:$0xff]  }
 0x1b4   : > { %13091 = vmatprep.subr.bf16.mxu1 %v15376_v1  ;;  %v14120_v18 = vld [vmem:[#allocation5 + $0x50] ss:$12 sps:$4 sm:$0xff]   ;;  %s17259_s0 = sld [smem:[#allocation35_spill]]  ;;  %v14114_v22 = vld [vmem:[#allocation5 + $0xac] ss:$12 sps:$4 sm:$0xff]   ;;  %vm15377_vm0 = vmmov 0  }
 0x1b5   : > { %1112 = vmatpush1.bf16.msra.mxu0 %v14098_v5  ;;  %v14113_v19 = vld [vmem:[#allocation5 + $0x90] ss:$12 sps:$4 sm:$0xff]   ;;  %v14121_v23 = vld [vmem:[#allocation5 + $0x68] ss:$12 sps:$4 sm:$0xff]   ;;  %v14122_v26 = vld [vmem:[#allocation5 + $0x80] ss:$12 sps:$4 sm:$0xff]   ;;  %13105 = vmatprep.mubr.msk.bf16.mxu1 %vm15377_vm0, %v15376_v1 }
 0x1b6   : > { %1113 = vmatprep.subr.bf16.mxu0 %v14099_v6  ;;  %v928_v20 = vld [vmem:[%s15909_s23] sm:$0xff]  ;;  %v15968_v31 = vshrl.u32 %v966_v30, 7  ;;  %s17260_s14 = sld [smem:[#allocation37_spill]]  ;;  %vm1215_vm1 = vcmask 261120   ;;  %s17192_s21 = smov 96   ;;  %vm1280_vm2 = vcmask 1043456  }
 0x1b7   : > { %13092 = vmatpush3.bf16.msra.mxu1 %v14118_v12  ;;  %v14116_v24 = vld [vmem:[#allocation5 + $0xa8] ss:$12 sps:$4 sm:$0xff]   ;;  %v14123_v28 = vld [vmem:[#allocation5 + $0x98] ss:$12 sps:$4 sm:$0xff]   ;;  %v14124_v29 = vld [vmem:[#allocation5 + $0xb0] ss:$12 sps:$4 sm:$0xff]  }
 0x1b8   : > { %13093 = vmatprep.subr.bf16.mxu1 %v15376_v1  ;;  %v15974_v33 = vsub.s32 1, %v15968_v31  ;;  %v15977_v34 = vsub.s32 0, %v15968_v31  ;;  %v15997_v46 = vsub.s32 2, %v15968_v31  ;;  %v1209_v55 = vand.u32 127, %v966_v30  ;;  %s17190_s30 = smov 64   ;;  %s17188_s7 = smov 32  }
 0x1b9   : > { %1114 = vmatpush1.bf16.msra.mxu0 %v14101_v7  ;;  %vm1264_vm4 = vcmask 64512   ;;  %s17261_s2 = sld [smem:[#allocation39_spill]]  ;;  %s17262_s20 = sld [smem:[#allocation40_spill]] }
 0x1ba   : > { %1115 = vmatprep.subr.bf16.mxu0 %v14102_v8  ;;  %v929_v21 = vld [vmem:[%s17259_s0] sm:$0xff]  ;;  %vm1210_vm3 = vcmp.gt.s32.totalorder %v1209_v55, %v15968_v31  ;;  %s17263_s23 = sld [smem:[#allocation41_spill]]  ;;  %s17264_s29 = sld [smem:[#allocation48_spill]] }
 0x1bb   : > { %13094 = vmatpush3.bf16.msra.mxu1 %v14119_v15  ;;  %v15948_v25 = vadd.f32 %v929_v21, %v928_v20  ;;  %v16007_v57 = vsel %vm1210_vm3, -1e+30, %v15376_v1  ;;  %s17266_s0 = sld [smem:[#allocation50_spill]]  ;;  %s17267_s25 = sld [smem:[#allocation51_spill]] }
 0x1bc   : > { %13095 = vmatprep.subr.bf16.mxu1 %v15376_v1  ;;  %v964_v32 = vld [vmem:[%s17260_s14] sm:$0x7]  ;;  %s17268_s6 = sld [smem:[#allocation52_spill]]  ;;  %s17271_s8 = smov 32  }
 0x1bd   : > { %1116 = vmatpush1.bf16.msra.mxu0 %v14104_v9  ;;  %v15953_v27 = vpack.c.bf16 %v15948_v25, %v15948_v25  ;;  %v973_v35 = vrot.slane %v964_v32, %v15974_v33  ;;  %v969_v36 = vrot.slane %v964_v32, %v15977_v34  ;;  %v977_v47 = vrot.slane %v964_v32, %v15997_v46  ;;  %s17272_s11 = sld [smem:[#allocation53_spill]]  ;;  %p17275_p3 = scmp.ne.s32.totalorder %s17240_s3, 0 }
 0x1be   : > { %1117 = vmatprep.subr.bf16.mxu0 %v14105_v10 }
 0x1bf   : > { %13096 = vmatpush3.bf16.msra.mxu1 %v14120_v18 }
 0x1c0   : > { %13097 = vmatprep.subr.bf16.mxu1 %v15376_v1 }
 0x1c1   : > { %1118 = vmatpush1.bf16.msra.mxu0 %v14107_v13 }
 0x1c2   : > { %1119 = vmatprep.subr.bf16.mxu0 %v14108_v14 }
 0x1c3   : > { %13098 = vmatpush3.bf16.msra.mxu1 %v14121_v23 }
 0x1c4   : > { %13099 = vmatprep.subr.bf16.mxu1 %v15376_v1 }
 0x1c5   : > { %1120 = vmatpush1.bf16.msra.mxu0 %v14110_v16 }
 0x1c6   : > { %1121 = vmatprep.subr.bf16.mxu0 %v14111_v17 }
 0x1c7   : > { %13100 = vmatpush3.bf16.msra.mxu1 %v14122_v26 }
 0x1c8   : > { %13101 = vmatprep.subr.bf16.mxu1 %v15376_v1 }
 0x1c9   : > { %1122 = vmatpush1.bf16.msra.mxu0 %v14113_v19 }
 0x1ca   : > { %1123 = vmatprep.subr.bf16.mxu0 %v14114_v22 }
 0x1cb   : > { %13102 = vmatpush3.bf16.msra.mxu1 %v14123_v28 }
 0x1cc   : > { %13103 = vmatprep.subr.bf16.mxu1 %v15376_v1 }
 0x1cd   : > { %1124 = vmatpush1.bf16.msra.mxu0 %v14116_v24 }
 0x1ce   : > { %13133 = vmatprep.subr.bf16.mxu0 %v15376_v1 }
 0x1cf   : > { %13104 = vmatpush3.bf16.msra.mxu1 %v14124_v29 }
 0x1d0   : > { %1142 = vmatmul.mubr.bf16.vlgmr.msra.gmra.mrb[0].mxu0 %v15953_v27  ;;  %13109 = vmatprep.subr.bf16.mxu1 %v15376_v1 }
 0x1d1   : > { %13137 = vmatprep.mubr.msk.bf16.mxu0 %vm15377_vm0, %v15376_v1 }
 0x1d2   : > { %13106 = vmatmul.mubr.bf16.vlgmr.msra.gmra.mrb[0].mxu1 %v15953_v27 }
 0x1d3   : > { %13111 = vmatprep.mubr.msk.bf16.mxu1 %vm15377_vm0, %v15376_v1 }
 0x2a3   : > { %v1143_v37 = vpop.f32.mrb[0].mxu0 }
 0x2a4   : > { %v1145_v38 = vpop.f32.mrb[1].mxu0  ;;  %v1144_v42 = vadd.f32 %v1143_v37, %v969_v36  ;;  %v14127_v37 = vld [vmem:[#allocation7 + $0x10] sm:$0xff]  }
 0x2a5   : > { %v1146_v39 = vadd.f32 %v1145_v38, %v973_v35  ;;  %v1147_v40 = vpop.f32.mrb[2].mxu0  ;;  %v1184_v48 = vpop.f32.mrb[0].mxu1  ;;  %13134 = vmatpush3.bf16.msra.mxu0 %v14127_v37  ;;  %v14128_v38 = vld [vmem:[#allocation7 + $0x18] sm:$0xff]  }
 0x2a6   : > { %v1148_v41 = vpop.f32.mrb[3].mxu0  ;;  %v15987_v45 = vpack.c.bf16 %v1144_v42, %v1144_v42  ;;  %v1185_v49 = vadd.f32 %v1184_v48, %v977_v47  ;;  %v13107_v50 = vpop.f32.mrb[1].mxu1  ;;  %13135 = vmatprep.subr.bf16.mxu0 %v15376_v1  ;;  %v14125_v42 = vld [vmem:[#allocation7] sm:$0xff]   ;;  %v14126_v47 = vld [vmem:[#allocation7 + $0x8] sm:$0xff]  }
 0x2a7   : > { %v15981_v43 = vpack.c.bf16 %v1146_v39, %v1146_v39  ;;  %v1187_v51 = vpop.f32.mrb[2].mxu1 }
 0x2a8   : > { %v16000_v52 = vpack.c.bf16 %v1185_v49, %v1185_v49  ;;  %v13108_v53 = vpop.f32.mrb[3].mxu1 }
 0x2a9   : > { %1329 = vrot.lane.b32.xlu1 %v15981_v43, %s17192_s21  ;;  %v1220_v44 = vsel %vm1215_vm1, %v15981_v43, 0  ;;  %13136 = vmatpush3.bf16.msra.mxu0 %v14128_v38 }
 0x2aa   : > { %13110 = vmatpush3.bf16.xpose.msra.mxu1 %v1220_v44  ;;  %v1282_v54 = vsel %vm1280_vm2, %v16000_v52, 0  ;;  %13149 = vmatprep.subr.bf16.mxu0 %v15376_v1 }
 0x2ab   : > { %13115 = vmatprep.subr.bf16.mxu1 %v15376_v1 }
 0x2ad   : > { %1326 = vrot.lane.b32.xlu1 %v15987_v45, %s17192_s21 }
 0x2b1   : > { %13112 = vmatmul.mubr.msk.bf16.vlgmr.msra.gmra.mrb[4].mxu1 %vm1215_vm1, %v15987_v45 }
 0x2b2   : > { %13117 = vmatprep.mubr.msk.bf16.mxu1 %vm15377_vm0, %v15376_v1  ;;  %13116 = vmatpush3.bf16.msra.mxu1 %v1282_v54 }
 0x2b3   : > { %13121 = vmatprep.subr.bf16.mxu1 %v15376_v1 }
 0x31b   : > { %v1330_v10 = vpop.permute.xlu1 %1329 }
 0x31c   : > { %v1335_v12 = vsel %vm1215_vm1, %v1330_v10, 0 }
 0x31f   : > { %v1327_v13 = vpop.permute.xlu1 %1326 }
 0x384   : > { %v1256_v56 = vpop.f32.mrb[4].mxu1 }
 0x385   : > { %v1262_v58 = vmul.f32 0.17677669, %v1256_v56  ;;  %v13113_v59 = vpop.f32.mrb[5].mxu1 }
 0x386   : > { %v1259_v60 = vpop.f32.mrb[6].mxu1 }
 0x387   : > { %v13114_v61 = vpop.f32.mrb[7].mxu1  ;;  %v1263_v62 = vadd.f32 %v1262_v58, %v16007_v57 }
 0x389   : > { %v1265_v63 = vsel %vm1264_vm4, %v1263_v62, -inf }
 0x38a   : > { %1266 = vmax.xlane.f32.xlu0 %v1265_v63 }
 0x417   : > { %v1267_v2 = vpop.xlane.xlu0 %1266 }
 0x418   : > { %v1268_v3 = vsub.f32 %v1263_v62, %v1267_v2 }
 0x41a   : > { %v1269_v4 = vmul.f32 1.442695, %v1268_v3 }
 0x41c   : > { %14741 = vpow2.f32 %v1269_v4 }
 0x426   : > { %v14742_v5 = vpop.eup %14741 }
 0x427   : > { %v1271_v6 = vsel %vm1264_vm4, %v14742_v5, 0.0 }
 0x428   : > { %1272 = vadd.xlane.f32.xlu0 %v1271_v6 }
 0x4b5   : > { %v1273_v7 = vpop.xlane.xlu0 %1272 }
 0x4b6   : > { %14743 = vrcp.f32 %v1273_v7 }
 0x4c0   : > { %v14744_v8 = vpop.eup %14743 }
 0x4c1   : > { %v1275_v9 = vmul.f32 %v14744_v8, %v14742_v5 }
 0x4c3   : > { %v1276_v11 = vpack.c.bf16 %v1275_v9, %v1275_v9 }
 0x4c5   : > { %13118 = vmatmul.mubr.msk.bf16.vlgmr.msra.gmra.mrb[8].mxu1 %vm1264_vm4, %v1276_v11 }
 0x4c6   : > { %13122 = vmatpush3.bf16.xpose.msra.mxu1 %v1335_v12  ;;  %13123 = vmatprep.mubr.msk.bf16.mxu1 %vm15377_vm0, %v15376_v1 }
 0x4c7   : > { %13127 = vmatprep.subr.bf16.mxu1 %v15376_v1 }
 0x4cd   : > { %13124 = vmatmul.mubr.msk.bf16.vlgmr.msra.gmra.mrb[12].mxu1 %vm1215_vm1, %v1327_v13 }
 0x4ce   : > { %13129 = vmatprep.mubr.msk.bf16.mxu1 %vm15377_vm0, %v15376_v1 }
 0x598   : > { %v1318_v14 = vpop.f32.mrb[8].mxu1 }
 0x599   : > { %v13119_v15 = vpop.f32.mrb[9].mxu1  ;;  %v1324_v49 = vpack.c.bf16 %v1318_v14, %v1318_v14 }
 0x59a   : > { %v1321_v16 = vpop.f32.mrb[10].mxu1 }
 0x59b   : > { %v13120_v17 = vpop.f32.mrb[11].mxu1 }
 0x5a0   : > { %v1371_v18 = vpop.f32.mrb[12].mxu1 }
 0x5a1   : > { %v1377_v19 = vmul.f32 0.17677669, %v1371_v18  ;;  %v13125_v20 = vpop.f32.mrb[13].mxu1 }
 0x5a2   : > { %v1374_v21 = vpop.f32.mrb[14].mxu1  ;;  %v14129_v20 = vld [vmem:[#allocation7 + $0x20] sm:$0xff]  }
 0x5a3   : > { %v13126_v22 = vpop.f32.mrb[15].mxu1  ;;  %v1378_v23 = vadd.f32 %v1377_v19, %v16007_v57 }
 0x5a5   : > { %v1379_v24 = vsel %vm1264_vm4, %v1378_v23, -inf }
 0x5a6   : > { %1380 = vmax.xlane.f32.xlu0 %v1379_v24 }
 0x5bc   : > { %1392 = vrot.lane.b32.xlu0 %v16000_v52, %s17192_s21 }
 0x5c0   : > { %1553 = vrot.lane.b32.xlu0 %v15981_v43, %s17190_s30 }
 0x5c4   : > { %1551 = vrot.lane.b32.xlu0 %v15987_v45, %s17190_s30 }
 0x633   : > { %v1381_v26 = vpop.xlane.xlu0 %1380 }
 0x634   : > { %v1382_v28 = vsub.f32 %v1378_v23, %v1381_v26 }
 0x636   : > { %v1383_v29 = vmul.f32 1.442695, %v1382_v28 }
 0x637   : > { %v1393_v30 = vpop.permute.xlu0 %1392 }
 0x638   : > { %14745 = vpow2.f32 %v1383_v29  ;;  %v1398_v32 = vsel %vm1280_vm2, %v1393_v30, 0 }
 0x639   : > { %13128 = vmatpush3.bf16.msra.mxu1 %v1398_v32 }
 0x63a   : > { %13141 = vmatprep.subr.bf16.mxu1 %v15376_v1 }
 0x63b   : > { %v1554_v51 = vpop.permute.xlu0 %1553 }
 0x63c   : > { %v1559_v58 = vsel %vm1215_vm1, %v1554_v51, 0 }
 0x63f   : > { %v1552_v62 = vpop.permute.xlu0 %1551 }
 0x642   : > { %v14746_v35 = vpop.eup %14745 }
 0x643   : > { %v1385_v36 = vsel %vm1264_vm4, %v14746_v35, 0.0 }
 0x644   : > { %1386 = vadd.xlane.f32.xlu1 %v1385_v36 }
 0x655   : > { %1615 = vrot.lane.b32.xlu1 %v16000_v52, %s17190_s30 }
 0x6d1   : > { %v1387_v39 = vpop.xlane.xlu1 %1386 }
 0x6d2   : > { %14747 = vrcp.f32 %v1387_v39 }
 0x6d5   : > { %v1616_v48 = vpop.permute.xlu1 %1615 }
 0x6d6   : > { %v1621_v50 = vsel %vm1280_vm2, %v1616_v48, 0 }
 0x6dc   : > { %v14748_v40 = vpop.eup %14747 }
 0x6dd   : > { %v1389_v41 = vmul.f32 %v14748_v40, %v14746_v35 }
 0x6df   : > { %v1390_v44 = vpack.c.bf16 %v1389_v41, %v1389_v41 }
 0x6e1   : > { %13130 = vmatmul.mubr.msk.bf16.vlgmr.msra.gmra.mrb[16].mxu1 %vm1264_vm4, %v1390_v44 }
 0x6e2   : > { %13142 = vmatpush3.bf16.msra.mxu1 %v14125_v42  ;;  %13145 = vmatprep.mubr.msk.bf16.mxu1 %vm15377_vm0, %v15376_v1 }
 0x6e3   : > { %13143 = vmatprep.subr.bf16.mxu1 %v15376_v1 }
 0x6e6   : > { %13144 = vmatpush3.bf16.msra.mxu1 %v14126_v47 }
 0x6e7   : > { %13155 = vmatprep.subr.bf16.mxu1 %v15376_v1 }
 0x6e9   : > { %13146 = vmatmul.mubr.msk.bf16.vlgmr.msra.gmra.mrb[20].mxu1 %vm1215_vm1, %v1324_v49 }
 0x6ea   : > { %13156 = vmatpush3.bf16.msra.mxu1 %v1621_v50  ;;  %13157 = vmatprep.mubr.msk.bf16.mxu1 %vm15377_vm0, %v15376_v1 }
 0x6eb   : > { %13169 = vmatprep.subr.bf16.mxu1 %v15376_v1 }
 0x7b4   : > { %v1434_v53 = vpop.f32.mrb[16].mxu1 }
 0x7b5   : > { %v1440_v54 = vpack.c.bf16 %v1434_v53, %v1434_v53  ;;  %v13131_v55 = vpop.f32.mrb[17].mxu1 }
 0x7b6   : > { %v1437_v56 = vpop.f32.mrb[18].mxu1  ;;  %v14131_v55 = vld [vmem:[#allocation7 + $0x30] sm:$0xff]  }
 0x7b7   : > { %v13132_v59 = vpop.f32.mrb[19].mxu1  ;;  %13138 = vmatmul.mubr.msk.bf16.vlgmr.msra.gmra.mrb[4].mxu0 %vm1215_vm1, %v1440_v54 }
 0x7b8   : > { %13150 = vmatpush3.bf16.xpose.msra.mxu0 %v1559_v58  ;;  %13151 = vmatprep.mubr.msk.bf16.mxu0 %vm15377_vm0, %v15376_v1 }
 0x7b9   : > { %13161 = vmatprep.subr.bf16.mxu0 %v15376_v1 }
 0x7bc   : > { %v1545_v60 = vpop.f32.mrb[20].mxu1 }
 0x7bd   : > { %v13147_v61 = vpop.f32.mrb[21].mxu1 }
 0x7be   : > { %v1548_v63 = vpop.f32.mrb[22].mxu1 }
 0x7bf   : > { %v13148_v2 = vpop.f32.mrb[23].mxu1  ;;  %13152 = vmatmul.mubr.msk.bf16.vlgmr.msra.gmra.mrb[8].mxu0 %vm1215_vm1, %v1552_v62 }
 0x7c0   : > { %13165 = vmatprep.mubr.msk.bf16.mxu0 %vm15377_vm0, %v15376_v1  ;;  %13162 = vmatpush3.bf16.msra.mxu0 %v14129_v20  ;;  %v14142_v20 = vld [vmem:[#allocation8] sm:$0xff]  }
 0x7c1   : > { %13163 = vmatprep.subr.bf16.mxu0 %v15376_v1 }
 0x88a   : > { %v1490_v3 = vpop.f32.mrb[4].mxu0 }
 0x88b   : > { %v16053_v4 = vadd.f32 %v1545_v60, %v1490_v3  ;;  %v13139_v5 = vpop.f32.mrb[5].mxu0  ;;  %v14132_v3 = vld [vmem:[#allocation7 + $0x38] sm:$0xff]  }
 0x88c   : > { %v1493_v6 = vpop.f32.mrb[6].mxu0 }
 0x88d   : > { %v13140_v7 = vpop.f32.mrb[7].mxu0 }
 0x892   : > { %v1595_v8 = vpop.f32.mrb[8].mxu0 }
 0x893   : > { %v1601_v9 = vmul.f32 0.17677669, %v1595_v8  ;;  %v13153_v10 = vpop.f32.mrb[9].mxu0 }
 0x894   : > { %v1598_v11 = vpop.f32.mrb[10].mxu0  ;;  %v11964_v10 = vld [vmem:[%s17261_s2] ss:$0 sm:$0xff] }
 0x895   : > { %v13154_v12 = vpop.f32.mrb[11].mxu0  ;;  %v1602_v13 = vadd.f32 %v1601_v9, %v16007_v57 }
 0x897   : > { %v1603_v14 = vsel %vm1264_vm4, %v1602_v13, -inf }
 0x898   : > { %1604 = vmax.xlane.f32.xlu0 %v1603_v14 }
 0x925   : > { %v1605_v15 = vpop.xlane.xlu0 %1604 }
 0x926   : > { %v1606_v16 = vsub.f32 %v1602_v13, %v1605_v15 }
 0x928   : > { %v1607_v17 = vmul.f32 1.442695, %v1606_v16 }
 0x92a   : > { %14749 = vpow2.f32 %v1607_v17  ;;  %v14133_v17 = vld [vmem:[#allocation11] ss:$8 sps:$4 sm:$0xff]  }
 0x934   : > { %v14750_v18 = vpop.eup %14749 }
 0x935   : > { %v1609_v19 = vsel %vm1264_vm4, %v14750_v18, 0.0 }
 0x936   : > { %1610 = vadd.xlane.f32.xlu1 %v1609_v19  ;;  %v14138_v19 = vld [vmem:[#allocation11 + $0x14] ss:$8 sps:$4 sm:$0xff]  }
 0x947   : > { %1722 = vrot.lane.b32.xlu1 %v15981_v43, %s17188_s7 }
 0x94b   : > { %1720 = vrot.lane.b32.xlu1 %v15987_v45, %s17188_s7  ;;  %v14130_v45 = vld [vmem:[#allocation7 + $0x28] sm:$0xff]  }
 0x94c   : > { %13164 = vmatpush3.bf16.msra.mxu0 %v14130_v45 }
 0x94d   : > { %13175 = vmatprep.subr.bf16.mxu0 %v15376_v1 }
 0x9c3   : > { %v1611_v21 = vpop.xlane.xlu1 %1610 }
 0x9c4   : > { %14751 = vrcp.f32 %v1611_v21  ;;  %v14136_v21 = vld [vmem:[#allocation11 + $0x10] ss:$8 sps:$4 sm:$0xff]  }
 0x9c7   : > { %v1723_v24 = vpop.permute.xlu1 %1722 }
 0x9c8   : > { %v1728_v28 = vsel %vm1215_vm1, %v1723_v24, 0  ;;  %v14139_v24 = vld [vmem:[#allocation11 + $0x20] ss:$8 sps:$4 sm:$0xff]  }
 0x9cb   : > { %v1721_v43 = vpop.permute.xlu1 %1720 }
 0x9ce   : > { %v14752_v22 = vpop.eup %14751 }
 0x9cf   : > { %v1613_v23 = vmul.f32 %v14752_v22, %v14750_v18  ;;  %v14135_v18 = vld [vmem:[#allocation11 + $0x4] ss:$8 sps:$4 sm:$0xff]  }
 0x9d0   : > { %v14141_v22 = vld [vmem:[#allocation11 + $0x24] ss:$8 sps:$4 sm:$0xff]  }
 0x9d1   : > { %v1614_v26 = vpack.c.bf16 %v1613_v23, %v1613_v23  ;;  %v14146_v23 = vld [vmem:[#allocation8 + $0x8] sm:$0xff]  }
 0x9d3   : > { %13158 = vmatmul.mubr.msk.bf16.vlgmr.msra.gmra.mrb[24].mxu1 %vm1264_vm4, %v1614_v26  ;;  %v14145_v26 = vld [vmem:[#allocation11 + $0x34] ss:$8 sps:$4 sm:$0xff]  }
 0x9d4   : > { %13170 = vmatpush3.bf16.xpose.msra.mxu1 %v1728_v28  ;;  %13171 = vmatprep.mubr.msk.bf16.mxu1 %vm15377_vm0, %v15376_v1  ;;  %v14149_v28 = vld [vmem:[#allocation11 + $0x44] ss:$8 sps:$4 sm:$0xff]  }
 0x9d5   : > { %13181 = vmatprep.subr.bf16.mxu1 %v15376_v1 }
 0x9db   : > { %13172 = vmatmul.mubr.msk.bf16.vlgmr.msra.gmra.mrb[28].mxu1 %vm1215_vm1, %v1721_v43  ;;  %v14147_v43 = vld [vmem:[#allocation11 + $0x40] ss:$8 sps:$4 sm:$0xff]  }
 0x9dc   : > { %13185 = vmatprep.mubr.msk.bf16.mxu1 %vm15377_vm0, %v15376_v1  ;;  %13182 = vmatpush3.bf16.msra.mxu1 %v14131_v55  ;;  %v11965_v55 = vld [vmem:[%s17262_s20] ss:$0 sm:$0xff] }
 0x9dd   : > { %13183 = vmatprep.subr.bf16.mxu1 %v15376_v1 }
 0x9e0   : > { %13184 = vmatpush3.bf16.msra.mxu1 %v14132_v3 }
 0x9e1   : > { %2146 = vmatprep.subr.bf16.mxu1 %v14135_v18 }
 0xaa6   : > { %v1657_v29 = vpop.f32.mrb[24].mxu1 }
 0xaa7   : > { %v1663_v30 = vpack.c.bf16 %v1657_v29, %v1657_v29  ;;  %v13159_v32 = vpop.f32.mrb[25].mxu1 }
 0xaa8   : > { %v1660_v35 = vpop.f32.mrb[26].mxu1 }
 0xaa9   : > { %v13160_v36 = vpop.f32.mrb[27].mxu1  ;;  %13166 = vmatmul.mubr.msk.bf16.vlgmr.msra.gmra.mrb[12].mxu0 %vm1215_vm1, %v1663_v30  ;;  %v14150_v35 = vld [vmem:[#allocation8 + $0x10] sm:$0xff]  }
 0xaaa   : > { %13177 = vmatprep.mubr.msk.bf16.mxu0 %vm15377_vm0, %v15376_v1  ;;  %v14153_v36 = vld [vmem:[#allocation11 + $0x54] ss:$8 sps:$4 sm:$0xff]  }
 0xaae   : > { %v1764_v37 = vpop.f32.mrb[28].mxu1 }
 0xaaf   : > { %v1770_v38 = vmul.f32 0.17677669, %v1764_v37  ;;  %v13173_v39 = vpop.f32.mrb[29].mxu1  ;;  %v14151_v37 = vld [vmem:[#allocation11 + $0x50] ss:$8 sps:$4 sm:$0xff]  }
 0xab0   : > { %v1767_v40 = vpop.f32.mrb[30].mxu1  ;;  %v14157_v39 = vld [vmem:[#allocation11 + $0x64] ss:$8 sps:$4 sm:$0xff]  }
 0xab1   : > { %v13174_v41 = vpop.f32.mrb[31].mxu1  ;;  %v1771_v42 = vadd.f32 %v1770_v38, %v16007_v57  ;;  %v14154_v38 = vld [vmem:[#allocation8 + $0x18] sm:$0xff]   ;;  %v14155_v40 = vld [vmem:[#allocation11 + $0x60] ss:$8 sps:$4 sm:$0xff]  }
 0xab2   : > { %v14158_v41 = vld [vmem:[#allocation8 + $0x20] sm:$0xff]  }
 0xab3   : > { %v1772_v44 = vsel %vm1264_vm4, %v1771_v42, -inf }
 0xab4   : > { %1773 = vmax.xlane.f32.xlu0 %v1772_v44  ;;  %v14159_v44 = vld [vmem:[#allocation11 + $0x70] ss:$8 sps:$4 sm:$0xff]  }
 0xaca   : > { %1784 = vrot.lane.b32.xlu0 %v16000_v52, %s17188_s7 }
 0xb41   : > { %v1774_v47 = vpop.xlane.xlu0 %1773 }
 0xb42   : > { %v1775_v48 = vsub.f32 %v1771_v42, %v1774_v47  ;;  %v14161_v42 = vld [vmem:[#allocation11 + $0x74] ss:$8 sps:$4 sm:$0xff]   ;;  %v14162_v47 = vld [vmem:[#allocation8 + $0x28] sm:$0xff]  }
 0xb44   : > { %v1776_v49 = vmul.f32 1.442695, %v1775_v48  ;;  %v14163_v48 = vld [vmem:[#allocation8 + $0x30] sm:$0xff]  }
 0xb45   : > { %v1785_v50 = vpop.permute.xlu0 %1784 }
 0xb46   : > { %14753 = vpow2.f32 %v1776_v49  ;;  %v1790_v51 = vsel %vm1280_vm2, %v1785_v50, 0  ;;  %v14164_v49 = vld [vmem:[#allocation8 + $0x38] sm:$0xff]  }
 0xb47   : > { %13176 = vmatpush3.bf16.msra.mxu0 %v1790_v51 }
 0xb48   : > { %13189 = vmatprep.subr.bf16.mxu0 %v15376_v1 }
 0xb50   : > { %v14754_v53 = vpop.eup %14753 }
 0xb51   : > { %v1778_v54 = vsel %vm1264_vm4, %v14754_v53, 0.0 }
 0xb52   : > { %1779 = vadd.xlane.f32.xlu1 %v1778_v54 }
 0xb7c   : > { %v1713_v56 = vpop.f32.mrb[12].mxu0 }
 0xb7d   : > { %v1719_v52 = vadd.f32 %v1713_v56, %v16053_v4  ;;  %v13167_v58 = vpop.f32.mrb[13].mxu0 }
 0xb7e   : > { %v1716_v59 = vpop.f32.mrb[14].mxu0 }
 0xb7f   : > { %v13168_v60 = vpop.f32.mrb[15].mxu0 }
 0xbdf   : > { %v1780_v61 = vpop.xlane.xlu1 %1779 }
 0xbe0   : > { %14755 = vrcp.f32 %v1780_v61  ;;  %v2054_v61 = vld [vmem:[#allocation13] sm:$0x3] }
 0xbea   : > { %v14756_v62 = vpop.eup %14755 }
 0xbeb   : > { %v1782_v63 = vmul.f32 %v14756_v62, %v14754_v53  ;;  %v2059_v62 = vrot.slane %v2054_v61, %v15977_v34 }
 0xbed   : > { %v1783_v2 = vpack.c.bf16 %v1782_v63, %v1782_v63  ;;  %v2063_v63 = vrot.slane %v2054_v61, %v15974_v33 }
 0xbef   : > { %13178 = vmatmul.mubr.msk.bf16.vlgmr.msra.gmra.mrb[16].mxu0 %vm1264_vm4, %v1783_v2 }
 0xbf0   : > { %13205 = vmatprep.mubr.msk.bf16.mxu0 %vm15377_vm0, %v15376_v1  ;;  %13190 = vmatpush3.bf16.msra.mxu0 %v14142_v20 }
 0xbf1   : > { %13191 = vmatprep.subr.bf16.mxu0 %v15376_v1 }
 0xbf4   : > { %13192 = vmatpush3.bf16.msra.mxu0 %v14146_v23 }
 0xbf5   : > { %13193 = vmatprep.subr.bf16.mxu0 %v15376_v1 }
 0xbf8   : > { %13194 = vmatpush3.bf16.msra.mxu0 %v14150_v35 }
 0xbf9   : > { %13195 = vmatprep.subr.bf16.mxu0 %v15376_v1 }
 0xbfc   : > { %13196 = vmatpush3.bf16.msra.mxu0 %v14154_v38 }
 0xbfd   : > { %13197 = vmatprep.subr.bf16.mxu0 %v15376_v1 }
 0xc00   : > { %13198 = vmatpush3.bf16.msra.mxu0 %v14158_v41 }
 0xc01   : > { %13199 = vmatprep.subr.bf16.mxu0 %v15376_v1 }
 0xc04   : > { %13200 = vmatpush3.bf16.msra.mxu0 %v14162_v47 }
 0xc05   : > { %13201 = vmatprep.subr.bf16.mxu0 %v15376_v1 }
 0xc08   : > { %13202 = vmatpush3.bf16.msra.mxu0 %v14163_v48 }
 0xc09   : > { %13203 = vmatprep.subr.bf16.mxu0 %v15376_v1 }
 0xc0c   : > { %13204 = vmatpush3.bf16.msra.mxu0 %v14164_v49 }
 0xc0d   : > { %13209 = vmatprep.subr.bf16.mxu0 %v15376_v1 }
 0xcc2   : > { %v1826_v5 = vpop.f32.mrb[16].mxu0 }
 0xcc3   : > { %v1832_v6 = vpack.c.bf16 %v1826_v5, %v1826_v5  ;;  %v13179_v7 = vpop.f32.mrb[17].mxu0 }
 0xcc4   : > { %v1829_v8 = vpop.f32.mrb[18].mxu0 }
 0xcc5   : > { %v13180_v4 = vpop.f32.mrb[19].mxu0  ;;  %13186 = vmatmul.mubr.msk.bf16.vlgmr.msra.gmra.mrb[32].mxu1 %vm1215_vm1, %v1832_v6 }
 0xcc6   : > { %2178 = vmatprep.mubr.bf16.mxu1 %v15375_v0  ;;  %2147 = vmatpush1.bf16.msra.mxu1 %v14133_v17 }
 0xcc7   : > { %2148 = vmatprep.subr.bf16.mxu1 %v14138_v19 }
 0xcca   : > { %2149 = vmatpush1.bf16.msra.mxu1 %v14136_v21 }
 0xccb   : > { %2150 = vmatprep.subr.bf16.mxu1 %v14141_v22 }
 0xcce   : > { %2151 = vmatpush1.bf16.msra.mxu1 %v14139_v24 }
 0xccf   : > { %2152 = vmatprep.subr.bf16.mxu1 %v14145_v26 }
 0xd98   : > { %v1882_v9 = vpop.f32.mrb[32].mxu1 }
 0xd99   : > { %v1888_v11 = vadd.f32 %v1882_v9, %v1719_v52  ;;  %v13187_v12 = vpop.f32.mrb[33].mxu1  ;;  %v11966_v52 = vld [vmem:[%s17263_s23] ss:$0 sm:$0xff] }
 0xd9a   : > { %v1885_v13 = vpop.f32.mrb[34].mxu1  ;;  %v11967_v12 = vld [vmem:[#allocation10] ss:$0 sm:$0xff] }
 0xd9b   : > { %v1896_v14 = vadd.f32 %v11964_v10, %v1888_v11  ;;  %v13188_v15 = vpop.f32.mrb[35].mxu1 }
 0xd9d   : > { %v1897_v16 = vadd.f32 %v1896_v14, %v15948_v25  ;;  %v14143_v25 = vld [vmem:[#allocation11 + $0x30] ss:$8 sps:$4 sm:$0xff]  }
 0xd9e   : > { %2153 = vmatpush1.bf16.msra.mxu1 %v14143_v25 }
 0xd9f   : > { %1900 = vadd.xlane.f32.xlu0 %v1897_v16  ;;  %2154 = vmatprep.subr.bf16.mxu1 %v14149_v28 }
 0xda2   : > { %2155 = vmatpush1.bf16.msra.mxu1 %v14147_v43 }
 0xda3   : > { %2156 = vmatprep.subr.bf16.mxu1 %v14153_v36 }
 0xda6   : > { %2157 = vmatpush1.bf16.msra.mxu1 %v14151_v37 }
 0xda7   : > { %2158 = vmatprep.subr.bf16.mxu1 %v14157_v39 }
 0xdaa   : > { %2159 = vmatpush1.bf16.msra.mxu1 %v14155_v40 }
 0xdab   : > { %2160 = vmatprep.subr.bf16.mxu1 %v14161_v42 }
 0xdae   : > { %2161 = vmatpush1.bf16.msra.mxu1 %v14159_v44 }
 0xdaf   : > { %13215 = vmatprep.subr.bf16.mxu1 %v15376_v1 }
 0xdb1   : > { %2179 = vmatmul.mubr.bf16.vlgmr.msra.gmra.mrb[36].mxu1 %v15953_v27 }
 0xdb2   : > { %13217 = vmatprep.mubr.msk.bf16.mxu1 %vm15377_vm0, %v15376_v1 }
 0xe2c   : > { %v1901_v45 = vpop.xlane.xlu0 %1900 }
 0xe2d   : > { %v1903_v29 = vmul.f32 0.0078125, %v1901_v45 }
 0xe2f   : > { %v1904_v30 = vsub.f32 %v1897_v16, %v1903_v29 }
 0xe31   : > { %v1905_v32 = vmul.f32 %v1904_v30, %v1904_v30 }
 0xe33   : > { %1906 = vadd.xlane.f32.xlu1 %v1905_v32 }
 0xe84   : > { %v2180_v2 = vpop.f32.mrb[36].mxu1 }
 0xe85   : > { %v2181_v3 = vadd.f32 %v2180_v2, %v2059_v62  ;;  %v2182_v5 = vpop.f32.mrb[37].mxu1  ;;  %v14165_v62 = vld [vmem:[#allocation14] sm:$0xff]   ;;  %v14166_v2 = vld [vmem:[#allocation14 + $0x8] sm:$0xff]  }
 0xe86   : > { %v2183_v6 = vadd.f32 %v2182_v5, %v2063_v63  ;;  %v2184_v7 = vpop.f32.mrb[38].mxu1 }
 0xe87   : > { %v16119_v8 = vpack.c.bf16 %v2181_v3, %v2181_v3  ;;  %v2185_v4 = vpop.f32.mrb[39].mxu1 }
 0xe88   : > { %v16121_v9 = vpack.c.bf16 %v2183_v6, %v2183_v6 }
 0xe89   : > { %2316 = vrot.lane.b32.xlu1 %v16119_v8, %s17192_s21  ;;  %v2210_v10 = vsel %vm1215_vm1, %v16119_v8, 0 }
 0xe8a   : > { %v2269_v11 = vsel %vm1280_vm2, %v16121_v9, 0 }
 0xe8b   : > { %13216 = vmatpush3.bf16.msra.mxu1 %v2269_v11 }
 0xe8c   : > { %13227 = vmatprep.subr.bf16.mxu1 %v15376_v1 }
 0xec0   : > { %v1907_v50 = vpop.xlane.xlu1 %1906 }
 0xec1   : > { %v1908_v51 = vmul.f32 0.0078125, %v1907_v50 }
 0xec3   : > { %v1909_v53 = vadd.f32 1e-05, %v1908_v51 }
 0xec5   : > { %14757 = vrsqrt.f32 %v1909_v53 }
 0xecf   : > { %v14758_v54 = vpop.eup %14757 }
 0xed0   : > { %v1911_v56 = vmul.f32 %v14758_v54, %v1904_v30  ;;  %v14167_v54 = vld [vmem:[#allocation14 + $0x10] sm:$0xff]  }
 0xed2   : > { %v1918_v58 = vmul.f32 %v11965_v55, %v1911_v56  ;;  %v14168_v55 = vld [vmem:[#allocation14 + $0x18] sm:$0xff]  }
 0xed4   : > { %v16111_v59 = vadd.f32 %v11966_v52, %v1918_v58 }
 0xed6   : > { %v1926_v60 = vpack.c.bf16 %v16111_v59, %v16111_v59 }
 0xed8   : > { %13206 = vmatmul.mubr.bf16.vlgmr.msra.gmra.mrb[20].mxu0 %v1926_v60 }
 0xed9   : > { %13211 = vmatprep.mubr.msk.bf16.mxu0 %vm15377_vm0, %v15376_v1  ;;  %13210 = vmatpush3.bf16.xpose.msra.mxu0 %v2210_v10 }
 0xeda   : > { %13221 = vmatprep.subr.bf16.mxu0 %v15376_v1 }
 0xefb   : > { %v2317_v14 = vpop.permute.xlu1 %2316 }
 0xefc   : > { %v2322_v20 = vsel %vm1215_vm1, %v2317_v14, 0 }
 0xfab   : > { %v2032_v13 = vpop.f32.mrb[20].mxu0 }
 0xfac   : > { %v2033_v15 = vadd.f32 %v11967_v12, %v2032_v13  ;;  %v13207_v16 = vpop.f32.mrb[21].mxu0 }
 0xfad   : > { %v2035_v17 = vpop.f32.mrb[22].mxu0 }
 0xfae   : > { %v16131_v18 = vpack.c.bf16 %v2033_v15, %v2033_v15  ;;  %v13208_v19 = vpop.f32.mrb[23].mxu0 }
 0xfb0   : > { %2313 = vrot.lane.b32.xlu0 %v16131_v18, %s17192_s21  ;;  %13212 = vmatmul.mubr.msk.bf16.vlgmr.msra.gmra.mrb[24].mxu0 %vm1215_vm1, %v16131_v18 }
 0xfb1   : > { %13222 = vmatpush3.bf16.xpose.msra.mxu0 %v2322_v20  ;;  %13223 = vmatprep.mubr.msk.bf16.mxu0 %vm15377_vm0, %v15376_v1 }
 0xfb2   : > { %13233 = vmatprep.subr.bf16.mxu0 %v15376_v1 }
0x1022   : > { %v2314_v21 = vpop.permute.xlu0 %2313 }
0x1023   : > { %13224 = vmatmul.mubr.msk.bf16.vlgmr.msra.gmra.mrb[28].mxu0 %vm1215_vm1, %v2314_v21 }
0x1024   : > { %13237 = vmatprep.mubr.msk.bf16.mxu0 %vm15377_vm0, %v15376_v1  ;;  %13234 = vmatpush3.bf16.msra.mxu0 %v14167_v54 }
0x1025   : > { %13235 = vmatprep.subr.bf16.mxu0 %v15376_v1 }
0x1028   : > { %13236 = vmatpush3.bf16.msra.mxu0 %v14168_v55 }
0x1029   : > { %13249 = vmatprep.subr.bf16.mxu0 %v15376_v1 }
0x1083   : > { %v2246_v22 = vpop.f32.mrb[24].mxu0 }
0x1084   : > { %v2252_v23 = vmul.f32 0.17677669, %v2246_v22  ;;  %v13213_v24 = vpop.f32.mrb[25].mxu0 }
0x1085   : > { %v2249_v26 = vpop.f32.mrb[26].mxu0 }
0x1086   : > { %v13214_v25 = vpop.f32.mrb[27].mxu0  ;;  %v2253_v28 = vsel %vm1264_vm4, %v2252_v23, -inf }
0x1087   : > { %2254 = vmax.xlane.f32.xlu1 %v2253_v28 }
0x10f6   : > { %v2358_v43 = vpop.f32.mrb[28].mxu0 }
0x10f7   : > { %v2364_v45 = vmul.f32 0.17677669, %v2358_v43  ;;  %v13225_v29 = vpop.f32.mrb[29].mxu0 }
0x10f8   : > { %v2361_v30 = vpop.f32.mrb[30].mxu0 }
0x10f9   : > { %v13226_v32 = vpop.f32.mrb[31].mxu0  ;;  %v2365_v35 = vsel %vm1264_vm4, %v2364_v45, -inf }
0x10fa   : > { %2366 = vmax.xlane.f32.xlu0 %v2365_v35 }
0x1110   : > { %2539 = vrot.lane.b32.xlu0 %v16119_v8, %s17190_s30 }
0x1114   : > { %v2255_v36 = vpop.xlane.xlu1 %2254 }
0x1115   : > { %v2256_v37 = vsub.f32 %v2252_v23, %v2255_v36 }
0x1117   : > { %v2257_v38 = vmul.f32 1.442695, %v2256_v37 }
0x1119   : > { %14759 = vpow2.f32 %v2257_v38 }
0x1123   : > { %v14760_v39 = vpop.eup %14759 }
0x1124   : > { %v2259_v40 = vsel %vm1264_vm4, %v14760_v39, 0.0 }
0x1125   : > { %2260 = vadd.xlane.f32.xlu1 %v2259_v40 }
0x1187   : > { %v2367_v41 = vpop.xlane.xlu0 %2366 }
0x1188   : > { %v2368_v42 = vsub.f32 %v2364_v45, %v2367_v41 }
0x118a   : > { %v2369_v44 = vmul.f32 1.442695, %v2368_v42 }
0x118b   : > { %v2540_v10 = vpop.permute.xlu0 %2539 }
0x118c   : > { %14761 = vpow2.f32 %v2369_v44  ;;  %v2545_v15 = vsel %vm1215_vm1, %v2540_v10, 0  ;;  %v14169_v44 = vld [vmem:[#allocation14 + $0x20] sm:$0xff]  }
0x1196   : > { %v14762_v47 = vpop.eup %14761 }
0x1197   : > { %v2371_v48 = vsel %vm1264_vm4, %v14762_v47, 0.0 }
0x1198   : > { %2372 = vadd.xlane.f32.xlu1 %v2371_v48 }
0x11a9   : > { %2378 = vrot.lane.b32.xlu1 %v16121_v9, %s17192_s21  ;;  %s17269_s21 = smov 96  }
0x11ad   : > { %2537 = vrot.lane.b32.xlu1 %v16131_v18, %s17190_s30 }
0x11b2   : > { %v2261_v49 = vpop.xlane.xlu1 %2260 }
0x11b3   : > { %14763 = vrcp.f32 %v2261_v49 }
0x11bd   : > { %v14764_v50 = vpop.eup %14763 }
0x11be   : > { %v2263_v51 = vmul.f32 %v14764_v50, %v14760_v39 }
0x11c0   : > { %v2264_v53 = vpack.c.bf16 %v2263_v51, %v2263_v51 }
0x11c2   : > { %13218 = vmatmul.mubr.msk.bf16.vlgmr.msra.gmra.mrb[40].mxu1 %vm1264_vm4, %v2264_v53  ;;  %v14170_v53 = vld [vmem:[#allocation14 + $0x28] sm:$0xff]  }
0x11c3   : > { %13229 = vmatprep.mubr.msk.bf16.mxu1 %vm15377_vm0, %v15376_v1 }
0x1225   : > { %v2373_v56 = vpop.xlane.xlu1 %2372 }
0x1226   : > { %14765 = vrcp.f32 %v2373_v56 }
0x1229   : > { %v2379_v52 = vpop.permute.xlu1 %2378 }
0x122a   : > { %v2384_v58 = vsel %vm1280_vm2, %v2379_v52, 0 }
0x122b   : > { %13228 = vmatpush3.bf16.msra.mxu1 %v2384_v58 }
0x122c   : > { %13241 = vmatprep.subr.bf16.mxu1 %v15376_v1 }
0x122d   : > { %v2538_v17 = vpop.permute.xlu1 %2537 }
0x1230   : > { %v14766_v60 = vpop.eup %14765 }
0x1231   : > { %v2375_v61 = vmul.f32 %v14766_v60, %v14762_v47 }
0x1233   : > { %v2376_v63 = vpack.c.bf16 %v2375_v61, %v2375_v61 }
0x1235   : > { %13230 = vmatmul.mubr.msk.bf16.vlgmr.msra.gmra.mrb[44].mxu1 %vm1264_vm4, %v2376_v63 }
0x1236   : > { %13242 = vmatpush3.bf16.msra.mxu1 %v14165_v62  ;;  %13245 = vmatprep.mubr.msk.bf16.mxu1 %vm15377_vm0, %v15376_v1 }
0x1237   : > { %13243 = vmatprep.subr.bf16.mxu1 %v15376_v1 }
0x123a   : > { %13244 = vmatpush3.bf16.msra.mxu1 %v14166_v2 }
0x123b   : > { %13255 = vmatprep.subr.bf16.mxu1 %v15376_v1 }
0x1295   : > { %v2305_v3 = vpop.f32.mrb[40].mxu1 }
0x1296   : > { %v2311_v5 = vpack.c.bf16 %v2305_v3, %v2305_v3  ;;  %v13219_v6 = vpop.f32.mrb[41].mxu1 }
0x1297   : > { %v2308_v7 = vpop.f32.mrb[42].mxu1 }
0x1298   : > { %v13220_v4 = vpop.f32.mrb[43].mxu1  ;;  %13246 = vmatmul.mubr.msk.bf16.vlgmr.msra.gmra.mrb[48].mxu1 %vm1215_vm1, %v2311_v5 }
0x1299   : > { %13257 = vmatprep.mubr.msk.bf16.mxu1 %vm15377_vm0, %v15376_v1 }
0x1308   : > { %v2420_v11 = vpop.f32.mrb[44].mxu1 }
0x1309   : > { %v2426_v12 = vpack.c.bf16 %v2420_v11, %v2420_v11  ;;  %v13231_v13 = vpop.f32.mrb[45].mxu1 }
0x130a   : > { %v2423_v14 = vpop.f32.mrb[46].mxu1  ;;  %v14171_v13 = vld [vmem:[#allocation14 + $0x30] sm:$0xff]  }
0x130b   : > { %v13232_v16 = vpop.f32.mrb[47].mxu1  ;;  %13238 = vmatmul.mubr.msk.bf16.vlgmr.msra.gmra.mrb[32].mxu0 %vm1215_vm1, %v2426_v12 }
0x130c   : > { %13250 = vmatpush3.bf16.xpose.msra.mxu0 %v2545_v15  ;;  %13251 = vmatprep.mubr.msk.bf16.mxu0 %vm15377_vm0, %v15376_v1 }
0x130d   : > { %13261 = vmatprep.subr.bf16.mxu0 %v15376_v1 }
0x1313   : > { %13252 = vmatmul.mubr.msk.bf16.vlgmr.msra.gmra.mrb[36].mxu0 %vm1215_vm1, %v2538_v17 }
0x1314   : > { %13265 = vmatprep.mubr.msk.bf16.mxu0 %vm15377_vm0, %v15376_v1  ;;  %13262 = vmatpush3.bf16.msra.mxu0 %v14169_v44  ;;  %v14181_v44 = vld [vmem:[#allocation17 + $0x24] ss:$16 sps:$4 sm:$0xff]  }
0x1315   : > { %13263 = vmatprep.subr.bf16.mxu0 %v15376_v1 }
0x1318   : > { %13264 = vmatpush3.bf16.msra.mxu0 %v14170_v53 }
0x1319   : > { %13275 = vmatprep.subr.bf16.mxu0 %v15376_v1 }
0x136b   : > { %v2531_v19 = vpop.f32.mrb[48].mxu1 }
0x136c   : > { %v13247_v20 = vpop.f32.mrb[49].mxu1 }
0x136d   : > { %v2534_v21 = vpop.f32.mrb[50].mxu1 }
0x136e   : > { %v13248_v22 = vpop.f32.mrb[51].mxu1 }
0x13de   : > { %v2476_v23 = vpop.f32.mrb[32].mxu0 }
0x13df   : > { %v16177_v24 = vadd.f32 %v2531_v19, %v2476_v23  ;;  %v13239_v26 = vpop.f32.mrb[33].mxu0  ;;  %v14172_v23 = vld [vmem:[#allocation14 + $0x38] sm:$0xff]  }
0x13e0   : > { %v2479_v25 = vpop.f32.mrb[34].mxu0 }
0x13e1   : > { %v13240_v28 = vpop.f32.mrb[35].mxu0 }
0x13e6   : > { %v2581_v43 = vpop.f32.mrb[36].mxu0 }
0x13e7   : > { %v2587_v45 = vmul.f32 0.17677669, %v2581_v43  ;;  %v13253_v29 = vpop.f32.mrb[37].mxu0 }
0x13e8   : > { %v2584_v30 = vpop.f32.mrb[38].mxu0  ;;  %v12012_v29 = vld [vmem:[#allocation16] ss:$0 sm:$0xff] }
0x13e9   : > { %v13254_v32 = vpop.f32.mrb[39].mxu0  ;;  %v2588_v35 = vsel %vm1264_vm4, %v2587_v45, -inf }
0x13ea   : > { %2589 = vmax.xlane.f32.xlu1 %v2588_v35 }
0x13fb   : > { %2600 = vrot.lane.b32.xlu1 %v16121_v9, %s17190_s30  ;;  %s17270_s30 = smov 64  }
0x13ff   : > { %2705 = vrot.lane.b32.xlu1 %v16131_v18, %s17188_s7 }
0x1477   : > { %v2590_v36 = vpop.xlane.xlu1 %2589 }
0x1478   : > { %v2591_v37 = vsub.f32 %v2587_v45, %v2590_v36 }
0x147a   : > { %v2592_v38 = vmul.f32 1.442695, %v2591_v37 }
0x147b   : > { %v2601_v39 = vpop.permute.xlu1 %2600 }
0x147c   : > { %14767 = vpow2.f32 %v2592_v38  ;;  %v2606_v40 = vsel %vm1280_vm2, %v2601_v39, 0  ;;  %v14173_v39 = vld [vmem:[#allocation17] ss:$16 sps:$4 sm:$0xff]  }
0x147d   : > { %13256 = vmatpush3.bf16.msra.mxu1 %v2606_v40  ;;  %v14175_v40 = vld [vmem:[#allocation17 + $0x4] ss:$16 sps:$4 sm:$0xff]  }
0x147e   : > { %13269 = vmatprep.subr.bf16.mxu1 %v15376_v1 }
0x1486   : > { %v14768_v41 = vpop.eup %14767 }
0x1487   : > { %v2594_v42 = vsel %vm1264_vm4, %v14768_v41, 0.0 }
0x1488   : > { %2595 = vadd.xlane.f32.xlu0 %v2594_v42  ;;  %v14178_v42 = vld [vmem:[#allocation17 + $0xc] ss:$16 sps:$4 sm:$0xff]  }
0x149e   : > { %2707 = vrot.lane.b32.xlu0 %v16119_v8, %s17188_s7  ;;  %v2706_v8 = vpop.permute.xlu1 %2705 }
0x1515   : > { %v2596_v18 = vpop.xlane.xlu0 %2595 }
0x1516   : > { %14769 = vrcp.f32 %v2596_v18  ;;  %v14184_v18 = vld [vmem:[#allocation17 + $0x2c] ss:$16 sps:$4 sm:$0xff]  }
0x1519   : > { %v2708_v49 = vpop.permute.xlu0 %2707 }
0x151a   : > { %v2713_v51 = vsel %vm1215_vm1, %v2708_v49, 0  ;;  %v14187_v49 = vld [vmem:[#allocation17 + $0x44] ss:$16 sps:$4 sm:$0xff]  }
0x1520   : > { %v14770_v47 = vpop.eup %14769 }
0x1521   : > { %v2598_v48 = vmul.f32 %v14770_v47, %v14768_v41  ;;  %v14176_v41 = vld [vmem:[#allocation17 + $0x8] ss:$16 sps:$4 sm:$0xff]   ;;  %v14179_v47 = vld [vmem:[#allocation17 + $0x20] ss:$16 sps:$4 sm:$0xff]  }
0x1523   : > { %v2599_v50 = vpack.c.bf16 %v2598_v48, %v2598_v48  ;;  %v14182_v48 = vld [vmem:[#allocation17 + $0x28] ss:$16 sps:$4 sm:$0xff]  }
0x1525   : > { %13258 = vmatmul.mubr.msk.bf16.vlgmr.msra.gmra.mrb[52].mxu1 %vm1264_vm4, %v2599_v50  ;;  %v14190_v50 = vld [vmem:[#allocation17 + $0x4c] ss:$16 sps:$4 sm:$0xff]  }
0x1526   : > { %13270 = vmatpush3.bf16.xpose.msra.mxu1 %v2713_v51  ;;  %13271 = vmatprep.mubr.msk.bf16.mxu1 %vm15377_vm0, %v15376_v1  ;;  %v14185_v51 = vld [vmem:[#allocation17 + $0x40] ss:$16 sps:$4 sm:$0xff]  }
0x1527   : > { %13281 = vmatprep.subr.bf16.mxu1 %v15376_v1 }
0x152d   : > { %13272 = vmatmul.mubr.msk.bf16.vlgmr.msra.gmra.mrb[56].mxu1 %vm1215_vm1, %v2706_v8 }
0x152e   : > { %13285 = vmatprep.mubr.msk.bf16.mxu1 %vm15377_vm0, %v15376_v1  ;;  %13282 = vmatpush3.bf16.msra.mxu1 %v14171_v13  ;;  %v14217_v13 = vld [vmem:[#allocation17 + $0xe4] ss:$16 sps:$4 sm:$0xff]  }
0x152f   : > { %13283 = vmatprep.subr.bf16.mxu1 %v15376_v1 }
0x1532   : > { %13284 = vmatpush3.bf16.msra.mxu1 %v14172_v23  ;;  %v12013_v23 = vld [vmem:[%s17264_s29] ss:$0 sm:$0xff] }
0x1533   : > { %3165 = vmatprep.subr.bf16.mxu1 %v14178_v42  ;;  %v14234_v42 = vld [vmem:[#allocation19 + $0xd8] sm:$0xff]  }
0x15f8   : > { %v2642_v54 = vpop.f32.mrb[52].mxu1 }
0x15f9   : > { %v2648_v55 = vpack.c.bf16 %v2642_v54, %v2642_v54  ;;  %v13259_v56 = vpop.f32.mrb[53].mxu1 }
0x15fa   : > { %v2645_v52 = vpop.f32.mrb[54].mxu1  ;;  %v14193_v56 = vld [vmem:[#allocation17 + $0x64] ss:$16 sps:$4 sm:$0xff]  }
0x15fb   : > { %v13260_v58 = vpop.f32.mrb[55].mxu1  ;;  %13266 = vmatmul.mubr.msk.bf16.vlgmr.msra.gmra.mrb[40].mxu0 %vm1215_vm1, %v2648_v55  ;;  %v14196_v52 = vld [vmem:[#allocation17 + $0x6c] ss:$16 sps:$4 sm:$0xff]  }
0x15fc   : > { %13277 = vmatprep.mubr.msk.bf16.mxu0 %vm15377_vm0, %v15376_v1  ;;  %v14191_v58 = vld [vmem:[#allocation17 + $0x60] ss:$16 sps:$4 sm:$0xff]  }
0x1600   : > { %v2749_v60 = vpop.f32.mrb[56].mxu1 }
0x1601   : > { %v2755_v61 = vmul.f32 0.17677669, %v2749_v60  ;;  %v13273_v62 = vpop.f32.mrb[57].mxu1  ;;  %v14194_v60 = vld [vmem:[#allocation17 + $0x68] ss:$16 sps:$4 sm:$0xff]  }
0x1602   : > { %v2752_v63 = vpop.f32.mrb[58].mxu1  ;;  %v14197_v62 = vld [vmem:[#allocation17 + $0x80] ss:$16 sps:$4 sm:$0xff]  }
0x1603   : > { %v13274_v2 = vpop.f32.mrb[59].mxu1  ;;  %v2756_v3 = vsel %vm1264_vm4, %v2755_v61, -inf  ;;  %v14200_v63 = vld [vmem:[#allocation17 + $0x88] ss:$16 sps:$4 sm:$0xff]  }
0x1604   : > { %2757 = vmax.xlane.f32.xlu1 %v2756_v3  ;;  %v14202_v2 = vld [vmem:[#allocation17 + $0x8c] ss:$16 sps:$4 sm:$0xff]   ;;  %v14205_v3 = vld [vmem:[#allocation17 + $0xa4] ss:$16 sps:$4 sm:$0xff]  }
0x1615   : > { %2768 = vrot.lane.b32.xlu1 %v16121_v9, %s17188_s7  ;;  %s17265_s7 = sld [smem:[#allocation49_spill]] }
0x1691   : > { %v2758_v5 = vpop.xlane.xlu1 %2757 }
0x1692   : > { %v2759_v6 = vsub.f32 %v2755_v61, %v2758_v5  ;;  %v14199_v61 = vld [vmem:[#allocation17 + $0x84] ss:$16 sps:$4 sm:$0xff]   ;;  %v14208_v5 = vld [vmem:[#allocation17 + $0xac] ss:$16 sps:$4 sm:$0xff]  }
0x1694   : > { %v2760_v7 = vmul.f32 1.442695, %v2759_v6  ;;  %v14203_v6 = vld [vmem:[#allocation17 + $0xa0] ss:$16 sps:$4 sm:$0xff]  }
0x1695   : > { %v2769_v4 = vpop.permute.xlu1 %2768 }
0x1696   : > { %14771 = vpow2.f32 %v2760_v7  ;;  %v2774_v10 = vsel %vm1280_vm2, %v2769_v4, 0  ;;  %v14206_v7 = vld [vmem:[#allocation17 + $0xa8] ss:$16 sps:$4 sm:$0xff]   ;;  %v14211_v4 = vld [vmem:[#allocation17 + $0xc4] ss:$16 sps:$4 sm:$0xff]  }
0x1697   : > { %13276 = vmatpush3.bf16.msra.mxu0 %v2774_v10  ;;  %v14214_v10 = vld [vmem:[#allocation17 + $0xcc] ss:$16 sps:$4 sm:$0xff]  }
0x1698   : > { %3124 = vmatprep.subr.bf16.mxu0 %v14175_v40  ;;  %v14232_v40 = vld [vmem:[#allocation19 + $0x90] sm:$0xff]  }
0x16a0   : > { %v14772_v11 = vpop.eup %14771 }
0x16a1   : > { %v2762_v12 = vsel %vm1264_vm4, %v14772_v11, 0.0 }
0x16a2   : > { %2763 = vadd.xlane.f32.xlu0 %v2762_v12  ;;  %v14212_v12 = vld [vmem:[#allocation17 + $0xc8] ss:$16 sps:$4 sm:$0xff]  }
0x16ce   : > { %v2698_v14 = vpop.f32.mrb[40].mxu0 }
0x16cf   : > { %v2704_v15 = vadd.f32 %v2698_v14, %v16177_v24  ;;  %v13267_v9 = vpop.f32.mrb[41].mxu0  ;;  %v14220_v14 = vld [vmem:[#allocation17 + $0xec] ss:$16 sps:$4 sm:$0xff]  }
0x16d0   : > { %v2701_v16 = vpop.f32.mrb[42].mxu0  ;;  %v14218_v9 = vld [vmem:[#allocation17 + $0xe8] ss:$16 sps:$4 sm:$0xff]  }
0x16d1   : > { %v13268_v17 = vpop.f32.mrb[43].mxu0  ;;  %v14221_v16 = vld [vmem:[#allocation19 + $0x40] sm:$0xff]  }
0x16d2   : > { %v14222_v17 = vld [vmem:[#allocation19 + $0xc0] sm:$0xff]  }
0x172f   : > { %v2764_v19 = vpop.xlane.xlu0 %2763 }
0x1730   : > { %14773 = vrcp.f32 %v2764_v19 }
0x173a   : > { %v14774_v20 = vpop.eup %14773 }
0x173b   : > { %v2766_v21 = vmul.f32 %v14774_v20, %v14772_v11  ;;  %v14209_v11 = vld [vmem:[#allocation17 + $0xc0] ss:$16 sps:$4 sm:$0xff]  }
0x173d   : > { %v2767_v22 = vpack.c.bf16 %v2766_v21, %v2766_v21 }
0x173f   : > { %13278 = vmatmul.mubr.msk.bf16.vlgmr.msra.gmra.mrb[44].mxu0 %vm1264_vm4, %v2767_v22 }
0x1740   : > { %3156 = vmatprep.mubr.bf16.mxu0 %v15375_v0  ;;  %3125 = vmatpush1.bf16.msra.mxu0 %v14173_v39  ;;  %v14231_v39 = vld [vmem:[#allocation19 + $0x10] sm:$0xff]  }
0x1741   : > { %3126 = vmatprep.subr.bf16.mxu0 %v14181_v44  ;;  %v14235_v44 = vld [vmem:[#allocation19 + $0x18] sm:$0xff]  }
0x1744   : > { %3127 = vmatpush1.bf16.msra.mxu0 %v14179_v47  ;;  %v14237_v47 = vld [vmem:[#allocation19 + $0x60] sm:$0xff]  }
0x1745   : > { %3128 = vmatprep.subr.bf16.mxu0 %v14187_v49  ;;  %v14239_v49 = vld [vmem:[#allocation19 + $0x20] sm:$0xff]  }
0x1748   : > { %3129 = vmatpush1.bf16.msra.mxu0 %v14185_v51  ;;  %v14241_v51 = vld [vmem:[#allocation19 + $0x68] sm:$0xff]  }
0x1749   : > { %3130 = vmatprep.subr.bf16.mxu0 %v14193_v56  ;;  %v14247_v56 = vld [vmem:[#allocation19 + $0x30] sm:$0xff]  }
0x174c   : > { %3131 = vmatpush1.bf16.msra.mxu0 %v14191_v58  ;;  %v14249_v58 = vld [vmem:[#allocation19 + $0x78] sm:$0xff]  }
0x174d   : > { %3132 = vmatprep.subr.bf16.mxu0 %v14199_v61  ;;  %v14251_v61 = vld [vmem:[#allocation19 + $0x38] sm:$0xff]  }
0x1750   : > { %3133 = vmatpush1.bf16.msra.mxu0 %v14197_v62  ;;  %v14252_v62 = vld [vmem:[#allocation19 + $0xb8] sm:$0xff]  }
0x1751   : > { %3134 = vmatprep.subr.bf16.mxu0 %v14205_v3 }
0x1754   : > { %3135 = vmatpush1.bf16.msra.mxu0 %v14203_v6 }
0x1755   : > { %3136 = vmatprep.subr.bf16.mxu0 %v14211_v4 }
0x1758   : > { %3137 = vmatpush1.bf16.msra.mxu0 %v14209_v11 }
0x1759   : > { %3138 = vmatprep.subr.bf16.mxu0 %v14217_v13 }
0x1812   : > { %v2810_v26 = vpop.f32.mrb[44].mxu0 }
0x1813   : > { %v2816_v25 = vpack.c.bf16 %v2810_v26, %v2810_v26  ;;  %v13279_v28 = vpop.f32.mrb[45].mxu0 }
0x1814   : > { %v2813_v43 = vpop.f32.mrb[46].mxu0 }
0x1815   : > { %v13280_v45 = vpop.f32.mrb[47].mxu0  ;;  %13286 = vmatmul.mubr.msk.bf16.vlgmr.msra.gmra.mrb[60].mxu1 %vm1215_vm1, %v2816_v25  ;;  %v12014_v25 = vld [vmem:[%s17265_s7] ss:$0 sm:$0xff] }
0x1816   : > { %3197 = vmatprep.mubr.bf16.mxu1 %v15375_v0  ;;  %3166 = vmatpush1.bf16.msra.mxu1 %v14176_v41  ;;  %v14223_v45 = vld [vmem:[#allocation19] sm:$0xff]   ;;  %v14233_v41 = vld [vmem:[#allocation19 + $0x58] sm:$0xff]  }
0x1817   : > { %3167 = vmatprep.subr.bf16.mxu1 %v14184_v18  ;;  %v14236_v18 = vld [vmem:[#allocation19 + $0x98] sm:$0xff]  }
0x181a   : > { %3168 = vmatpush1.bf16.msra.mxu1 %v14182_v48  ;;  %v14238_v48 = vld [vmem:[#allocation19 + $0xe0] sm:$0xff]  }
0x181b   : > { %3169 = vmatprep.subr.bf16.mxu1 %v14190_v50  ;;  %v14240_v50 = vld [vmem:[#allocation19 + $0xa0] sm:$0xff]  }
0x18e8   : > { %v2866_v24 = vpop.f32.mrb[60].mxu1 }
0x18e9   : > { %v2872_v30 = vadd.f32 %v2866_v24, %v2704_v15  ;;  %v13287_v32 = vpop.f32.mrb[61].mxu1  ;;  %v14215_v15 = vld [vmem:[#allocation17 + $0xe0] ss:$16 sps:$4 sm:$0xff]  }
0x18ea   : > { %v2869_v35 = vpop.f32.mrb[62].mxu1  ;;  %3139 = vmatpush1.bf16.msra.mxu0 %v14215_v15  ;;  %v14224_v24 = vld [vmem:[#allocation19 + $0x80] sm:$0xff]   ;;  %v14226_v32 = vld [vmem:[#allocation19 + $0xc8] sm:$0xff]  }
0x18eb   : > { %v2880_v36 = vadd.f32 %v12012_v29, %v2872_v30  ;;  %v13288_v37 = vpop.f32.mrb[63].mxu1  ;;  %12682 = vmatprep.subr.bf16.mxu0 %v14221_v16  ;;  %v14225_v30 = vld [vmem:[#allocation19 + $0x48] sm:$0xff]  }
0x18ec   : > { %v14227_v35 = vld [vmem:[#allocation19 + $0x8] sm:$0xff]   ;;  %v14229_v37 = vld [vmem:[#allocation19 + $0x50] sm:$0xff]  }
0x18ed   : > { %v2881_v38 = vadd.f32 %v2880_v36, %v16111_v59  ;;  %v14188_v59 = vld [vmem:[#allocation17 + $0x48] ss:$16 sps:$4 sm:$0xff]  }
0x18ee   : > { %3170 = vmatpush1.bf16.msra.mxu1 %v14188_v59  ;;  %v14228_v36 = vld [vmem:[#allocation19 + $0x88] sm:$0xff]  }
0x18ef   : > { %2884 = vadd.xlane.f32.xlu0 %v2881_v38  ;;  %3171 = vmatprep.subr.bf16.mxu1 %v14196_v52  ;;  %v14242_v59 = vld [vmem:[#allocation19 + $0xe8] sm:$0xff]   ;;  %v14248_v52 = vld [vmem:[#allocation19 + $0xb0] sm:$0xff]  }
0x18f2   : > { %3172 = vmatpush1.bf16.msra.mxu1 %v14194_v60  ;;  %v14250_v60 = vld [vmem:[#allocation19 + $0xf8] sm:$0xff]  }
0x18f3   : > { %3173 = vmatprep.subr.bf16.mxu1 %v14202_v2  ;;  %v16229_v2 = vsub.s32 3, %v15968_v31 }
0x18f6   : > { %3174 = vmatpush1.bf16.msra.mxu1 %v14200_v63  ;;  %v2942_v63 = vld [vmem:[%s17266_s0] sm:$0xf] }
0x18f7   : > { %3175 = vmatprep.subr.bf16.mxu1 %v14208_v5  ;;  %v2947_v3 = vrot.slane %v2942_v63, %v15977_v34  ;;  %v2955_v5 = vrot.slane %v2942_v63, %v15997_v46  ;;  %v2951_v6 = vrot.slane %v2942_v63, %v15974_v33 }
0x18fa   : > { %3176 = vmatpush1.bf16.msra.mxu1 %v14206_v7  ;;  %v2959_v7 = vrot.slane %v2942_v63, %v16229_v2  ;;  %v14269_v63 = vld [vmem:[#allocation5 + $0x120] ss:$12 sps:$4 sm:$0xff]  }
0x18fb   : > { %3177 = vmatprep.subr.bf16.mxu1 %v14214_v10 }
0x18fe   : > { %3178 = vmatpush1.bf16.msra.mxu1 %v14212_v12 }
0x18ff   : > { %3179 = vmatprep.subr.bf16.mxu1 %v14220_v14 }
0x1902   : > { %3180 = vmatpush1.bf16.msra.mxu1 %v14218_v9 }
0x1903   : > { %12704 = vmatprep.subr.bf16.mxu1 %v14222_v17 }
0x197c   : > { %v2885_v8 = vpop.xlane.xlu0 %2884 }
0x197d   : > { %v2886_v53 = vmul.f32 0.0078125, %v2885_v8  ;;  %v14243_v8 = vld [vmem:[#allocation19 + $0x28] sm:$0xff]  }
0x197f   : > { %v2887_v54 = vsub.f32 %v2881_v38, %v2886_v53  ;;  %v14230_v38 = vld [vmem:[#allocation19 + $0xd0] sm:$0xff]   ;;  %v14244_v53 = vld [vmem:[#allocation19 + $0xa8] sm:$0xff]  }
0x1981   : > { %v2888_v55 = vmul.f32 %v2887_v54, %v2887_v54 }
0x1983   : > { %2889 = vadd.xlane.f32.xlu0 %v2888_v55  ;;  %v14246_v55 = vld [vmem:[#allocation19 + $0xf0] sm:$0xff]  }
0x1a10   : > { %v2890_v19 = vpop.xlane.xlu0 %2889 }
0x1a11   : > { %v2891_v20 = vmul.f32 0.0078125, %v2890_v19 }
0x1a13   : > { %v2892_v21 = vadd.f32 1e-05, %v2891_v20 }
0x1a15   : > { %14775 = vrsqrt.f32 %v2892_v21 }
0x1a1f   : > { %v14776_v22 = vpop.eup %14775 }
0x1a20   : > { %v2894_v26 = vmul.f32 %v14776_v22, %v2887_v54  ;;  %v14245_v54 = vld [vmem:[#allocation19 + $0x70] sm:$0xff]  }
0x1a22   : > { %v2901_v28 = vmul.f32 %v12013_v23, %v2894_v26 }
0x1a24   : > { %v16220_v43 = vadd.f32 %v12014_v25, %v2901_v28 }
0x1a26   : > { %v2909_v29 = vpack.c.bf16 %v16220_v43, %v16220_v43 }
0x1a28   : > { %3157 = vmatmul.mubr.bf16.vlgmr.msra.gmra.mrb[48].mxu0 %v2909_v29  ;;  %3198 = vmatmul.mubr.bf16.vlgmr.msra.gmra.mrb[64].mxu1 %v2909_v29 }
0x1a29   : > { %12683 = vmatpush3.bf16.msra.mxu0 %v14223_v45  ;;  %12705 = vmatpush3.bf16.msra.mxu1 %v14224_v24 }
0x1a2a   : > { %12684 = vmatprep.subr.bf16.mxu0 %v14225_v30  ;;  %12706 = vmatprep.subr.bf16.mxu1 %v14226_v32  ;;  %v12047_v30 = vld [vmem:[#allocation20] ss:$0 sm:$0xff] }
0x1a2d   : > { %12685 = vmatpush3.bf16.msra.mxu0 %v14227_v35  ;;  %12707 = vmatpush3.bf16.msra.mxu1 %v14228_v36 }
0x1a2e   : > { %12686 = vmatprep.subr.bf16.mxu0 %v14229_v37  ;;  %12708 = vmatprep.subr.bf16.mxu1 %v14230_v38 }
0x1a31   : > { %12687 = vmatpush3.bf16.msra.mxu0 %v14231_v39  ;;  %12709 = vmatpush3.bf16.msra.mxu1 %v14232_v40 }
0x1a32   : > { %12688 = vmatprep.subr.bf16.mxu0 %v14233_v41  ;;  %12710 = vmatprep.subr.bf16.mxu1 %v14234_v42 }
0x1a35   : > { %12689 = vmatpush3.bf16.msra.mxu0 %v14235_v44  ;;  %12711 = vmatpush3.bf16.msra.mxu1 %v14236_v18 }
0x1a36   : > { %12690 = vmatprep.subr.bf16.mxu0 %v14237_v47  ;;  %12712 = vmatprep.subr.bf16.mxu1 %v14238_v48  ;;  %v14253_v47 = vld [vmem:[#allocation5 + $0xc0] ss:$12 sps:$4 sm:$0xff]   ;;  %v14255_v48 = vld [vmem:[#allocation5 + $0xc4] ss:$12 sps:$4 sm:$0xff]  }
0x1a39   : > { %12691 = vmatpush3.bf16.msra.mxu0 %v14239_v49  ;;  %12713 = vmatpush3.bf16.msra.mxu1 %v14240_v50  ;;  %v14256_v49 = vld [vmem:[#allocation5 + $0xc8] ss:$12 sps:$4 sm:$0xff]  }
0x1a3a   : > { %12692 = vmatprep.subr.bf16.mxu0 %v14241_v51  ;;  %12714 = vmatprep.subr.bf16.mxu1 %v14242_v59  ;;  %v14259_v50 = vld [vmem:[#allocation5 + $0xdc] ss:$12 sps:$4 sm:$0xff]   ;;  %v14260_v51 = vld [vmem:[#allocation5 + $0xe0] ss:$12 sps:$4 sm:$0xff]   ;;  %v14257_v59 = vld [vmem:[#allocation5 + $0xd8] ss:$12 sps:$4 sm:$0xff]  }
0x1a3d   : > { %12693 = vmatpush3.bf16.msra.mxu0 %v14243_v8  ;;  %12715 = vmatpush3.bf16.msra.mxu1 %v14244_v53  ;;  %v14263_v8 = vld [vmem:[#allocation5 + $0xf4] ss:$12 sps:$4 sm:$0xff]   ;;  %v14261_v53 = vld [vmem:[#allocation5 + $0xf0] ss:$12 sps:$4 sm:$0xff]  }
0x1a3e   : > { %12694 = vmatprep.subr.bf16.mxu0 %v14245_v54  ;;  %12716 = vmatprep.subr.bf16.mxu1 %v14246_v55 }
0x1a41   : > { %12695 = vmatpush3.bf16.msra.mxu0 %v14247_v56  ;;  %12717 = vmatpush3.bf16.msra.mxu1 %v14248_v52  ;;  %v14264_v52 = vld [vmem:[#allocation5 + $0xf8] ss:$12 sps:$4 sm:$0xff]  }
0x1a42   : > { %12696 = vmatprep.subr.bf16.mxu0 %v14249_v58  ;;  %12718 = vmatprep.subr.bf16.mxu1 %v14250_v60  ;;  %v14267_v58 = vld [vmem:[#allocation5 + $0x10c] ss:$12 sps:$4 sm:$0xff]   ;;  %v14265_v60 = vld [vmem:[#allocation5 + $0x108] ss:$12 sps:$4 sm:$0xff]  }
0x1a45   : > { %12697 = vmatpush3.bf16.msra.mxu0 %v14251_v61  ;;  %12719 = vmatpush3.bf16.msra.mxu1 %v14252_v62  ;;  %v14268_v61 = vld [vmem:[#allocation5 + $0x110] ss:$12 sps:$4 sm:$0xff]  }
0x1a46   : > { %13289 = vmatprep.subr.bf16.mxu1 %v15376_v1  ;;  %3765 = vmatprep.subr.bf16.mxu0 %v14255_v48  ;;  %v14271_v62 = vld [vmem:[#allocation5 + $0x124] ss:$12 sps:$4 sm:$0xff]  }
0x1afb   : > { %v3158_v4 = vpop.f32.mrb[48].mxu0  ;;  %v3199_v10 = vpop.f32.mrb[64].mxu1 }
0x1afc   : > { %v3159_v11 = vadd.f32 %v3158_v4, %v2947_v3  ;;  %v3200_v12 = vadd.f32 %v3199_v10, %v2955_v5  ;;  %v3160_v13 = vpop.f32.mrb[49].mxu0  ;;  %v3201_v14 = vpop.f32.mrb[65].mxu1  ;;  %v14272_v3 = vld [vmem:[#allocation5 + $0x128] ss:$12 sps:$4 sm:$0xff]   ;;  %v14277_v10 = vld [vmem:[#allocation5 + $0x150] ss:$12 sps:$4 sm:$0xff]  }
0x1afd   : > { %v3161_v15 = vadd.f32 %v3160_v13, %v2951_v6  ;;  %v3202_v9 = vadd.f32 %v3201_v14, %v2959_v7  ;;  %v3162_v16 = vpop.f32.mrb[50].mxu0  ;;  %v3203_v17 = vpop.f32.mrb[66].mxu1  ;;  %v14275_v5 = vld [vmem:[#allocation5 + $0x13c] ss:$12 sps:$4 sm:$0xff]   ;;  %v14273_v6 = vld [vmem:[#allocation5 + $0x138] ss:$12 sps:$4 sm:$0xff]  }
0x1afe   : > { %v3206_v31 = vmax.f32 %v3159_v11, 0.0  ;;  %v3208_v19 = vmax.f32 %v3200_v12, 0.0  ;;  %v3163_v20 = vpop.f32.mrb[51].mxu0  ;;  %v3204_v21 = vpop.f32.mrb[67].mxu1  ;;  %v14276_v7 = vld [vmem:[#allocation5 + $0x140] ss:$12 sps:$4 sm:$0xff]  }
0x1aff   : > { %v3207_v22 = vmax.f32 %v3161_v15, 0.0  ;;  %v3209_v23 = vmax.f32 %v3202_v9, 0.0  ;;  %v14279_v4 = vld [vmem:[#allocation5 + $0x154] ss:$12 sps:$4 sm:$0xff]   ;;  %v14280_v11 = vld [vmem:[#allocation5 + $0x158] ss:$12 sps:$4 sm:$0xff]  }
0x1b00   : > { %v3210_v28 = vpack.c.bf16 %v3206_v31, %v3206_v31  ;;  %v3212_v45 = vpack.c.bf16 %v3208_v19, %v3208_v19  ;;  %v14283_v12 = vld [vmem:[#allocation5 + $0x16c] ss:$12 sps:$4 sm:$0xff]   ;;  %v14281_v13 = vld [vmem:[#allocation5 + $0x168] ss:$12 sps:$4 sm:$0xff]   ;;  %v14284_v14 = vld [vmem:[#allocation5 + $0x170] ss:$12 sps:$4 sm:$0xff]  }
0x1b01   : > { %v3211_v26 = vpack.c.bf16 %v3207_v22, %v3207_v22  ;;  %v3213_v25 = vpack.c.bf16 %v3209_v23, %v3209_v23  ;;  %v12080_v31 = vld [vmem:[%s17267_s25] ss:$0 sm:$0xff] }
0x1b02   : > { %v12081_v20 = vld [vmem:[%s17268_s6] ss:$0 sm:$0xff] }
0x1b03   : > { %3509 = vmatprep.mubr.bf16.mxu0 %v3211_v26  ;;  %3549 = vmatprep.mubr.bf16.mxu1 %v3213_v25  ;;  %v12082_v26 = vld [vmem:[%s17260_s14 + $0x3] sm:$0x7] }
0x1b04   : > { %3510 = vmatmul.mubr.bf16.vlgmr.msra.gmra.mrb[52].mxu0 %v3210_v28  ;;  %3550 = vmatmul.mubr.bf16.vlgmr.msra.gmra.mrb[68].mxu1 %v3212_v45  ;;  %v3625_v25 = vrot.slane %v12082_v26, %v15977_v34  ;;  %v3633_v28 = vrot.slane %v12082_v26, %v15997_v46  ;;  %v3629_v45 = vrot.slane %v12082_v26, %v15974_v33 }
0x1b05   : > { %3797 = vmatprep.mubr.bf16.mxu0 %v15375_v0  ;;  %13305 = vmatprep.mubr.msk.bf16.mxu1 %vm15377_vm0, %v15376_v1 }
0x1b06   : > { %13290 = vmatpush3.bf16.msra.mxu1 %v14256_v49  ;;  %3766 = vmatpush1.bf16.msra.mxu0 %v14253_v47 }
0x1b07   : > { %13291 = vmatprep.subr.bf16.mxu1 %v15376_v1  ;;  %3767 = vmatprep.subr.bf16.mxu0 %v14259_v50 }
0x1b0a   : > { %13292 = vmatpush3.bf16.msra.mxu1 %v14260_v51  ;;  %3768 = vmatpush1.bf16.msra.mxu0 %v14257_v59 }
0x1b0b   : > { %13293 = vmatprep.subr.bf16.mxu1 %v15376_v1  ;;  %3769 = vmatprep.subr.bf16.mxu0 %v14263_v8 }
0x1b0e   : > { %3770 = vmatpush1.bf16.msra.mxu0 %v14261_v53  ;;  %13294 = vmatpush3.bf16.msra.mxu1 %v14264_v52 }
0x1b0f   : > { %13295 = vmatprep.subr.bf16.mxu1 %v15376_v1  ;;  %3771 = vmatprep.subr.bf16.mxu0 %v14267_v58 }
0x1b12   : > { %3772 = vmatpush1.bf16.msra.mxu0 %v14265_v60  ;;  %13296 = vmatpush3.bf16.msra.mxu1 %v14268_v61 }
0x1b13   : > { %3773 = vmatprep.subr.bf16.mxu0 %v14271_v62  ;;  %13297 = vmatprep.subr.bf16.mxu1 %v15376_v1 }
0x1b16   : > { %3774 = vmatpush1.bf16.msra.mxu0 %v14269_v63  ;;  %13298 = vmatpush3.bf16.msra.mxu1 %v14272_v3 }
0x1b17   : > { %3775 = vmatprep.subr.bf16.mxu0 %v14275_v5  ;;  %13299 = vmatprep.subr.bf16.mxu1 %v15376_v1 }
0x1b1a   : > { %3776 = vmatpush1.bf16.msra.mxu0 %v14273_v6  ;;  %13300 = vmatpush3.bf16.msra.mxu1 %v14276_v7 }
0x1b1b   : > { %3777 = vmatprep.subr.bf16.mxu0 %v14279_v4  ;;  %13301 = vmatprep.subr.bf16.mxu1 %v15376_v1 }
0x1b1e   : > { %3778 = vmatpush1.bf16.msra.mxu0 %v14277_v10  ;;  %13302 = vmatpush3.bf16.msra.mxu1 %v14280_v11 }
0x1b1f   : > { %3779 = vmatprep.subr.bf16.mxu0 %v14283_v12  ;;  %13303 = vmatprep.subr.bf16.mxu1 %v15376_v1 }
0x1b22   : > { %3780 = vmatpush1.bf16.msra.mxu0 %v14281_v13  ;;  %13304 = vmatpush3.bf16.msra.mxu1 %v14284_v14 }
0x1b23   : > { %13315 = vmatprep.subr.bf16.mxu1 %v15376_v1  ;;  %13309 = vmatprep.subr.bf16.mxu0 %v15376_v1 }
0x1bd7   : > { %v12698_v24 = vpop.f32.mrb[52].mxu0  ;;  %v12720_v29 = vpop.f32.mrb[68].mxu1 }
0x1bd8   : > { %v12699_v32 = vpop.f32.mrb[53].mxu0  ;;  %v12721_v35 = vpop.f32.mrb[69].mxu1 }
0x1bd9   : > { %v12700_v36 = vadd.f32 %v12699_v32, %v12698_v24  ;;  %v12722_v37 = vadd.f32 %v12721_v35, %v12720_v29  ;;  %v12701_v38 = vpop.f32.mrb[54].mxu0  ;;  %v12723_v39 = vpop.f32.mrb[70].mxu1 }
0x1bda   : > { %v12702_v40 = vpop.f32.mrb[55].mxu0  ;;  %v12724_v41 = vpop.f32.mrb[71].mxu1 }
0x1bdb   : > { %v3512_v42 = vadd.f32 %v12700_v36, %v12047_v30 }
0x1bdd   : > { %v3552_v44 = vadd.f32 %v12722_v37, %v3512_v42 }
0x1bdf   : > { %v3557_v18 = vadd.f32 %v3552_v44, %v16220_v43 }
0x1be1   : > { %3560 = vadd.xlane.f32.xlu0 %v3557_v18 }
0x1c6e   : > { %v3561_v43 = vpop.xlane.xlu0 %3560 }
0x1c6f   : > { %v3562_v54 = vmul.f32 0.0078125, %v3561_v43 }
0x1c71   : > { %v3563_v55 = vsub.f32 %v3557_v18, %v3562_v54 }
0x1c73   : > { %v3564_v56 = vmul.f32 %v3563_v55, %v3563_v55 }
0x1c75   : > { %3565 = vadd.xlane.f32.xlu0 %v3564_v56 }
0x1d02   : > { %v3566_v15 = vpop.xlane.xlu0 %3565 }
0x1d03   : > { %v3567_v9 = vmul.f32 0.0078125, %v3566_v15 }
0x1d05   : > { %v3568_v16 = vadd.f32 1e-05, %v3567_v9 }
0x1d07   : > { %14777 = vrsqrt.f32 %v3568_v16 }
0x1d11   : > { %v14778_v17 = vpop.eup %14777 }
0x1d12   : > { %v3570_v19 = vmul.f32 %v14778_v17, %v3563_v55 }
0x1d14   : > { %v3577_v21 = vmul.f32 %v12080_v31, %v3570_v19  ;;  %v14287_v19 = vld [vmem:[#allocation7 + $0x50] sm:$0xff]  }
0x1d16   : > { %v16254_v22 = vadd.f32 %v12081_v20, %v3577_v21  ;;  %v14288_v20 = vld [vmem:[#allocation7 + $0x58] sm:$0xff]  }
0x1d18   : > { %v3585_v23 = vpack.c.bf16 %v16254_v22, %v16254_v22 }
0x1d1a   : > { %3798 = vmatmul.mubr.bf16.vlgmr.msra.gmra.mrb[56].mxu0 %v3585_v23  ;;  %13306 = vmatmul.mubr.bf16.vlgmr.msra.gmra.mrb[72].mxu1 %v3585_v23 }
0x1d1b   : > { %13311 = vmatprep.mubr.msk.bf16.mxu0 %vm15377_vm0, %v15376_v1  ;;  %13317 = vmatprep.mubr.msk.bf16.mxu1 %vm15377_vm0, %v15376_v1 }
0x1ded   : > { %v3799_v24 = vpop.f32.mrb[56].mxu0  ;;  %v3840_v29 = vpop.f32.mrb[72].mxu1 }
0x1dee   : > { %v3800_v30 = vadd.f32 %v3799_v24, %v3625_v25  ;;  %v3841_v32 = vadd.f32 %v3840_v29, %v3633_v28  ;;  %v3801_v35 = vpop.f32.mrb[57].mxu0  ;;  %v13307_v36 = vpop.f32.mrb[73].mxu1  ;;  %v14286_v29 = vld [vmem:[#allocation7 + $0x48] sm:$0xff]  }
0x1def   : > { %v3802_v37 = vadd.f32 %v3801_v35, %v3629_v45  ;;  %v3803_v38 = vpop.f32.mrb[58].mxu0  ;;  %v3843_v39 = vpop.f32.mrb[74].mxu1  ;;  %v14285_v45 = vld [vmem:[#allocation7 + $0x40] sm:$0xff]  }
0x1df0   : > { %v16268_v40 = vpack.c.bf16 %v3800_v30, %v3800_v30  ;;  %v16270_v41 = vpack.c.bf16 %v3841_v32, %v3841_v32  ;;  %v3804_v42 = vpop.f32.mrb[59].mxu0  ;;  %v13308_v44 = vpop.f32.mrb[75].mxu1 }
0x1df1   : > { %v16272_v18 = vpack.c.bf16 %v3802_v37, %v3802_v37 }
0x1df2   : > { %3974 = vrot.lane.b32.xlu1 %v16268_v40, %s17269_s21  ;;  %v3930_v47 = vsel %vm1280_vm2, %v16270_v41, 0 }
0x1df3   : > { %13316 = vmatpush3.bf16.msra.mxu1 %v3930_v47  ;;  %3977 = vrot.lane.b32.xlu0 %v16272_v18, %s17269_s21  ;;  %v3870_v48 = vsel %vm1215_vm1, %v16272_v18, 0 }
0x1df4   : > { %13310 = vmatpush3.bf16.xpose.msra.mxu0 %v3870_v48  ;;  %13327 = vmatprep.subr.bf16.mxu1 %v15376_v1 }
0x1df5   : > { %13321 = vmatprep.subr.bf16.mxu0 %v15376_v1 }
0x1dfb   : > { %13312 = vmatmul.mubr.msk.bf16.vlgmr.msra.gmra.mrb[60].mxu0 %vm1215_vm1, %v16268_v40 }
0x1dfc   : > { %13323 = vmatprep.mubr.msk.bf16.mxu0 %vm15377_vm0, %v15376_v1 }
0x1e64   : > { %v3975_v51 = vpop.permute.xlu1 %3974 }
0x1e65   : > { %v3978_v49 = vpop.permute.xlu0 %3977 }
0x1e66   : > { %v3983_v50 = vsel %vm1215_vm1, %v3978_v49, 0 }
0x1e67   : > { %13322 = vmatpush3.bf16.xpose.msra.mxu0 %v3983_v50 }
0x1e68   : > { %13333 = vmatprep.subr.bf16.mxu0 %v15376_v1 }
0x1e6e   : > { %13324 = vmatmul.mubr.msk.bf16.vlgmr.msra.gmra.mrb[64].mxu0 %vm1215_vm1, %v3975_v51 }
0x1e6f   : > { %13337 = vmatprep.mubr.msk.bf16.mxu0 %vm15377_vm0, %v15376_v1  ;;  %13334 = vmatpush3.bf16.msra.mxu0 %v14287_v19  ;;  %v14290_v19 = vld [vmem:[#allocation7 + $0x68] sm:$0xff]  }
0x1e70   : > { %13335 = vmatprep.subr.bf16.mxu0 %v15376_v1 }
0x1e73   : > { %13336 = vmatpush3.bf16.msra.mxu0 %v14288_v20 }
0x1e74   : > { %13349 = vmatprep.subr.bf16.mxu0 %v15376_v1 }
0x1ece   : > { %v3906_v59 = vpop.f32.mrb[60].mxu0 }
0x1ecf   : > { %v3912_v8 = vmul.f32 0.17677669, %v3906_v59  ;;  %v13313_v53 = vpop.f32.mrb[61].mxu0 }
0x1ed0   : > { %v3909_v43 = vpop.f32.mrb[62].mxu0 }
0x1ed1   : > { %v13314_v54 = vpop.f32.mrb[63].mxu0  ;;  %v3913_v55 = vadd.f32 %v3912_v8, %v16007_v57 }
0x1ed3   : > { %v3914_v56 = vsel %vm1264_vm4, %v3913_v55, -inf }
0x1ed4   : > { %3915 = vmax.xlane.f32.xlu1 %v3914_v56 }
0x1f41   : > { %v4019_v52 = vpop.f32.mrb[64].mxu0 }
0x1f42   : > { %v4025_v58 = vmul.f32 0.17677669, %v4019_v52  ;;  %v13325_v60 = vpop.f32.mrb[65].mxu0 }
0x1f43   : > { %v4022_v61 = vpop.f32.mrb[66].mxu0 }
0x1f44   : > { %v13326_v62 = vpop.f32.mrb[67].mxu0  ;;  %v4026_v63 = vadd.f32 %v4025_v58, %v16007_v57 }
0x1f46   : > { %v4027_v3 = vsel %vm1264_vm4, %v4026_v63, -inf }
0x1f47   : > { %4028 = vmax.xlane.f32.xlu0 %v4027_v3 }
0x1f5d   : > { %4201 = vrot.lane.b32.xlu0 %v16272_v18, %s17270_s30 }
0x1f61   : > { %v3916_v5 = vpop.xlane.xlu1 %3915 }
0x1f62   : > { %v3917_v6 = vsub.f32 %v3913_v55, %v3916_v5 }
0x1f64   : > { %v3918_v7 = vmul.f32 1.442695, %v3917_v6 }
0x1f66   : > { %14779 = vpow2.f32 %v3918_v7 }
0x1f70   : > { %v14780_v4 = vpop.eup %14779 }
0x1f71   : > { %v3920_v10 = vsel %vm1264_vm4, %v14780_v4, 0.0 }
0x1f72   : > { %3921 = vadd.xlane.f32.xlu1 %v3920_v10 }
0x1fd4   : > { %v4029_v11 = vpop.xlane.xlu0 %4028 }
0x1fd5   : > { %v4030_v12 = vsub.f32 %v4026_v63, %v4029_v11 }
0x1fd7   : > { %v4031_v13 = vmul.f32 1.442695, %v4030_v12 }
0x1fd8   : > { %v4202_v38 = vpop.permute.xlu0 %4201 }
0x1fd9   : > { %14781 = vpow2.f32 %v4031_v13  ;;  %v4207_v48 = vsel %vm1215_vm1, %v4202_v38, 0 }
0x1fe3   : > { %v14782_v14 = vpop.eup %14781 }
0x1fe4   : > { %v4033_v15 = vsel %vm1264_vm4, %v14782_v14, 0.0 }
0x1fe5   : > { %4034 = vadd.xlane.f32.xlu1 %v4033_v15 }
0x1ff6   : > { %4040 = vrot.lane.b32.xlu1 %v16270_v41, %s17269_s21 }
0x1ffa   : > { %4199 = vrot.lane.b32.xlu1 %v16268_v40, %s17270_s30 }
0x1fff   : > { %v3922_v9 = vpop.xlane.xlu1 %3921 }
0x2000   : > { %14783 = vrcp.f32 %v3922_v9 }
0x200a   : > { %v14784_v16 = vpop.eup %14783 }
0x200b   : > { %v3924_v17 = vmul.f32 %v14784_v16, %v14780_v4 }
0x200d   : > { %v3925_v31 = vpack.c.bf16 %v3924_v17, %v3924_v17 }
0x200f   : > { %13318 = vmatmul.mubr.msk.bf16.vlgmr.msra.gmra.mrb[76].mxu1 %vm1264_vm4, %v3925_v31 }
0x2010   : > { %13329 = vmatprep.mubr.msk.bf16.mxu1 %vm15377_vm0, %v15376_v1 }
0x2072   : > { %v4035_v21 = vpop.xlane.xlu1 %4034 }
0x2073   : > { %14785 = vrcp.f32 %v4035_v21 }
0x2076   : > { %v4041_v23 = vpop.permute.xlu1 %4040 }
0x2077   : > { %v4046_v26 = vsel %vm1280_vm2, %v4041_v23, 0 }
0x2078   : > { %13328 = vmatpush3.bf16.msra.mxu1 %v4046_v26 }
0x2079   : > { %13341 = vmatprep.subr.bf16.mxu1 %v15376_v1 }
0x207a   : > { %v4200_v50 = vpop.permute.xlu1 %4199 }
0x207d   : > { %v14786_v25 = vpop.eup %14785 }
0x207e   : > { %v4037_v28 = vmul.f32 %v14786_v25, %v14782_v14  ;;  %v14289_v14 = vld [vmem:[#allocation7 + $0x60] sm:$0xff]  }
0x2080   : > { %v4038_v24 = vpack.c.bf16 %v4037_v28, %v4037_v28 }
0x2082   : > { %13330 = vmatmul.mubr.msk.bf16.vlgmr.msra.gmra.mrb[80].mxu1 %vm1264_vm4, %v4038_v24 }
0x2083   : > { %13342 = vmatpush3.bf16.msra.mxu1 %v14285_v45  ;;  %13345 = vmatprep.mubr.msk.bf16.mxu1 %vm15377_vm0, %v15376_v1 }
0x2084   : > { %13343 = vmatprep.subr.bf16.mxu1 %v15376_v1 }
0x2087   : > { %13344 = vmatpush3.bf16.msra.mxu1 %v14286_v29 }
0x2088   : > { %13355 = vmatprep.subr.bf16.mxu1 %v15376_v1 }
0x20e2   : > { %v3966_v30 = vpop.f32.mrb[76].mxu1 }
0x20e3   : > { %v3972_v32 = vpack.c.bf16 %v3966_v30, %v3966_v30  ;;  %v13319_v35 = vpop.f32.mrb[77].mxu1 }
0x20e4   : > { %v3969_v36 = vpop.f32.mrb[78].mxu1 }
0x20e5   : > { %v13320_v37 = vpop.f32.mrb[79].mxu1  ;;  %13346 = vmatmul.mubr.msk.bf16.vlgmr.msra.gmra.mrb[84].mxu1 %vm1215_vm1, %v3972_v32 }
0x20e6   : > { %13357 = vmatprep.mubr.msk.bf16.mxu1 %vm15377_vm0, %v15376_v1 }
0x2155   : > { %v4082_v39 = vpop.f32.mrb[80].mxu1 }
0x2156   : > { %v4088_v42 = vpack.c.bf16 %v4082_v39, %v4082_v39  ;;  %v13331_v44 = vpop.f32.mrb[81].mxu1 }
0x2157   : > { %v4085_v47 = vpop.f32.mrb[82].mxu1  ;;  %v14291_v44 = vld [vmem:[#allocation7 + $0x70] sm:$0xff]  }
0x2158   : > { %v13332_v49 = vpop.f32.mrb[83].mxu1  ;;  %13338 = vmatmul.mubr.msk.bf16.vlgmr.msra.gmra.mrb[68].mxu0 %vm1215_vm1, %v4088_v42 }
0x2159   : > { %13350 = vmatpush3.bf16.xpose.msra.mxu0 %v4207_v48  ;;  %13351 = vmatprep.mubr.msk.bf16.mxu0 %vm15377_vm0, %v15376_v1 }
0x215a   : > { %13361 = vmatprep.subr.bf16.mxu0 %v15376_v1 }
0x2160   : > { %13352 = vmatmul.mubr.msk.bf16.vlgmr.msra.gmra.mrb[72].mxu0 %vm1215_vm1, %v4200_v50 }
0x2161   : > { %13365 = vmatprep.mubr.msk.bf16.mxu0 %vm15377_vm0, %v15376_v1  ;;  %13362 = vmatpush3.bf16.msra.mxu0 %v14289_v14  ;;  %v14302_v14 = vld [vmem:[#allocation8 + $0x40] sm:$0xff]  }
0x2162   : > { %13363 = vmatprep.subr.bf16.mxu0 %v15376_v1 }
0x2165   : > { %13364 = vmatpush3.bf16.msra.mxu0 %v14290_v19 }
0x2166   : > { %13375 = vmatprep.subr.bf16.mxu0 %v15376_v1 }
0x21b8   : > { %v4193_v51 = vpop.f32.mrb[84].mxu1 }
0x21b9   : > { %v13347_v59 = vpop.f32.mrb[85].mxu1 }
0x21ba   : > { %v4196_v8 = vpop.f32.mrb[86].mxu1 }
0x21bb   : > { %v13348_v53 = vpop.f32.mrb[87].mxu1 }
0x222b   : > { %v4138_v43 = vpop.f32.mrb[68].mxu0 }
0x222c   : > { %v16328_v54 = vadd.f32 %v4193_v51, %v4138_v43  ;;  %v13339_v55 = vpop.f32.mrb[69].mxu0 }
0x222d   : > { %v4141_v56 = vpop.f32.mrb[70].mxu0 }
0x222e   : > { %v13340_v52 = vpop.f32.mrb[71].mxu0 }
0x2233   : > { %v4243_v58 = vpop.f32.mrb[72].mxu0 }
0x2234   : > { %v4249_v60 = vmul.f32 0.17677669, %v4243_v58  ;;  %v13353_v61 = vpop.f32.mrb[73].mxu0 }
0x2235   : > { %v4246_v62 = vpop.f32.mrb[74].mxu0 }
0x2236   : > { %v13354_v63 = vpop.f32.mrb[75].mxu0  ;;  %v4250_v3 = vadd.f32 %v4249_v60, %v16007_v57 }
0x2237   : > { %v12128_v63 = vld [vmem:[%s17261_s2 + $0x1] ss:$0 sm:$0xff] }
0x2238   : > { %v4251_v5 = vsel %vm1264_vm4, %v4250_v3, -inf }
0x2239   : > { %4252 = vmax.xlane.f32.xlu1 %v4251_v5 }
0x224a   : > { %4263 = vrot.lane.b32.xlu1 %v16270_v41, %s17270_s30 }
0x224e   : > { %4368 = vrot.lane.b32.xlu1 %v16268_v40, %s17271_s8 }
0x22c6   : > { %v4253_v6 = vpop.xlane.xlu1 %4252 }
0x22c7   : > { %v4254_v7 = vsub.f32 %v4250_v3, %v4253_v6 }
0x22c9   : > { %v4255_v4 = vmul.f32 1.442695, %v4254_v7 }
0x22ca   : > { %v4264_v10 = vpop.permute.xlu1 %4263 }
0x22cb   : > { %14787 = vpow2.f32 %v4255_v4  ;;  %v4269_v11 = vsel %vm1280_vm2, %v4264_v10, 0 }
0x22cc   : > { %13356 = vmatpush3.bf16.msra.mxu1 %v4269_v11  ;;  %v14293_v11 = vld [vmem:[#allocation11 + $0x80] ss:$8 sps:$4 sm:$0xff]  }
0x22cd   : > { %13369 = vmatprep.subr.bf16.mxu1 %v15376_v1 }
0x22d5   : > { %v14788_v12 = vpop.eup %14787 }
0x22d6   : > { %v4257_v13 = vsel %vm1264_vm4, %v14788_v12, 0.0 }
0x22d7   : > { %4258 = vadd.xlane.f32.xlu0 %v4257_v13  ;;  %v14298_v13 = vld [vmem:[#allocation11 + $0x94] ss:$8 sps:$4 sm:$0xff]  }
0x22ed   : > { %4370 = vrot.lane.b32.xlu0 %v16272_v18, %s17271_s8  ;;  %v4369_v18 = vpop.permute.xlu1 %4368 }
0x2364   : > { %v4259_v40 = vpop.xlane.xlu0 %4258 }
0x2365   : > { %14789 = vrcp.f32 %v4259_v40  ;;  %v14296_v40 = vld [vmem:[#allocation11 + $0x90] ss:$8 sps:$4 sm:$0xff]  }
0x2368   : > { %v4371_v16 = vpop.permute.xlu0 %4370 }
0x2369   : > { %v4376_v31 = vsel %vm1215_vm1, %v4371_v16, 0  ;;  %v14299_v16 = vld [vmem:[#allocation11 + $0xa0] ss:$8 sps:$4 sm:$0xff]  }
0x236f   : > { %v14790_v15 = vpop.eup %14789 }
0x2370   : > { %v4261_v9 = vmul.f32 %v14790_v15, %v14788_v12  ;;  %v14295_v12 = vld [vmem:[#allocation11 + $0x84] ss:$8 sps:$4 sm:$0xff]  }
0x2371   : > { %v14301_v15 = vld [vmem:[#allocation11 + $0xa4] ss:$8 sps:$4 sm:$0xff]  }
0x2372   : > { %v4262_v17 = vpack.c.bf16 %v4261_v9, %v4261_v9  ;;  %v14306_v9 = vld [vmem:[#allocation8 + $0x48] sm:$0xff]  }
0x2374   : > { %13358 = vmatmul.mubr.msk.bf16.vlgmr.msra.gmra.mrb[88].mxu1 %vm1264_vm4, %v4262_v17  ;;  %v14305_v17 = vld [vmem:[#allocation11 + $0xb4] ss:$8 sps:$4 sm:$0xff]  }
0x2375   : > { %13370 = vmatpush3.bf16.xpose.msra.mxu1 %v4376_v31  ;;  %13371 = vmatprep.mubr.msk.bf16.mxu1 %vm15377_vm0, %v15376_v1  ;;  %v14309_v31 = vld [vmem:[#allocation11 + $0xc4] ss:$8 sps:$4 sm:$0xff]  }
0x2376   : > { %13381 = vmatprep.subr.bf16.mxu1 %v15376_v1 }
0x237c   : > { %13372 = vmatmul.mubr.msk.bf16.vlgmr.msra.gmra.mrb[92].mxu1 %vm1215_vm1, %v4369_v18  ;;  %v14307_v18 = vld [vmem:[#allocation11 + $0xc0] ss:$8 sps:$4 sm:$0xff]  }
0x237d   : > { %13385 = vmatprep.mubr.msk.bf16.mxu1 %vm15377_vm0, %v15376_v1  ;;  %13382 = vmatpush3.bf16.msra.mxu1 %v14291_v44 }
0x237e   : > { %13383 = vmatprep.subr.bf16.mxu1 %v15376_v1 }
0x2447   : > { %v4305_v20 = vpop.f32.mrb[88].mxu1 }
0x2448   : > { %v4311_v21 = vpack.c.bf16 %v4305_v20, %v4305_v20  ;;  %v13359_v23 = vpop.f32.mrb[89].mxu1 }
0x2449   : > { %v4308_v26 = vpop.f32.mrb[90].mxu1 }
0x244a   : > { %v13360_v25 = vpop.f32.mrb[91].mxu1  ;;  %13366 = vmatmul.mubr.msk.bf16.vlgmr.msra.gmra.mrb[76].mxu0 %vm1215_vm1, %v4311_v21  ;;  %v14310_v26 = vld [vmem:[#allocation8 + $0x50] sm:$0xff]  }
0x244b   : > { %13377 = vmatprep.mubr.msk.bf16.mxu0 %vm15377_vm0, %v15376_v1  ;;  %v14313_v25 = vld [vmem:[#allocation11 + $0xd4] ss:$8 sps:$4 sm:$0xff]  }
0x244f   : > { %v4412_v28 = vpop.f32.mrb[92].mxu1 }
0x2450   : > { %v4418_v45 = vmul.f32 0.17677669, %v4412_v28  ;;  %v13373_v24 = vpop.f32.mrb[93].mxu1  ;;  %v14311_v28 = vld [vmem:[#allocation11 + $0xd0] ss:$8 sps:$4 sm:$0xff]  }
0x2451   : > { %v4415_v29 = vpop.f32.mrb[94].mxu1  ;;  %v14317_v24 = vld [vmem:[#allocation11 + $0xe4] ss:$8 sps:$4 sm:$0xff]  }
0x2452   : > { %v13374_v30 = vpop.f32.mrb[95].mxu1  ;;  %v4419_v32 = vadd.f32 %v4418_v45, %v16007_v57  ;;  %v14314_v45 = vld [vmem:[#allocation8 + $0x58] sm:$0xff]   ;;  %v14315_v29 = vld [vmem:[#allocation11 + $0xe0] ss:$8 sps:$4 sm:$0xff]  }
0x2453   : > { %v14318_v30 = vld [vmem:[#allocation8 + $0x60] sm:$0xff]  }
0x2454   : > { %v4420_v35 = vsel %vm1264_vm4, %v4419_v32, -inf }
0x2455   : > { %4421 = vmax.xlane.f32.xlu1 %v4420_v35  ;;  %v14319_v35 = vld [vmem:[#allocation11 + $0xf0] ss:$8 sps:$4 sm:$0xff]  }
0x24e2   : > { %v4422_v36 = vpop.xlane.xlu1 %4421 }
0x24e3   : > { %v4423_v37 = vsub.f32 %v4419_v32, %v4422_v36  ;;  %v14321_v32 = vld [vmem:[#allocation11 + $0xf4] ss:$8 sps:$4 sm:$0xff]   ;;  %v14322_v36 = vld [vmem:[#allocation8 + $0x68] sm:$0xff]  }
0x24e5   : > { %v4424_v38 = vmul.f32 1.442695, %v4423_v37  ;;  %v14323_v37 = vld [vmem:[#allocation8 + $0x70] sm:$0xff]  }
0x24e7   : > { %14791 = vpow2.f32 %v4424_v38  ;;  %v14324_v38 = vld [vmem:[#allocation8 + $0x78] sm:$0xff]  }
0x24f1   : > { %v14792_v39 = vpop.eup %14791 }
0x24f2   : > { %v4426_v42 = vsel %vm1264_vm4, %v14792_v39, 0.0 }
0x24f3   : > { %4427 = vadd.xlane.f32.xlu0 %v4426_v42 }
0x2509   : > { %4432 = vrot.lane.b32.xlu0 %v16270_v41, %s17271_s8 }
0x251d   : > { %v4361_v47 = vpop.f32.mrb[76].mxu0 }
0x251e   : > { %v4367_v48 = vadd.f32 %v4361_v47, %v16328_v54  ;;  %v13367_v49 = vpop.f32.mrb[77].mxu0  ;;  %v14292_v54 = vld [vmem:[#allocation7 + $0x78] sm:$0xff]  }
0x251f   : > { %v4364_v50 = vpop.f32.mrb[78].mxu0  ;;  %13384 = vmatpush3.bf16.msra.mxu1 %v14292_v54 }
0x2520   : > { %v13368_v51 = vpop.f32.mrb[79].mxu0  ;;  %4800 = vmatprep.subr.bf16.mxu1 %v14295_v12  ;;  %v12132_v50 = vld [vmem:[%s17263_s23 + $0x1] ss:$0 sm:$0xff] }
0x2580   : > { %v4428_v59 = vpop.xlane.xlu0 %4427 }
0x2581   : > { %14793 = vrcp.f32 %v4428_v59 }
0x2584   : > { %v4433_v8 = vpop.permute.xlu0 %4432 }
0x2585   : > { %v4438_v53 = vsel %vm1280_vm2, %v4433_v8, 0 }
0x2586   : > { %13376 = vmatpush3.bf16.msra.mxu0 %v4438_v53  ;;  %v4708_v53 = vld [vmem:[#allocation13 + $0x2] sm:$0x3] }
0x2587   : > { %13389 = vmatprep.subr.bf16.mxu0 %v15376_v1 }
0x258b   : > { %v14794_v43 = vpop.eup %14793 }
0x258c   : > { %v4430_v41 = vmul.f32 %v14794_v43, %v14792_v39  ;;  %v4713_v43 = vrot.slane %v4708_v53, %v15977_v34 }
0x258e   : > { %v4431_v55 = vpack.c.bf16 %v4430_v41, %v4430_v41  ;;  %v4717_v41 = vrot.slane %v4708_v53, %v15974_v33 }
0x2590   : > { %13378 = vmatmul.mubr.msk.bf16.vlgmr.msra.gmra.mrb[80].mxu0 %vm1264_vm4, %v4431_v55 }
0x2591   : > { %13405 = vmatprep.mubr.msk.bf16.mxu0 %vm15377_vm0, %v15376_v1  ;;  %13390 = vmatpush3.bf16.msra.mxu0 %v14302_v14 }
0x2592   : > { %13391 = vmatprep.subr.bf16.mxu0 %v15376_v1 }
0x2595   : > { %13392 = vmatpush3.bf16.msra.mxu0 %v14306_v9 }
0x2596   : > { %13393 = vmatprep.subr.bf16.mxu0 %v15376_v1 }
0x2599   : > { %13394 = vmatpush3.bf16.msra.mxu0 %v14310_v26 }
0x259a   : > { %13395 = vmatprep.subr.bf16.mxu0 %v15376_v1 }
0x259d   : > { %13396 = vmatpush3.bf16.msra.mxu0 %v14314_v45 }
0x259e   : > { %13397 = vmatprep.subr.bf16.mxu0 %v15376_v1 }
0x25a1   : > { %13398 = vmatpush3.bf16.msra.mxu0 %v14318_v30 }
0x25a2   : > { %13399 = vmatprep.subr.bf16.mxu0 %v15376_v1 }
0x25a5   : > { %13400 = vmatpush3.bf16.msra.mxu0 %v14322_v36 }
0x25a6   : > { %13401 = vmatprep.subr.bf16.mxu0 %v15376_v1 }
0x25a9   : > { %13402 = vmatpush3.bf16.msra.mxu0 %v14323_v37 }
0x25aa   : > { %13403 = vmatprep.subr.bf16.mxu0 %v15376_v1 }
0x25ad   : > { %13404 = vmatpush3.bf16.msra.mxu0 %v14324_v38 }
0x25ae   : > { %13409 = vmatprep.subr.bf16.mxu0 %v15376_v1 }
0x2663   : > { %v4474_v56 = vpop.f32.mrb[80].mxu0 }
0x2664   : > { %v4480_v52 = vpack.c.bf16 %v4474_v56, %v4474_v56  ;;  %v13379_v58 = vpop.f32.mrb[81].mxu0 }
0x2665   : > { %v4477_v60 = vpop.f32.mrb[82].mxu0 }
0x2666   : > { %v13380_v61 = vpop.f32.mrb[83].mxu0  ;;  %13386 = vmatmul.mubr.msk.bf16.vlgmr.msra.gmra.mrb[96].mxu1 %vm1215_vm1, %v4480_v52 }
0x2667   : > { %4832 = vmatprep.mubr.bf16.mxu1 %v15375_v0  ;;  %4801 = vmatpush1.bf16.msra.mxu1 %v14293_v11 }
0x2668   : > { %4802 = vmatprep.subr.bf16.mxu1 %v14298_v13 }
0x266b   : > { %4803 = vmatpush1.bf16.msra.mxu1 %v14296_v40 }
0x266c   : > { %4804 = vmatprep.subr.bf16.mxu1 %v14301_v15 }
0x266f   : > { %4805 = vmatpush1.bf16.msra.mxu1 %v14299_v16 }
0x2670   : > { %4806 = vmatprep.subr.bf16.mxu1 %v14305_v17 }
0x2739   : > { %v4530_v62 = vpop.f32.mrb[96].mxu1 }
0x273a   : > { %v4536_v3 = vadd.f32 %v4530_v62, %v4367_v48  ;;  %v13387_v5 = vpop.f32.mrb[97].mxu1  ;;  %v12131_v48 = vld [vmem:[%s17262_s20 + $0x1] ss:$0 sm:$0xff] }
0x273b   : > { %v4533_v6 = vpop.f32.mrb[98].mxu1  ;;  %v12133_v5 = vld [vmem:[#allocation10 + $0x1] ss:$0 sm:$0xff] }
0x273c   : > { %v4545_v7 = vadd.f32 %v12128_v63, %v4536_v3  ;;  %v13388_v4 = vpop.f32.mrb[99].mxu1 }
0x273e   : > { %v4546_v10 = vadd.f32 %v4545_v7, %v16254_v22  ;;  %v14303_v22 = vld [vmem:[#allocation11 + $0xb0] ss:$8 sps:$4 sm:$0xff]  }
0x273f   : > { %4807 = vmatpush1.bf16.msra.mxu1 %v14303_v22 }
0x2740   : > { %4551 = vadd.xlane.f32.xlu1 %v4546_v10  ;;  %4808 = vmatprep.subr.bf16.mxu1 %v14309_v31 }
0x2743   : > { %4809 = vmatpush1.bf16.msra.mxu1 %v14307_v18 }
0x2744   : > { %4810 = vmatprep.subr.bf16.mxu1 %v14313_v25 }
0x2747   : > { %4811 = vmatpush1.bf16.msra.mxu1 %v14311_v28 }
0x2748   : > { %4812 = vmatprep.subr.bf16.mxu1 %v14317_v24 }
0x274b   : > { %4813 = vmatpush1.bf16.msra.mxu1 %v14315_v29 }
0x274c   : > { %4814 = vmatprep.subr.bf16.mxu1 %v14321_v32 }
0x274f   : > { %4815 = vmatpush1.bf16.msra.mxu1 %v14319_v35 }
0x2750   : > { %13415 = vmatprep.subr.bf16.mxu1 %v15376_v1 }
0x2752   : > { %4833 = vmatmul.mubr.bf16.vlgmr.msra.gmra.mrb[100].mxu1 %v15953_v27 }
0x2753   : > { %13417 = vmatprep.mubr.msk.bf16.mxu1 %vm15377_vm0, %v15376_v1 }
0x27cd   : > { %v4552_v19 = vpop.xlane.xlu1 %4551 }
0x27ce   : > { %v4553_v20 = vmul.f32 0.0078125, %v4552_v19 }
0x27d0   : > { %v4554_v21 = vsub.f32 %v4546_v10, %v4553_v20 }
0x27d2   : > { %v4555_v23 = vmul.f32 %v4554_v21, %v4554_v21 }
0x27d4   : > { %4556 = vadd.xlane.f32.xlu1 %v4555_v23 }
0x2825   : > { %v4834_v55 = vpop.f32.mrb[100].mxu1 }
0x2826   : > { %v4835_v54 = vadd.f32 %v4834_v55, %v4713_v43  ;;  %v4836_v56 = vpop.f32.mrb[101].mxu1  ;;  %v14325_v43 = vld [vmem:[#allocation14 + $0x40] sm:$0xff]   ;;  %v14326_v55 = vld [vmem:[#allocation14 + $0x48] sm:$0xff]  }
0x2827   : > { %v4837_v52 = vadd.f32 %v4836_v56, %v4717_v41  ;;  %v4838_v58 = vpop.f32.mrb[102].mxu1 }
0x2828   : > { %v16398_v60 = vpack.c.bf16 %v4835_v54, %v4835_v54  ;;  %v4839_v61 = vpop.f32.mrb[103].mxu1 }
0x2829   : > { %v16400_v62 = vpack.c.bf16 %v4837_v52, %v4837_v52 }
0x282a   : > { %4971 = vrot.lane.b32.xlu1 %v16398_v60, %s17269_s21  ;;  %v4865_v63 = vsel %vm1215_vm1, %v16398_v60, 0 }
0x282b   : > { %v4924_v3 = vsel %vm1280_vm2, %v16400_v62, 0 }
0x282c   : > { %13416 = vmatpush3.bf16.msra.mxu1 %v4924_v3 }
0x282d   : > { %13427 = vmatprep.subr.bf16.mxu1 %v15376_v1 }
0x2861   : > { %v4557_v39 = vpop.xlane.xlu1 %4556 }
0x2862   : > { %v4558_v42 = vmul.f32 0.0078125, %v4557_v39 }
0x2864   : > { %v4559_v44 = vadd.f32 1e-05, %v4558_v42 }
0x2866   : > { %14795 = vrsqrt.f32 %v4559_v44 }
0x2870   : > { %v14796_v47 = vpop.eup %14795 }
0x2871   : > { %v4561_v49 = vmul.f32 %v14796_v47, %v4554_v21 }
0x2873   : > { %v4568_v51 = vmul.f32 %v12131_v48, %v4561_v49  ;;  %v14327_v49 = vld [vmem:[#allocation14 + $0x50] sm:$0xff]  }
0x2875   : > { %v16390_v59 = vadd.f32 %v12132_v50, %v4568_v51  ;;  %v14328_v50 = vld [vmem:[#allocation14 + $0x58] sm:$0xff]  }
0x2877   : > { %v4576_v8 = vpack.c.bf16 %v16390_v59, %v16390_v59 }
0x2879   : > { %13406 = vmatmul.mubr.bf16.vlgmr.msra.gmra.mrb[84].mxu0 %v4576_v8 }
0x287a   : > { %13411 = vmatprep.mubr.msk.bf16.mxu0 %vm15377_vm0, %v15376_v1  ;;  %13410 = vmatpush3.bf16.xpose.msra.mxu0 %v4865_v63 }
0x287b   : > { %13421 = vmatprep.subr.bf16.mxu0 %v15376_v1 }
0x289c   : > { %v4972_v7 = vpop.permute.xlu1 %4971 }
0x289d   : > { %v4977_v14 = vsel %vm1215_vm1, %v4972_v7, 0 }
0x294c   : > { %v4684_v6 = vpop.f32.mrb[84].mxu0 }
0x294d   : > { %v4685_v4 = vadd.f32 %v12133_v5, %v4684_v6  ;;  %v13407_v10 = vpop.f32.mrb[85].mxu0 }
0x294e   : > { %v4687_v11 = vpop.f32.mrb[86].mxu0 }
0x294f   : > { %v16410_v12 = vpack.c.bf16 %v4685_v4, %v4685_v4  ;;  %v13408_v13 = vpop.f32.mrb[87].mxu0 }
0x2951   : > { %4968 = vrot.lane.b32.xlu0 %v16410_v12, %s17269_s21  ;;  %13412 = vmatmul.mubr.msk.bf16.vlgmr.msra.gmra.mrb[88].mxu0 %vm1215_vm1, %v16410_v12 }
0x2952   : > { %13422 = vmatpush3.bf16.xpose.msra.mxu0 %v4977_v14  ;;  %13423 = vmatprep.mubr.msk.bf16.mxu0 %vm15377_vm0, %v15376_v1 }
0x2953   : > { %13433 = vmatprep.subr.bf16.mxu0 %v15376_v1 }
0x29c3   : > { %v4969_v40 = vpop.permute.xlu0 %4968 }
0x29c4   : > { %13424 = vmatmul.mubr.msk.bf16.vlgmr.msra.gmra.mrb[92].mxu0 %vm1215_vm1, %v4969_v40 }
0x29c5   : > { %13437 = vmatprep.mubr.msk.bf16.mxu0 %vm15377_vm0, %v15376_v1  ;;  %13434 = vmatpush3.bf16.msra.mxu0 %v14327_v49 }
0x29c6   : > { %13435 = vmatprep.subr.bf16.mxu0 %v15376_v1 }
0x29c9   : > { %13436 = vmatpush3.bf16.msra.mxu0 %v14328_v50 }
0x29ca   : > { %13449 = vmatprep.subr.bf16.mxu0 %v15376_v1 }
0x2a24   : > { %v4901_v15 = vpop.f32.mrb[88].mxu0 }
0x2a25   : > { %v4907_v9 = vmul.f32 0.17677669, %v4901_v15  ;;  %v13413_v16 = vpop.f32.mrb[89].mxu0 }
0x2a26   : > { %v4904_v17 = vpop.f32.mrb[90].mxu0 }
0x2a27   : > { %v13414_v22 = vpop.f32.mrb[91].mxu0  ;;  %v4908_v31 = vsel %vm1264_vm4, %v4907_v9, -inf }
0x2a28   : > { %4909 = vmax.xlane.f32.xlu0 %v4908_v31 }
0x2a97   : > { %v5013_v18 = vpop.f32.mrb[92].mxu0 }
0x2a98   : > { %v5019_v19 = vmul.f32 0.17677669, %v5013_v18  ;;  %v13425_v20 = vpop.f32.mrb[93].mxu0 }
0x2a99   : > { %v5016_v21 = vpop.f32.mrb[94].mxu0 }
0x2a9a   : > { %v13426_v23 = vpop.f32.mrb[95].mxu0  ;;  %v5020_v26 = vsel %vm1264_vm4, %v5019_v19, -inf }
0x2a9b   : > { %5021 = vmax.xlane.f32.xlu1 %v5020_v26 }
0x2aac   : > { %5033 = vrot.lane.b32.xlu1 %v16400_v62, %s17269_s21 }
0x2ab0   : > { %5192 = vrot.lane.b32.xlu1 %v16410_v12, %s17270_s30 }
0x2ab5   : > { %v4910_v25 = vpop.xlane.xlu0 %4909 }
0x2ab6   : > { %v4911_v28 = vsub.f32 %v4907_v9, %v4910_v25 }
0x2ab8   : > { %v4912_v45 = vmul.f32 1.442695, %v4911_v28 }
0x2aba   : > { %14797 = vpow2.f32 %v4912_v45 }
0x2ac4   : > { %v14798_v24 = vpop.eup %14797 }
0x2ac5   : > { %v4914_v29 = vsel %vm1264_vm4, %v14798_v24, 0.0 }
0x2ac6   : > { %4915 = vadd.xlane.f32.xlu0 %v4914_v29 }
0x2b28   : > { %v5022_v30 = vpop.xlane.xlu1 %5021 }
0x2b29   : > { %v5023_v32 = vsub.f32 %v5019_v19, %v5022_v30  ;;  %v14329_v30 = vld [vmem:[#allocation14 + $0x60] sm:$0xff]  }
0x2b2b   : > { %v5024_v35 = vmul.f32 1.442695, %v5023_v32 }
0x2b2c   : > { %v5034_v44 = vpop.permute.xlu1 %5033 }
0x2b2d   : > { %14799 = vpow2.f32 %v5024_v35  ;;  %v5039_v48 = vsel %vm1280_vm2, %v5034_v44, 0  ;;  %v14330_v44 = vld [vmem:[#allocation14 + $0x68] sm:$0xff]  }
0x2b30   : > { %v5193_v11 = vpop.permute.xlu1 %5192 }
0x2b37   : > { %v14800_v36 = vpop.eup %14799 }
0x2b38   : > { %v5026_v37 = vsel %vm1264_vm4, %v14800_v36, 0.0 }
0x2b39   : > { %5027 = vadd.xlane.f32.xlu0 %v5026_v37 }
0x2b4f   : > { %5194 = vrot.lane.b32.xlu0 %v16398_v60, %s17270_s30 }
0x2b53   : > { %v4916_v38 = vpop.xlane.xlu0 %4915 }
0x2b54   : > { %14801 = vrcp.f32 %v4916_v38 }
0x2b5e   : > { %v14802_v39 = vpop.eup %14801 }
0x2b5f   : > { %v4918_v42 = vmul.f32 %v14802_v39, %v14798_v24 }
0x2b61   : > { %v4919_v47 = vpack.c.bf16 %v4918_v42, %v4918_v42 }
0x2b63   : > { %13418 = vmatmul.mubr.msk.bf16.vlgmr.msra.gmra.mrb[104].mxu1 %vm1264_vm4, %v4919_v47 }
0x2b64   : > { %13428 = vmatpush3.bf16.msra.mxu1 %v5039_v48  ;;  %13429 = vmatprep.mubr.msk.bf16.mxu1 %vm15377_vm0, %v15376_v1 }
0x2b65   : > { %13441 = vmatprep.subr.bf16.mxu1 %v15376_v1 }
0x2bc6   : > { %v5028_v51 = vpop.xlane.xlu0 %5027 }
0x2bc7   : > { %14803 = vrcp.f32 %v5028_v51 }
0x2bca   : > { %v5195_v63 = vpop.permute.xlu0 %5194 }
0x2bcb   : > { %v5200_v4 = vsel %vm1215_vm1, %v5195_v63, 0 }
0x2bd1   : > { %v14804_v8 = vpop.eup %14803 }
0x2bd2   : > { %v5030_v53 = vmul.f32 %v14804_v8, %v14800_v36 }
0x2bd4   : > { %v5031_v41 = vpack.c.bf16 %v5030_v53, %v5030_v53 }
0x2bd6   : > { %13430 = vmatmul.mubr.msk.bf16.vlgmr.msra.gmra.mrb[108].mxu1 %vm1264_vm4, %v5031_v41 }
0x2bd7   : > { %13442 = vmatpush3.bf16.msra.mxu1 %v14325_v43  ;;  %13445 = vmatprep.mubr.msk.bf16.mxu1 %vm15377_vm0, %v15376_v1 }
0x2bd8   : > { %13443 = vmatprep.subr.bf16.mxu1 %v15376_v1 }
0x2bdb   : > { %13444 = vmatpush3.bf16.msra.mxu1 %v14326_v55 }
0x2bdc   : > { %13455 = vmatprep.subr.bf16.mxu1 %v15376_v1 }
0x2c36   : > { %v4960_v54 = vpop.f32.mrb[104].mxu1 }
0x2c37   : > { %v4966_v56 = vpack.c.bf16 %v4960_v54, %v4960_v54  ;;  %v13419_v52 = vpop.f32.mrb[105].mxu1 }
0x2c38   : > { %v4963_v58 = vpop.f32.mrb[106].mxu1 }
0x2c39   : > { %v13420_v61 = vpop.f32.mrb[107].mxu1  ;;  %13446 = vmatmul.mubr.msk.bf16.vlgmr.msra.gmra.mrb[112].mxu1 %vm1215_vm1, %v4966_v56 }
0x2c3a   : > { %13457 = vmatprep.mubr.msk.bf16.mxu1 %vm15377_vm0, %v15376_v1 }
0x2ca9   : > { %v5075_v3 = vpop.f32.mrb[108].mxu1 }
0x2caa   : > { %v5081_v5 = vpack.c.bf16 %v5075_v3, %v5075_v3  ;;  %v13431_v6 = vpop.f32.mrb[109].mxu1 }
0x2cab   : > { %v5078_v7 = vpop.f32.mrb[110].mxu1  ;;  %v14331_v6 = vld [vmem:[#allocation14 + $0x70] sm:$0xff]  }
0x2cac   : > { %v13432_v10 = vpop.f32.mrb[111].mxu1  ;;  %13438 = vmatmul.mubr.msk.bf16.vlgmr.msra.gmra.mrb[96].mxu0 %vm1215_vm1, %v5081_v5 }
0x2cad   : > { %13450 = vmatpush3.bf16.xpose.msra.mxu0 %v5200_v4  ;;  %13451 = vmatprep.mubr.msk.bf16.mxu0 %vm15377_vm0, %v15376_v1 }
0x2cae   : > { %13461 = vmatprep.subr.bf16.mxu0 %v15376_v1 }
0x2cb4   : > { %13452 = vmatmul.mubr.msk.bf16.vlgmr.msra.gmra.mrb[100].mxu0 %vm1215_vm1, %v5193_v11 }
0x2cb5   : > { %13465 = vmatprep.mubr.msk.bf16.mxu0 %vm15377_vm0, %v15376_v1  ;;  %13462 = vmatpush3.bf16.msra.mxu0 %v14329_v30  ;;  %v14336_v30 = vld [vmem:[#allocation17 + $0x108] ss:$16 sps:$4 sm:$0xff]  }
0x2cb6   : > { %13463 = vmatprep.subr.bf16.mxu0 %v15376_v1 }
0x2cb9   : > { %13464 = vmatpush3.bf16.msra.mxu0 %v14330_v44 }
0x2cba   : > { %13475 = vmatprep.subr.bf16.mxu0 %v15376_v1 }
0x2d0c   : > { %v5186_v13 = vpop.f32.mrb[112].mxu1 }
0x2d0d   : > { %v13447_v14 = vpop.f32.mrb[113].mxu1 }
0x2d0e   : > { %v5189_v40 = vpop.f32.mrb[114].mxu1 }
0x2d0f   : > { %v13448_v15 = vpop.f32.mrb[115].mxu1 }
0x2d7f   : > { %v5131_v9 = vpop.f32.mrb[96].mxu0 }
0x2d80   : > { %v16456_v16 = vadd.f32 %v5186_v13, %v5131_v9  ;;  %v13439_v17 = vpop.f32.mrb[97].mxu0  ;;  %v14332_v9 = vld [vmem:[#allocation14 + $0x78] sm:$0xff]  }
0x2d81   : > { %v5134_v22 = vpop.f32.mrb[98].mxu0 }
0x2d82   : > { %v13440_v31 = vpop.f32.mrb[99].mxu0 }
0x2d87   : > { %v5236_v18 = vpop.f32.mrb[100].mxu0 }
0x2d88   : > { %v5242_v19 = vmul.f32 0.17677669, %v5236_v18  ;;  %v13453_v20 = vpop.f32.mrb[101].mxu0 }
0x2d89   : > { %v5239_v21 = vpop.f32.mrb[102].mxu0  ;;  %v12178_v20 = vld [vmem:[#allocation16 + $0x1] ss:$0 sm:$0xff] }
0x2d8a   : > { %v13454_v23 = vpop.f32.mrb[103].mxu0  ;;  %v5243_v26 = vsel %vm1264_vm4, %v5242_v19, -inf }
0x2d8b   : > { %5244 = vmax.xlane.f32.xlu1 %v5243_v26 }
0x2d9c   : > { %5362 = vrot.lane.b32.xlu1 %v16398_v60, %s17271_s8 }
0x2da0   : > { %5360 = vrot.lane.b32.xlu1 %v16410_v12, %s17271_s8 }
0x2e18   : > { %v5245_v25 = vpop.xlane.xlu1 %5244 }
0x2e19   : > { %v5246_v28 = vsub.f32 %v5242_v19, %v5245_v25 }
0x2e1b   : > { %v5247_v45 = vmul.f32 1.442695, %v5246_v28 }
0x2e1c   : > { %v5363_v37 = vpop.permute.xlu1 %5362 }
0x2e1d   : > { %14805 = vpow2.f32 %v5247_v45  ;;  %v5368_v39 = vsel %vm1215_vm1, %v5363_v37, 0  ;;  %v14347_v37 = vld [vmem:[#allocation17 + $0x144] ss:$16 sps:$4 sm:$0xff]  }
0x2e20   : > { %v5361_v42 = vpop.permute.xlu1 %5360 }
0x2e27   : > { %v14806_v24 = vpop.eup %14805 }
0x2e28   : > { %v5249_v29 = vsel %vm1264_vm4, %v14806_v24, 0.0 }
0x2e29   : > { %5250 = vadd.xlane.f32.xlu0 %v5249_v29  ;;  %v14335_v29 = vld [vmem:[#allocation17 + $0x104] ss:$16 sps:$4 sm:$0xff]  }
0x2e3f   : > { %5255 = vrot.lane.b32.xlu0 %v16400_v62, %s17270_s30 }
0x2eb6   : > { %v5251_v32 = vpop.xlane.xlu0 %5250 }
0x2eb7   : > { %14807 = vrcp.f32 %v5251_v32  ;;  %v14338_v32 = vld [vmem:[#allocation17 + $0x10c] ss:$16 sps:$4 sm:$0xff]  }
0x2eba   : > { %v5256_v60 = vpop.permute.xlu0 %5255 }
0x2ebb   : > { %v5261_v12 = vsel %vm1280_vm2, %v5256_v60, 0  ;;  %v14341_v60 = vld [vmem:[#allocation17 + $0x124] ss:$16 sps:$4 sm:$0xff]  }
0x2ebc   : > { %13456 = vmatpush3.bf16.msra.mxu1 %v5261_v12  ;;  %v14344_v12 = vld [vmem:[#allocation17 + $0x12c] ss:$16 sps:$4 sm:$0xff]  }
0x2ebd   : > { %13469 = vmatprep.subr.bf16.mxu1 %v15376_v1 }
0x2ec1   : > { %v14808_v35 = vpop.eup %14807 }
0x2ec2   : > { %v5253_v36 = vmul.f32 %v14808_v35, %v14806_v24  ;;  %v14333_v24 = vld [vmem:[#allocation17 + $0x100] ss:$16 sps:$4 sm:$0xff]  }
0x2ec3   : > { %v14339_v35 = vld [vmem:[#allocation17 + $0x120] ss:$16 sps:$4 sm:$0xff]  }
0x2ec4   : > { %v5254_v38 = vpack.c.bf16 %v5253_v36, %v5253_v36  ;;  %v14342_v36 = vld [vmem:[#allocation17 + $0x128] ss:$16 sps:$4 sm:$0xff]  }
0x2ec6   : > { %13458 = vmatmul.mubr.msk.bf16.vlgmr.msra.gmra.mrb[116].mxu1 %vm1264_vm4, %v5254_v38  ;;  %v14350_v38 = vld [vmem:[#allocation17 + $0x14c] ss:$16 sps:$4 sm:$0xff]  }
0x2ec7   : > { %13470 = vmatpush3.bf16.xpose.msra.mxu1 %v5368_v39  ;;  %13471 = vmatprep.mubr.msk.bf16.mxu1 %vm15377_vm0, %v15376_v1  ;;  %v14345_v39 = vld [vmem:[#allocation17 + $0x140] ss:$16 sps:$4 sm:$0xff]  }
0x2ec8   : > { %13481 = vmatprep.subr.bf16.mxu1 %v15376_v1 }
0x2ece   : > { %13472 = vmatmul.mubr.msk.bf16.vlgmr.msra.gmra.mrb[120].mxu1 %vm1215_vm1, %v5361_v42 }
0x2ecf   : > { %13485 = vmatprep.mubr.msk.bf16.mxu1 %vm15377_vm0, %v15376_v1  ;;  %13482 = vmatpush3.bf16.msra.mxu1 %v14331_v6  ;;  %v14377_v6 = vld [vmem:[#allocation17 + $0x1e4] ss:$16 sps:$4 sm:$0xff]  }
0x2ed0   : > { %13483 = vmatprep.subr.bf16.mxu1 %v15376_v1 }
0x2ed3   : > { %13484 = vmatpush3.bf16.msra.mxu1 %v14332_v9  ;;  %v12181_v9 = vld [vmem:[%s17264_s29 + $0x1] ss:$0 sm:$0xff] }
0x2ed4   : > { %5825 = vmatprep.subr.bf16.mxu1 %v14338_v32  ;;  %v14394_v32 = vld [vmem:[#allocation19 + $0x1d8] sm:$0xff]  }
0x2f99   : > { %v5297_v47 = vpop.f32.mrb[116].mxu1 }
0x2f9a   : > { %v5303_v48 = vpack.c.bf16 %v5297_v47, %v5297_v47  ;;  %v13459_v49 = vpop.f32.mrb[117].mxu1 }
0x2f9b   : > { %v5300_v50 = vpop.f32.mrb[118].mxu1  ;;  %v14353_v49 = vld [vmem:[#allocation17 + $0x164] ss:$16 sps:$4 sm:$0xff]  }
0x2f9c   : > { %v13460_v51 = vpop.f32.mrb[119].mxu1  ;;  %13466 = vmatmul.mubr.msk.bf16.vlgmr.msra.gmra.mrb[104].mxu0 %vm1215_vm1, %v5303_v48  ;;  %v14356_v50 = vld [vmem:[#allocation17 + $0x16c] ss:$16 sps:$4 sm:$0xff]  }
0x2f9d   : > { %13477 = vmatprep.mubr.msk.bf16.mxu0 %vm15377_vm0, %v15376_v1  ;;  %v14351_v51 = vld [vmem:[#allocation17 + $0x160] ss:$16 sps:$4 sm:$0xff]  }
0x2fa1   : > { %v5404_v8 = vpop.f32.mrb[120].mxu1 }
0x2fa2   : > { %v5410_v53 = vmul.f32 0.17677669, %v5404_v8  ;;  %v13473_v43 = vpop.f32.mrb[121].mxu1  ;;  %v14354_v8 = vld [vmem:[#allocation17 + $0x168] ss:$16 sps:$4 sm:$0xff]  }
0x2fa3   : > { %v5407_v41 = vpop.f32.mrb[122].mxu1  ;;  %v14362_v43 = vld [vmem:[#allocation17 + $0x18c] ss:$16 sps:$4 sm:$0xff]  }
0x2fa4   : > { %v13474_v55 = vpop.f32.mrb[123].mxu1  ;;  %v5411_v54 = vsel %vm1264_vm4, %v5410_v53, -inf  ;;  %v14357_v41 = vld [vmem:[#allocation17 + $0x180] ss:$16 sps:$4 sm:$0xff]  }
0x2fa5   : > { %5412 = vmax.xlane.f32.xlu0 %v5411_v54  ;;  %v14360_v55 = vld [vmem:[#allocation17 + $0x188] ss:$16 sps:$4 sm:$0xff]   ;;  %v14365_v54 = vld [vmem:[#allocation17 + $0x1a4] ss:$16 sps:$4 sm:$0xff]  }
0x2fbb   : > { %5423 = vrot.lane.b32.xlu0 %v16400_v62, %s17271_s8 }
0x3032   : > { %v5413_v56 = vpop.xlane.xlu0 %5412 }
0x3033   : > { %v5414_v52 = vsub.f32 %v5410_v53, %v5413_v56  ;;  %v14359_v53 = vld [vmem:[#allocation17 + $0x184] ss:$16 sps:$4 sm:$0xff]   ;;  %v14368_v56 = vld [vmem:[#allocation17 + $0x1ac] ss:$16 sps:$4 sm:$0xff]  }
0x3035   : > { %v5415_v58 = vmul.f32 1.442695, %v5414_v52  ;;  %v14363_v52 = vld [vmem:[#allocation17 + $0x1a0] ss:$16 sps:$4 sm:$0xff]  }
0x3036   : > { %v5424_v61 = vpop.permute.xlu0 %5423 }
0x3037   : > { %14809 = vpow2.f32 %v5415_v58  ;;  %v5429_v63 = vsel %vm1280_vm2, %v5424_v61, 0  ;;  %v14366_v58 = vld [vmem:[#allocation17 + $0x1a8] ss:$16 sps:$4 sm:$0xff]   ;;  %v14371_v61 = vld [vmem:[#allocation17 + $0x1c4] ss:$16 sps:$4 sm:$0xff]  }
0x3038   : > { %13476 = vmatpush3.bf16.msra.mxu0 %v5429_v63  ;;  %v14374_v63 = vld [vmem:[#allocation17 + $0x1cc] ss:$16 sps:$4 sm:$0xff]  }
0x3039   : > { %5784 = vmatprep.subr.bf16.mxu0 %v14335_v29  ;;  %v14392_v29 = vld [vmem:[#allocation19 + $0x190] sm:$0xff]  }
0x3041   : > { %v14810_v3 = vpop.eup %14809 }
0x3042   : > { %v5417_v5 = vsel %vm1264_vm4, %v14810_v3, 0.0 }
0x3043   : > { %5418 = vadd.xlane.f32.xlu1 %v5417_v5  ;;  %v14372_v5 = vld [vmem:[#allocation17 + $0x1c8] ss:$16 sps:$4 sm:$0xff]  }
0x306f   : > { %v5353_v7 = vpop.f32.mrb[104].mxu0 }
0x3070   : > { %v5359_v4 = vadd.f32 %v5353_v7, %v16456_v16  ;;  %v13467_v62 = vpop.f32.mrb[105].mxu0  ;;  %v14380_v7 = vld [vmem:[#allocation17 + $0x1ec] ss:$16 sps:$4 sm:$0xff]  }
0x3071   : > { %v5356_v10 = vpop.f32.mrb[106].mxu0  ;;  %v14378_v62 = vld [vmem:[#allocation17 + $0x1e8] ss:$16 sps:$4 sm:$0xff]  }
0x3072   : > { %v13468_v11 = vpop.f32.mrb[107].mxu0  ;;  %v14381_v10 = vld [vmem:[#allocation19 + $0x140] sm:$0xff]  }
0x3073   : > { %v14382_v11 = vld [vmem:[#allocation19 + $0x1c0] sm:$0xff]  }
0x30d0   : > { %v5419_v13 = vpop.xlane.xlu1 %5418 }
0x30d1   : > { %14811 = vrcp.f32 %v5419_v13 }
0x30db   : > { %v14812_v14 = vpop.eup %14811 }
0x30dc   : > { %v5421_v40 = vmul.f32 %v14812_v14, %v14810_v3  ;;  %v14369_v3 = vld [vmem:[#allocation17 + $0x1c0] ss:$16 sps:$4 sm:$0xff]  }
0x30de   : > { %v5422_v15 = vpack.c.bf16 %v5421_v40, %v5421_v40 }
0x30e0   : > { %13478 = vmatmul.mubr.msk.bf16.vlgmr.msra.gmra.mrb[108].mxu0 %vm1264_vm4, %v5422_v15 }
0x30e1   : > { %5816 = vmatprep.mubr.bf16.mxu0 %v15375_v0  ;;  %5785 = vmatpush1.bf16.msra.mxu0 %v14333_v24  ;;  %v14391_v24 = vld [vmem:[#allocation19 + $0x110] sm:$0xff]  }
0x30e2   : > { %5786 = vmatprep.subr.bf16.mxu0 %v14341_v60  ;;  %v14395_v60 = vld [vmem:[#allocation19 + $0x118] sm:$0xff]  }
0x30e5   : > { %5787 = vmatpush1.bf16.msra.mxu0 %v14339_v35  ;;  %v14397_v35 = vld [vmem:[#allocation19 + $0x160] sm:$0xff]  }
0x30e6   : > { %5788 = vmatprep.subr.bf16.mxu0 %v14347_v37  ;;  %v14399_v37 = vld [vmem:[#allocation19 + $0x120] sm:$0xff]  }
0x30e9   : > { %5789 = vmatpush1.bf16.msra.mxu0 %v14345_v39  ;;  %v14401_v39 = vld [vmem:[#allocation19 + $0x168] sm:$0xff]  }
0x30ea   : > { %5790 = vmatprep.subr.bf16.mxu0 %v14353_v49  ;;  %v14407_v49 = vld [vmem:[#allocation19 + $0x130] sm:$0xff]  }
0x30ed   : > { %5791 = vmatpush1.bf16.msra.mxu0 %v14351_v51  ;;  %v14409_v51 = vld [vmem:[#allocation19 + $0x178] sm:$0xff]  }
0x30ee   : > { %5792 = vmatprep.subr.bf16.mxu0 %v14359_v53  ;;  %v14411_v53 = vld [vmem:[#allocation19 + $0x138] sm:$0xff]  }
0x30f1   : > { %5793 = vmatpush1.bf16.msra.mxu0 %v14357_v41  ;;  %v12183_v41 = vld [vmem:[%s17266_s0 + $0x4] sm:$0xf] }
0x30f2   : > { %5794 = vmatprep.subr.bf16.mxu0 %v14365_v54  ;;  %v5615_v54 = vrot.slane %v12183_v41, %v15997_v46 }
0x30f5   : > { %5795 = vmatpush1.bf16.msra.mxu0 %v14363_v52  ;;  %v5619_v52 = vrot.slane %v12183_v41, %v16229_v2 }
0x30f6   : > { %5796 = vmatprep.subr.bf16.mxu0 %v14371_v61 }
0x30f9   : > { %5797 = vmatpush1.bf16.msra.mxu0 %v14369_v3 }
0x30fa   : > { %5798 = vmatprep.subr.bf16.mxu0 %v14377_v6 }
0x31b3   : > { %v5465_v17 = vpop.f32.mrb[108].mxu0 }
0x31b4   : > { %v5471_v22 = vpack.c.bf16 %v5465_v17, %v5465_v17  ;;  %v13479_v31 = vpop.f32.mrb[109].mxu0 }
0x31b5   : > { %v5468_v18 = vpop.f32.mrb[110].mxu0 }
0x31b6   : > { %v13480_v19 = vpop.f32.mrb[111].mxu0  ;;  %13486 = vmatmul.mubr.msk.bf16.vlgmr.msra.gmra.mrb[124].mxu1 %vm1215_vm1, %v5471_v22  ;;  %v12182_v22 = vld [vmem:[%s17265_s7 + $0x1] ss:$0 sm:$0xff] }
0x31b7   : > { %5857 = vmatprep.mubr.bf16.mxu1 %v15375_v0  ;;  %5826 = vmatpush1.bf16.msra.mxu1 %v14336_v30  ;;  %v14383_v19 = vld [vmem:[#allocation19 + $0x100] sm:$0xff]   ;;  %v14393_v30 = vld [vmem:[#allocation19 + $0x158] sm:$0xff]  }
0x31b8   : > { %5827 = vmatprep.subr.bf16.mxu1 %v14344_v12  ;;  %v14396_v12 = vld [vmem:[#allocation19 + $0x198] sm:$0xff]  }
0x31bb   : > { %5828 = vmatpush1.bf16.msra.mxu1 %v14342_v36  ;;  %v14398_v36 = vld [vmem:[#allocation19 + $0x1e0] sm:$0xff]  }
0x31bc   : > { %5829 = vmatprep.subr.bf16.mxu1 %v14350_v38  ;;  %v14400_v38 = vld [vmem:[#allocation19 + $0x1a0] sm:$0xff]  }
0x3289   : > { %v5521_v16 = vpop.f32.mrb[124].mxu1 }
0x328a   : > { %v5527_v21 = vadd.f32 %v5521_v16, %v5359_v4  ;;  %v13487_v23 = vpop.f32.mrb[125].mxu1  ;;  %v14375_v4 = vld [vmem:[#allocation17 + $0x1e0] ss:$16 sps:$4 sm:$0xff]  }
0x328b   : > { %v5524_v26 = vpop.f32.mrb[126].mxu1  ;;  %5799 = vmatpush1.bf16.msra.mxu0 %v14375_v4  ;;  %v14384_v16 = vld [vmem:[#allocation19 + $0x180] sm:$0xff]   ;;  %v14386_v23 = vld [vmem:[#allocation19 + $0x1c8] sm:$0xff]  }
0x328c   : > { %v5536_v25 = vadd.f32 %v12178_v20, %v5527_v21  ;;  %v13488_v28 = vpop.f32.mrb[127].mxu1  ;;  %12800 = vmatprep.subr.bf16.mxu0 %v14381_v10  ;;  %v14385_v21 = vld [vmem:[#allocation19 + $0x148] sm:$0xff]  }
0x328d   : > { %v14387_v26 = vld [vmem:[#allocation19 + $0x108] sm:$0xff]   ;;  %v14389_v28 = vld [vmem:[#allocation19 + $0x150] sm:$0xff]  }
0x328e   : > { %v5537_v45 = vadd.f32 %v5536_v25, %v16390_v59  ;;  %v14348_v59 = vld [vmem:[#allocation17 + $0x148] ss:$16 sps:$4 sm:$0xff]  }
0x328f   : > { %5830 = vmatpush1.bf16.msra.mxu1 %v14348_v59  ;;  %v14388_v25 = vld [vmem:[#allocation19 + $0x188] sm:$0xff]  }
0x3290   : > { %5542 = vadd.xlane.f32.xlu1 %v5537_v45  ;;  %5831 = vmatprep.subr.bf16.mxu1 %v14356_v50  ;;  %v14402_v59 = vld [vmem:[#allocation19 + $0x1e8] sm:$0xff]   ;;  %v14408_v50 = vld [vmem:[#allocation19 + $0x1b0] sm:$0xff]  }
0x3293   : > { %5832 = vmatpush1.bf16.msra.mxu1 %v14354_v8  ;;  %v14410_v8 = vld [vmem:[#allocation19 + $0x1f8] sm:$0xff]  }
0x3294   : > { %5833 = vmatprep.subr.bf16.mxu1 %v14362_v43  ;;  %v14412_v43 = vld [vmem:[#allocation19 + $0x1b8] sm:$0xff]  }
0x3297   : > { %5834 = vmatpush1.bf16.msra.mxu1 %v14360_v55  ;;  %v5607_v55 = vrot.slane %v12183_v41, %v15977_v34 }
0x3298   : > { %5835 = vmatprep.subr.bf16.mxu1 %v14368_v56  ;;  %v5611_v56 = vrot.slane %v12183_v41, %v15974_v33  ;;  %v14429_v41 = vld [vmem:[#allocation5 + $0x1e0] ss:$12 sps:$4 sm:$0xff]  }
0x329b   : > { %5836 = vmatpush1.bf16.msra.mxu1 %v14366_v58 }
0x329c   : > { %5837 = vmatprep.subr.bf16.mxu1 %v14374_v63 }
0x329f   : > { %5838 = vmatpush1.bf16.msra.mxu1 %v14372_v5 }
0x32a0   : > { %5839 = vmatprep.subr.bf16.mxu1 %v14380_v7 }
0x32a3   : > { %5840 = vmatpush1.bf16.msra.mxu1 %v14378_v62 }
0x32a4   : > { %12822 = vmatprep.subr.bf16.mxu1 %v14382_v11 }
0x331d   : > { %v5543_v42 = vpop.xlane.xlu1 %5542 }
0x331e   : > { %v5544_v44 = vmul.f32 0.0078125, %v5543_v42  ;;  %v14403_v42 = vld [vmem:[#allocation19 + $0x128] sm:$0xff]  }
0x3320   : > { %v5545_v47 = vsub.f32 %v5537_v45, %v5544_v44  ;;  %v14390_v45 = vld [vmem:[#allocation19 + $0x1d0] sm:$0xff]   ;;  %v14404_v44 = vld [vmem:[#allocation19 + $0x1a8] sm:$0xff]  }
0x3322   : > { %v5546_v48 = vmul.f32 %v5545_v47, %v5545_v47 }
0x3324   : > { %5547 = vadd.xlane.f32.xlu1 %v5546_v48  ;;  %v14406_v48 = vld [vmem:[#allocation19 + $0x1f0] sm:$0xff]  }
0x33b1   : > { %v5548_v13 = vpop.xlane.xlu1 %5547 }
0x33b2   : > { %v5549_v14 = vmul.f32 0.0078125, %v5548_v13 }
0x33b4   : > { %v5550_v40 = vadd.f32 1e-05, %v5549_v14 }
0x33b6   : > { %14813 = vrsqrt.f32 %v5550_v40 }
0x33c0   : > { %v14814_v15 = vpop.eup %14813 }
0x33c1   : > { %v5552_v17 = vmul.f32 %v14814_v15, %v5545_v47  ;;  %v14405_v47 = vld [vmem:[#allocation19 + $0x170] sm:$0xff]  }
0x33c3   : > { %v5559_v31 = vmul.f32 %v12181_v9, %v5552_v17 }
0x33c5   : > { %v16499_v18 = vadd.f32 %v12182_v22, %v5559_v31 }
0x33c7   : > { %v5567_v20 = vpack.c.bf16 %v16499_v18, %v16499_v18 }
0x33c9   : > { %5817 = vmatmul.mubr.bf16.vlgmr.msra.gmra.mrb[112].mxu0 %v5567_v20  ;;  %5858 = vmatmul.mubr.bf16.vlgmr.msra.gmra.mrb[128].mxu1 %v5567_v20 }
0x33ca   : > { %12801 = vmatpush3.bf16.msra.mxu0 %v14383_v19  ;;  %12823 = vmatpush3.bf16.msra.mxu1 %v14384_v16 }
0x33cb   : > { %12802 = vmatprep.subr.bf16.mxu0 %v14385_v21  ;;  %12824 = vmatprep.subr.bf16.mxu1 %v14386_v23  ;;  %v12216_v21 = vld [vmem:[#allocation20 + $0x1] ss:$0 sm:$0xff] }
0x33ce   : > { %12803 = vmatpush3.bf16.msra.mxu0 %v14387_v26  ;;  %12825 = vmatpush3.bf16.msra.mxu1 %v14388_v25 }
0x33cf   : > { %12804 = vmatprep.subr.bf16.mxu0 %v14389_v28  ;;  %12826 = vmatprep.subr.bf16.mxu1 %v14390_v45 }
0x33d2   : > { %12805 = vmatpush3.bf16.msra.mxu0 %v14391_v24  ;;  %12827 = vmatpush3.bf16.msra.mxu1 %v14392_v29 }
0x33d3   : > { %12806 = vmatprep.subr.bf16.mxu0 %v14393_v30  ;;  %12828 = vmatprep.subr.bf16.mxu1 %v14394_v32 }
0x33d6   : > { %12807 = vmatpush3.bf16.msra.mxu0 %v14395_v60  ;;  %12829 = vmatpush3.bf16.msra.mxu1 %v14396_v12 }
0x33d7   : > { %12808 = vmatprep.subr.bf16.mxu0 %v14397_v35  ;;  %12830 = vmatprep.subr.bf16.mxu1 %v14398_v36  ;;  %v14413_v35 = vld [vmem:[#allocation5 + $0x180] ss:$12 sps:$4 sm:$0xff]   ;;  %v14415_v36 = vld [vmem:[#allocation5 + $0x184] ss:$12 sps:$4 sm:$0xff]  }
0x33da   : > { %12809 = vmatpush3.bf16.msra.mxu0 %v14399_v37  ;;  %12831 = vmatpush3.bf16.msra.mxu1 %v14400_v38  ;;  %v14416_v37 = vld [vmem:[#allocation5 + $0x188] ss:$12 sps:$4 sm:$0xff]  }
0x33db   : > { %12810 = vmatprep.subr.bf16.mxu0 %v14401_v39  ;;  %12832 = vmatprep.subr.bf16.mxu1 %v14402_v59  ;;  %v14419_v38 = vld [vmem:[#allocation5 + $0x19c] ss:$12 sps:$4 sm:$0xff]   ;;  %v14420_v39 = vld [vmem:[#allocation5 + $0x1a0] ss:$12 sps:$4 sm:$0xff]   ;;  %v14417_v59 = vld [vmem:[#allocation5 + $0x198] ss:$12 sps:$4 sm:$0xff]  }
0x33de   : > { %12811 = vmatpush3.bf16.msra.mxu0 %v14403_v42  ;;  %12833 = vmatpush3.bf16.msra.mxu1 %v14404_v44  ;;  %v14423_v42 = vld [vmem:[#allocation5 + $0x1b4] ss:$12 sps:$4 sm:$0xff]   ;;  %v14421_v44 = vld [vmem:[#allocation5 + $0x1b0] ss:$12 sps:$4 sm:$0xff]  }
0x33df   : > { %12812 = vmatprep.subr.bf16.mxu0 %v14405_v47  ;;  %12834 = vmatprep.subr.bf16.mxu1 %v14406_v48 }
0x33e2   : > { %12813 = vmatpush3.bf16.msra.mxu0 %v14407_v49  ;;  %12835 = vmatpush3.bf16.msra.mxu1 %v14408_v50  ;;  %v14424_v50 = vld [vmem:[#allocation5 + $0x1b8] ss:$12 sps:$4 sm:$0xff]  }
0x33e3   : > { %12814 = vmatprep.subr.bf16.mxu0 %v14409_v51  ;;  %12836 = vmatprep.subr.bf16.mxu1 %v14410_v8  ;;  %v14427_v51 = vld [vmem:[#allocation5 + $0x1cc] ss:$12 sps:$4 sm:$0xff]   ;;  %v14425_v8 = vld [vmem:[#allocation5 + $0x1c8] ss:$12 sps:$4 sm:$0xff]  }
0x33e6   : > { %12815 = vmatpush3.bf16.msra.mxu0 %v14411_v53  ;;  %12837 = vmatpush3.bf16.msra.mxu1 %v14412_v43  ;;  %v14428_v53 = vld [vmem:[#allocation5 + $0x1d0] ss:$12 sps:$4 sm:$0xff]  }
0x33e7   : > { %13489 = vmatprep.subr.bf16.mxu1 %v15376_v1  ;;  %6429 = vmatprep.subr.bf16.mxu0 %v14415_v36  ;;  %v14431_v43 = vld [vmem:[#allocation5 + $0x1e4] ss:$12 sps:$4 sm:$0xff]  }
0x349c   : > { %v5818_v58 = vpop.f32.mrb[112].mxu0  ;;  %v5859_v61 = vpop.f32.mrb[128].mxu1 }
0x349d   : > { %v5819_v63 = vadd.f32 %v5818_v58, %v5607_v55  ;;  %v5860_v3 = vadd.f32 %v5859_v61, %v5615_v54  ;;  %v5820_v5 = vpop.f32.mrb[113].mxu0  ;;  %v5861_v6 = vpop.f32.mrb[129].mxu1  ;;  %v14432_v55 = vld [vmem:[#allocation5 + $0x1e8] ss:$12 sps:$4 sm:$0xff]   ;;  %v14437_v61 = vld [vmem:[#allocation5 + $0x210] ss:$12 sps:$4 sm:$0xff]  }
0x349e   : > { %v5821_v7 = vadd.f32 %v5820_v5, %v5611_v56  ;;  %v5862_v4 = vadd.f32 %v5861_v6, %v5619_v52  ;;  %v5822_v62 = vpop.f32.mrb[114].mxu0  ;;  %v5863_v10 = vpop.f32.mrb[130].mxu1  ;;  %v14435_v54 = vld [vmem:[#allocation5 + $0x1fc] ss:$12 sps:$4 sm:$0xff]   ;;  %v14433_v56 = vld [vmem:[#allocation5 + $0x1f8] ss:$12 sps:$4 sm:$0xff]  }
0x349f   : > { %v5866_v11 = vmax.f32 %v5819_v63, 0.0  ;;  %v5868_v13 = vmax.f32 %v5860_v3, 0.0  ;;  %v5823_v14 = vpop.f32.mrb[115].mxu0  ;;  %v5864_v40 = vpop.f32.mrb[131].mxu1  ;;  %v14436_v52 = vld [vmem:[#allocation5 + $0x200] ss:$12 sps:$4 sm:$0xff]  }
0x34a0   : > { %v5867_v15 = vmax.f32 %v5821_v7, 0.0  ;;  %v5869_v9 = vmax.f32 %v5862_v4, 0.0  ;;  %v14439_v58 = vld [vmem:[#allocation5 + $0x214] ss:$12 sps:$4 sm:$0xff]   ;;  %v14440_v63 = vld [vmem:[#allocation5 + $0x218] ss:$12 sps:$4 sm:$0xff]  }
0x34a1   : > { %v5870_v31 = vpack.c.bf16 %v5866_v11, %v5866_v11  ;;  %v5872_v19 = vpack.c.bf16 %v5868_v13, %v5868_v13  ;;  %v14443_v3 = vld [vmem:[#allocation5 + $0x22c] ss:$12 sps:$4 sm:$0xff]   ;;  %v14441_v5 = vld [vmem:[#allocation5 + $0x228] ss:$12 sps:$4 sm:$0xff]   ;;  %v14444_v6 = vld [vmem:[#allocation5 + $0x230] ss:$12 sps:$4 sm:$0xff]  }
0x34a2   : > { %v5871_v17 = vpack.c.bf16 %v5867_v15, %v5867_v15  ;;  %v5873_v22 = vpack.c.bf16 %v5869_v9, %v5869_v9  ;;  %v12251_v11 = vld [vmem:[%s17267_s25 + $0x1] ss:$0 sm:$0xff] }
0x34a3   : > { %v12252_v14 = vld [vmem:[%s17268_s6 + $0x1] ss:$0 sm:$0xff] }
0x34a4   : > { %6171 = vmatprep.mubr.bf16.mxu0 %v5871_v17  ;;  %6211 = vmatprep.mubr.bf16.mxu1 %v5873_v22  ;;  %v12253_v17 = vld [vmem:[%s17260_s14 + $0x6] sm:$0x7] }
0x34a5   : > { %6172 = vmatmul.mubr.bf16.vlgmr.msra.gmra.mrb[116].mxu0 %v5870_v31  ;;  %6212 = vmatmul.mubr.bf16.vlgmr.msra.gmra.mrb[132].mxu1 %v5872_v19  ;;  %v6289_v22 = vrot.slane %v12253_v17, %v15977_v34  ;;  %v6297_v31 = vrot.slane %v12253_v17, %v15997_v46  ;;  %v6293_v19 = vrot.slane %v12253_v17, %v15974_v33 }
0x34a6   : > { %6461 = vmatprep.mubr.bf16.mxu0 %v15375_v0  ;;  %13505 = vmatprep.mubr.msk.bf16.mxu1 %vm15377_vm0, %v15376_v1 }
0x34a7   : > { %13490 = vmatpush3.bf16.msra.mxu1 %v14416_v37  ;;  %6430 = vmatpush1.bf16.msra.mxu0 %v14413_v35 }
0x34a8   : > { %13491 = vmatprep.subr.bf16.mxu1 %v15376_v1  ;;  %6431 = vmatprep.subr.bf16.mxu0 %v14419_v38 }
0x34ab   : > { %13492 = vmatpush3.bf16.msra.mxu1 %v14420_v39  ;;  %6432 = vmatpush1.bf16.msra.mxu0 %v14417_v59 }
0x34ac   : > { %13493 = vmatprep.subr.bf16.mxu1 %v15376_v1  ;;  %6433 = vmatprep.subr.bf16.mxu0 %v14423_v42 }
0x34af   : > { %6434 = vmatpush1.bf16.msra.mxu0 %v14421_v44  ;;  %13494 = vmatpush3.bf16.msra.mxu1 %v14424_v50 }
0x34b0   : > { %13495 = vmatprep.subr.bf16.mxu1 %v15376_v1  ;;  %6435 = vmatprep.subr.bf16.mxu0 %v14427_v51 }
0x34b3   : > { %6436 = vmatpush1.bf16.msra.mxu0 %v14425_v8  ;;  %13496 = vmatpush3.bf16.msra.mxu1 %v14428_v53 }
0x34b4   : > { %13497 = vmatprep.subr.bf16.mxu1 %v15376_v1  ;;  %6437 = vmatprep.subr.bf16.mxu0 %v14431_v43 }
0x34b7   : > { %6438 = vmatpush1.bf16.msra.mxu0 %v14429_v41  ;;  %13498 = vmatpush3.bf16.msra.mxu1 %v14432_v55 }
0x34b8   : > { %13499 = vmatprep.subr.bf16.mxu1 %v15376_v1  ;;  %6439 = vmatprep.subr.bf16.mxu0 %v14435_v54 }
0x34bb   : > { %6440 = vmatpush1.bf16.msra.mxu0 %v14433_v56  ;;  %13500 = vmatpush3.bf16.msra.mxu1 %v14436_v52 }
0x34bc   : > { %13501 = vmatprep.subr.bf16.mxu1 %v15376_v1  ;;  %6441 = vmatprep.subr.bf16.mxu0 %v14439_v58 }
0x34bf   : > { %6442 = vmatpush1.bf16.msra.mxu0 %v14437_v61  ;;  %13502 = vmatpush3.bf16.msra.mxu1 %v14440_v63 }
0x34c0   : > { %6443 = vmatprep.subr.bf16.mxu0 %v14443_v3  ;;  %13503 = vmatprep.subr.bf16.mxu1 %v15376_v1 }
0x34c3   : > { %6444 = vmatpush1.bf16.msra.mxu0 %v14441_v5  ;;  %13504 = vmatpush3.bf16.msra.mxu1 %v14444_v6 }
0x34c4   : > { %13515 = vmatprep.subr.bf16.mxu1 %v15376_v1  ;;  %13509 = vmatprep.subr.bf16.mxu0 %v15376_v1 }
0x3578   : > { %v12816_v16 = vpop.f32.mrb[116].mxu0  ;;  %v12838_v20 = vpop.f32.mrb[132].mxu1 }
0x3579   : > { %v12817_v23 = vpop.f32.mrb[117].mxu0  ;;  %v12839_v26 = vpop.f32.mrb[133].mxu1 }
0x357a   : > { %v12818_v25 = vadd.f32 %v12817_v23, %v12816_v16  ;;  %v12840_v28 = vadd.f32 %v12839_v26, %v12838_v20  ;;  %v12819_v45 = vpop.f32.mrb[118].mxu0  ;;  %v12841_v24 = vpop.f32.mrb[134].mxu1 }
0x357b   : > { %v12820_v29 = vpop.f32.mrb[119].mxu0  ;;  %v12842_v30 = vpop.f32.mrb[135].mxu1 }
0x357c   : > { %v6174_v32 = vadd.f32 %v12818_v25, %v12216_v21 }
0x357e   : > { %v6214_v60 = vadd.f32 %v12840_v28, %v6174_v32 }
0x3580   : > { %v6219_v12 = vadd.f32 %v6214_v60, %v16499_v18 }
0x3582   : > { %6224 = vadd.xlane.f32.xlu1 %v6219_v12 }
0x360f   : > { %v6225_v18 = vpop.xlane.xlu1 %6224 }
0x3610   : > { %v6226_v47 = vmul.f32 0.0078125, %v6225_v18 }
0x3612   : > { %v6227_v48 = vsub.f32 %v6219_v12, %v6226_v47 }
0x3614   : > { %v6228_v49 = vmul.f32 %v6227_v48, %v6227_v48 }
0x3616   : > { %6229 = vadd.xlane.f32.xlu1 %v6228_v49 }
0x36a3   : > { %v6230_v7 = vpop.xlane.xlu1 %6229 }
0x36a4   : > { %v6231_v4 = vmul.f32 0.0078125, %v6230_v7 }
0x36a6   : > { %v6232_v62 = vadd.f32 1e-05, %v6231_v4 }
0x36a8   : > { %14815 = vrsqrt.f32 %v6232_v62 }
0x36b2   : > { %v14816_v10 = vpop.eup %14815 }
0x36b3   : > { %v6234_v13 = vmul.f32 %v14816_v10, %v6227_v48 }
0x36b5   : > { %v6241_v40 = vmul.f32 %v12251_v11, %v6234_v13  ;;  %v14447_v13 = vld [vmem:[#allocation7 + $0x90] sm:$0xff]  }
0x36b7   : > { %v16530_v15 = vadd.f32 %v12252_v14, %v6241_v40  ;;  %v14448_v14 = vld [vmem:[#allocation7 + $0x98] sm:$0xff]  }
0x36b9   : > { %v6249_v9 = vpack.c.bf16 %v16530_v15, %v16530_v15 }
0x36bb   : > { %6462 = vmatmul.mubr.bf16.vlgmr.msra.gmra.mrb[120].mxu0 %v6249_v9  ;;  %13506 = vmatmul.mubr.bf16.vlgmr.msra.gmra.mrb[136].mxu1 %v6249_v9 }
0x36bc   : > { %13511 = vmatprep.mubr.msk.bf16.mxu0 %vm15377_vm0, %v15376_v1  ;;  %13517 = vmatprep.mubr.msk.bf16.mxu1 %vm15377_vm0, %v15376_v1 }
0x378e   : > { %v6463_v16 = vpop.f32.mrb[120].mxu0  ;;  %v6504_v20 = vpop.f32.mrb[136].mxu1 }
0x378f   : > { %v6464_v21 = vadd.f32 %v6463_v16, %v6289_v22  ;;  %v6505_v23 = vadd.f32 %v6504_v20, %v6297_v31  ;;  %v6465_v26 = vpop.f32.mrb[121].mxu0  ;;  %v13507_v25 = vpop.f32.mrb[137].mxu1  ;;  %v14446_v20 = vld [vmem:[#allocation7 + $0x88] sm:$0xff]  }
0x3790   : > { %v6466_v28 = vadd.f32 %v6465_v26, %v6293_v19  ;;  %v6467_v45 = vpop.f32.mrb[122].mxu0  ;;  %v6507_v24 = vpop.f32.mrb[138].mxu1  ;;  %v14445_v19 = vld [vmem:[#allocation7 + $0x80] sm:$0xff]  }
0x3791   : > { %v16544_v29 = vpack.c.bf16 %v6464_v21, %v6464_v21  ;;  %v16546_v30 = vpack.c.bf16 %v6505_v23, %v6505_v23  ;;  %v6468_v32 = vpop.f32.mrb[123].mxu0  ;;  %v13508_v60 = vpop.f32.mrb[139].mxu1 }
0x3792   : > { %v16548_v12 = vpack.c.bf16 %v6466_v28, %v6466_v28 }
0x3793   : > { %6638 = vrot.lane.b32.xlu1 %v16544_v29, %s17269_s21  ;;  %v6594_v35 = vsel %vm1280_vm2, %v16546_v30, 0 }
0x3794   : > { %13516 = vmatpush3.bf16.msra.mxu1 %v6594_v35  ;;  %6641 = vrot.lane.b32.xlu0 %v16548_v12, %s17269_s21  ;;  %v6534_v36 = vsel %vm1215_vm1, %v16548_v12, 0 }
0x3795   : > { %13510 = vmatpush3.bf16.xpose.msra.mxu0 %v6534_v36  ;;  %13527 = vmatprep.subr.bf16.mxu1 %v15376_v1 }
0x3796   : > { %13521 = vmatprep.subr.bf16.mxu0 %v15376_v1 }
0x379c   : > { %13512 = vmatmul.mubr.msk.bf16.vlgmr.msra.gmra.mrb[124].mxu0 %vm1215_vm1, %v16544_v29 }
0x379d   : > { %13523 = vmatprep.mubr.msk.bf16.mxu0 %vm15377_vm0, %v15376_v1 }
0x3805   : > { %v6639_v39 = vpop.permute.xlu1 %6638 }
0x3806   : > { %v6642_v37 = vpop.permute.xlu0 %6641 }
0x3807   : > { %v6647_v38 = vsel %vm1215_vm1, %v6642_v37, 0 }
0x3808   : > { %13522 = vmatpush3.bf16.xpose.msra.mxu0 %v6647_v38 }
0x3809   : > { %13533 = vmatprep.subr.bf16.mxu0 %v15376_v1 }
0x380f   : > { %13524 = vmatmul.mubr.msk.bf16.vlgmr.msra.gmra.mrb[128].mxu0 %vm1215_vm1, %v6639_v39 }
0x3810   : > { %13537 = vmatprep.mubr.msk.bf16.mxu0 %vm15377_vm0, %v15376_v1  ;;  %13534 = vmatpush3.bf16.msra.mxu0 %v14447_v13  ;;  %v14450_v13 = vld [vmem:[#allocation7 + $0xa8] sm:$0xff]  }
0x3811   : > { %13535 = vmatprep.subr.bf16.mxu0 %v15376_v1 }
0x3814   : > { %13536 = vmatpush3.bf16.msra.mxu0 %v14448_v14 }
0x3815   : > { %13549 = vmatprep.subr.bf16.mxu0 %v15376_v1 }
0x386f   : > { %v6570_v59 = vpop.f32.mrb[124].mxu0 }
0x3870   : > { %v6576_v42 = vmul.f32 0.17677669, %v6570_v59  ;;  %v13513_v44 = vpop.f32.mrb[125].mxu0 }
0x3871   : > { %v6573_v18 = vpop.f32.mrb[126].mxu0 }
0x3872   : > { %v13514_v47 = vpop.f32.mrb[127].mxu0  ;;  %v6577_v48 = vadd.f32 %v6576_v42, %v16007_v57 }
0x3874   : > { %v6578_v49 = vsel %vm1264_vm4, %v6577_v48, -inf }
0x3875   : > { %6579 = vmax.xlane.f32.xlu0 %v6578_v49 }
0x38e2   : > { %v6683_v50 = vpop.f32.mrb[128].mxu0 }
0x38e3   : > { %v6689_v51 = vmul.f32 0.17677669, %v6683_v50  ;;  %v13525_v8 = vpop.f32.mrb[129].mxu0 }
0x38e4   : > { %v6686_v53 = vpop.f32.mrb[130].mxu0 }
0x38e5   : > { %v13526_v43 = vpop.f32.mrb[131].mxu0  ;;  %v6690_v41 = vadd.f32 %v6689_v51, %v16007_v57 }
0x38e7   : > { %v6691_v55 = vsel %vm1264_vm4, %v6690_v41, -inf }
0x38e8   : > { %6692 = vmax.xlane.f32.xlu1 %v6691_v55 }
0x38f9   : > { %6865 = vrot.lane.b32.xlu1 %v16548_v12, %s17270_s30 }
0x3902   : > { %v6580_v54 = vpop.xlane.xlu0 %6579 }
0x3903   : > { %v6581_v56 = vsub.f32 %v6577_v48, %v6580_v54 }
0x3905   : > { %v6582_v52 = vmul.f32 1.442695, %v6581_v56 }
0x3907   : > { %14817 = vpow2.f32 %v6582_v52 }
0x3911   : > { %v14818_v58 = vpop.eup %14817 }
0x3912   : > { %v6584_v61 = vsel %vm1264_vm4, %v14818_v58, 0.0 }
0x3913   : > { %6585 = vadd.xlane.f32.xlu0 %v6584_v61 }
0x3975   : > { %v6693_v63 = vpop.xlane.xlu1 %6692 }
0x3976   : > { %v6694_v3 = vsub.f32 %v6690_v41, %v6693_v63 }
0x3978   : > { %v6695_v5 = vmul.f32 1.442695, %v6694_v3 }
0x3979   : > { %v6866_v45 = vpop.permute.xlu1 %6865 }
0x397a   : > { %14819 = vpow2.f32 %v6695_v5  ;;  %v6871_v36 = vsel %vm1215_vm1, %v6866_v45, 0 }
0x3984   : > { %v14820_v6 = vpop.eup %14819 }
0x3985   : > { %v6697_v7 = vsel %vm1264_vm4, %v14820_v6, 0.0 }
0x3986   : > { %6698 = vadd.xlane.f32.xlu0 %v6697_v7 }
0x399c   : > { %6704 = vrot.lane.b32.xlu0 %v16546_v30, %s17269_s21 }
0x39a0   : > { %v6586_v4 = vpop.xlane.xlu0 %6585  ;;  %6863 = vrot.lane.b32.xlu0 %v16544_v29, %s17270_s30 }
0x39a1   : > { %14821 = vrcp.f32 %v6586_v4 }
0x39ab   : > { %v14822_v62 = vpop.eup %14821 }
0x39ac   : > { %v6588_v10 = vmul.f32 %v14822_v62, %v14818_v58 }
0x39ae   : > { %v6589_v11 = vpack.c.bf16 %v6588_v10, %v6588_v10 }
0x39b0   : > { %13518 = vmatmul.mubr.msk.bf16.vlgmr.msra.gmra.mrb[140].mxu1 %vm1264_vm4, %v6589_v11 }
0x39b1   : > { %13529 = vmatprep.mubr.msk.bf16.mxu1 %vm15377_vm0, %v15376_v1 }
0x3a13   : > { %v6699_v40 = vpop.xlane.xlu0 %6698 }
0x3a14   : > { %14823 = vrcp.f32 %v6699_v40 }
0x3a17   : > { %v6705_v9 = vpop.permute.xlu0 %6704 }
0x3a18   : > { %v6710_v17 = vsel %vm1280_vm2, %v6705_v9, 0 }
0x3a19   : > { %13528 = vmatpush3.bf16.msra.mxu1 %v6710_v17 }
0x3a1a   : > { %13541 = vmatprep.subr.bf16.mxu1 %v15376_v1 }
0x3a1b   : > { %v6864_v38 = vpop.permute.xlu0 %6863 }
0x3a1e   : > { %v14824_v22 = vpop.eup %14823 }
0x3a1f   : > { %v6701_v31 = vmul.f32 %v14824_v22, %v14820_v6  ;;  %v14449_v6 = vld [vmem:[#allocation7 + $0xa0] sm:$0xff]  }
0x3a21   : > { %v6702_v16 = vpack.c.bf16 %v6701_v31, %v6701_v31 }
0x3a23   : > { %13530 = vmatmul.mubr.msk.bf16.vlgmr.msra.gmra.mrb[144].mxu1 %vm1264_vm4, %v6702_v16 }
0x3a24   : > { %13542 = vmatpush3.bf16.msra.mxu1 %v14445_v19  ;;  %13545 = vmatprep.mubr.msk.bf16.mxu1 %vm15377_vm0, %v15376_v1 }
0x3a25   : > { %13543 = vmatprep.subr.bf16.mxu1 %v15376_v1 }
0x3a28   : > { %13544 = vmatpush3.bf16.msra.mxu1 %v14446_v20 }
0x3a29   : > { %13555 = vmatprep.subr.bf16.mxu1 %v15376_v1 }
0x3a83   : > { %v6630_v21 = vpop.f32.mrb[140].mxu1 }
0x3a84   : > { %v6636_v23 = vpack.c.bf16 %v6630_v21, %v6630_v21  ;;  %v13519_v26 = vpop.f32.mrb[141].mxu1 }
0x3a85   : > { %v6633_v25 = vpop.f32.mrb[142].mxu1 }
0x3a86   : > { %v13520_v28 = vpop.f32.mrb[143].mxu1  ;;  %13546 = vmatmul.mubr.msk.bf16.vlgmr.msra.gmra.mrb[148].mxu1 %vm1215_vm1, %v6636_v23 }
0x3a87   : > { %13557 = vmatprep.mubr.msk.bf16.mxu1 %vm15377_vm0, %v15376_v1 }
0x3af6   : > { %v6746_v24 = vpop.f32.mrb[144].mxu1 }
0x3af7   : > { %v6752_v32 = vpack.c.bf16 %v6746_v24, %v6746_v24  ;;  %v13531_v60 = vpop.f32.mrb[145].mxu1 }
0x3af8   : > { %v6749_v35 = vpop.f32.mrb[146].mxu1  ;;  %v14451_v60 = vld [vmem:[#allocation7 + $0xb0] sm:$0xff]  }
0x3af9   : > { %v13532_v37 = vpop.f32.mrb[147].mxu1  ;;  %13538 = vmatmul.mubr.msk.bf16.vlgmr.msra.gmra.mrb[132].mxu0 %vm1215_vm1, %v6752_v32 }
0x3afa   : > { %13550 = vmatpush3.bf16.xpose.msra.mxu0 %v6871_v36  ;;  %13551 = vmatprep.mubr.msk.bf16.mxu0 %vm15377_vm0, %v15376_v1 }
0x3afb   : > { %13561 = vmatprep.subr.bf16.mxu0 %v15376_v1 }
0x3b01   : > { %13552 = vmatmul.mubr.msk.bf16.vlgmr.msra.gmra.mrb[136].mxu0 %vm1215_vm1, %v6864_v38 }
0x3b02   : > { %13565 = vmatprep.mubr.msk.bf16.mxu0 %vm15377_vm0, %v15376_v1  ;;  %13562 = vmatpush3.bf16.msra.mxu0 %v14449_v6  ;;  %v14462_v6 = vld [vmem:[#allocation8 + $0x80] sm:$0xff]  }
0x3b03   : > { %13563 = vmatprep.subr.bf16.mxu0 %v15376_v1 }
0x3b06   : > { %13564 = vmatpush3.bf16.msra.mxu0 %v14450_v13 }
0x3b07   : > { %13575 = vmatprep.subr.bf16.mxu0 %v15376_v1 }
0x3b59   : > { %v6857_v39 = vpop.f32.mrb[148].mxu1 }
0x3b5a   : > { %v13547_v59 = vpop.f32.mrb[149].mxu1 }
0x3b5b   : > { %v6860_v42 = vpop.f32.mrb[150].mxu1 }
0x3b5c   : > { %v13548_v44 = vpop.f32.mrb[151].mxu1 }
0x3bcc   : > { %v6802_v18 = vpop.f32.mrb[132].mxu0 }
0x3bcd   : > { %v16604_v47 = vadd.f32 %v6857_v39, %v6802_v18  ;;  %v13539_v48 = vpop.f32.mrb[133].mxu0 }
0x3bce   : > { %v6805_v49 = vpop.f32.mrb[134].mxu0 }
0x3bcf   : > { %v13540_v50 = vpop.f32.mrb[135].mxu0 }
0x3bd4   : > { %v6907_v51 = vpop.f32.mrb[136].mxu0 }
0x3bd5   : > { %v6913_v8 = vmul.f32 0.17677669, %v6907_v51  ;;  %v13553_v53 = vpop.f32.mrb[137].mxu0 }
0x3bd6   : > { %v6910_v43 = vpop.f32.mrb[138].mxu0 }
0x3bd7   : > { %v13554_v41 = vpop.f32.mrb[139].mxu0  ;;  %v6914_v55 = vadd.f32 %v6913_v8, %v16007_v57 }
0x3bd8   : > { %v12299_v41 = vld [vmem:[%s17261_s2 + $0x2] ss:$0 sm:$0xff] }
0x3bd9   : > { %v6915_v54 = vsel %vm1264_vm4, %v6914_v55, -inf }
0x3bda   : > { %6916 = vmax.xlane.f32.xlu0 %v6915_v54 }
0x3bf0   : > { %6927 = vrot.lane.b32.xlu0 %v16546_v30, %s17270_s30 }
0x3bf4   : > { %7032 = vrot.lane.b32.xlu0 %v16544_v29, %s17271_s8 }
0x3c67   : > { %v6917_v56 = vpop.xlane.xlu0 %6916 }
0x3c68   : > { %v6918_v52 = vsub.f32 %v6914_v55, %v6917_v56 }
0x3c6a   : > { %v6919_v58 = vmul.f32 1.442695, %v6918_v52 }
0x3c6b   : > { %v6928_v61 = vpop.permute.xlu0 %6927 }
0x3c6c   : > { %14825 = vpow2.f32 %v6919_v58  ;;  %v6933_v63 = vsel %vm1280_vm2, %v6928_v61, 0 }
0x3c6d   : > { %13556 = vmatpush3.bf16.msra.mxu1 %v6933_v63  ;;  %v14453_v63 = vld [vmem:[#allocation11 + $0x100] ss:$8 sps:$4 sm:$0xff]  }
0x3c6e   : > { %13569 = vmatprep.subr.bf16.mxu1 %v15376_v1 }
0x3c76   : > { %v14826_v3 = vpop.eup %14825 }
0x3c77   : > { %v6921_v5 = vsel %vm1264_vm4, %v14826_v3, 0.0 }
0x3c78   : > { %6922 = vadd.xlane.f32.xlu1 %v6921_v5  ;;  %v14458_v5 = vld [vmem:[#allocation11 + $0x114] ss:$8 sps:$4 sm:$0xff]  }
0x3c89   : > { %7034 = vrot.lane.b32.xlu1 %v16548_v12, %s17271_s8  ;;  %v7033_v12 = vpop.permute.xlu0 %7032 }
0x3d05   : > { %v6923_v29 = vpop.xlane.xlu1 %6922 }
0x3d06   : > { %14827 = vrcp.f32 %v6923_v29  ;;  %v14456_v29 = vld [vmem:[#allocation11 + $0x110] ss:$8 sps:$4 sm:$0xff]  }
0x3d09   : > { %v7035_v62 = vpop.permute.xlu1 %7034 }
0x3d0a   : > { %v7040_v11 = vsel %vm1215_vm1, %v7035_v62, 0  ;;  %v14459_v62 = vld [vmem:[#allocation11 + $0x120] ss:$8 sps:$4 sm:$0xff]  }
0x3d10   : > { %v14828_v7 = vpop.eup %14827 }
0x3d11   : > { %v6925_v4 = vmul.f32 %v14828_v7, %v14826_v3  ;;  %v14455_v3 = vld [vmem:[#allocation11 + $0x104] ss:$8 sps:$4 sm:$0xff]  }
0x3d12   : > { %v14461_v7 = vld [vmem:[#allocation11 + $0x124] ss:$8 sps:$4 sm:$0xff]  }
0x3d13   : > { %v6926_v10 = vpack.c.bf16 %v6925_v4, %v6925_v4  ;;  %v14466_v4 = vld [vmem:[#allocation8 + $0x88] sm:$0xff]  }
0x3d15   : > { %13558 = vmatmul.mubr.msk.bf16.vlgmr.msra.gmra.mrb[152].mxu1 %vm1264_vm4, %v6926_v10  ;;  %v14465_v10 = vld [vmem:[#allocation11 + $0x134] ss:$8 sps:$4 sm:$0xff]  }
0x3d16   : > { %13570 = vmatpush3.bf16.xpose.msra.mxu1 %v7040_v11  ;;  %13571 = vmatprep.mubr.msk.bf16.mxu1 %vm15377_vm0, %v15376_v1  ;;  %v14469_v11 = vld [vmem:[#allocation11 + $0x144] ss:$8 sps:$4 sm:$0xff]  }
0x3d17   : > { %13581 = vmatprep.subr.bf16.mxu1 %v15376_v1 }
0x3d1d   : > { %13572 = vmatmul.mubr.msk.bf16.vlgmr.msra.gmra.mrb[156].mxu1 %vm1215_vm1, %v7033_v12  ;;  %v14467_v12 = vld [vmem:[#allocation11 + $0x140] ss:$8 sps:$4 sm:$0xff]  }
0x3d1e   : > { %13585 = vmatprep.mubr.msk.bf16.mxu1 %vm15377_vm0, %v15376_v1  ;;  %13582 = vmatpush3.bf16.msra.mxu1 %v14451_v60 }
0x3d1f   : > { %13583 = vmatprep.subr.bf16.mxu1 %v15376_v1 }
0x3de8   : > { %v6969_v14 = vpop.f32.mrb[152].mxu1 }
0x3de9   : > { %v6975_v40 = vpack.c.bf16 %v6969_v14, %v6969_v14  ;;  %v13559_v9 = vpop.f32.mrb[153].mxu1 }
0x3dea   : > { %v6972_v17 = vpop.f32.mrb[154].mxu1 }
0x3deb   : > { %v13560_v22 = vpop.f32.mrb[155].mxu1  ;;  %13566 = vmatmul.mubr.msk.bf16.vlgmr.msra.gmra.mrb[140].mxu0 %vm1215_vm1, %v6975_v40  ;;  %v14470_v17 = vld [vmem:[#allocation8 + $0x90] sm:$0xff]  }
0x3dec   : > { %13577 = vmatprep.mubr.msk.bf16.mxu0 %vm15377_vm0, %v15376_v1  ;;  %v14473_v22 = vld [vmem:[#allocation11 + $0x154] ss:$8 sps:$4 sm:$0xff]  }
0x3df0   : > { %v7076_v31 = vpop.f32.mrb[156].mxu1 }
0x3df1   : > { %v7082_v19 = vmul.f32 0.17677669, %v7076_v31  ;;  %v13573_v16 = vpop.f32.mrb[157].mxu1  ;;  %v14471_v31 = vld [vmem:[#allocation11 + $0x150] ss:$8 sps:$4 sm:$0xff]  }
0x3df2   : > { %v7079_v20 = vpop.f32.mrb[158].mxu1  ;;  %v14477_v16 = vld [vmem:[#allocation11 + $0x164] ss:$8 sps:$4 sm:$0xff]  }
0x3df3   : > { %v7083_v21 = vadd.f32 %v7082_v19, %v16007_v57  ;;  %v13574_v23 = vpop.f32.mrb[159].mxu1  ;;  %v14474_v19 = vld [vmem:[#allocation8 + $0x98] sm:$0xff]   ;;  %v14475_v20 = vld [vmem:[#allocation11 + $0x160] ss:$8 sps:$4 sm:$0xff]  }
0x3df4   : > { %v14481_v23 = vld [vmem:[#allocation11 + $0x174] ss:$8 sps:$4 sm:$0xff]  }
0x3df5   : > { %v7084_v26 = vsel %vm1264_vm4, %v7083_v21, -inf }
0x3df6   : > { %7085 = vmax.xlane.f32.xlu1 %v7084_v26  ;;  %v14479_v26 = vld [vmem:[#allocation11 + $0x170] ss:$8 sps:$4 sm:$0xff]  }
0x3e83   : > { %v7086_v25 = vpop.xlane.xlu1 %7085 }
0x3e84   : > { %v7087_v28 = vsub.f32 %v7083_v21, %v7086_v25  ;;  %v14478_v21 = vld [vmem:[#allocation8 + $0xa0] sm:$0xff]   ;;  %v14482_v25 = vld [vmem:[#allocation8 + $0xa8] sm:$0xff]  }
0x3e86   : > { %v7088_v45 = vmul.f32 1.442695, %v7087_v28  ;;  %v14483_v28 = vld [vmem:[#allocation8 + $0xb0] sm:$0xff]  }
0x3e88   : > { %14829 = vpow2.f32 %v7088_v45  ;;  %v14484_v45 = vld [vmem:[#allocation8 + $0xb8] sm:$0xff]  }
0x3e92   : > { %v14830_v24 = vpop.eup %14829 }
0x3e93   : > { %v7090_v32 = vsel %vm1264_vm4, %v14830_v24, 0.0 }
0x3e94   : > { %7091 = vadd.xlane.f32.xlu0 %v7090_v32 }
0x3eaa   : > { %7096 = vrot.lane.b32.xlu0 %v16546_v30, %s17271_s8 }
0x3ebe   : > { %v7025_v35 = vpop.f32.mrb[140].mxu0 }
0x3ebf   : > { %v7031_v36 = vadd.f32 %v7025_v35, %v16604_v47  ;;  %v13567_v37 = vpop.f32.mrb[141].mxu0  ;;  %v14452_v47 = vld [vmem:[#allocation7 + $0xb8] sm:$0xff]  }
0x3ec0   : > { %v7028_v38 = vpop.f32.mrb[142].mxu0  ;;  %13584 = vmatpush3.bf16.msra.mxu1 %v14452_v47 }
0x3ec1   : > { %v13568_v39 = vpop.f32.mrb[143].mxu0  ;;  %7464 = vmatprep.subr.bf16.mxu1 %v14455_v3  ;;  %v12303_v38 = vld [vmem:[%s17263_s23 + $0x2] ss:$0 sm:$0xff] }
0x3f21   : > { %v7092_v59 = vpop.xlane.xlu0 %7091 }
0x3f22   : > { %14831 = vrcp.f32 %v7092_v59 }
0x3f25   : > { %v7097_v42 = vpop.permute.xlu0 %7096 }
0x3f26   : > { %v7102_v44 = vsel %vm1280_vm2, %v7097_v42, 0 }
0x3f27   : > { %13576 = vmatpush3.bf16.msra.mxu0 %v7102_v44  ;;  %v7372_v44 = vld [vmem:[#allocation13 + $0x4] sm:$0x3] }
0x3f28   : > { %13589 = vmatprep.subr.bf16.mxu0 %v15376_v1 }
0x3f2c   : > { %v14832_v18 = vpop.eup %14831 }
0x3f2d   : > { %v7094_v30 = vmul.f32 %v14832_v18, %v14830_v24  ;;  %v7377_v18 = vrot.slane %v7372_v44, %v15977_v34 }
0x3f2f   : > { %v7095_v48 = vpack.c.bf16 %v7094_v30, %v7094_v30  ;;  %v7381_v30 = vrot.slane %v7372_v44, %v15974_v33 }
0x3f31   : > { %13578 = vmatmul.mubr.msk.bf16.vlgmr.msra.gmra.mrb[144].mxu0 %vm1264_vm4, %v7095_v48 }
0x3f32   : > { %13605 = vmatprep.mubr.msk.bf16.mxu0 %vm15377_vm0, %v15376_v1  ;;  %13590 = vmatpush3.bf16.msra.mxu0 %v14462_v6 }
0x3f33   : > { %13591 = vmatprep.subr.bf16.mxu0 %v15376_v1 }
0x3f36   : > { %13592 = vmatpush3.bf16.msra.mxu0 %v14466_v4 }
0x3f37   : > { %13593 = vmatprep.subr.bf16.mxu0 %v15376_v1 }
0x3f3a   : > { %13594 = vmatpush3.bf16.msra.mxu0 %v14470_v17 }
0x3f3b   : > { %13595 = vmatprep.subr.bf16.mxu0 %v15376_v1 }
0x3f3e   : > { %13596 = vmatpush3.bf16.msra.mxu0 %v14474_v19 }
0x3f3f   : > { %13597 = vmatprep.subr.bf16.mxu0 %v15376_v1 }
0x3f42   : > { %13598 = vmatpush3.bf16.msra.mxu0 %v14478_v21 }
0x3f43   : > { %13599 = vmatprep.subr.bf16.mxu0 %v15376_v1 }
0x3f46   : > { %13600 = vmatpush3.bf16.msra.mxu0 %v14482_v25 }
0x3f47   : > { %13601 = vmatprep.subr.bf16.mxu0 %v15376_v1 }
0x3f4a   : > { %13602 = vmatpush3.bf16.msra.mxu0 %v14483_v28 }
0x3f4b   : > { %13603 = vmatprep.subr.bf16.mxu0 %v15376_v1 }
0x3f4e   : > { %13604 = vmatpush3.bf16.msra.mxu0 %v14484_v45 }
0x3f4f   : > { %13609 = vmatprep.subr.bf16.mxu0 %v15376_v1 }
0x4004   : > { %v7138_v49 = vpop.f32.mrb[144].mxu0 }
0x4005   : > { %v7144_v50 = vpack.c.bf16 %v7138_v49, %v7138_v49  ;;  %v13579_v51 = vpop.f32.mrb[145].mxu0 }
0x4006   : > { %v7141_v8 = vpop.f32.mrb[146].mxu0 }
0x4007   : > { %v13580_v53 = vpop.f32.mrb[147].mxu0  ;;  %13586 = vmatmul.mubr.msk.bf16.vlgmr.msra.gmra.mrb[160].mxu1 %vm1215_vm1, %v7144_v50 }
0x4008   : > { %7496 = vmatprep.mubr.bf16.mxu1 %v15375_v0  ;;  %7465 = vmatpush1.bf16.msra.mxu1 %v14453_v63 }
0x4009   : > { %7466 = vmatprep.subr.bf16.mxu1 %v14458_v5 }
0x400c   : > { %7467 = vmatpush1.bf16.msra.mxu1 %v14456_v29 }
0x400d   : > { %7468 = vmatprep.subr.bf16.mxu1 %v14461_v7 }
0x4010   : > { %7469 = vmatpush1.bf16.msra.mxu1 %v14459_v62 }
0x4011   : > { %7470 = vmatprep.subr.bf16.mxu1 %v14465_v10 }
0x40da   : > { %v7194_v43 = vpop.f32.mrb[160].mxu1 }
0x40db   : > { %v7200_v55 = vadd.f32 %v7194_v43, %v7031_v36  ;;  %v13587_v54 = vpop.f32.mrb[161].mxu1  ;;  %v12302_v36 = vld [vmem:[%s17262_s20 + $0x2] ss:$0 sm:$0xff] }
0x40dc   : > { %v7197_v56 = vpop.f32.mrb[162].mxu1  ;;  %v12304_v54 = vld [vmem:[#allocation10 + $0x2] ss:$0 sm:$0xff] }
0x40dd   : > { %v7209_v52 = vadd.f32 %v12299_v41, %v7200_v55  ;;  %v13588_v58 = vpop.f32.mrb[163].mxu1 }
0x40df   : > { %v7210_v61 = vadd.f32 %v7209_v52, %v16530_v15  ;;  %v14463_v15 = vld [vmem:[#allocation11 + $0x130] ss:$8 sps:$4 sm:$0xff]  }
0x40e0   : > { %7471 = vmatpush1.bf16.msra.mxu1 %v14463_v15 }
0x40e1   : > { %7215 = vadd.xlane.f32.xlu1 %v7210_v61  ;;  %7472 = vmatprep.subr.bf16.mxu1 %v14469_v11 }
0x40e4   : > { %7473 = vmatpush1.bf16.msra.mxu1 %v14467_v12 }
0x40e5   : > { %7474 = vmatprep.subr.bf16.mxu1 %v14473_v22 }
0x40e8   : > { %7475 = vmatpush1.bf16.msra.mxu1 %v14471_v31 }
0x40e9   : > { %7476 = vmatprep.subr.bf16.mxu1 %v14477_v16 }
0x40ec   : > { %7477 = vmatpush1.bf16.msra.mxu1 %v14475_v20 }
0x40ed   : > { %7478 = vmatprep.subr.bf16.mxu1 %v14481_v23 }
0x40f0   : > { %7479 = vmatpush1.bf16.msra.mxu1 %v14479_v26 }
0x40f1   : > { %13615 = vmatprep.subr.bf16.mxu1 %v15376_v1 }
0x40f3   : > { %7497 = vmatmul.mubr.bf16.vlgmr.msra.gmra.mrb[164].mxu1 %v15953_v27 }
0x40f4   : > { %13617 = vmatprep.mubr.msk.bf16.mxu1 %vm15377_vm0, %v15376_v1 }
0x416e   : > { %v7216_v13 = vpop.xlane.xlu1 %7215 }
0x416f   : > { %v7217_v14 = vmul.f32 0.0078125, %v7216_v13 }
0x4171   : > { %v7218_v40 = vsub.f32 %v7210_v61, %v7217_v14 }
0x4173   : > { %v7219_v9 = vmul.f32 %v7218_v40, %v7218_v40 }
0x4175   : > { %7220 = vadd.xlane.f32.xlu1 %v7219_v9 }
0x41c6   : > { %v7498_v48 = vpop.f32.mrb[164].mxu1 }
0x41c7   : > { %v7499_v47 = vadd.f32 %v7498_v48, %v7377_v18  ;;  %v7500_v49 = vpop.f32.mrb[165].mxu1  ;;  %v14485_v18 = vld [vmem:[#allocation14 + $0x80] sm:$0xff]   ;;  %v14486_v48 = vld [vmem:[#allocation14 + $0x88] sm:$0xff]  }
0x41c8   : > { %v7501_v50 = vadd.f32 %v7500_v49, %v7381_v30  ;;  %v7502_v51 = vpop.f32.mrb[166].mxu1 }
0x41c9   : > { %v16674_v8 = vpack.c.bf16 %v7499_v47, %v7499_v47  ;;  %v7503_v53 = vpop.f32.mrb[167].mxu1 }
0x41ca   : > { %v16676_v43 = vpack.c.bf16 %v7501_v50, %v7501_v50 }
0x41cb   : > { %7635 = vrot.lane.b32.xlu1 %v16674_v8, %s17269_s21  ;;  %v7529_v41 = vsel %vm1215_vm1, %v16674_v8, 0 }
0x41cc   : > { %v7588_v55 = vsel %vm1280_vm2, %v16676_v43, 0 }
0x41cd   : > { %13616 = vmatpush3.bf16.msra.mxu1 %v7588_v55 }
0x41ce   : > { %13627 = vmatprep.subr.bf16.mxu1 %v15376_v1 }
0x4202   : > { %v7221_v24 = vpop.xlane.xlu1 %7220 }
0x4203   : > { %v7222_v32 = vmul.f32 0.0078125, %v7221_v24 }
0x4205   : > { %v7223_v60 = vadd.f32 1e-05, %v7222_v32 }
0x4207   : > { %14833 = vrsqrt.f32 %v7223_v60 }
0x4211   : > { %v14834_v35 = vpop.eup %14833 }
0x4212   : > { %v7225_v37 = vmul.f32 %v14834_v35, %v7218_v40 }
0x4214   : > { %v7232_v39 = vmul.f32 %v12302_v36, %v7225_v37  ;;  %v14487_v37 = vld [vmem:[#allocation14 + $0x90] sm:$0xff]  }
0x4216   : > { %v16666_v59 = vadd.f32 %v12303_v38, %v7232_v39  ;;  %v14488_v38 = vld [vmem:[#allocation14 + $0x98] sm:$0xff]  }
0x4218   : > { %v7240_v42 = vpack.c.bf16 %v16666_v59, %v16666_v59 }
0x421a   : > { %13606 = vmatmul.mubr.bf16.vlgmr.msra.gmra.mrb[148].mxu0 %v7240_v42 }
0x421b   : > { %13611 = vmatprep.mubr.msk.bf16.mxu0 %vm15377_vm0, %v15376_v1  ;;  %13610 = vmatpush3.bf16.xpose.msra.mxu0 %v7529_v41 }
0x421c   : > { %13621 = vmatprep.subr.bf16.mxu0 %v15376_v1 }
0x423d   : > { %v7636_v52 = vpop.permute.xlu1 %7635 }
0x423e   : > { %v7641_v6 = vsel %vm1215_vm1, %v7636_v52, 0 }
0x42ed   : > { %v7348_v56 = vpop.f32.mrb[148].mxu0 }
0x42ee   : > { %v7349_v58 = vadd.f32 %v12304_v54, %v7348_v56  ;;  %v13607_v61 = vpop.f32.mrb[149].mxu0 }
0x42ef   : > { %v7351_v63 = vpop.f32.mrb[150].mxu0 }
0x42f0   : > { %v16686_v3 = vpack.c.bf16 %v7349_v58, %v7349_v58  ;;  %v13608_v5 = vpop.f32.mrb[151].mxu0 }
0x42f2   : > { %7632 = vrot.lane.b32.xlu0 %v16686_v3, %s17269_s21  ;;  %13612 = vmatmul.mubr.msk.bf16.vlgmr.msra.gmra.mrb[152].mxu0 %vm1215_vm1, %v16686_v3 }
0x42f3   : > { %13622 = vmatpush3.bf16.xpose.msra.mxu0 %v7641_v6  ;;  %13623 = vmatprep.mubr.msk.bf16.mxu0 %vm15377_vm0, %v15376_v1 }
0x42f4   : > { %13633 = vmatprep.subr.bf16.mxu0 %v15376_v1 }
0x4364   : > { %v7633_v29 = vpop.permute.xlu0 %7632 }
0x4365   : > { %13624 = vmatmul.mubr.msk.bf16.vlgmr.msra.gmra.mrb[156].mxu0 %vm1215_vm1, %v7633_v29 }
0x4366   : > { %13637 = vmatprep.mubr.msk.bf16.mxu0 %vm15377_vm0, %v15376_v1  ;;  %13634 = vmatpush3.bf16.msra.mxu0 %v14487_v37 }
0x4367   : > { %13635 = vmatprep.subr.bf16.mxu0 %v15376_v1 }
0x436a   : > { %13636 = vmatpush3.bf16.msra.mxu0 %v14488_v38 }
0x436b   : > { %13649 = vmatprep.subr.bf16.mxu0 %v15376_v1 }
0x43c5   : > { %v7565_v7 = vpop.f32.mrb[152].mxu0 }
0x43c6   : > { %v7571_v4 = vmul.f32 0.17677669, %v7565_v7  ;;  %v13613_v62 = vpop.f32.mrb[153].mxu0 }
0x43c7   : > { %v7568_v10 = vpop.f32.mrb[154].mxu0 }
0x43c8   : > { %v13614_v15 = vpop.f32.mrb[155].mxu0  ;;  %v7572_v11 = vsel %vm1264_vm4, %v7571_v4, -inf }
0x43c9   : > { %7573 = vmax.xlane.f32.xlu0 %v7572_v11 }
0x4438   : > { %v7677_v12 = vpop.f32.mrb[156].mxu0 }
0x4439   : > { %v7683_v13 = vmul.f32 0.17677669, %v7677_v12  ;;  %v13625_v14 = vpop.f32.mrb[157].mxu0 }
0x443a   : > { %v7680_v40 = vpop.f32.mrb[158].mxu0 }
0x443b   : > { %v13626_v9 = vpop.f32.mrb[159].mxu0  ;;  %v7684_v17 = vsel %vm1264_vm4, %v7683_v13, -inf }
0x443c   : > { %7685 = vmax.xlane.f32.xlu1 %v7684_v17 }
0x444d   : > { %7697 = vrot.lane.b32.xlu1 %v16676_v43, %s17269_s21 }
0x4451   : > { %7856 = vrot.lane.b32.xlu1 %v16686_v3, %s17270_s30 }
0x4456   : > { %v7574_v22 = vpop.xlane.xlu0 %7573 }
0x4457   : > { %v7575_v31 = vsub.f32 %v7571_v4, %v7574_v22 }
0x4459   : > { %v7576_v19 = vmul.f32 1.442695, %v7575_v31 }
0x445b   : > { %14835 = vpow2.f32 %v7576_v19 }
0x4465   : > { %v14836_v16 = vpop.eup %14835 }
0x4466   : > { %v7578_v20 = vsel %vm1264_vm4, %v14836_v16, 0.0 }
0x4467   : > { %7579 = vadd.xlane.f32.xlu0 %v7578_v20 }
0x44c9   : > { %v7686_v21 = vpop.xlane.xlu1 %7685 }
0x44ca   : > { %v7687_v23 = vsub.f32 %v7683_v13, %v7686_v21  ;;  %v14489_v21 = vld [vmem:[#allocation14 + $0xa0] sm:$0xff]  }
0x44cc   : > { %v7688_v26 = vmul.f32 1.442695, %v7687_v23 }
0x44cd   : > { %v7698_v60 = vpop.permute.xlu1 %7697 }
0x44ce   : > { %14837 = vpow2.f32 %v7688_v26  ;;  %v7703_v36 = vsel %vm1280_vm2, %v7698_v60, 0  ;;  %v14490_v60 = vld [vmem:[#allocation14 + $0xa8] sm:$0xff]  }
0x44d1   : > { %v7857_v63 = vpop.permute.xlu1 %7856 }
0x44d8   : > { %v14838_v25 = vpop.eup %14837 }
0x44d9   : > { %v7690_v28 = vsel %vm1264_vm4, %v14838_v25, 0.0 }
0x44da   : > { %7691 = vadd.xlane.f32.xlu0 %v7690_v28 }
0x44f0   : > { %7858 = vrot.lane.b32.xlu0 %v16674_v8, %s17270_s30 }
0x44f4   : > { %v7580_v45 = vpop.xlane.xlu0 %7579 }
0x44f5   : > { %14839 = vrcp.f32 %v7580_v45 }
0x44ff   : > { %v14840_v24 = vpop.eup %14839 }
0x4500   : > { %v7582_v32 = vmul.f32 %v14840_v24, %v14836_v16 }
0x4502   : > { %v7583_v35 = vpack.c.bf16 %v7582_v32, %v7582_v32 }
0x4504   : > { %13618 = vmatmul.mubr.msk.bf16.vlgmr.msra.gmra.mrb[168].mxu1 %vm1264_vm4, %v7583_v35 }
0x4505   : > { %13628 = vmatpush3.bf16.msra.mxu1 %v7703_v36  ;;  %13629 = vmatprep.mubr.msk.bf16.mxu1 %vm15377_vm0, %v15376_v1 }
0x4506   : > { %13641 = vmatprep.subr.bf16.mxu1 %v15376_v1 }
0x4567   : > { %v7692_v39 = vpop.xlane.xlu0 %7691 }
0x4568   : > { %14841 = vrcp.f32 %v7692_v39 }
0x456b   : > { %v7859_v41 = vpop.permute.xlu0 %7858 }
0x456c   : > { %v7864_v58 = vsel %vm1215_vm1, %v7859_v41, 0 }
0x4572   : > { %v14842_v42 = vpop.eup %14841 }
0x4573   : > { %v7694_v44 = vmul.f32 %v14842_v42, %v14838_v25 }
0x4575   : > { %v7695_v30 = vpack.c.bf16 %v7694_v44, %v7694_v44 }
0x4577   : > { %13630 = vmatmul.mubr.msk.bf16.vlgmr.msra.gmra.mrb[172].mxu1 %vm1264_vm4, %v7695_v30 }
0x4578   : > { %13642 = vmatpush3.bf16.msra.mxu1 %v14485_v18  ;;  %13645 = vmatprep.mubr.msk.bf16.mxu1 %vm15377_vm0, %v15376_v1 }
0x4579   : > { %13643 = vmatprep.subr.bf16.mxu1 %v15376_v1 }
0x457c   : > { %13644 = vmatpush3.bf16.msra.mxu1 %v14486_v48 }
0x457d   : > { %13655 = vmatprep.subr.bf16.mxu1 %v15376_v1 }
0x45d7   : > { %v7624_v47 = vpop.f32.mrb[168].mxu1 }
0x45d8   : > { %v7630_v49 = vpack.c.bf16 %v7624_v47, %v7624_v47  ;;  %v13619_v50 = vpop.f32.mrb[169].mxu1 }
0x45d9   : > { %v7627_v51 = vpop.f32.mrb[170].mxu1 }
0x45da   : > { %v13620_v53 = vpop.f32.mrb[171].mxu1  ;;  %13646 = vmatmul.mubr.msk.bf16.vlgmr.msra.gmra.mrb[176].mxu1 %vm1215_vm1, %v7630_v49 }
0x45db   : > { %13657 = vmatprep.mubr.msk.bf16.mxu1 %vm15377_vm0, %v15376_v1 }
0x464a   : > { %v7739_v55 = vpop.f32.mrb[172].mxu1 }
0x464b   : > { %v7745_v54 = vpack.c.bf16 %v7739_v55, %v7739_v55  ;;  %v13631_v56 = vpop.f32.mrb[173].mxu1 }
0x464c   : > { %v7742_v52 = vpop.f32.mrb[174].mxu1  ;;  %v14491_v56 = vld [vmem:[#allocation14 + $0xb0] sm:$0xff]  }
0x464d   : > { %v13632_v61 = vpop.f32.mrb[175].mxu1  ;;  %13638 = vmatmul.mubr.msk.bf16.vlgmr.msra.gmra.mrb[160].mxu0 %vm1215_vm1, %v7745_v54 }
0x464e   : > { %13650 = vmatpush3.bf16.xpose.msra.mxu0 %v7864_v58  ;;  %13651 = vmatprep.mubr.msk.bf16.mxu0 %vm15377_vm0, %v15376_v1 }
0x464f   : > { %13661 = vmatprep.subr.bf16.mxu0 %v15376_v1 }
0x4655   : > { %13652 = vmatmul.mubr.msk.bf16.vlgmr.msra.gmra.mrb[164].mxu0 %vm1215_vm1, %v7857_v63 }
0x4656   : > { %13665 = vmatprep.mubr.msk.bf16.mxu0 %vm15377_vm0, %v15376_v1  ;;  %13662 = vmatpush3.bf16.msra.mxu0 %v14489_v21  ;;  %v14496_v21 = vld [vmem:[#allocation17 + $0x208] ss:$16 sps:$4 sm:$0xff]  }
0x4657   : > { %13663 = vmatprep.subr.bf16.mxu0 %v15376_v1 }
0x465a   : > { %13664 = vmatpush3.bf16.msra.mxu0 %v14490_v60 }
0x465b   : > { %13675 = vmatprep.subr.bf16.mxu0 %v15376_v1 }
0x46ad   : > { %v7850_v5 = vpop.f32.mrb[176].mxu1 }
0x46ae   : > { %v13647_v6 = vpop.f32.mrb[177].mxu1 }
0x46af   : > { %v7853_v29 = vpop.f32.mrb[178].mxu1 }
0x46b0   : > { %v13648_v7 = vpop.f32.mrb[179].mxu1 }
0x4720   : > { %v7795_v4 = vpop.f32.mrb[160].mxu0 }
0x4721   : > { %v16732_v62 = vadd.f32 %v7850_v5, %v7795_v4  ;;  %v13639_v10 = vpop.f32.mrb[161].mxu0  ;;  %v14492_v4 = vld [vmem:[#allocation14 + $0xb8] sm:$0xff]  }
0x4722   : > { %v7798_v15 = vpop.f32.mrb[162].mxu0 }
0x4723   : > { %v13640_v11 = vpop.f32.mrb[163].mxu0 }
0x4728   : > { %v7900_v12 = vpop.f32.mrb[164].mxu0 }
0x4729   : > { %v7906_v13 = vmul.f32 0.17677669, %v7900_v12  ;;  %v13653_v14 = vpop.f32.mrb[165].mxu0 }
0x472a   : > { %v7903_v40 = vpop.f32.mrb[166].mxu0  ;;  %v12349_v14 = vld [vmem:[#allocation16 + $0x2] ss:$0 sm:$0xff] }
0x472b   : > { %v13654_v9 = vpop.f32.mrb[167].mxu0  ;;  %v7907_v17 = vsel %vm1264_vm4, %v7906_v13, -inf }
0x472c   : > { %7908 = vmax.xlane.f32.xlu1 %v7907_v17 }
0x473d   : > { %8026 = vrot.lane.b32.xlu1 %v16674_v8, %s17271_s8 }
0x4741   : > { %8024 = vrot.lane.b32.xlu1 %v16686_v3, %s17271_s8 }
0x47b9   : > { %v7909_v22 = vpop.xlane.xlu1 %7908 }
0x47ba   : > { %v7910_v31 = vsub.f32 %v7906_v13, %v7909_v22 }
0x47bc   : > { %v7911_v19 = vmul.f32 1.442695, %v7910_v31 }
0x47bd   : > { %v8027_v28 = vpop.permute.xlu1 %8026 }
0x47be   : > { %14843 = vpow2.f32 %v7911_v19  ;;  %v8032_v24 = vsel %vm1215_vm1, %v8027_v28, 0  ;;  %v14507_v28 = vld [vmem:[#allocation17 + $0x244] ss:$16 sps:$4 sm:$0xff]  }
0x47c1   : > { %v8025_v32 = vpop.permute.xlu1 %8024 }
0x47c8   : > { %v14844_v16 = vpop.eup %14843 }
0x47c9   : > { %v7913_v20 = vsel %vm1264_vm4, %v14844_v16, 0.0 }
0x47ca   : > { %7914 = vadd.xlane.f32.xlu0 %v7913_v20  ;;  %v14495_v20 = vld [vmem:[#allocation17 + $0x204] ss:$16 sps:$4 sm:$0xff]  }
0x47e0   : > { %7919 = vrot.lane.b32.xlu0 %v16676_v43, %s17270_s30 }
0x4857   : > { %v7915_v23 = vpop.xlane.xlu0 %7914 }
0x4858   : > { %14845 = vrcp.f32 %v7915_v23  ;;  %v14498_v23 = vld [vmem:[#allocation17 + $0x20c] ss:$16 sps:$4 sm:$0xff]  }
0x485b   : > { %v7920_v8 = vpop.permute.xlu0 %7919 }
0x485c   : > { %v7925_v3 = vsel %vm1280_vm2, %v7920_v8, 0  ;;  %v14501_v8 = vld [vmem:[#allocation17 + $0x224] ss:$16 sps:$4 sm:$0xff]  }
0x485d   : > { %13656 = vmatpush3.bf16.msra.mxu1 %v7925_v3  ;;  %v14504_v3 = vld [vmem:[#allocation17 + $0x22c] ss:$16 sps:$4 sm:$0xff]  }
0x485e   : > { %13669 = vmatprep.subr.bf16.mxu1 %v15376_v1 }
0x4862   : > { %v14846_v26 = vpop.eup %14845 }
0x4863   : > { %v7917_v25 = vmul.f32 %v14846_v26, %v14844_v16  ;;  %v14493_v16 = vld [vmem:[#allocation17 + $0x200] ss:$16 sps:$4 sm:$0xff]  }
0x4864   : > { %v14499_v26 = vld [vmem:[#allocation17 + $0x220] ss:$16 sps:$4 sm:$0xff]  }
0x4865   : > { %v7918_v45 = vpack.c.bf16 %v7917_v25, %v7917_v25  ;;  %v14502_v25 = vld [vmem:[#allocation17 + $0x228] ss:$16 sps:$4 sm:$0xff]  }
0x4867   : > { %13658 = vmatmul.mubr.msk.bf16.vlgmr.msra.gmra.mrb[180].mxu1 %vm1264_vm4, %v7918_v45  ;;  %v14510_v45 = vld [vmem:[#allocation17 + $0x24c] ss:$16 sps:$4 sm:$0xff]  }
0x4868   : > { %13670 = vmatpush3.bf16.xpose.msra.mxu1 %v8032_v24  ;;  %13671 = vmatprep.mubr.msk.bf16.mxu1 %vm15377_vm0, %v15376_v1  ;;  %v14505_v24 = vld [vmem:[#allocation17 + $0x240] ss:$16 sps:$4 sm:$0xff]  }
0x4869   : > { %13681 = vmatprep.subr.bf16.mxu1 %v15376_v1 }
0x486f   : > { %13672 = vmatmul.mubr.msk.bf16.vlgmr.msra.gmra.mrb[184].mxu1 %vm1215_vm1, %v8025_v32 }
0x4870   : > { %13685 = vmatprep.mubr.msk.bf16.mxu1 %vm15377_vm0, %v15376_v1  ;;  %13682 = vmatpush3.bf16.msra.mxu1 %v14491_v56  ;;  %v14537_v56 = vld [vmem:[#allocation17 + $0x2e4] ss:$16 sps:$4 sm:$0xff]  }
0x4871   : > { %13683 = vmatprep.subr.bf16.mxu1 %v15376_v1 }
0x4874   : > { %13684 = vmatpush3.bf16.msra.mxu1 %v14492_v4  ;;  %v12352_v4 = vld [vmem:[%s17264_s29 + $0x2] ss:$0 sm:$0xff] }
0x4875   : > { %8489 = vmatprep.subr.bf16.mxu1 %v14498_v23  ;;  %v14554_v23 = vld [vmem:[#allocation19 + $0x2d8] sm:$0xff]  }
0x493a   : > { %v7961_v35 = vpop.f32.mrb[180].mxu1 }
0x493b   : > { %v7967_v36 = vpack.c.bf16 %v7961_v35, %v7961_v35  ;;  %v13659_v37 = vpop.f32.mrb[181].mxu1 }
0x493c   : > { %v7964_v38 = vpop.f32.mrb[182].mxu1  ;;  %v14513_v37 = vld [vmem:[#allocation17 + $0x264] ss:$16 sps:$4 sm:$0xff]  }
0x493d   : > { %v13660_v39 = vpop.f32.mrb[183].mxu1  ;;  %13666 = vmatmul.mubr.msk.bf16.vlgmr.msra.gmra.mrb[168].mxu0 %vm1215_vm1, %v7967_v36  ;;  %v14516_v38 = vld [vmem:[#allocation17 + $0x26c] ss:$16 sps:$4 sm:$0xff]  }
0x493e   : > { %13677 = vmatprep.mubr.msk.bf16.mxu0 %vm15377_vm0, %v15376_v1  ;;  %v14511_v39 = vld [vmem:[#allocation17 + $0x260] ss:$16 sps:$4 sm:$0xff]  }
0x4942   : > { %v8068_v42 = vpop.f32.mrb[184].mxu1 }
0x4943   : > { %v8074_v44 = vmul.f32 0.17677669, %v8068_v42  ;;  %v13673_v18 = vpop.f32.mrb[185].mxu1  ;;  %v14514_v42 = vld [vmem:[#allocation17 + $0x268] ss:$16 sps:$4 sm:$0xff]  }
0x4944   : > { %v8071_v30 = vpop.f32.mrb[186].mxu1  ;;  %v14522_v18 = vld [vmem:[#allocation17 + $0x28c] ss:$16 sps:$4 sm:$0xff]  }
0x4945   : > { %v13674_v48 = vpop.f32.mrb[187].mxu1  ;;  %v8075_v47 = vsel %vm1264_vm4, %v8074_v44, -inf  ;;  %v14517_v30 = vld [vmem:[#allocation17 + $0x280] ss:$16 sps:$4 sm:$0xff]  }
0x4946   : > { %8076 = vmax.xlane.f32.xlu0 %v8075_v47  ;;  %v14520_v48 = vld [vmem:[#allocation17 + $0x288] ss:$16 sps:$4 sm:$0xff]   ;;  %v14525_v47 = vld [vmem:[#allocation17 + $0x2a4] ss:$16 sps:$4 sm:$0xff]  }
0x495c   : > { %8087 = vrot.lane.b32.xlu0 %v16676_v43, %s17271_s8 }
0x49d3   : > { %v8077_v49 = vpop.xlane.xlu0 %8076 }
0x49d4   : > { %v8078_v50 = vsub.f32 %v8074_v44, %v8077_v49  ;;  %v14519_v44 = vld [vmem:[#allocation17 + $0x284] ss:$16 sps:$4 sm:$0xff]   ;;  %v14528_v49 = vld [vmem:[#allocation17 + $0x2ac] ss:$16 sps:$4 sm:$0xff]  }
0x49d6   : > { %v8079_v51 = vmul.f32 1.442695, %v8078_v50  ;;  %v14523_v50 = vld [vmem:[#allocation17 + $0x2a0] ss:$16 sps:$4 sm:$0xff]  }
0x49d7   : > { %v8088_v53 = vpop.permute.xlu0 %8087 }
0x49d8   : > { %14847 = vpow2.f32 %v8079_v51  ;;  %v8093_v41 = vsel %vm1280_vm2, %v8088_v53, 0  ;;  %v14526_v51 = vld [vmem:[#allocation17 + $0x2a8] ss:$16 sps:$4 sm:$0xff]   ;;  %v14531_v53 = vld [vmem:[#allocation17 + $0x2c4] ss:$16 sps:$4 sm:$0xff]  }
0x49d9   : > { %13676 = vmatpush3.bf16.msra.mxu0 %v8093_v41  ;;  %v14534_v41 = vld [vmem:[#allocation17 + $0x2cc] ss:$16 sps:$4 sm:$0xff]  }
0x49da   : > { %8448 = vmatprep.subr.bf16.mxu0 %v14495_v20  ;;  %v14552_v20 = vld [vmem:[#allocation19 + $0x290] sm:$0xff]  }
0x49e2   : > { %v14848_v55 = vpop.eup %14847 }
0x49e3   : > { %v8081_v54 = vsel %vm1264_vm4, %v14848_v55, 0.0 }
0x49e4   : > { %8082 = vadd.xlane.f32.xlu1 %v8081_v54  ;;  %v14532_v54 = vld [vmem:[#allocation17 + $0x2c8] ss:$16 sps:$4 sm:$0xff]  }
0x4a10   : > { %v8017_v52 = vpop.f32.mrb[168].mxu0 }
0x4a11   : > { %v8023_v58 = vadd.f32 %v8017_v52, %v16732_v62  ;;  %v13667_v43 = vpop.f32.mrb[169].mxu0  ;;  %v14540_v52 = vld [vmem:[#allocation17 + $0x2ec] ss:$16 sps:$4 sm:$0xff]  }
0x4a12   : > { %v8020_v61 = vpop.f32.mrb[170].mxu0  ;;  %v14538_v43 = vld [vmem:[#allocation17 + $0x2e8] ss:$16 sps:$4 sm:$0xff]  }
0x4a13   : > { %v13668_v63 = vpop.f32.mrb[171].mxu0  ;;  %v14541_v61 = vld [vmem:[#allocation19 + $0x240] sm:$0xff]  }
0x4a14   : > { %v14542_v63 = vld [vmem:[#allocation19 + $0x2c0] sm:$0xff]  }
0x4a71   : > { %v8083_v5 = vpop.xlane.xlu1 %8082 }
0x4a72   : > { %14849 = vrcp.f32 %v8083_v5 }
0x4a7c   : > { %v14850_v6 = vpop.eup %14849 }
0x4a7d   : > { %v8085_v29 = vmul.f32 %v14850_v6, %v14848_v55  ;;  %v14529_v55 = vld [vmem:[#allocation17 + $0x2c0] ss:$16 sps:$4 sm:$0xff]  }
0x4a7f   : > { %v8086_v7 = vpack.c.bf16 %v8085_v29, %v8085_v29 }
0x4a81   : > { %13678 = vmatmul.mubr.msk.bf16.vlgmr.msra.gmra.mrb[172].mxu0 %vm1264_vm4, %v8086_v7 }
0x4a82   : > { %8480 = vmatprep.mubr.bf16.mxu0 %v15375_v0  ;;  %8449 = vmatpush1.bf16.msra.mxu0 %v14493_v16  ;;  %v14551_v16 = vld [vmem:[#allocation19 + $0x210] sm:$0xff]  }
0x4a83   : > { %8450 = vmatprep.subr.bf16.mxu0 %v14501_v8  ;;  %v14555_v8 = vld [vmem:[#allocation19 + $0x218] sm:$0xff]  }
0x4a86   : > { %8451 = vmatpush1.bf16.msra.mxu0 %v14499_v26  ;;  %v14557_v26 = vld [vmem:[#allocation19 + $0x260] sm:$0xff]  }
0x4a87   : > { %8452 = vmatprep.subr.bf16.mxu0 %v14507_v28  ;;  %v14559_v28 = vld [vmem:[#allocation19 + $0x220] sm:$0xff]  }
0x4a8a   : > { %8453 = vmatpush1.bf16.msra.mxu0 %v14505_v24  ;;  %v14561_v24 = vld [vmem:[#allocation19 + $0x268] sm:$0xff]  }
0x4a8b   : > { %8454 = vmatprep.subr.bf16.mxu0 %v14513_v37  ;;  %v14567_v37 = vld [vmem:[#allocation19 + $0x230] sm:$0xff]  }
0x4a8e   : > { %8455 = vmatpush1.bf16.msra.mxu0 %v14511_v39  ;;  %v14569_v39 = vld [vmem:[#allocation19 + $0x278] sm:$0xff]  }
0x4a8f   : > { %8456 = vmatprep.subr.bf16.mxu0 %v14519_v44  ;;  %v14571_v44 = vld [vmem:[#allocation19 + $0x238] sm:$0xff]  }
0x4a92   : > { %8457 = vmatpush1.bf16.msra.mxu0 %v14517_v30  ;;  %v12354_v30 = vld [vmem:[%s17266_s0 + $0x8] sm:$0xf] }
0x4a93   : > { %8458 = vmatprep.subr.bf16.mxu0 %v14525_v47  ;;  %v8279_v47 = vrot.slane %v12354_v30, %v15997_v46 }
0x4a96   : > { %8459 = vmatpush1.bf16.msra.mxu0 %v14523_v50  ;;  %v8283_v50 = vrot.slane %v12354_v30, %v16229_v2 }
0x4a97   : > { %8460 = vmatprep.subr.bf16.mxu0 %v14531_v53 }
0x4a9a   : > { %8461 = vmatpush1.bf16.msra.mxu0 %v14529_v55 }
0x4a9b   : > { %8462 = vmatprep.subr.bf16.mxu0 %v14537_v56 }
0x4b54   : > { %v8129_v10 = vpop.f32.mrb[172].mxu0 }
0x4b55   : > { %v8135_v15 = vpack.c.bf16 %v8129_v10, %v8129_v10  ;;  %v13679_v11 = vpop.f32.mrb[173].mxu0 }
0x4b56   : > { %v8132_v12 = vpop.f32.mrb[174].mxu0 }
0x4b57   : > { %v13680_v13 = vpop.f32.mrb[175].mxu0  ;;  %13686 = vmatmul.mubr.msk.bf16.vlgmr.msra.gmra.mrb[188].mxu1 %vm1215_vm1, %v8135_v15  ;;  %v12353_v15 = vld [vmem:[%s17265_s7 + $0x2] ss:$0 sm:$0xff] }
0x4b58   : > { %8521 = vmatprep.mubr.bf16.mxu1 %v15375_v0  ;;  %8490 = vmatpush1.bf16.msra.mxu1 %v14496_v21  ;;  %v14543_v13 = vld [vmem:[#allocation19 + $0x200] sm:$0xff]   ;;  %v14553_v21 = vld [vmem:[#allocation19 + $0x258] sm:$0xff]  }
0x4b59   : > { %8491 = vmatprep.subr.bf16.mxu1 %v14504_v3  ;;  %v14556_v3 = vld [vmem:[#allocation19 + $0x298] sm:$0xff]  }
0x4b5c   : > { %8492 = vmatpush1.bf16.msra.mxu1 %v14502_v25  ;;  %v14558_v25 = vld [vmem:[#allocation19 + $0x2e0] sm:$0xff]  }
0x4b5d   : > { %8493 = vmatprep.subr.bf16.mxu1 %v14510_v45  ;;  %v14560_v45 = vld [vmem:[#allocation19 + $0x2a0] sm:$0xff]  }
0x4c2a   : > { %v8185_v62 = vpop.f32.mrb[188].mxu1 }
0x4c2b   : > { %v8191_v40 = vadd.f32 %v8185_v62, %v8023_v58  ;;  %v13687_v9 = vpop.f32.mrb[189].mxu1  ;;  %v14535_v58 = vld [vmem:[#allocation17 + $0x2e0] ss:$16 sps:$4 sm:$0xff]  }
0x4c2c   : > { %v8188_v17 = vpop.f32.mrb[190].mxu1  ;;  %8463 = vmatpush1.bf16.msra.mxu0 %v14535_v58  ;;  %v14544_v62 = vld [vmem:[#allocation19 + $0x280] sm:$0xff]   ;;  %v14546_v9 = vld [vmem:[#allocation19 + $0x2c8] sm:$0xff]  }
0x4c2d   : > { %v8200_v22 = vadd.f32 %v12349_v14, %v8191_v40  ;;  %v13688_v31 = vpop.f32.mrb[191].mxu1  ;;  %12918 = vmatprep.subr.bf16.mxu0 %v14541_v61  ;;  %v14545_v40 = vld [vmem:[#allocation19 + $0x248] sm:$0xff]  }
0x4c2e   : > { %v14547_v17 = vld [vmem:[#allocation19 + $0x208] sm:$0xff]   ;;  %v14549_v31 = vld [vmem:[#allocation19 + $0x250] sm:$0xff]  }
0x4c2f   : > { %v8201_v19 = vadd.f32 %v8200_v22, %v16666_v59  ;;  %v14508_v59 = vld [vmem:[#allocation17 + $0x248] ss:$16 sps:$4 sm:$0xff]  }
0x4c30   : > { %8494 = vmatpush1.bf16.msra.mxu1 %v14508_v59  ;;  %v14548_v22 = vld [vmem:[#allocation19 + $0x288] sm:$0xff]  }
0x4c31   : > { %8206 = vadd.xlane.f32.xlu1 %v8201_v19  ;;  %8495 = vmatprep.subr.bf16.mxu1 %v14516_v38  ;;  %v14562_v59 = vld [vmem:[#allocation19 + $0x2e8] sm:$0xff]   ;;  %v14568_v38 = vld [vmem:[#allocation19 + $0x2b0] sm:$0xff]  }
0x4c34   : > { %8496 = vmatpush1.bf16.msra.mxu1 %v14514_v42  ;;  %v14570_v42 = vld [vmem:[#allocation19 + $0x2f8] sm:$0xff]  }
0x4c35   : > { %8497 = vmatprep.subr.bf16.mxu1 %v14522_v18  ;;  %v14572_v18 = vld [vmem:[#allocation19 + $0x2b8] sm:$0xff]  }
0x4c38   : > { %8498 = vmatpush1.bf16.msra.mxu1 %v14520_v48  ;;  %v8271_v48 = vrot.slane %v12354_v30, %v15977_v34 }
0x4c39   : > { %8499 = vmatprep.subr.bf16.mxu1 %v14528_v49  ;;  %v8275_v49 = vrot.slane %v12354_v30, %v15974_v33  ;;  %v14589_v30 = vld [vmem:[#allocation5 + $0x2a0] ss:$12 sps:$4 sm:$0xff]  }
0x4c3c   : > { %8500 = vmatpush1.bf16.msra.mxu1 %v14526_v51 }
0x4c3d   : > { %8501 = vmatprep.subr.bf16.mxu1 %v14534_v41 }
0x4c40   : > { %8502 = vmatpush1.bf16.msra.mxu1 %v14532_v54 }
0x4c41   : > { %8503 = vmatprep.subr.bf16.mxu1 %v14540_v52 }
0x4c44   : > { %8504 = vmatpush1.bf16.msra.mxu1 %v14538_v43 }
0x4c45   : > { %12940 = vmatprep.subr.bf16.mxu1 %v14542_v63 }
0x4cbe   : > { %v8207_v32 = vpop.xlane.xlu1 %8206 }
0x4cbf   : > { %v8208_v60 = vmul.f32 0.0078125, %v8207_v32  ;;  %v14563_v32 = vld [vmem:[#allocation19 + $0x228] sm:$0xff]  }
0x4cc1   : > { %v8209_v35 = vsub.f32 %v8201_v19, %v8208_v60  ;;  %v14550_v19 = vld [vmem:[#allocation19 + $0x2d0] sm:$0xff]   ;;  %v14564_v60 = vld [vmem:[#allocation19 + $0x2a8] sm:$0xff]  }
0x4cc3   : > { %v8210_v36 = vmul.f32 %v8209_v35, %v8209_v35 }
0x4cc5   : > { %8211 = vadd.xlane.f32.xlu1 %v8210_v36  ;;  %v14566_v36 = vld [vmem:[#allocation19 + $0x2f0] sm:$0xff]  }
0x4d52   : > { %v8212_v5 = vpop.xlane.xlu1 %8211 }
0x4d53   : > { %v8213_v6 = vmul.f32 0.0078125, %v8212_v5 }
0x4d55   : > { %v8214_v29 = vadd.f32 1e-05, %v8213_v6 }
0x4d57   : > { %14851 = vrsqrt.f32 %v8214_v29 }
0x4d61   : > { %v14852_v7 = vpop.eup %14851 }
0x4d62   : > { %v8216_v10 = vmul.f32 %v14852_v7, %v8209_v35  ;;  %v14565_v35 = vld [vmem:[#allocation19 + $0x270] sm:$0xff]  }
0x4d64   : > { %v8223_v11 = vmul.f32 %v12352_v4, %v8216_v10 }
0x4d66   : > { %v16775_v12 = vadd.f32 %v12353_v15, %v8223_v11 }
0x4d68   : > { %v8231_v14 = vpack.c.bf16 %v16775_v12, %v16775_v12 }
0x4d6a   : > { %8481 = vmatmul.mubr.bf16.vlgmr.msra.gmra.mrb[176].mxu0 %v8231_v14  ;;  %8522 = vmatmul.mubr.bf16.vlgmr.msra.gmra.mrb[192].mxu1 %v8231_v14 }
0x4d6b   : > { %12919 = vmatpush3.bf16.msra.mxu0 %v14543_v13  ;;  %12941 = vmatpush3.bf16.msra.mxu1 %v14544_v62 }
0x4d6c   : > { %12920 = vmatprep.subr.bf16.mxu0 %v14545_v40  ;;  %12942 = vmatprep.subr.bf16.mxu1 %v14546_v9  ;;  %v12387_v40 = vld [vmem:[#allocation20 + $0x2] ss:$0 sm:$0xff] }
0x4d6f   : > { %12921 = vmatpush3.bf16.msra.mxu0 %v14547_v17  ;;  %12943 = vmatpush3.bf16.msra.mxu1 %v14548_v22 }
0x4d70   : > { %12922 = vmatprep.subr.bf16.mxu0 %v14549_v31  ;;  %12944 = vmatprep.subr.bf16.mxu1 %v14550_v19 }
0x4d73   : > { %12923 = vmatpush3.bf16.msra.mxu0 %v14551_v16  ;;  %12945 = vmatpush3.bf16.msra.mxu1 %v14552_v20 }
0x4d74   : > { %12924 = vmatprep.subr.bf16.mxu0 %v14553_v21  ;;  %12946 = vmatprep.subr.bf16.mxu1 %v14554_v23 }
0x4d77   : > { %12925 = vmatpush3.bf16.msra.mxu0 %v14555_v8  ;;  %12947 = vmatpush3.bf16.msra.mxu1 %v14556_v3 }
0x4d78   : > { %12926 = vmatprep.subr.bf16.mxu0 %v14557_v26  ;;  %12948 = vmatprep.subr.bf16.mxu1 %v14558_v25  ;;  %v14573_v26 = vld [vmem:[#allocation5 + $0x240] ss:$12 sps:$4 sm:$0xff]   ;;  %v14575_v25 = vld [vmem:[#allocation5 + $0x244] ss:$12 sps:$4 sm:$0xff]  }
0x4d7b   : > { %12927 = vmatpush3.bf16.msra.mxu0 %v14559_v28  ;;  %12949 = vmatpush3.bf16.msra.mxu1 %v14560_v45  ;;  %v14576_v28 = vld [vmem:[#allocation5 + $0x248] ss:$12 sps:$4 sm:$0xff]  }
0x4d7c   : > { %12928 = vmatprep.subr.bf16.mxu0 %v14561_v24  ;;  %12950 = vmatprep.subr.bf16.mxu1 %v14562_v59  ;;  %v14579_v45 = vld [vmem:[#allocation5 + $0x25c] ss:$12 sps:$4 sm:$0xff]   ;;  %v14580_v24 = vld [vmem:[#allocation5 + $0x260] ss:$12 sps:$4 sm:$0xff]   ;;  %v14577_v59 = vld [vmem:[#allocation5 + $0x258] ss:$12 sps:$4 sm:$0xff]  }
0x4d7f   : > { %12929 = vmatpush3.bf16.msra.mxu0 %v14563_v32  ;;  %12951 = vmatpush3.bf16.msra.mxu1 %v14564_v60  ;;  %v14583_v32 = vld [vmem:[#allocation5 + $0x274] ss:$12 sps:$4 sm:$0xff]   ;;  %v14581_v60 = vld [vmem:[#allocation5 + $0x270] ss:$12 sps:$4 sm:$0xff]  }
0x4d80   : > { %12930 = vmatprep.subr.bf16.mxu0 %v14565_v35  ;;  %12952 = vmatprep.subr.bf16.mxu1 %v14566_v36 }
0x4d83   : > { %12931 = vmatpush3.bf16.msra.mxu0 %v14567_v37  ;;  %12953 = vmatpush3.bf16.msra.mxu1 %v14568_v38  ;;  %v14584_v38 = vld [vmem:[#allocation5 + $0x278] ss:$12 sps:$4 sm:$0xff]  }
0x4d84   : > { %12932 = vmatprep.subr.bf16.mxu0 %v14569_v39  ;;  %12954 = vmatprep.subr.bf16.mxu1 %v14570_v42  ;;  %v14587_v39 = vld [vmem:[#allocation5 + $0x28c] ss:$12 sps:$4 sm:$0xff]   ;;  %v14585_v42 = vld [vmem:[#allocation5 + $0x288] ss:$12 sps:$4 sm:$0xff]  }
0x4d87   : > { %12933 = vmatpush3.bf16.msra.mxu0 %v14571_v44  ;;  %12955 = vmatpush3.bf16.msra.mxu1 %v14572_v18  ;;  %v14588_v44 = vld [vmem:[#allocation5 + $0x290] ss:$12 sps:$4 sm:$0xff]  }
0x4d88   : > { %13689 = vmatprep.subr.bf16.mxu1 %v15376_v1  ;;  %9093 = vmatprep.subr.bf16.mxu0 %v14575_v25  ;;  %v14591_v18 = vld [vmem:[#allocation5 + $0x2a4] ss:$12 sps:$4 sm:$0xff]  }
0x4e3d   : > { %v8482_v51 = vpop.f32.mrb[176].mxu0  ;;  %v8523_v53 = vpop.f32.mrb[192].mxu1 }
0x4e3e   : > { %v8483_v41 = vadd.f32 %v8482_v51, %v8271_v48  ;;  %v8524_v55 = vadd.f32 %v8523_v53, %v8279_v47  ;;  %v8484_v54 = vpop.f32.mrb[177].mxu0  ;;  %v8525_v56 = vpop.f32.mrb[193].mxu1  ;;  %v14592_v48 = vld [vmem:[#allocation5 + $0x2a8] ss:$12 sps:$4 sm:$0xff]   ;;  %v14597_v53 = vld [vmem:[#allocation5 + $0x2d0] ss:$12 sps:$4 sm:$0xff]  }
0x4e3f   : > { %v8485_v52 = vadd.f32 %v8484_v54, %v8275_v49  ;;  %v8526_v58 = vadd.f32 %v8525_v56, %v8283_v50  ;;  %v8486_v43 = vpop.f32.mrb[178].mxu0  ;;  %v8527_v61 = vpop.f32.mrb[194].mxu1  ;;  %v14595_v47 = vld [vmem:[#allocation5 + $0x2bc] ss:$12 sps:$4 sm:$0xff]   ;;  %v14593_v49 = vld [vmem:[#allocation5 + $0x2b8] ss:$12 sps:$4 sm:$0xff]  }
0x4e40   : > { %v8530_v63 = vmax.f32 %v8483_v41, 0.0  ;;  %v8532_v5 = vmax.f32 %v8524_v55, 0.0  ;;  %v8487_v6 = vpop.f32.mrb[179].mxu0  ;;  %v8528_v29 = vpop.f32.mrb[195].mxu1  ;;  %v14596_v50 = vld [vmem:[#allocation5 + $0x2c0] ss:$12 sps:$4 sm:$0xff]  }
0x4e41   : > { %v8531_v7 = vmax.f32 %v8485_v52, 0.0  ;;  %v8533_v4 = vmax.f32 %v8526_v58, 0.0  ;;  %v14599_v51 = vld [vmem:[#allocation5 + $0x2d4] ss:$12 sps:$4 sm:$0xff]   ;;  %v14600_v41 = vld [vmem:[#allocation5 + $0x2d8] ss:$12 sps:$4 sm:$0xff]  }
0x4e42   : > { %v8534_v11 = vpack.c.bf16 %v8530_v63, %v8530_v63  ;;  %v8536_v13 = vpack.c.bf16 %v8532_v5, %v8532_v5  ;;  %v14603_v55 = vld [vmem:[#allocation5 + $0x2ec] ss:$12 sps:$4 sm:$0xff]   ;;  %v14601_v54 = vld [vmem:[#allocation5 + $0x2e8] ss:$12 sps:$4 sm:$0xff]   ;;  %v14604_v56 = vld [vmem:[#allocation5 + $0x2f0] ss:$12 sps:$4 sm:$0xff]  }
0x4e43   : > { %v8535_v10 = vpack.c.bf16 %v8531_v7, %v8531_v7  ;;  %v8537_v15 = vpack.c.bf16 %v8533_v4, %v8533_v4  ;;  %v12422_v63 = vld [vmem:[%s17267_s25 + $0x2] ss:$0 sm:$0xff] }
0x4e44   : > { %v12423_v6 = vld [vmem:[%s17268_s6 + $0x2] ss:$0 sm:$0xff] }
0x4e45   : > { %8835 = vmatprep.mubr.bf16.mxu0 %v8535_v10  ;;  %8875 = vmatprep.mubr.bf16.mxu1 %v8537_v15  ;;  %v12424_v10 = vld [vmem:[%s17260_s14 + $0x9] sm:$0x7] }
0x4e46   : > { %8836 = vmatmul.mubr.bf16.vlgmr.msra.gmra.mrb[180].mxu0 %v8534_v11  ;;  %8876 = vmatmul.mubr.bf16.vlgmr.msra.gmra.mrb[196].mxu1 %v8536_v13  ;;  %v8953_v15 = vrot.slane %v12424_v10, %v15977_v34  ;;  %v8961_v11 = vrot.slane %v12424_v10, %v15997_v46  ;;  %v8957_v13 = vrot.slane %v12424_v10, %v15974_v33 }
0x4e47   : > { %9125 = vmatprep.mubr.bf16.mxu0 %v15375_v0  ;;  %13705 = vmatprep.mubr.msk.bf16.mxu1 %vm15377_vm0, %v15376_v1 }
0x4e48   : > { %13690 = vmatpush3.bf16.msra.mxu1 %v14576_v28  ;;  %9094 = vmatpush1.bf16.msra.mxu0 %v14573_v26 }
0x4e49   : > { %13691 = vmatprep.subr.bf16.mxu1 %v15376_v1  ;;  %9095 = vmatprep.subr.bf16.mxu0 %v14579_v45 }
0x4e4c   : > { %13692 = vmatpush3.bf16.msra.mxu1 %v14580_v24  ;;  %9096 = vmatpush1.bf16.msra.mxu0 %v14577_v59 }
0x4e4d   : > { %13693 = vmatprep.subr.bf16.mxu1 %v15376_v1  ;;  %9097 = vmatprep.subr.bf16.mxu0 %v14583_v32 }
0x4e50   : > { %9098 = vmatpush1.bf16.msra.mxu0 %v14581_v60  ;;  %13694 = vmatpush3.bf16.msra.mxu1 %v14584_v38 }
0x4e51   : > { %13695 = vmatprep.subr.bf16.mxu1 %v15376_v1  ;;  %9099 = vmatprep.subr.bf16.mxu0 %v14587_v39 }
0x4e54   : > { %9100 = vmatpush1.bf16.msra.mxu0 %v14585_v42  ;;  %13696 = vmatpush3.bf16.msra.mxu1 %v14588_v44 }
0x4e55   : > { %13697 = vmatprep.subr.bf16.mxu1 %v15376_v1  ;;  %9101 = vmatprep.subr.bf16.mxu0 %v14591_v18 }
0x4e58   : > { %9102 = vmatpush1.bf16.msra.mxu0 %v14589_v30  ;;  %13698 = vmatpush3.bf16.msra.mxu1 %v14592_v48 }
0x4e59   : > { %13699 = vmatprep.subr.bf16.mxu1 %v15376_v1  ;;  %9103 = vmatprep.subr.bf16.mxu0 %v14595_v47 }
0x4e5c   : > { %9104 = vmatpush1.bf16.msra.mxu0 %v14593_v49  ;;  %13700 = vmatpush3.bf16.msra.mxu1 %v14596_v50 }
0x4e5d   : > { %13701 = vmatprep.subr.bf16.mxu1 %v15376_v1  ;;  %9105 = vmatprep.subr.bf16.mxu0 %v14599_v51 }
0x4e60   : > { %9106 = vmatpush1.bf16.msra.mxu0 %v14597_v53  ;;  %13702 = vmatpush3.bf16.msra.mxu1 %v14600_v41 }
0x4e61   : > { %9107 = vmatprep.subr.bf16.mxu0 %v14603_v55  ;;  %13703 = vmatprep.subr.bf16.mxu1 %v15376_v1 }
0x4e64   : > { %9108 = vmatpush1.bf16.msra.mxu0 %v14601_v54  ;;  %13704 = vmatpush3.bf16.msra.mxu1 %v14604_v56 }
0x4e65   : > { %13715 = vmatprep.subr.bf16.mxu1 %v15376_v1  ;;  %13709 = vmatprep.subr.bf16.mxu0 %v15376_v1 }
0x4f19   : > { %v12934_v62 = vpop.f32.mrb[180].mxu0  ;;  %v12956_v14 = vpop.f32.mrb[196].mxu1 }
0x4f1a   : > { %v12935_v9 = vpop.f32.mrb[181].mxu0  ;;  %v12957_v17 = vpop.f32.mrb[197].mxu1 }
0x4f1b   : > { %v12936_v22 = vadd.f32 %v12935_v9, %v12934_v62  ;;  %v12958_v31 = vadd.f32 %v12957_v17, %v12956_v14  ;;  %v12937_v19 = vpop.f32.mrb[182].mxu0  ;;  %v12959_v16 = vpop.f32.mrb[198].mxu1 }
0x4f1c   : > { %v12938_v20 = vpop.f32.mrb[183].mxu0  ;;  %v12960_v21 = vpop.f32.mrb[199].mxu1 }
0x4f1d   : > { %v8838_v23 = vadd.f32 %v12936_v22, %v12387_v40 }
0x4f1f   : > { %v8878_v8 = vadd.f32 %v12958_v31, %v8838_v23 }
0x4f21   : > { %v8883_v3 = vadd.f32 %v8878_v8, %v16775_v12 }
0x4f23   : > { %8888 = vadd.xlane.f32.xlu1 %v8883_v3 }
0x4fb0   : > { %v8889_v12 = vpop.xlane.xlu1 %8888 }
0x4fb1   : > { %v8890_v35 = vmul.f32 0.0078125, %v8889_v12 }
0x4fb3   : > { %v8891_v36 = vsub.f32 %v8883_v3, %v8890_v35 }
0x4fb5   : > { %v8892_v37 = vmul.f32 %v8891_v36, %v8891_v36 }
0x4fb7   : > { %8893 = vadd.xlane.f32.xlu1 %v8892_v37 }
0x5044   : > { %v8894_v52 = vpop.xlane.xlu1 %8893 }
0x5045   : > { %v8895_v58 = vmul.f32 0.0078125, %v8894_v52 }
0x5047   : > { %v8896_v43 = vadd.f32 1e-05, %v8895_v58 }
0x5049   : > { %14853 = vrsqrt.f32 %v8896_v43 }
0x5053   : > { %v14854_v61 = vpop.eup %14853 }
0x5054   : > { %v8898_v5 = vmul.f32 %v14854_v61, %v8891_v36 }
0x5056   : > { %v8905_v29 = vmul.f32 %v12422_v63, %v8898_v5  ;;  %v14607_v5 = vld [vmem:[#allocation7 + $0xd0] sm:$0xff]  }
0x5058   : > { %v16806_v7 = vadd.f32 %v12423_v6, %v8905_v29  ;;  %v14608_v6 = vld [vmem:[#allocation7 + $0xd8] sm:$0xff]  }
0x505a   : > { %v8913_v4 = vpack.c.bf16 %v16806_v7, %v16806_v7 }
0x505c   : > { %9126 = vmatmul.mubr.bf16.vlgmr.msra.gmra.mrb[184].mxu0 %v8913_v4  ;;  %13706 = vmatmul.mubr.bf16.vlgmr.msra.gmra.mrb[200].mxu1 %v8913_v4 }
0x505d   : > { %13711 = vmatprep.mubr.msk.bf16.mxu0 %vm15377_vm0, %v15376_v1  ;;  %13717 = vmatprep.mubr.msk.bf16.mxu1 %vm15377_vm0, %v15376_v1 }
0x512f   : > { %v9127_v62 = vpop.f32.mrb[184].mxu0  ;;  %v9168_v14 = vpop.f32.mrb[200].mxu1 }
0x5130   : > { %v9128_v40 = vadd.f32 %v9127_v62, %v8953_v15  ;;  %v9169_v9 = vadd.f32 %v9168_v14, %v8961_v11  ;;  %v9129_v17 = vpop.f32.mrb[185].mxu0  ;;  %v13707_v22 = vpop.f32.mrb[201].mxu1  ;;  %v14606_v14 = vld [vmem:[#allocation7 + $0xc8] sm:$0xff]  }
0x5131   : > { %v9130_v31 = vadd.f32 %v9129_v17, %v8957_v13  ;;  %v9131_v19 = vpop.f32.mrb[186].mxu0  ;;  %v9171_v16 = vpop.f32.mrb[202].mxu1  ;;  %v14605_v13 = vld [vmem:[#allocation7 + $0xc0] sm:$0xff]  }
0x5132   : > { %v16820_v20 = vpack.c.bf16 %v9128_v40, %v9128_v40  ;;  %v16822_v21 = vpack.c.bf16 %v9169_v9, %v9169_v9  ;;  %v9132_v23 = vpop.f32.mrb[187].mxu0  ;;  %v13708_v8 = vpop.f32.mrb[203].mxu1 }
0x5133   : > { %v16824_v3 = vpack.c.bf16 %v9130_v31, %v9130_v31 }
0x5134   : > { %9302 = vrot.lane.b32.xlu1 %v16820_v20, %s17269_s21  ;;  %v9258_v26 = vsel %vm1280_vm2, %v16822_v21, 0 }
0x5135   : > { %13716 = vmatpush3.bf16.msra.mxu1 %v9258_v26  ;;  %9305 = vrot.lane.b32.xlu0 %v16824_v3, %s17269_s21  ;;  %v9198_v25 = vsel %vm1215_vm1, %v16824_v3, 0 }
0x5136   : > { %13710 = vmatpush3.bf16.xpose.msra.mxu0 %v9198_v25  ;;  %13727 = vmatprep.subr.bf16.mxu1 %v15376_v1 }
0x5137   : > { %13721 = vmatprep.subr.bf16.mxu0 %v15376_v1 }
0x513d   : > { %13712 = vmatmul.mubr.msk.bf16.vlgmr.msra.gmra.mrb[188].mxu0 %vm1215_vm1, %v16820_v20 }
0x513e   : > { %13723 = vmatprep.mubr.msk.bf16.mxu0 %vm15377_vm0, %v15376_v1 }
0x51a6   : > { %v9303_v24 = vpop.permute.xlu1 %9302 }
0x51a7   : > { %v9306_v28 = vpop.permute.xlu0 %9305 }
0x51a8   : > { %v9311_v45 = vsel %vm1215_vm1, %v9306_v28, 0 }
0x51a9   : > { %13722 = vmatpush3.bf16.xpose.msra.mxu0 %v9311_v45 }
0x51aa   : > { %13733 = vmatprep.subr.bf16.mxu0 %v15376_v1 }
0x51b0   : > { %13724 = vmatmul.mubr.msk.bf16.vlgmr.msra.gmra.mrb[192].mxu0 %vm1215_vm1, %v9303_v24 }
0x51b1   : > { %13737 = vmatprep.mubr.msk.bf16.mxu0 %vm15377_vm0, %v15376_v1  ;;  %13734 = vmatpush3.bf16.msra.mxu0 %v14607_v5  ;;  %v14610_v5 = vld [vmem:[#allocation7 + $0xe8] sm:$0xff]  }
0x51b2   : > { %13735 = vmatprep.subr.bf16.mxu0 %v15376_v1 }
0x51b5   : > { %13736 = vmatpush3.bf16.msra.mxu0 %v14608_v6 }
0x51b6   : > { %13749 = vmatprep.subr.bf16.mxu0 %v15376_v1 }
0x5210   : > { %v9234_v59 = vpop.f32.mrb[188].mxu0 }
0x5211   : > { %v9240_v32 = vmul.f32 0.17677669, %v9234_v59  ;;  %v13713_v60 = vpop.f32.mrb[189].mxu0 }
0x5212   : > { %v9237_v12 = vpop.f32.mrb[190].mxu0 }
0x5213   : > { %v9241_v35 = vadd.f32 %v9240_v32, %v16007_v57  ;;  %v13714_v36 = vpop.f32.mrb[191].mxu0 }
0x5215   : > { %v9242_v37 = vsel %vm1264_vm4, %v9241_v35, -inf }
0x5216   : > { %9243 = vmax.xlane.f32.xlu0 %v9242_v37 }
0x5283   : > { %v9347_v38 = vpop.f32.mrb[192].mxu0 }
0x5284   : > { %v9353_v39 = vmul.f32 0.17677669, %v9347_v38  ;;  %v13725_v42 = vpop.f32.mrb[193].mxu0 }
0x5285   : > { %v9350_v44 = vpop.f32.mrb[194].mxu0 }
0x5286   : > { %v9354_v18 = vadd.f32 %v9353_v39, %v16007_v57  ;;  %v13726_v30 = vpop.f32.mrb[195].mxu0 }
0x5288   : > { %v9355_v48 = vsel %vm1264_vm4, %v9354_v18, -inf }
0x5289   : > { %9356 = vmax.xlane.f32.xlu1 %v9355_v48 }
0x529a   : > { %9529 = vrot.lane.b32.xlu1 %v16824_v3, %s17270_s30 }
0x52a3   : > { %v9244_v47 = vpop.xlane.xlu0 %9243 }
0x52a4   : > { %v9245_v49 = vsub.f32 %v9241_v35, %v9244_v47 }
0x52a6   : > { %v9246_v50 = vmul.f32 1.442695, %v9245_v49 }
0x52a8   : > { %14855 = vpow2.f32 %v9246_v50 }
0x52b2   : > { %v14856_v51 = vpop.eup %14855 }
0x52b3   : > { %v9248_v53 = vsel %vm1264_vm4, %v14856_v51, 0.0 }
0x52b4   : > { %9249 = vadd.xlane.f32.xlu0 %v9248_v53 }
0x5316   : > { %v9357_v41 = vpop.xlane.xlu1 %9356 }
0x5317   : > { %v9358_v55 = vsub.f32 %v9354_v18, %v9357_v41 }
0x5319   : > { %v9359_v54 = vmul.f32 1.442695, %v9358_v55 }
0x531a   : > { %v9530_v19 = vpop.permute.xlu1 %9529 }
0x531b   : > { %14857 = vpow2.f32 %v9359_v54  ;;  %v9535_v25 = vsel %vm1215_vm1, %v9530_v19, 0 }
0x5325   : > { %v14858_v56 = vpop.eup %14857 }
0x5326   : > { %v9361_v52 = vsel %vm1264_vm4, %v14858_v56, 0.0 }
0x5327   : > { %9362 = vadd.xlane.f32.xlu0 %v9361_v52 }
0x533d   : > { %9368 = vrot.lane.b32.xlu0 %v16822_v21, %s17269_s21 }
0x5341   : > { %v9250_v58 = vpop.xlane.xlu0 %9249  ;;  %9527 = vrot.lane.b32.xlu0 %v16820_v20, %s17270_s30 }
0x5342   : > { %14859 = vrcp.f32 %v9250_v58 }
0x534c   : > { %v14860_v43 = vpop.eup %14859 }
0x534d   : > { %v9252_v61 = vmul.f32 %v14860_v43, %v14856_v51 }
0x534f   : > { %v9253_v63 = vpack.c.bf16 %v9252_v61, %v9252_v61 }
0x5351   : > { %13718 = vmatmul.mubr.msk.bf16.vlgmr.msra.gmra.mrb[204].mxu1 %vm1264_vm4, %v9253_v63 }
0x5352   : > { %13729 = vmatprep.mubr.msk.bf16.mxu1 %vm15377_vm0, %v15376_v1 }
0x53b4   : > { %v9363_v29 = vpop.xlane.xlu0 %9362 }
0x53b5   : > { %14861 = vrcp.f32 %v9363_v29 }
0x53b8   : > { %v9369_v4 = vpop.permute.xlu0 %9368 }
0x53b9   : > { %v9374_v10 = vsel %vm1280_vm2, %v9369_v4, 0 }
0x53ba   : > { %13728 = vmatpush3.bf16.msra.mxu1 %v9374_v10 }
0x53bb   : > { %13741 = vmatprep.subr.bf16.mxu1 %v15376_v1 }
0x53bc   : > { %v9528_v45 = vpop.permute.xlu0 %9527 }
0x53bf   : > { %v14862_v15 = vpop.eup %14861 }
0x53c0   : > { %v9365_v11 = vmul.f32 %v14862_v15, %v14858_v56  ;;  %v14609_v56 = vld [vmem:[#allocation7 + $0xe0] sm:$0xff]  }
0x53c2   : > { %v9366_v62 = vpack.c.bf16 %v9365_v11, %v9365_v11 }
0x53c4   : > { %13730 = vmatmul.mubr.msk.bf16.vlgmr.msra.gmra.mrb[208].mxu1 %vm1264_vm4, %v9366_v62 }
0x53c5   : > { %13742 = vmatpush3.bf16.msra.mxu1 %v14605_v13  ;;  %13745 = vmatprep.mubr.msk.bf16.mxu1 %vm15377_vm0, %v15376_v1 }
0x53c6   : > { %13743 = vmatprep.subr.bf16.mxu1 %v15376_v1 }
0x53c9   : > { %13744 = vmatpush3.bf16.msra.mxu1 %v14606_v14 }
0x53ca   : > { %13755 = vmatprep.subr.bf16.mxu1 %v15376_v1 }
0x5424   : > { %v9294_v40 = vpop.f32.mrb[204].mxu1 }
0x5425   : > { %v9300_v9 = vpack.c.bf16 %v9294_v40, %v9294_v40  ;;  %v13719_v17 = vpop.f32.mrb[205].mxu1 }
0x5426   : > { %v9297_v22 = vpop.f32.mrb[206].mxu1 }
0x5427   : > { %v13720_v31 = vpop.f32.mrb[207].mxu1  ;;  %13746 = vmatmul.mubr.msk.bf16.vlgmr.msra.gmra.mrb[212].mxu1 %vm1215_vm1, %v9300_v9 }
0x5428   : > { %13757 = vmatprep.mubr.msk.bf16.mxu1 %vm15377_vm0, %v15376_v1 }
0x5497   : > { %v9410_v16 = vpop.f32.mrb[208].mxu1 }
0x5498   : > { %v9416_v23 = vpack.c.bf16 %v9410_v16, %v9410_v16  ;;  %v13731_v8 = vpop.f32.mrb[209].mxu1 }
0x5499   : > { %v9413_v26 = vpop.f32.mrb[210].mxu1  ;;  %v14611_v8 = vld [vmem:[#allocation7 + $0xf0] sm:$0xff]  }
0x549a   : > { %v13732_v28 = vpop.f32.mrb[211].mxu1  ;;  %13738 = vmatmul.mubr.msk.bf16.vlgmr.msra.gmra.mrb[196].mxu0 %vm1215_vm1, %v9416_v23 }
0x549b   : > { %13750 = vmatpush3.bf16.xpose.msra.mxu0 %v9535_v25  ;;  %13751 = vmatprep.mubr.msk.bf16.mxu0 %vm15377_vm0, %v15376_v1 }
0x549c   : > { %13761 = vmatprep.subr.bf16.mxu0 %v15376_v1 }
0x54a2   : > { %13752 = vmatmul.mubr.msk.bf16.vlgmr.msra.gmra.mrb[200].mxu0 %vm1215_vm1, %v9528_v45 }
0x54a3   : > { %13765 = vmatprep.mubr.msk.bf16.mxu0 %vm15377_vm0, %v15376_v1  ;;  %13762 = vmatpush3.bf16.msra.mxu0 %v14609_v56  ;;  %v14616_v56 = vld [vmem:[#allocation11 + $0x190] ss:$8 sps:$4 sm:$0xff]  }
0x54a4   : > { %13763 = vmatprep.subr.bf16.mxu0 %v15376_v1 }
0x54a7   : > { %13764 = vmatpush3.bf16.msra.mxu0 %v14610_v5 }
0x54a8   : > { %13775 = vmatprep.subr.bf16.mxu0 %v15376_v1 }
0x54fa   : > { %v9521_v24 = vpop.f32.mrb[212].mxu1 }
0x54fb   : > { %v13747_v59 = vpop.f32.mrb[213].mxu1 }
0x54fc   : > { %v9524_v32 = vpop.f32.mrb[214].mxu1 }
0x54fd   : > { %v13748_v60 = vpop.f32.mrb[215].mxu1 }
0x556d   : > { %v9466_v12 = vpop.f32.mrb[196].mxu0 }
0x556e   : > { %v16880_v35 = vadd.f32 %v9521_v24, %v9466_v12  ;;  %v13739_v36 = vpop.f32.mrb[197].mxu0 }
0x556f   : > { %v9469_v37 = vpop.f32.mrb[198].mxu0 }
0x5570   : > { %v13740_v38 = vpop.f32.mrb[199].mxu0 }
0x5575   : > { %v9571_v39 = vpop.f32.mrb[200].mxu0 }
0x5576   : > { %v9577_v42 = vmul.f32 0.17677669, %v9571_v39  ;;  %v13753_v44 = vpop.f32.mrb[201].mxu0 }
0x5577   : > { %v9574_v18 = vpop.f32.mrb[202].mxu0 }
0x5578   : > { %v9578_v30 = vadd.f32 %v9577_v42, %v16007_v57  ;;  %v13754_v48 = vpop.f32.mrb[203].mxu0  ;;  %v12470_v18 = vld [vmem:[%s17261_s2 + $0x3] ss:$0 sm:$0xff]  ;;  %s17273_s2 = sshll.u32 %s15903_s4, 3 }
0x557a   : > { %v9579_v47 = vsel %vm1264_vm4, %v9578_v30, -inf }
0x557b   : > { %9580 = vmax.xlane.f32.xlu0 %v9579_v47 }
0x5591   : > { %9591 = vrot.lane.b32.xlu0 %v16822_v21, %s17270_s30 }
0x5595   : > { %9696 = vrot.lane.b32.xlu0 %v16820_v20, %s17271_s8 }
0x5608   : > { %v9581_v49 = vpop.xlane.xlu0 %9580 }
0x5609   : > { %v9582_v50 = vsub.f32 %v9578_v30, %v9581_v49 }
0x560b   : > { %v9583_v51 = vmul.f32 1.442695, %v9582_v50 }
0x560c   : > { %v9592_v53 = vpop.permute.xlu0 %9591 }
0x560d   : > { %14863 = vpow2.f32 %v9583_v51  ;;  %v9597_v41 = vsel %vm1280_vm2, %v9592_v53, 0  ;;  %v14613_v53 = vld [vmem:[#allocation11 + $0x180] ss:$8 sps:$4 sm:$0xff]  }
0x560e   : > { %13756 = vmatpush3.bf16.msra.mxu1 %v9597_v41  ;;  %v14615_v41 = vld [vmem:[#allocation11 + $0x184] ss:$8 sps:$4 sm:$0xff]  }
0x560f   : > { %13769 = vmatprep.subr.bf16.mxu1 %v15376_v1 }
0x5617   : > { %v14864_v55 = vpop.eup %14863 }
0x5618   : > { %v9585_v54 = vsel %vm1264_vm4, %v14864_v55, 0.0 }
0x5619   : > { %9586 = vadd.xlane.f32.xlu1 %v9585_v54  ;;  %v14622_v54 = vld [vmem:[#allocation8 + $0xc0] sm:$0xff]  }
0x562a   : > { %9698 = vrot.lane.b32.xlu1 %v16824_v3, %s17271_s8  ;;  %v9697_v3 = vpop.permute.xlu0 %9696 }
0x56a6   : > { %v9587_v20 = vpop.xlane.xlu1 %9586 }
0x56a7   : > { %14865 = vrcp.f32 %v9587_v20  ;;  %v14621_v20 = vld [vmem:[#allocation11 + $0x1a4] ss:$8 sps:$4 sm:$0xff]  }
0x56aa   : > { %v9699_v43 = vpop.permute.xlu1 %9698 }
0x56ab   : > { %v9704_v63 = vsel %vm1215_vm1, %v9699_v43, 0  ;;  %v14625_v43 = vld [vmem:[#allocation11 + $0x1b4] ss:$8 sps:$4 sm:$0xff]  }
0x56b1   : > { %v14866_v52 = vpop.eup %14865 }
0x56b2   : > { %v9589_v58 = vmul.f32 %v14866_v52, %v14864_v55  ;;  %v14618_v55 = vld [vmem:[#allocation11 + $0x194] ss:$8 sps:$4 sm:$0xff]   ;;  %v14626_v52 = vld [vmem:[#allocation8 + $0xc8] sm:$0xff]  }
0x56b4   : > { %v9590_v61 = vpack.c.bf16 %v9589_v58, %v9589_v58  ;;  %v14619_v58 = vld [vmem:[#allocation11 + $0x1a0] ss:$8 sps:$4 sm:$0xff]  }
0x56b6   : > { %13758 = vmatmul.mubr.msk.bf16.vlgmr.msra.gmra.mrb[216].mxu1 %vm1264_vm4, %v9590_v61  ;;  %v14629_v61 = vld [vmem:[#allocation11 + $0x1c4] ss:$8 sps:$4 sm:$0xff]  }
0x56b7   : > { %13770 = vmatpush3.bf16.xpose.msra.mxu1 %v9704_v63  ;;  %13771 = vmatprep.mubr.msk.bf16.mxu1 %vm15377_vm0, %v15376_v1  ;;  %v14627_v63 = vld [vmem:[#allocation11 + $0x1c0] ss:$8 sps:$4 sm:$0xff]  }
0x56b8   : > { %13781 = vmatprep.subr.bf16.mxu1 %v15376_v1 }
0x56be   : > { %13772 = vmatmul.mubr.msk.bf16.vlgmr.msra.gmra.mrb[220].mxu1 %vm1215_vm1, %v9697_v3 }
0x56bf   : > { %13785 = vmatprep.mubr.msk.bf16.mxu1 %vm15377_vm0, %v15376_v1  ;;  %13782 = vmatpush3.bf16.msra.mxu1 %v14611_v8 }
0x56c0   : > { %13783 = vmatprep.subr.bf16.mxu1 %v15376_v1 }
0x5789   : > { %v9633_v6 = vpop.f32.mrb[216].mxu1 }
0x578a   : > { %v9639_v29 = vpack.c.bf16 %v9633_v6, %v9633_v6  ;;  %v13759_v4 = vpop.f32.mrb[217].mxu1 }
0x578b   : > { %v9636_v10 = vpop.f32.mrb[218].mxu1  ;;  %v14630_v4 = vld [vmem:[#allocation8 + $0xd0] sm:$0xff]  }
0x578c   : > { %v13760_v15 = vpop.f32.mrb[219].mxu1  ;;  %13766 = vmatmul.mubr.msk.bf16.vlgmr.msra.gmra.mrb[204].mxu0 %vm1215_vm1, %v9639_v29  ;;  %v14633_v10 = vld [vmem:[#allocation11 + $0x1d4] ss:$8 sps:$4 sm:$0xff]  }
0x578d   : > { %13777 = vmatprep.mubr.msk.bf16.mxu0 %vm15377_vm0, %v15376_v1  ;;  %v14631_v15 = vld [vmem:[#allocation11 + $0x1d0] ss:$8 sps:$4 sm:$0xff]  }
0x5791   : > { %v9740_v11 = vpop.f32.mrb[220].mxu1 }
0x5792   : > { %v9746_v13 = vmul.f32 0.17677669, %v9740_v11  ;;  %v13773_v62 = vpop.f32.mrb[221].mxu1  ;;  %v14634_v11 = vld [vmem:[#allocation8 + $0xd8] sm:$0xff]  }
0x5793   : > { %v9743_v14 = vpop.f32.mrb[222].mxu1  ;;  %v14635_v62 = vld [vmem:[#allocation11 + $0x1e0] ss:$8 sps:$4 sm:$0xff]  }
0x5794   : > { %v9747_v40 = vadd.f32 %v9746_v13, %v16007_v57  ;;  %v13774_v9 = vpop.f32.mrb[223].mxu1  ;;  %v14637_v13 = vld [vmem:[#allocation11 + $0x1e4] ss:$8 sps:$4 sm:$0xff]   ;;  %v14638_v14 = vld [vmem:[#allocation8 + $0xe0] sm:$0xff]  }
0x5795   : > { %v14639_v9 = vld [vmem:[#allocation11 + $0x1f0] ss:$8 sps:$4 sm:$0xff]  }
0x5796   : > { %v9748_v17 = vsel %vm1264_vm4, %v9747_v40, -inf }
0x5797   : > { %9749 = vmax.xlane.f32.xlu1 %v9748_v17  ;;  %v14642_v17 = vld [vmem:[#allocation8 + $0xe8] sm:$0xff]  }
0x5824   : > { %v9750_v22 = vpop.xlane.xlu1 %9749 }
0x5825   : > { %v9751_v31 = vsub.f32 %v9747_v40, %v9750_v22  ;;  %v14641_v40 = vld [vmem:[#allocation11 + $0x1f4] ss:$8 sps:$4 sm:$0xff]   ;;  %v14643_v22 = vld [vmem:[#allocation8 + $0xf0] sm:$0xff]  }
0x5827   : > { %v9752_v19 = vmul.f32 1.442695, %v9751_v31  ;;  %v14644_v31 = vld [vmem:[#allocation8 + $0xf8] sm:$0xff]  }
0x5829   : > { %14867 = vpow2.f32 %v9752_v19 }
0x5833   : > { %v14868_v16 = vpop.eup %14867 }
0x5834   : > { %v9754_v23 = vsel %vm1264_vm4, %v14868_v16, 0.0 }
0x5835   : > { %9755 = vadd.xlane.f32.xlu0 %v9754_v23 }
0x584b   : > { %9760 = vrot.lane.b32.xlu0 %v16822_v21, %s17271_s8 }
0x585f   : > { %v9689_v57 = vpop.f32.mrb[204].mxu0 }
0x5860   : > { %v9695_v26 = vadd.f32 %v9689_v57, %v16880_v35  ;;  %v13767_v25 = vpop.f32.mrb[205].mxu0  ;;  %v14612_v35 = vld [vmem:[#allocation7 + $0xf8] sm:$0xff]  }
0x5861   : > { %v9692_v28 = vpop.f32.mrb[206].mxu0  ;;  %13784 = vmatpush3.bf16.msra.mxu1 %v14612_v35 }
0x5862   : > { %v13768_v45 = vpop.f32.mrb[207].mxu0  ;;  %10128 = vmatprep.subr.bf16.mxu1 %v14615_v41 }
0x58c2   : > { %v9756_v24 = vpop.xlane.xlu0 %9755 }
0x58c3   : > { %14869 = vrcp.f32 %v9756_v24  ;;  %v10036_v24 = vld [vmem:[#allocation13 + $0x6] sm:$0x3] }
0x58c6   : > { %v9761_v59 = vpop.permute.xlu0 %9760 }
0x58c7   : > { %v9766_v32 = vsel %vm1280_vm2, %v9761_v59, 0  ;;  %v10041_v59 = vrot.slane %v10036_v24, %v15977_v34 }
0x58c8   : > { %13776 = vmatpush3.bf16.msra.mxu0 %v9766_v32  ;;  %v10045_v32 = vrot.slane %v10036_v24, %v15974_v33 }
0x58c9   : > { %13789 = vmatprep.subr.bf16.mxu0 %v15376_v1 }
0x58cd   : > { %v14870_v60 = vpop.eup %14869 }
0x58ce   : > { %v9758_v21 = vmul.f32 %v14870_v60, %v14868_v16 }
0x58d0   : > { %v9759_v12 = vpack.c.bf16 %v9758_v21, %v9758_v21 }
0x58d2   : > { %13778 = vmatmul.mubr.msk.bf16.vlgmr.msra.gmra.mrb[208].mxu0 %vm1264_vm4, %v9759_v12 }
0x58d3   : > { %13805 = vmatprep.mubr.msk.bf16.mxu0 %vm15377_vm0, %v15376_v1  ;;  %13790 = vmatpush3.bf16.msra.mxu0 %v14622_v54 }
0x58d4   : > { %13791 = vmatprep.subr.bf16.mxu0 %v15376_v1 }
0x58d7   : > { %13792 = vmatpush3.bf16.msra.mxu0 %v14626_v52 }
0x58d8   : > { %13793 = vmatprep.subr.bf16.mxu0 %v15376_v1 }
0x58db   : > { %13794 = vmatpush3.bf16.msra.mxu0 %v14630_v4 }
0x58dc   : > { %13795 = vmatprep.subr.bf16.mxu0 %v15376_v1 }
0x58df   : > { %13796 = vmatpush3.bf16.msra.mxu0 %v14634_v11 }
0x58e0   : > { %13797 = vmatprep.subr.bf16.mxu0 %v15376_v1 }
0x58e3   : > { %13798 = vmatpush3.bf16.msra.mxu0 %v14638_v14 }
0x58e4   : > { %13799 = vmatprep.subr.bf16.mxu0 %v15376_v1 }
0x58e7   : > { %13800 = vmatpush3.bf16.msra.mxu0 %v14642_v17 }
0x58e8   : > { %13801 = vmatprep.subr.bf16.mxu0 %v15376_v1 }
0x58eb   : > { %13802 = vmatpush3.bf16.msra.mxu0 %v14643_v22 }
0x58ec   : > { %13803 = vmatprep.subr.bf16.mxu0 %v15376_v1 }
0x58ef   : > { %13804 = vmatpush3.bf16.msra.mxu0 %v14644_v31 }
0x58f0   : > { %13809 = vmatprep.subr.bf16.mxu0 %v15376_v1 }
0x59a5   : > { %v9802_v36 = vpop.f32.mrb[208].mxu0 }
0x59a6   : > { %v9808_v37 = vpack.c.bf16 %v9802_v36, %v9802_v36  ;;  %v13779_v38 = vpop.f32.mrb[209].mxu0 }
0x59a7   : > { %v9805_v39 = vpop.f32.mrb[210].mxu0 }
0x59a8   : > { %v13780_v42 = vpop.f32.mrb[211].mxu0  ;;  %13786 = vmatmul.mubr.msk.bf16.vlgmr.msra.gmra.mrb[224].mxu1 %vm1215_vm1, %v9808_v37 }
0x59a9   : > { %10160 = vmatprep.mubr.bf16.mxu1 %v15375_v0  ;;  %10129 = vmatpush1.bf16.msra.mxu1 %v14613_v53 }
0x59aa   : > { %10130 = vmatprep.subr.bf16.mxu1 %v14618_v55 }
0x59ad   : > { %10131 = vmatpush1.bf16.msra.mxu1 %v14616_v56 }
0x59ae   : > { %10132 = vmatprep.subr.bf16.mxu1 %v14621_v20 }
0x59b1   : > { %10133 = vmatpush1.bf16.msra.mxu1 %v14619_v58 }
0x59b2   : > { %10134 = vmatprep.subr.bf16.mxu1 %v14625_v43 }
0x5a7b   : > { %v9858_v44 = vpop.f32.mrb[224].mxu1 }
0x5a7c   : > { %v9864_v30 = vadd.f32 %v9858_v44, %v9695_v26  ;;  %v13787_v48 = vpop.f32.mrb[225].mxu1  ;;  %v12474_v26 = vld [vmem:[%s17263_s23 + $0x3] ss:$0 sm:$0xff] }
0x5a7d   : > { %v9861_v47 = vpop.f32.mrb[226].mxu1 }
0x5a7e   : > { %v9873_v49 = vadd.f32 %v12470_v18, %v9864_v30  ;;  %v13788_v50 = vpop.f32.mrb[227].mxu1  ;;  %v12475_v18 = vld [vmem:[#allocation10 + $0x3] ss:$0 sm:$0xff] }
0x5a80   : > { %v9874_v51 = vadd.f32 %v9873_v49, %v16806_v7  ;;  %v14623_v7 = vld [vmem:[#allocation11 + $0x1b0] ss:$8 sps:$4 sm:$0xff]  }
0x5a81   : > { %10135 = vmatpush1.bf16.msra.mxu1 %v14623_v7 }
0x5a82   : > { %9879 = vadd.xlane.f32.xlu1 %v9874_v51  ;;  %10136 = vmatprep.subr.bf16.mxu1 %v14629_v61 }
0x5a85   : > { %10137 = vmatpush1.bf16.msra.mxu1 %v14627_v63 }
0x5a86   : > { %10138 = vmatprep.subr.bf16.mxu1 %v14633_v10 }
0x5a89   : > { %10139 = vmatpush1.bf16.msra.mxu1 %v14631_v15 }
0x5a8a   : > { %10140 = vmatprep.subr.bf16.mxu1 %v14637_v13 }
0x5a8d   : > { %10141 = vmatpush1.bf16.msra.mxu1 %v14635_v62 }
0x5a8e   : > { %10142 = vmatprep.subr.bf16.mxu1 %v14641_v40 }
0x5a91   : > { %10143 = vmatpush1.bf16.msra.mxu1 %v14639_v9 }
0x5a92   : > { %13815 = vmatprep.subr.bf16.mxu1 %v15376_v1 }
0x5a94   : > { %10161 = vmatmul.mubr.bf16.vlgmr.msra.gmra.mrb[228].mxu1 %v15953_v27  ;;  %v12473_v27 = vld [vmem:[%s17262_s20 + $0x3] ss:$0 sm:$0xff] }
0x5a95   : > { %13817 = vmatprep.mubr.msk.bf16.mxu1 %vm15377_vm0, %v15376_v1 }
0x5b0f   : > { %v9880_v3 = vpop.xlane.xlu1 %9879 }
0x5b10   : > { %v9881_v5 = vmul.f32 0.0078125, %v9880_v3 }
0x5b12   : > { %v9882_v6 = vsub.f32 %v9874_v51, %v9881_v5 }
0x5b14   : > { %v9883_v29 = vmul.f32 %v9882_v6, %v9882_v6 }
0x5b16   : > { %9884 = vadd.xlane.f32.xlu1 %v9883_v29 }
0x5b67   : > { %v10162_v60 = vpop.f32.mrb[228].mxu1 }
0x5b68   : > { %v10163_v21 = vadd.f32 %v10162_v60, %v10041_v59  ;;  %v10164_v12 = vpop.f32.mrb[229].mxu1  ;;  %v14646_v59 = vld [vmem:[#allocation14 + $0xc8] sm:$0xff]  }
0x5b69   : > { %v10165_v35 = vadd.f32 %v10164_v12, %v10045_v32  ;;  %v10166_v36 = vpop.f32.mrb[230].mxu1 }
0x5b6a   : > { %v16950_v37 = vpack.c.bf16 %v10163_v21, %v10163_v21  ;;  %v10167_v38 = vpop.f32.mrb[231].mxu1 }
0x5b6b   : > { %v16952_v39 = vpack.c.bf16 %v10165_v35, %v10165_v35 }
0x5b6c   : > { %10299 = vrot.lane.b32.xlu1 %v16950_v37, %s17269_s21  ;;  %v10193_v42 = vsel %vm1215_vm1, %v16950_v37, 0 }
0x5b6d   : > { %v10252_v44 = vsel %vm1280_vm2, %v16952_v39, 0 }
0x5b6e   : > { %13816 = vmatpush3.bf16.msra.mxu1 %v10252_v44 }
0x5b6f   : > { %13827 = vmatprep.subr.bf16.mxu1 %v15376_v1 }
0x5ba3   : > { %v9885_v19 = vpop.xlane.xlu1 %9884 }
0x5ba4   : > { %v9886_v16 = vmul.f32 0.0078125, %v9885_v19 }
0x5ba6   : > { %v9887_v23 = vadd.f32 1e-05, %v9886_v16 }
0x5ba8   : > { %14871 = vrsqrt.f32 %v9887_v23 }
0x5bb2   : > { %v14872_v8 = vpop.eup %14871 }
0x5bb3   : > { %v9889_v57 = vmul.f32 %v14872_v8, %v9882_v6  ;;  %v14647_v8 = vld [vmem:[#allocation14 + $0xd0] sm:$0xff]  }
0x5bb5   : > { %v9896_v25 = vmul.f32 %v12473_v27, %v9889_v57  ;;  %v14648_v27 = vld [vmem:[#allocation14 + $0xd8] sm:$0xff]  }
0x5bb7   : > { %v16942_v28 = vadd.f32 %v12474_v26, %v9896_v25 }
0x5bb9   : > { %v9904_v45 = vpack.c.bf16 %v16942_v28, %v16942_v28 }
0x5bbb   : > { %13806 = vmatmul.mubr.bf16.vlgmr.msra.gmra.mrb[212].mxu0 %v9904_v45  ;;  %v14645_v45 = vld [vmem:[#allocation14 + $0xc0] sm:$0xff]  }
0x5bbc   : > { %13811 = vmatprep.mubr.msk.bf16.mxu0 %vm15377_vm0, %v15376_v1  ;;  %13810 = vmatpush3.bf16.xpose.msra.mxu0 %v10193_v42 }
0x5bbd   : > { %13821 = vmatprep.subr.bf16.mxu0 %v15376_v1 }
0x5bde   : > { %v10300_v48 = vpop.permute.xlu1 %10299 }
0x5bdf   : > { %v10305_v41 = vsel %vm1215_vm1, %v10300_v48, 0 }
0x5c8e   : > { %v10012_v30 = vpop.f32.mrb[212].mxu0 }
0x5c8f   : > { %v10013_v47 = vadd.f32 %v12475_v18, %v10012_v30  ;;  %v13807_v49 = vpop.f32.mrb[213].mxu0 }
0x5c90   : > { %v10015_v50 = vpop.f32.mrb[214].mxu0 }
0x5c91   : > { %v16962_v51 = vpack.c.bf16 %v10013_v47, %v10013_v47  ;;  %v13808_v53 = vpop.f32.mrb[215].mxu0 }
0x5c93   : > { %10296 = vrot.lane.b32.xlu0 %v16962_v51, %s17269_s21  ;;  %13812 = vmatmul.mubr.msk.bf16.vlgmr.msra.gmra.mrb[216].mxu0 %vm1215_vm1, %v16962_v51 }
0x5c94   : > { %13822 = vmatpush3.bf16.xpose.msra.mxu0 %v10305_v41  ;;  %13823 = vmatprep.mubr.msk.bf16.mxu0 %vm15377_vm0, %v15376_v1 }
0x5c95   : > { %13833 = vmatprep.subr.bf16.mxu0 %v15376_v1 }
0x5d05   : > { %v10297_v55 = vpop.permute.xlu0 %10296 }
0x5d06   : > { %13824 = vmatmul.mubr.msk.bf16.vlgmr.msra.gmra.mrb[220].mxu0 %vm1215_vm1, %v10297_v55 }
0x5d07   : > { %13837 = vmatprep.mubr.msk.bf16.mxu0 %vm15377_vm0, %v15376_v1  ;;  %13834 = vmatpush3.bf16.msra.mxu0 %v14647_v8 }
0x5d08   : > { %13835 = vmatprep.subr.bf16.mxu0 %v15376_v1 }
0x5d0b   : > { %13836 = vmatpush3.bf16.msra.mxu0 %v14648_v27 }
0x5d0c   : > { %13849 = vmatprep.subr.bf16.mxu0 %v15376_v1 }
0x5d66   : > { %v10229_v54 = vpop.f32.mrb[216].mxu0 }
0x5d67   : > { %v10235_v56 = vmul.f32 0.17677669, %v10229_v54  ;;  %v13813_v20 = vpop.f32.mrb[217].mxu0 }
0x5d68   : > { %v10232_v52 = vpop.f32.mrb[218].mxu0 }
0x5d69   : > { %v13814_v58 = vpop.f32.mrb[219].mxu0  ;;  %v10236_v43 = vsel %vm1264_vm4, %v10235_v56, -inf }
0x5d6a   : > { %10237 = vmax.xlane.f32.xlu0 %v10236_v43 }
0x5dd9   : > { %v10341_v7 = vpop.f32.mrb[220].mxu0 }
0x5dda   : > { %v10347_v61 = vmul.f32 0.17677669, %v10341_v7  ;;  %v13825_v63 = vpop.f32.mrb[221].mxu0 }
0x5ddb   : > { %v10344_v3 = vpop.f32.mrb[222].mxu0 }
0x5ddc   : > { %v13826_v5 = vpop.f32.mrb[223].mxu0  ;;  %v10348_v6 = vsel %vm1264_vm4, %v10347_v61, -inf }
0x5ddd   : > { %10349 = vmax.xlane.f32.xlu1 %v10348_v6 }
0x5dee   : > { %10361 = vrot.lane.b32.xlu1 %v16952_v39, %s17269_s21 }
0x5df2   : > { %10520 = vrot.lane.b32.xlu1 %v16962_v51, %s17270_s30 }
0x5df7   : > { %v10238_v29 = vpop.xlane.xlu0 %10237 }
0x5df8   : > { %v10239_v4 = vsub.f32 %v10235_v56, %v10238_v29 }
0x5dfa   : > { %v10240_v10 = vmul.f32 1.442695, %v10239_v4 }
0x5dfc   : > { %14873 = vpow2.f32 %v10240_v10 }
0x5e06   : > { %v14874_v15 = vpop.eup %14873 }
0x5e07   : > { %v10242_v11 = vsel %vm1264_vm4, %v14874_v15, 0.0 }
0x5e08   : > { %10243 = vadd.xlane.f32.xlu0 %v10242_v11 }
0x5e6a   : > { %v10350_v13 = vpop.xlane.xlu1 %10349 }
0x5e6b   : > { %v10351_v62 = vsub.f32 %v10347_v61, %v10350_v13 }
0x5e6d   : > { %v10352_v14 = vmul.f32 1.442695, %v10351_v62 }
0x5e6e   : > { %v10362_v19 = vpop.permute.xlu1 %10361 }
0x5e6f   : > { %14875 = vpow2.f32 %v10352_v14  ;;  %v10367_v23 = vsel %vm1280_vm2, %v10362_v19, 0 }
0x5e72   : > { %v10521_v47 = vpop.permute.xlu1 %10520 }
0x5e79   : > { %v14876_v40 = vpop.eup %14875 }
0x5e7a   : > { %v10354_v9 = vsel %vm1264_vm4, %v14876_v40, 0.0 }
0x5e7b   : > { %10355 = vadd.xlane.f32.xlu0 %v10354_v9 }
0x5e91   : > { %10522 = vrot.lane.b32.xlu0 %v16950_v37, %s17270_s30 }
0x5e95   : > { %v10244_v17 = vpop.xlane.xlu0 %10243 }
0x5e96   : > { %14877 = vrcp.f32 %v10244_v17 }
0x5ea0   : > { %v14878_v22 = vpop.eup %14877 }
0x5ea1   : > { %v10246_v31 = vmul.f32 %v14878_v22, %v14874_v15  ;;  %v14649_v15 = vld [vmem:[#allocation14 + $0xe0] sm:$0xff]   ;;  %v14650_v22 = vld [vmem:[#allocation14 + $0xe8] sm:$0xff]  }
0x5ea3   : > { %v10247_v16 = vpack.c.bf16 %v10246_v31, %v10246_v31 }
0x5ea5   : > { %13818 = vmatmul.mubr.msk.bf16.vlgmr.msra.gmra.mrb[232].mxu1 %vm1264_vm4, %v10247_v16 }
0x5ea6   : > { %13828 = vmatpush3.bf16.msra.mxu1 %v10367_v23  ;;  %13829 = vmatprep.mubr.msk.bf16.mxu1 %vm15377_vm0, %v15376_v1 }
0x5ea7   : > { %13841 = vmatprep.subr.bf16.mxu1 %v15376_v1 }
0x5f08   : > { %v10356_v57 = vpop.xlane.xlu0 %10355 }
0x5f09   : > { %14879 = vrcp.f32 %v10356_v57 }
0x5f0c   : > { %v10523_v36 = vpop.permute.xlu0 %10522 }
0x5f0d   : > { %v10528_v30 = vsel %vm1215_vm1, %v10523_v36, 0 }
0x5f13   : > { %v14880_v26 = vpop.eup %14879 }
0x5f14   : > { %v10358_v25 = vmul.f32 %v14880_v26, %v14876_v40 }
0x5f16   : > { %v10359_v24 = vpack.c.bf16 %v10358_v25, %v10358_v25 }
0x5f18   : > { %13830 = vmatmul.mubr.msk.bf16.vlgmr.msra.gmra.mrb[236].mxu1 %vm1264_vm4, %v10359_v24 }
0x5f19   : > { %13842 = vmatpush3.bf16.msra.mxu1 %v14645_v45  ;;  %13845 = vmatprep.mubr.msk.bf16.mxu1 %vm15377_vm0, %v15376_v1 }
0x5f1a   : > { %13843 = vmatprep.subr.bf16.mxu1 %v15376_v1 }
0x5f1d   : > { %13844 = vmatpush3.bf16.msra.mxu1 %v14646_v59 }
0x5f1e   : > { %13855 = vmatprep.subr.bf16.mxu1 %v15376_v1 }
0x5f78   : > { %v10288_v32 = vpop.f32.mrb[232].mxu1 }
0x5f79   : > { %v10294_v60 = vpack.c.bf16 %v10288_v32, %v10288_v32  ;;  %v13819_v21 = vpop.f32.mrb[233].mxu1 }
0x5f7a   : > { %v10291_v12 = vpop.f32.mrb[234].mxu1 }
0x5f7b   : > { %v13820_v35 = vpop.f32.mrb[235].mxu1  ;;  %13846 = vmatmul.mubr.msk.bf16.vlgmr.msra.gmra.mrb[240].mxu1 %vm1215_vm1, %v10294_v60 }
0x5f7c   : > { %13857 = vmatprep.mubr.msk.bf16.mxu1 %vm15377_vm0, %v15376_v1 }
0x5feb   : > { %v10403_v38 = vpop.f32.mrb[236].mxu1 }
0x5fec   : > { %v10409_v42 = vpack.c.bf16 %v10403_v38, %v10403_v38  ;;  %v13831_v44 = vpop.f32.mrb[237].mxu1  ;;  %v14651_v38 = vld [vmem:[#allocation14 + $0xf0] sm:$0xff]  }
0x5fed   : > { %v10406_v18 = vpop.f32.mrb[238].mxu1 }
0x5fee   : > { %v13832_v48 = vpop.f32.mrb[239].mxu1  ;;  %13838 = vmatmul.mubr.msk.bf16.vlgmr.msra.gmra.mrb[224].mxu0 %vm1215_vm1, %v10409_v42 }
0x5fef   : > { %13850 = vmatpush3.bf16.xpose.msra.mxu0 %v10528_v30  ;;  %13851 = vmatprep.mubr.msk.bf16.mxu0 %vm15377_vm0, %v15376_v1 }
0x5ff0   : > { %13861 = vmatprep.subr.bf16.mxu0 %v15376_v1 }
0x5ff6   : > { %13852 = vmatmul.mubr.msk.bf16.vlgmr.msra.gmra.mrb[228].mxu0 %vm1215_vm1, %v10521_v47 }
0x5ff7   : > { %13865 = vmatprep.mubr.msk.bf16.mxu0 %vm15377_vm0, %v15376_v1  ;;  %13862 = vmatpush3.bf16.msra.mxu0 %v14649_v15  ;;  %v14661_v15 = vld [vmem:[#allocation17 + $0x324] ss:$16 sps:$4 sm:$0xff]  }
0x5ff8   : > { %13863 = vmatprep.subr.bf16.mxu0 %v15376_v1 }
0x5ffb   : > { %13864 = vmatpush3.bf16.msra.mxu0 %v14650_v22  ;;  %v14673_v22 = vld [vmem:[#allocation17 + $0x364] ss:$16 sps:$4 sm:$0xff]  }
0x5ffc   : > { %13875 = vmatprep.subr.bf16.mxu0 %v15376_v1 }
0x604e   : > { %v10514_v49 = vpop.f32.mrb[240].mxu1 }
0x604f   : > { %v13847_v50 = vpop.f32.mrb[241].mxu1 }
0x6050   : > { %v10517_v53 = vpop.f32.mrb[242].mxu1 }
0x6051   : > { %v13848_v41 = vpop.f32.mrb[243].mxu1  ;;  %v14652_v53 = vld [vmem:[#allocation14 + $0xf8] sm:$0xff]  }
0x60c1   : > { %v10459_v55 = vpop.f32.mrb[224].mxu0 }
0x60c2   : > { %v17008_v54 = vadd.f32 %v10514_v49, %v10459_v55  ;;  %v13839_v56 = vpop.f32.mrb[225].mxu0 }
0x60c3   : > { %v10462_v20 = vpop.f32.mrb[226].mxu0 }
0x60c4   : > { %v13840_v52 = vpop.f32.mrb[227].mxu0 }
0x60c9   : > { %v10564_v58 = vpop.f32.mrb[228].mxu0 }
0x60ca   : > { %v10570_v43 = vmul.f32 0.17677669, %v10564_v58  ;;  %v13853_v7 = vpop.f32.mrb[229].mxu0  ;;  %v12520_v58 = vld [vmem:[#allocation16 + $0x3] ss:$0 sm:$0xff] }
0x60cb   : > { %v10567_v61 = vpop.f32.mrb[230].mxu0 }
0x60cc   : > { %v13854_v63 = vpop.f32.mrb[231].mxu0  ;;  %v10571_v3 = vsel %vm1264_vm4, %v10570_v43, -inf }
0x60cd   : > { %10572 = vmax.xlane.f32.xlu1 %v10571_v3 }
0x60de   : > { %10690 = vrot.lane.b32.xlu1 %v16950_v37, %s17271_s8 }
0x60e2   : > { %10688 = vrot.lane.b32.xlu1 %v16962_v51, %s17271_s8 }
0x615a   : > { %v10573_v5 = vpop.xlane.xlu1 %10572 }
0x615b   : > { %v10574_v6 = vsub.f32 %v10570_v43, %v10573_v5 }
0x615d   : > { %v10575_v29 = vmul.f32 1.442695, %v10574_v6  ;;  %v14653_v6 = vld [vmem:[#allocation17 + $0x300] ss:$16 sps:$4 sm:$0xff]  }
0x615e   : > { %v10691_v14 = vpop.permute.xlu1 %10690 }
0x615f   : > { %14881 = vpow2.f32 %v10575_v29  ;;  %v10696_v9 = vsel %vm1215_vm1, %v10691_v14, 0  ;;  %v14655_v29 = vld [vmem:[#allocation17 + $0x304] ss:$16 sps:$4 sm:$0xff]  }
0x6162   : > { %v10689_v17 = vpop.permute.xlu1 %10688 }
0x6169   : > { %v14882_v4 = vpop.eup %14881 }
0x616a   : > { %v10577_v10 = vsel %vm1264_vm4, %v14882_v4, 0.0 }
0x616b   : > { %10578 = vadd.xlane.f32.xlu0 %v10577_v10  ;;  %v14658_v10 = vld [vmem:[#allocation17 + $0x30c] ss:$16 sps:$4 sm:$0xff]  }
0x6181   : > { %10583 = vrot.lane.b32.xlu0 %v16952_v39, %s17270_s30 }
0x61f8   : > { %v10579_v11 = vpop.xlane.xlu0 %10578 }
0x61f9   : > { %14883 = vrcp.f32 %v10579_v11  ;;  %v14664_v11 = vld [vmem:[#allocation17 + $0x32c] ss:$16 sps:$4 sm:$0xff]  }
0x61fc   : > { %v10584_v37 = vpop.permute.xlu0 %10583 }
0x61fd   : > { %v10589_v51 = vsel %vm1280_vm2, %v10584_v37, 0  ;;  %v14662_v37 = vld [vmem:[#allocation17 + $0x328] ss:$16 sps:$4 sm:$0xff]  }
0x61fe   : > { %13856 = vmatpush3.bf16.msra.mxu1 %v10589_v51  ;;  %v14667_v51 = vld [vmem:[#allocation17 + $0x344] ss:$16 sps:$4 sm:$0xff]  }
0x61ff   : > { %13869 = vmatprep.subr.bf16.mxu1 %v15376_v1 }
0x6203   : > { %v14884_v13 = vpop.eup %14883 }
0x6204   : > { %v10581_v62 = vmul.f32 %v14884_v13, %v14882_v4  ;;  %v14656_v4 = vld [vmem:[#allocation17 + $0x308] ss:$16 sps:$4 sm:$0xff]   ;;  %v14670_v13 = vld [vmem:[#allocation17 + $0x34c] ss:$16 sps:$4 sm:$0xff]  }
0x6206   : > { %v10582_v40 = vpack.c.bf16 %v10581_v62, %v10581_v62  ;;  %v14665_v62 = vld [vmem:[#allocation17 + $0x340] ss:$16 sps:$4 sm:$0xff]  }
0x6208   : > { %13858 = vmatmul.mubr.msk.bf16.vlgmr.msra.gmra.mrb[244].mxu1 %vm1264_vm4, %v10582_v40 }
0x6209   : > { %13870 = vmatpush3.bf16.xpose.msra.mxu1 %v10696_v9  ;;  %13871 = vmatprep.mubr.msk.bf16.mxu1 %vm15377_vm0, %v15376_v1 }
0x620a   : > { %13881 = vmatprep.subr.bf16.mxu1 %v15376_v1 }
0x6210   : > { %13872 = vmatmul.mubr.msk.bf16.vlgmr.msra.gmra.mrb[248].mxu1 %vm1215_vm1, %v10689_v17 }
0x6211   : > { %13885 = vmatprep.mubr.msk.bf16.mxu1 %vm15377_vm0, %v15376_v1  ;;  %13882 = vmatpush3.bf16.msra.mxu1 %v14651_v38  ;;  %v14698_v38 = vld [vmem:[#allocation17 + $0x3e8] ss:$16 sps:$4 sm:$0xff]  }
0x6212   : > { %13883 = vmatprep.subr.bf16.mxu1 %v15376_v1 }
0x6215   : > { %13884 = vmatpush3.bf16.msra.mxu1 %v14652_v53 }
0x6216   : > { %11153 = vmatprep.subr.bf16.mxu1 %v14658_v10  ;;  %v14717_v10 = vld [vmem:[#allocation19 + $0x360] sm:$0xff]  }
0x62db   : > { %v10625_v31 = vpop.f32.mrb[244].mxu1 }
0x62dc   : > { %v10631_v19 = vpack.c.bf16 %v10625_v31, %v10625_v31  ;;  %v13859_v16 = vpop.f32.mrb[245].mxu1  ;;  %v14676_v31 = vld [vmem:[#allocation17 + $0x36c] ss:$16 sps:$4 sm:$0xff]  }
0x62dd   : > { %v10628_v23 = vpop.f32.mrb[246].mxu1  ;;  %v14674_v16 = vld [vmem:[#allocation17 + $0x368] ss:$16 sps:$4 sm:$0xff]  }
0x62de   : > { %v13860_v8 = vpop.f32.mrb[247].mxu1  ;;  %13866 = vmatmul.mubr.msk.bf16.vlgmr.msra.gmra.mrb[232].mxu0 %vm1215_vm1, %v10631_v19  ;;  %v14671_v19 = vld [vmem:[#allocation17 + $0x360] ss:$16 sps:$4 sm:$0xff]   ;;  %v14679_v23 = vld [vmem:[#allocation17 + $0x384] ss:$16 sps:$4 sm:$0xff]  }
0x62df   : > { %13877 = vmatprep.mubr.msk.bf16.mxu0 %vm15377_vm0, %v15376_v1  ;;  %v14682_v8 = vld [vmem:[#allocation17 + $0x38c] ss:$16 sps:$4 sm:$0xff]  }
0x62e3   : > { %v10732_v27 = vpop.f32.mrb[248].mxu1 }
0x62e4   : > { %v10738_v57 = vmul.f32 0.17677669, %v10732_v27  ;;  %v13873_v26 = vpop.f32.mrb[249].mxu1  ;;  %v14677_v27 = vld [vmem:[#allocation17 + $0x380] ss:$16 sps:$4 sm:$0xff]  }
0x62e5   : > { %v10735_v25 = vpop.f32.mrb[250].mxu1  ;;  %v14685_v26 = vld [vmem:[#allocation17 + $0x3a4] ss:$16 sps:$4 sm:$0xff]  }
0x62e6   : > { %v13874_v45 = vpop.f32.mrb[251].mxu1  ;;  %v10739_v24 = vsel %vm1264_vm4, %v10738_v57, -inf  ;;  %v14688_v25 = vld [vmem:[#allocation17 + $0x3ac] ss:$16 sps:$4 sm:$0xff]  }
0x62e7   : > { %10740 = vmax.xlane.f32.xlu0 %v10739_v24  ;;  %v14683_v45 = vld [vmem:[#allocation17 + $0x3a0] ss:$16 sps:$4 sm:$0xff]   ;;  %v14686_v24 = vld [vmem:[#allocation17 + $0x3a8] ss:$16 sps:$4 sm:$0xff]  }
0x62fd   : > { %10751 = vrot.lane.b32.xlu0 %v16952_v39, %s17271_s8  ;;  %s17274_s8 = sld [smem:[#allocation54_spill]] }
0x6374   : > { %v10741_v59 = vpop.xlane.xlu0 %10740 }
0x6375   : > { %v10742_v32 = vsub.f32 %v10738_v57, %v10741_v59  ;;  %v14680_v57 = vld [vmem:[#allocation17 + $0x388] ss:$16 sps:$4 sm:$0xff]   ;;  %v14691_v59 = vld [vmem:[#allocation17 + $0x3c4] ss:$16 sps:$4 sm:$0xff]  }
0x6377   : > { %v10743_v60 = vmul.f32 1.442695, %v10742_v32  ;;  %v14694_v32 = vld [vmem:[#allocation17 + $0x3cc] ss:$16 sps:$4 sm:$0xff]  }
0x6378   : > { %v10752_v21 = vpop.permute.xlu0 %10751 }
0x6379   : > { %14885 = vpow2.f32 %v10743_v60  ;;  %v10757_v12 = vsel %vm1280_vm2, %v10752_v21, 0  ;;  %v14689_v60 = vld [vmem:[#allocation17 + $0x3c0] ss:$16 sps:$4 sm:$0xff]   ;;  %v14692_v21 = vld [vmem:[#allocation17 + $0x3c8] ss:$16 sps:$4 sm:$0xff]  }
0x637a   : > { %13876 = vmatpush3.bf16.msra.mxu0 %v10757_v12  ;;  %v14697_v12 = vld [vmem:[#allocation17 + $0x3e4] ss:$16 sps:$4 sm:$0xff]  }
0x637b   : > { %11112 = vmatprep.subr.bf16.mxu0 %v14655_v29  ;;  %v14715_v29 = vld [vmem:[#allocation19 + $0x318] sm:$0xff]  }
0x6383   : > { %v14886_v35 = vpop.eup %14885 }
0x6384   : > { %v10745_v36 = vsel %vm1264_vm4, %v14886_v35, 0.0 }
0x6385   : > { %10746 = vadd.xlane.f32.xlu1 %v10745_v36  ;;  %v14695_v36 = vld [vmem:[#allocation17 + $0x3e0] ss:$16 sps:$4 sm:$0xff]  }
0x63b1   : > { %v10681_v42 = vpop.f32.mrb[232].mxu0 }
0x63b2   : > { %v10687_v44 = vadd.f32 %v10681_v42, %v17008_v54  ;;  %v13867_v39 = vpop.f32.mrb[233].mxu0  ;;  %v14701_v42 = vld [vmem:[#allocation19 + $0x340] sm:$0xff]  }
0x63b3   : > { %v10684_v18 = vpop.f32.mrb[234].mxu0 }
0x63b4   : > { %v13868_v30 = vpop.f32.mrb[235].mxu0 }
0x6412   : > { %v10747_v48 = vpop.xlane.xlu1 %10746 }
0x6413   : > { %14887 = vrcp.f32 %v10747_v48 }
0x641d   : > { %v14888_v47 = vpop.eup %14887 }
0x641e   : > { %v10749_v49 = vmul.f32 %v14888_v47, %v14886_v35  ;;  %v14700_v35 = vld [vmem:[#allocation17 + $0x3ec] ss:$16 sps:$4 sm:$0xff]   ;;  %v12523_v47 = vld [vmem:[%s17264_s29 + $0x3] ss:$0 sm:$0xff] }
0x6420   : > { %v10750_v50 = vpack.c.bf16 %v10749_v49, %v10749_v49 }
0x6422   : > { %13878 = vmatmul.mubr.msk.bf16.vlgmr.msra.gmra.mrb[236].mxu0 %vm1264_vm4, %v10750_v50  ;;  %v12524_v50 = vld [vmem:[%s17265_s7 + $0x3] ss:$0 sm:$0xff]  ;;  %s926_s7 = scalar_lea.vmem [#allocation23], %s17273_s2  ;;  %s15381_s2 = smov [#allocation23]  }
0x6423   : > { %11144 = vmatprep.mubr.bf16.mxu0 %v15375_v0  ;;  %11113 = vmatpush1.bf16.msra.mxu0 %v14653_v6  ;;  %v14714_v6 = vld [vmem:[#allocation19 + $0x3d8] sm:$0xff]   ;;  %s11704_s10 = sshll.u32 %s926_s7, 4  ;;  %s15263_s13 = sshll.u32 %s15381_s2, 4  ;;  %s17090_s10 = int_to_ptr.vmem [resolvable:$true] %s11704_s10  ;;  %s15264_s13 = int_to_ptr.vmem [resolvable:$false] %s15263_s13 }
0x6424   : > { %11114 = vmatprep.subr.bf16.mxu0 %v14661_v15  ;;  %v14718_v15 = vld [vmem:[#allocation19 + $0x3e0] sm:$0xff]   ;;  %s15259_s12 = scalar_lea.vmem %s17090_s10, 128  ;;  %p15266_p4 = scmp.lt.s32.totalorder %s17090_s10, %s15264_s13 }
0x6425   : > { %p15260_p13 = scmp.ne.s32.totalorder %s17090_s10, %s15259_s12 }
0x6427   : > { %p15261_p6 = pnand %p15260_p13, %p17275_p3 }
0x6429   : > { %p15262_p9 = pneg %p15261_p6 }
0x64f5   : > { %v10793_v41 = vpop.f32.mrb[236].mxu0 }
0x64f6   : > { %v10799_v55 = vpack.c.bf16 %v10793_v41, %v10793_v41  ;;  %v13879_v56 = vpop.f32.mrb[237].mxu0 }
0x64f7   : > { %v10796_v20 = vpop.f32.mrb[238].mxu0  ;;  %v14704_v56 = vld [vmem:[#allocation19 + $0x380] sm:$0xff]  }
0x64f8   : > { %v13880_v52 = vpop.f32.mrb[239].mxu0  ;;  %13886 = vmatmul.mubr.msk.bf16.vlgmr.msra.gmra.mrb[252].mxu1 %vm1215_vm1, %v10799_v55  ;;  %v14703_v55 = vld [vmem:[#allocation19 + $0x300] sm:$0xff]  }
0x64f9   : > { %11185 = vmatprep.mubr.bf16.mxu1 %v15375_v0  ;;  %v14659_v0 = vld [vmem:[#allocation17 + $0x320] ss:$16 sps:$4 sm:$0xff]   ;;  %11154 = vmatpush1.bf16.msra.mxu1 %v14656_v4  ;;  %v14705_v52 = vld [vmem:[#allocation19 + $0x348] sm:$0xff]   ;;  %v14716_v4 = vld [vmem:[#allocation19 + $0x398] sm:$0xff]  }
0x64fa   : > { %11155 = vmatprep.subr.bf16.mxu1 %v14664_v11  ;;  %11115 = vmatpush1.bf16.msra.mxu0 %v14659_v0  ;;  %v14719_v11 = vld [vmem:[#allocation19 + $0x320] sm:$0xff]  }
0x64fb   : > { %11116 = vmatprep.subr.bf16.mxu0 %v14667_v51  ;;  %v14720_v0 = vld [vmem:[#allocation19 + $0x3a0] sm:$0xff]   ;;  %v14722_v51 = vld [vmem:[#allocation19 + $0x3e8] sm:$0xff]  }
0x64fd   : > { %11156 = vmatpush1.bf16.msra.mxu1 %v14662_v37  ;;  %v14721_v37 = vld [vmem:[#allocation19 + $0x368] sm:$0xff]  }
0x64fe   : > { %11157 = vmatprep.subr.bf16.mxu1 %v14670_v13  ;;  %11117 = vmatpush1.bf16.msra.mxu0 %v14665_v62  ;;  %v14723_v13 = vld [vmem:[#allocation19 + $0x328] sm:$0xff]  }
0x64ff   : > { %11118 = vmatprep.subr.bf16.mxu0 %v14673_v22  ;;  %v14724_v62 = vld [vmem:[#allocation19 + $0x3a8] sm:$0xff]   ;;  %v14730_v22 = vld [vmem:[#allocation19 + $0x3f8] sm:$0xff]  }
0x6502   : > { %11119 = vmatpush1.bf16.msra.mxu0 %v14671_v19  ;;  %v14732_v19 = vld [vmem:[#allocation19 + $0x3b8] sm:$0xff]  }
0x6503   : > { %11120 = vmatprep.subr.bf16.mxu0 %v14679_v23 }
0x6506   : > { %11121 = vmatpush1.bf16.msra.mxu0 %v14677_v27 }
0x6507   : > { %11122 = vmatprep.subr.bf16.mxu0 %v14685_v26 }
0x650a   : > { %11123 = vmatpush1.bf16.msra.mxu0 %v14683_v45 }
0x650b   : > { %11124 = vmatprep.subr.bf16.mxu0 %v14691_v59 }
0x650e   : > { %11125 = vmatpush1.bf16.msra.mxu0 %v14689_v60 }
0x650f   : > { %11126 = vmatprep.subr.bf16.mxu0 %v14697_v12 }
0x6512   : > { %11127 = vmatpush1.bf16.msra.mxu0 %v14695_v36 }
0x6513   : > { %13036 = vmatprep.subr.bf16.mxu0 %v14701_v42 }
0x65cb   : > { %v10849_v54 = vpop.f32.mrb[252].mxu1 }
0x65cc   : > { %v10855_v43 = vadd.f32 %v10849_v54, %v10687_v44  ;;  %v13887_v7 = vpop.f32.mrb[253].mxu1  ;;  %v14702_v44 = vld [vmem:[#allocation19 + $0x3c0] sm:$0xff]   ;;  %v14706_v54 = vld [vmem:[#allocation19 + $0x3c8] sm:$0xff]  }
0x65cd   : > { %v10852_v61 = vpop.f32.mrb[254].mxu1  ;;  %v14709_v7 = vld [vmem:[#allocation19 + $0x350] sm:$0xff]  }
0x65ce   : > { %v10864_v63 = vadd.f32 %v12520_v58, %v10855_v43  ;;  %v13888_v3 = vpop.f32.mrb[255].mxu1  ;;  %v14707_v58 = vld [vmem:[#allocation19 + $0x308] sm:$0xff]   ;;  %v14710_v61 = vld [vmem:[#allocation19 + $0x3d0] sm:$0xff]  }
0x65cf   : > { %v14708_v43 = vld [vmem:[#allocation19 + $0x388] sm:$0xff]   ;;  %v14712_v3 = vld [vmem:[#allocation19 + $0x390] sm:$0xff]  }
0x65d0   : > { %v10865_v5 = vadd.f32 %v10864_v63, %v16942_v28  ;;  %v14668_v28 = vld [vmem:[#allocation17 + $0x348] ss:$16 sps:$4 sm:$0xff]   ;;  %v14711_v63 = vld [vmem:[#allocation19 + $0x310] sm:$0xff]  }
0x65d1   : > { %11158 = vmatpush1.bf16.msra.mxu1 %v14668_v28  ;;  %v14725_v28 = vld [vmem:[#allocation19 + $0x370] sm:$0xff]  }
0x65d2   : > { %10870 = vadd.xlane.f32.xlu1 %v10865_v5  ;;  %11159 = vmatprep.subr.bf16.mxu1 %v14676_v31  ;;  %v14731_v31 = vld [vmem:[#allocation19 + $0x338] sm:$0xff]  }
0x65d5   : > { %11160 = vmatpush1.bf16.msra.mxu1 %v14674_v16  ;;  %v12525_v16 = vld [vmem:[%s17266_s0 + $0xc] sm:$0xf]  ;;  %s12605_s0 = sshll.u32 %s17246_s24, 7  ;;  %s11691_s24 = scalar_lea.sflag [#allocation4], %s15903_s4 }
0x65d6   : > { %11161 = vmatprep.subr.bf16.mxu1 %v14682_v8  ;;  %v10935_v23 = vrot.slane %v12525_v16, %v15977_v34  ;;  %v10943_v8 = vrot.slane %v12525_v16, %v15997_v46  ;;  %v10939_v27 = vrot.slane %v12525_v16, %v15974_v33 }
0x65d9   : > { %11162 = vmatpush1.bf16.msra.mxu1 %v14680_v57  ;;  %v10947_v57 = vrot.slane %v12525_v16, %v16229_v2 }
0x65da   : > { %11163 = vmatprep.subr.bf16.mxu1 %v14688_v25 }
0x65dd   : > { %11164 = vmatpush1.bf16.msra.mxu1 %v14686_v24 }
0x65de   : > { %11165 = vmatprep.subr.bf16.mxu1 %v14694_v32 }
0x65e1   : > { %11166 = vmatpush1.bf16.msra.mxu1 %v14692_v21 }
0x65e2   : > { %11167 = vmatprep.subr.bf16.mxu1 %v14700_v35 }
0x65e5   : > { %11168 = vmatpush1.bf16.msra.mxu1 %v14698_v38 }
0x65e6   : > { %13058 = vmatprep.subr.bf16.mxu1 %v14702_v44 }
0x665f   : > { %v10871_v14 = vpop.xlane.xlu1 %10870 }
0x6660   : > { %v10872_v40 = vmul.f32 0.0078125, %v10871_v14  ;;  %v14726_v14 = vld [vmem:[#allocation19 + $0x3f0] sm:$0xff]  }
0x6662   : > { %v10873_v9 = vsub.f32 %v10865_v5, %v10872_v40  ;;  %v14713_v5 = vld [vmem:[#allocation19 + $0x358] sm:$0xff]   ;;  %v14727_v40 = vld [vmem:[#allocation19 + $0x330] sm:$0xff]  }
0x6664   : > { %v10874_v17 = vmul.f32 %v10873_v9, %v10873_v9 }
0x6666   : > { %10875 = vadd.xlane.f32.xlu1 %v10874_v17  ;;  %v14729_v17 = vld [vmem:[#allocation19 + $0x378] sm:$0xff]  }
0x66f3   : > { %v10876_v39 = vpop.xlane.xlu1 %10875 }
0x66f4   : > { %v10877_v18 = vmul.f32 0.0078125, %v10876_v39 }
0x66f6   : > { %v10878_v30 = vadd.f32 1e-05, %v10877_v18 }
0x66f8   : > { %14889 = vrsqrt.f32 %v10878_v30 }
0x6702   : > { %v14890_v48 = vpop.eup %14889 }
0x6703   : > { %v10880_v49 = vmul.f32 %v14890_v48, %v10873_v9  ;;  %v14728_v9 = vld [vmem:[#allocation19 + $0x3b0] sm:$0xff]  }
0x6705   : > { %v10887_v53 = vmul.f32 %v12523_v47, %v10880_v49  ;;  %v12558_v47 = vld [vmem:[#allocation20 + $0x3] ss:$0 sm:$0xff] }
0x6707   : > { %v17051_v41 = vadd.f32 %v12524_v50, %v10887_v53 }
0x6709   : > { %v10895_v20 = vpack.c.bf16 %v17051_v41, %v17051_v41 }
0x670b   : > { %11145 = vmatmul.mubr.bf16.vlgmr.msra.gmra.mrb[240].mxu0 %v10895_v20  ;;  %11186 = vmatmul.mubr.bf16.vlgmr.msra.gmra.mrb[0].mxu1 %v10895_v20 }
0x670c   : > { %13037 = vmatpush3.bf16.msra.mxu0 %v14703_v55  ;;  %13059 = vmatpush3.bf16.msra.mxu1 %v14704_v56 }
0x670d   : > { %13038 = vmatprep.subr.bf16.mxu0 %v14705_v52  ;;  %13060 = vmatprep.subr.bf16.mxu1 %v14706_v54 }
0x6710   : > { %13039 = vmatpush3.bf16.msra.mxu0 %v14707_v58  ;;  %13061 = vmatpush3.bf16.msra.mxu1 %v14708_v43 }
0x6711   : > { %13040 = vmatprep.subr.bf16.mxu0 %v14709_v7  ;;  %13062 = vmatprep.subr.bf16.mxu1 %v14710_v61  ;;  %v14733_v61 = vld [vmem:[#allocation22] sm:$0xff]  }
0x6714   : > { %13041 = vmatpush3.bf16.msra.mxu0 %v14711_v63  ;;  %13063 = vmatpush3.bf16.msra.mxu1 %v14712_v3  ;;  %v14734_v63 = vld [vmem:[#allocation22 + $0x8] sm:$0xff]  }
0x6715   : > { %13042 = vmatprep.subr.bf16.mxu0 %v14713_v5  ;;  %13064 = vmatprep.subr.bf16.mxu1 %v14714_v6 }
0x6718   : > { %13043 = vmatpush3.bf16.msra.mxu0 %v14715_v29  ;;  %13065 = vmatpush3.bf16.msra.mxu1 %v14716_v4  ;;  %v14735_v4 = vld [vmem:[#allocation22 + $0x10] sm:$0xff]  }
0x6719   : > { %13044 = vmatprep.subr.bf16.mxu0 %v14717_v10  ;;  %13066 = vmatprep.subr.bf16.mxu1 %v14718_v15  ;;  %v14736_v10 = vld [vmem:[#allocation22 + $0x18] sm:$0xff]   ;;  %v14738_v15 = vld [vmem:[#allocation22 + $0x28] sm:$0xff]  }
0x671c   : > { %13045 = vmatpush3.bf16.msra.mxu0 %v14719_v11  ;;  %13067 = vmatpush3.bf16.msra.mxu1 %v14720_v0  ;;  %v14739_v11 = vld [vmem:[#allocation22 + $0x30] sm:$0xff]   ;;  %v14740_v0 = vld [vmem:[#allocation22 + $0x38] sm:$0xff]  }
0x671d   : > { %13046 = vmatprep.subr.bf16.mxu0 %v14721_v37  ;;  %13068 = vmatprep.subr.bf16.mxu1 %v14722_v51 }
0x6720   : > { %13047 = vmatpush3.bf16.msra.mxu0 %v14723_v13  ;;  %13069 = vmatpush3.bf16.msra.mxu1 %v14724_v62 }
0x6721   : > { %13048 = vmatprep.subr.bf16.mxu0 %v14725_v28  ;;  %13070 = vmatprep.subr.bf16.mxu1 %v14726_v14  ;;  %v12593_v28 = vld [vmem:[%s17267_s25 + $0x3] ss:$0 sm:$0xff] }
0x6724   : > { %13049 = vmatpush3.bf16.msra.mxu0 %v14727_v40  ;;  %13071 = vmatpush3.bf16.msra.mxu1 %v14728_v9  ;;  %v12594_v40 = vld [vmem:[%s17268_s6 + $0x3] ss:$0 sm:$0xff]  ;;  %s17088_s6 = scalar_lea.hbm %s17274_s8, %s12605_s0 }
0x6725   : > { %13050 = vmatprep.subr.bf16.mxu0 %v14729_v17  ;;  %13072 = vmatprep.subr.bf16.mxu1 %v14730_v22  ;;  %v12595_v22 = vld [vmem:[%s17272_s11] ss:$0 sm:$0xff]  ;;  %s15265_s11 = scalar_lea.vmem %s15264_s13, 256 }
0x6726   : > { %p15267_p8 = scmp.lt.s32.totalorder %s15265_s11, %s15259_s12 }
0x6728   : > { %13051 = vmatpush3.bf16.msra.mxu0 %v14731_v31  ;;  %13073 = vmatpush3.bf16.msra.mxu1 %v14732_v19  ;;  %p15268_p0 = por %p15267_p8, %p15266_p4 }
0x6729   : > { %13889 = vmatprep.subr.bf16.mxu0 %v15376_v1 }
0x672a   : > { %p15269_p5 = pnand %p15268_p0, %p15262_p9 }
0x67de   : > { %v11146_v26 = vpop.f32.mrb[240].mxu0  ;;  %v11187_v25 = vpop.f32.mrb[0].mxu1 }
0x67df   : > { %v11147_v45 = vadd.f32 %v11146_v26, %v10935_v23  ;;  %v11188_v24 = vadd.f32 %v11187_v25, %v10943_v8  ;;  %v11148_v59 = vpop.f32.mrb[241].mxu0  ;;  %v11189_v32 = vpop.f32.mrb[1].mxu1 }
0x67e0   : > { %v11149_v60 = vadd.f32 %v11148_v59, %v10939_v27  ;;  %v11190_v21 = vadd.f32 %v11189_v32, %v10947_v57  ;;  %v11150_v12 = vpop.f32.mrb[242].mxu0  ;;  %v11191_v35 = vpop.f32.mrb[2].mxu1 }
0x67e1   : > { %v11194_v36 = vmax.f32 %v11147_v45, 0.0  ;;  %v11196_v38 = vmax.f32 %v11188_v24, 0.0  ;;  %v11151_v42 = vpop.f32.mrb[243].mxu0  ;;  %v11192_v34 = vpop.f32.mrb[3].mxu1 }
0x67e2   : > { %v11195_v44 = vmax.f32 %v11149_v60, 0.0  ;;  %v11197_v46 = vmax.f32 %v11190_v21, 0.0 }
0x67e3   : > { %v11198_v18 = vpack.c.bf16 %v11194_v36, %v11194_v36  ;;  %v11200_v2 = vpack.c.bf16 %v11196_v38, %v11196_v38 }
0x67e4   : > { %v11199_v39 = vpack.c.bf16 %v11195_v44, %v11195_v44  ;;  %v11201_v33 = vpack.c.bf16 %v11197_v46, %v11197_v46 }
0x67e6   : > { %11499 = vmatprep.mubr.bf16.mxu0 %v11199_v39  ;;  %11539 = vmatprep.mubr.bf16.mxu1 %v11201_v33 }
0x67e7   : > { %11500 = vmatmul.mubr.bf16.vlgmr.msra.gmra.mrb[244].mxu0 %v11198_v18  ;;  %11540 = vmatmul.mubr.bf16.vlgmr.msra.gmra.mrb[4].mxu1 %v11200_v2 }
0x67e8   : > { %13905 = vmatprep.mubr.msk.bf16.mxu0 %vm15377_vm0, %v15376_v1  ;;  %13890 = vmatpush3.bf16.msra.mxu0 %v14733_v61 }
0x67e9   : > { %13891 = vmatprep.subr.bf16.mxu0 %v15376_v1 }
0x67ec   : > { %13892 = vmatpush3.bf16.msra.mxu0 %v14734_v63 }
0x67ed   : > { %13893 = vmatprep.subr.bf16.mxu0 %v15376_v1 }
0x67f0   : > { %13894 = vmatpush3.bf16.msra.mxu0 %v14735_v4 }
0x67f1   : > { %13895 = vmatprep.subr.bf16.mxu0 %v15376_v1 }
0x67f4   : > { %13896 = vmatpush3.bf16.msra.mxu0 %v14736_v10 }
0x67f5   : > { %13897 = vmatprep.subr.bf16.mxu0 %v15376_v1 }
0x68ba   : > { %v13052_v30 = vpop.f32.mrb[244].mxu0  ;;  %v13074_v48 = vpop.f32.mrb[4].mxu1 }
0x68bb   : > { %v13053_v49 = vpop.f32.mrb[245].mxu0  ;;  %v13075_v50 = vpop.f32.mrb[5].mxu1 }
0x68bc   : > { %v13054_v53 = vadd.f32 %v13053_v49, %v13052_v30  ;;  %v13076_v55 = vadd.f32 %v13075_v50, %v13074_v48  ;;  %v13055_v56 = vpop.f32.mrb[246].mxu0  ;;  %v13077_v20 = vpop.f32.mrb[6].mxu1 }
0x68bd   : > { %v13056_v52 = vpop.f32.mrb[247].mxu0  ;;  %v13078_v54 = vpop.f32.mrb[7].mxu1 }
0x68be   : > { %v11502_v58 = vadd.f32 %v13054_v53, %v12558_v47 }
0x68c0   : > { %v11542_v43 = vadd.f32 %v13076_v55, %v11502_v58 }
0x68c2   : > { %v11547_v7 = vadd.f32 %v11542_v43, %v17051_v41  ;;  %v14737_v41 = vld [vmem:[#allocation22 + $0x20] sm:$0xff]  }
0x68c3   : > { %13898 = vmatpush3.bf16.msra.mxu0 %v14737_v41 }
0x68c4   : > { %11552 = vadd.xlane.f32.xlu1 %v11547_v7  ;;  %13899 = vmatprep.subr.bf16.mxu0 %v15376_v1 }
0x68c7   : > { %13900 = vmatpush3.bf16.msra.mxu0 %v14738_v15 }
0x68c8   : > { %13901 = vmatprep.subr.bf16.mxu0 %v15376_v1 }
0x68cb   : > { %13902 = vmatpush3.bf16.msra.mxu0 %v14739_v11 }
0x68cc   : > { %13903 = vmatprep.subr.bf16.mxu0 %v15376_v1 }
0x68cf   : > { %13904 = vmatpush3.bf16.msra.mxu0 %v14740_v0 }
0x6951   : > { %v11553_v3 = vpop.xlane.xlu1 %11552 }
0x6952   : > { %v11554_v5 = vmul.f32 0.0078125, %v11553_v3 }
0x6954   : > { %v11555_v6 = vsub.f32 %v11547_v7, %v11554_v5 }
0x6956   : > { %v11556_v29 = vmul.f32 %v11555_v6, %v11555_v6 }
0x6958   : > { %11557 = vadd.xlane.f32.xlu1 %v11556_v29 }
0x69e5   : > { %v11558_v37 = vpop.xlane.xlu1 %11557 }
0x69e6   : > { %v11559_v51 = vmul.f32 0.0078125, %v11558_v37 }
0x69e8   : > { %v11560_v13 = vadd.f32 1e-05, %v11559_v51 }
0x69ea   : > { %14891 = vrsqrt.f32 %v11560_v13 }
0x69f4   : > { %v14892_v62 = vpop.eup %14891 }
0x69f5   : > { %v11562_v14 = vmul.f32 %v14892_v62, %v11555_v6 }
0x69f7   : > { %v11569_v9 = vmul.f32 %v12593_v28, %v11562_v14 }
0x69f9   : > { %v11576_v17 = vadd.f32 %v12594_v40, %v11569_v9 }
0x69fb   : > { %v11577_v1 = vpack.c.bf16 %v11576_v17, %v11576_v17 }
0x69fd   : > { %13906 = vmatmul.mubr.bf16.vlgmr.msra.gmra.mrb[248].mxu0 %v11577_v1 }
0x6ad0   : > { %v11683_v31 = vpop.f32.mrb[248].mxu0 }
0x6ad1   : > { %v11684_v19 = vadd.f32 %v12595_v22, %v11683_v31  ;;  %v13907_v16 = vpop.f32.mrb[249].mxu0 }
0x6ad2   : > { %v11686_v23 = vpop.f32.mrb[250].mxu0 }
0x6ad3   : > { %11689 = vst [vmem:[%s926_s7] sm:$0xff] %v11684_v19  ;;  %v13908_v8 = vpop.f32.mrb[251].mxu0 }
0x6ad4   : > { %15272 = shalt.err (!%p15269_p5)
}
0x6ad5   : > { %s15273_s4 = scalar_lea.hbm %s17088_s6, 128  ;;  %s15277_s21 = scalar_lea.hbm %s17274_s8, 256 }
0x6ad6   : > { %p15274_p2 = scmp.ne.s32.totalorder %s17088_s6, %s15273_s4  ;;  %p15278_p1 = scmp.lt.u32.totalorder %s17088_s6, %s17274_s8 }
0x6ad7   : > { %p15279_p11 = scmp.lt.u32.totalorder %s15277_s21, %s15273_s4  ;;  %p15281_p13 = scmp.lt.u32.totalorder %s15273_s4, %s17088_s6 }
0x6ad8   : > { %p15275_p7 = pnand %p15274_p2, %p17275_p3 }
0x6ad9   : > { %p15280_p12 = por %p15279_p11, %p15278_p1 }
0x6ada   : > { %p15276_p10 = pneg %p15275_p7 }
0x6adb   : > { %p15282_p6 = por %p15281_p13, %p15280_p12 }
0x6add   : > { %p15283_p9 = pnand %p15282_p6, %p15276_p10 }
0x6adf   : > { %15286 = shalt.err (!%p15283_p9)
}
0x6ae0   : > { %13959 = dma.vmem_to_hbm [thread:$0]  (%p17275_p3), %s17090_s10, 128, %s17088_s6, %s11691_s24  }
0x6ae1 PF: > { %s11716_s12 = sand.u32 1, %s15337_s5   ;;  %p17276_p4 = scmp.ne.s32.totalorder %s17241_s9, 0 }
0x6ae2   : > { %p17277_p8 = scmp.ge.s32.totalorder %s15349_s28, 2  ;;  %s11717_s13 = scalar_lea.sflag [#allocation4], %s11716_s12 }
0x6ae4   : > { %p14003_p0 = pnand %p17277_p8, %p17276_p4 }
0x6ae6   : > { %15332 = dma.done.wait (!%p14003_p0), %s11717_s13, 128  }
0x6ae7   : > { %15334 = vsyncadd (!%p14003_p0), %s11717_s13, 4294967168  ;;  %p43_p5 = scmp.ge.s32.totalorder %s15833_s15, 4   ;;  %s17278_s5 = smov %s15341_s26 }
0x6ae8   : > { %s17279_s26 = smov %s15345_s27  ;;  %s17280_s27 = smov %s15845_s1 }
0x6ae9   : > { %s17281_s28 = smov %s15833_s15  ;;  %45 = sbr.rel (!%p43_p5) target bundleno = 33 (0x21), region = 269 }
0x6af0   :  { %11722 = vsyncpa [#allocation3], 1 }
0x6af1   :  { %11724 = vsyncpa [#allocation3 + $0x1], 1 }
0x6af2   :  { %11725 = vsyncpa [#allocation6], 1 }
0x6af3   :  { %11726 = vsyncpa [#allocation9], 1 }
0x6af4   :  { %11727 = vsyncpa [#allocation12], 1 }
0x6af5   :  { %11728 = vsyncpa [#allocation15], 1 }
0x6af6   :  { %11729 = vsyncpa [#allocation18], 1 }
0x6af7   :  { %11730 = vsyncpa [#allocation21], 1 }
0x6af8   :  { %11731 = vsyncpa [#allocation4], 1 }
0x6af9   :  { %11733 = vsyncpa [#allocation4 + $0x1], 1 }

</bundles_post_ra>
